<compile_context>
chip_gen: v5e
topology: v5e:2x2
jax: 0.10.0
libtpu: 0.0.40
codegen_flags: <defaults>
</compile_context>

<pallas_src>
import functools

import jax
import jax.numpy as jnp
from jax.experimental import pallas as pl
from jax.experimental.pallas import tpu as pltpu

_INV_SQRT2 = 0.7071067811865476
_LANE = 128


def _gelu_exact(x):
    # PyTorch nn.GELU() default: 0.5 * x * (1 + erf(x / sqrt(2)))
    return 0.5 * x * (1.0 + jax.lax.erf(x * _INV_SQRT2))


def _round_up(n, m):
    return ((n + m - 1) // m) * m


def autoencoder_kernel(batch_real, b_tile,
                       x_ref,
                       w1_ref, b1_ref,
                       w2_ref, b2_ref,
                       w3_ref, b3_ref,
                       w4_ref, b4_ref,
                       psum_ref):
    """One (B_TILE, in_pad) batch tile: full AE forward + masked partial SSE."""
    x = x_ref[...]  # f32, kept for the exact MSE residual

    def mm(a_f32, w_ref):
        # bf16 MXU inputs, f32 accumulation.
        return jnp.dot(a_f32.astype(jnp.bfloat16), w_ref[...],
                       preferred_element_type=jnp.float32)

    # Encoder
    h = _gelu_exact(mm(x, w1_ref) + b1_ref[...])
    z = _gelu_exact(mm(h, w2_ref) + b2_ref[...])
    # Decoder
    d = _gelu_exact(mm(z, w3_ref) + b3_ref[...])
    x_hat = mm(d, w4_ref) + b4_ref[...]

    # Partial sum of squared error for this batch tile.  Padded feature
    # columns are exactly zero in both x and x_hat (zero-padded weights/bias,
    # GELU(0)=0); padded batch rows are masked out here.
    diff = x_hat - x
    sq = diff * diff
    row = pl.program_id(0) * b_tile + jax.lax.broadcasted_iota(
        jnp.int32, sq.shape, 0)
    sq = jnp.where(row < batch_real, sq, 0.0)
    psum_ref[...] = jnp.full(psum_ref.shape, jnp.sum(sq), dtype=jnp.float32)


def autoencoder_loss(x, params, *, b_tile=256):
    """Scalar MSE(decoder(encoder(x)), x).  b_tile: 256 on v6e/v7x, 128 on v5e."""
    (w1, b1), (w2, b2), (w3, b3), (w4, b4) = params
    batch, in_dim = x.shape
    h_dim = w1.shape[1]
    z_dim = w2.shape[1]

    in_pad = _round_up(in_dim, _LANE)
    h_pad = _round_up(h_dim, _LANE)
    z_pad = _round_up(z_dim, _LANE)
    batch_pad = _round_up(batch, b_tile)
    num_tiles = batch_pad // b_tile

    def pad2(a, rows, cols):
        return jnp.pad(a, ((0, rows - a.shape[0]), (0, cols - a.shape[1])))

    # Zero-padding to lane-dense 128-wide slabs is exact (see header comment).
    x_p = pad2(x.astype(jnp.float32), batch_pad, in_pad)
    w1_p = pad2(w1, in_pad, h_pad).astype(jnp.bfloat16)
    w2_p = pad2(w2, h_pad, z_pad).astype(jnp.bfloat16)
    w3_p = pad2(w3, z_pad, h_pad).astype(jnp.bfloat16)
    w4_p = pad2(w4, h_pad, in_pad).astype(jnp.bfloat16)
    b1_p = pad2(b1, 1, h_pad)
    b2_p = pad2(b2, 1, z_pad)
    b3_p = pad2(b3, 1, h_pad)
    b4_p = pad2(b4, 1, in_pad)

    # Weights/biases: constant index_map -> fetched once, stay VMEM-resident.
    const = lambda shape: pl.BlockSpec(shape, lambda i: (0, 0))
    in_specs = [
        pl.BlockSpec((b_tile, in_pad), lambda i: (i, 0)),   # X batch tile
        const((in_pad, h_pad)), const((1, h_pad)),          # W1, b1
        const((h_pad, z_pad)), const((1, z_pad)),           # W2, b2
        const((z_pad, h_pad)), const((1, h_pad)),           # W3, b3
        const((h_pad, in_pad)), const((1, in_pad)),         # W4, b4
    ]
    # Per-block partial sums in a lane-dense (8,128) tile per grid step.
    out_specs = pl.BlockSpec((1, 8, _LANE), lambda i: (i, 0, 0))

    flops = 2 * batch_pad * (in_pad * h_pad + h_pad * z_pad
                             + z_pad * h_pad + h_pad * in_pad)
    transcendentals = batch_pad * (2 * h_pad + z_pad)          # one erf / elem
    bytes_accessed = (
        x_p.size * 4
        + (w1_p.size + w2_p.size + w3_p.size + w4_p.size) * 2
        + (b1_p.size + b2_p.size + b3_p.size + b4_p.size) * 4
        + num_tiles * 8 * _LANE * 4
    )

    psums = pl.pallas_call(
        functools.partial(autoencoder_kernel, batch, b_tile),
        grid=(num_tiles,),
        in_specs=in_specs,
        out_specs=out_specs,
        out_shape=jax.ShapeDtypeStruct((num_tiles, 8, _LANE), jnp.float32),
        compiler_params=pltpu.CompilerParams(
            dimension_semantics=("parallel",)),
        cost_estimate=pl.CostEstimate(
            flops=flops,
            transcendentals=transcendentals,
            bytes_accessed=bytes_accessed),
    )(x_p, w1_p, b1_p, w2_p, b2_p, w3_p, b3_p, w4_p, b4_p)

    # Final reduce of per-block partial sums in f32, then divide by the REAL
    # (unpadded) element count: MSELoss(reduction='mean').
    total = jnp.sum(psums[:, 0, 0])
    return total / (batch * in_dim)


def init_linear(key, in_features, out_features):
    """PyTorch nn.Linear default init: U(-1/sqrt(fan_in), 1/sqrt(fan_in)).

    Weight returned as (in_features, out_features) — the transpose of the
    PyTorch layout, so the kernel computes x @ W + b.  Bias is (1, out).
    """
    kw, kb = jax.random.split(key)
    bound = 1.0 / (in_features ** 0.5)
    w = jax.random.uniform(kw, (in_features, out_features), jnp.float32,
                           minval=-bound, maxval=bound)
    b = jax.random.uniform(kb, (1, out_features), jnp.float32,
                           minval=-bound, maxval=bound)
    return w, b


def reference_loss(x, params):
    """Pure-JAX reference mirroring the kernel numerics (bf16 MXU, f32 acc)."""
    (w1, b1), (w2, b2), (w3, b3), (w4, b4) = params

    def mm(a, w):
        return jnp.dot(a.astype(jnp.bfloat16), w.astype(jnp.bfloat16),
                       preferred_element_type=jnp.float32)

    h = _gelu_exact(mm(x, w1) + b1)
    z = _gelu_exact(mm(h, w2) + b2)
    d = _gelu_exact(mm(z, w3) + b3)
    x_hat = mm(d, w4) + b4
    return jnp.mean((x_hat - x) ** 2)


if __name__ == "__main__":
    # Small shapes consistent with AutoEncoder(in_dim, z_dim, h_dim); batch is
    # chosen so the grid has two tiles and exercises the padded-row masking.
    batch, in_dim, z_dim, h_dim = 300, 64, 16, 128

    key = jax.random.PRNGKey(0)
    k_x, k1, k2, k3, k4 = jax.random.split(key, 5)

    x = jax.random.normal(k_x, (batch, in_dim), jnp.float32)
    params = (
        init_linear(k1, in_dim, h_dim),   # encoder fc1
        init_linear(k2, h_dim, z_dim),    # encoder fc2
        init_linear(k3, z_dim, h_dim),    # decoder fc1
        init_linear(k4, h_dim, in_dim),   # decoder fc2
    )

    loss = jax.block_until_ready(autoencoder_loss(x, params, b_tile=256))
    ref = jax.block_until_ready(reference_loss(x, params))

    # bf16 MXU inputs (f32 accumulation) -> tolerance looser than pure-f32.
    assert jnp.allclose(loss, ref, rtol=2e-3, atol=1e-4), (loss, ref)
    print("KERNEL_OK")
</pallas_src>

<mosaic_0001>
module attributes {stable_mosaic.version = 11 : i64} {
  func.func @autoencoder_kernel(%arg0: i32, %arg1: memref<256x128xf32, #tpu.memory_space<vmem>>, %arg2: memref<128x128xbf16, #tpu.memory_space<vmem>>, %arg3: memref<1x128xf32, #tpu.memory_space<vmem>>, %arg4: memref<128x128xbf16, #tpu.memory_space<vmem>>, %arg5: memref<1x128xf32, #tpu.memory_space<vmem>>, %arg6: memref<128x128xbf16, #tpu.memory_space<vmem>>, %arg7: memref<1x128xf32, #tpu.memory_space<vmem>>, %arg8: memref<128x128xbf16, #tpu.memory_space<vmem>>, %arg9: memref<1x128xf32, #tpu.memory_space<vmem>>, %arg10: memref<1x8x128xf32, #tpu.memory_space<vmem>>) attributes {dimension_semantics = [#tpu.dimension_semantics<parallel>], iteration_bounds = array<i64: 2>, scalar_prefetch = 0 : i64, scratch_operands = 0 : i64, tpu.core_type = #tpu.core_type<tc>, window_params = [{transform_indices = @transform_0, window_bounds = array<i64: 256, 128>}, {pipeline_mode = #tpu.pipeline_mode<synchronous>, transform_indices = @transform_1, window_bounds = array<i64: 128, 128>}, {pipeline_mode = #tpu.pipeline_mode<synchronous>, transform_indices = @transform_2, window_bounds = array<i64: 1, 128>}, {pipeline_mode = #tpu.pipeline_mode<synchronous>, transform_indices = @transform_3, window_bounds = array<i64: 128, 128>}, {pipeline_mode = #tpu.pipeline_mode<synchronous>, transform_indices = @transform_4, window_bounds = array<i64: 1, 128>}, {pipeline_mode = #tpu.pipeline_mode<synchronous>, transform_indices = @transform_5, window_bounds = array<i64: 128, 128>}, {pipeline_mode = #tpu.pipeline_mode<synchronous>, transform_indices = @transform_6, window_bounds = array<i64: 1, 128>}, {pipeline_mode = #tpu.pipeline_mode<synchronous>, transform_indices = @transform_7, window_bounds = array<i64: 128, 128>}, {pipeline_mode = #tpu.pipeline_mode<synchronous>, transform_indices = @transform_8, window_bounds = array<i64: 1, 128>}, {transform_indices = @transform_9, window_bounds = array<i64: 1, 8, 128>}]} {
    %c0 = arith.constant 0 : index
    %c0_0 = arith.constant 0 : index
    %0 = vector.load %arg1[%c0, %c0_0] : memref<256x128xf32, #tpu.memory_space<vmem>>, vector<256x128xf32>
    %1 = arith.truncf %0 : vector<256x128xf32> to vector<256x128xbf16>
    %c0_1 = arith.constant 0 : index
    %c0_2 = arith.constant 0 : index
    %2 = vector.load %arg2[%c0_1, %c0_2] : memref<128x128xbf16, #tpu.memory_space<vmem>>, vector<128x128xbf16>
    %cst = arith.constant dense<0.000000e+00> : vector<256x128xf32>
    %3 = tpu.matmul %1, %2, %cst {dimension_numbers = #tpu.dot_dimension_numbers<[1], [0], [0], [1], [0, 0, 1, 1], [], []>} : vector<256x128xbf16>, vector<128x128xbf16>, vector<256x128xf32> -> vector<256x128xf32>
    %c0_3 = arith.constant 0 : index
    %c0_4 = arith.constant 0 : index
    %4 = vector.load %arg3[%c0_3, %c0_4] : memref<1x128xf32, #tpu.memory_space<vmem>>, vector<1x128xf32>
    %5 = vector.broadcast %4 : vector<1x128xf32> to vector<256x128xf32>
    %6 = arith.addf %3, %5 : vector<256x128xf32>
    %cst_5 = arith.constant 5.000000e-01 : f32
    %7 = vector.broadcast %cst_5 : f32 to vector<256x128xf32>
    %8 = arith.mulf %7, %6 : vector<256x128xf32>
    %cst_6 = arith.constant 0.707106769 : f32
    %9 = vector.broadcast %cst_6 : f32 to vector<256x128xf32>
    %10 = arith.mulf %6, %9 : vector<256x128xf32>
    %11 = math.erf %10 : vector<256x128xf32>
    %cst_7 = arith.constant 1.000000e+00 : f32
    %12 = vector.broadcast %cst_7 : f32 to vector<256x128xf32>
    %13 = arith.addf %12, %11 : vector<256x128xf32>
    %14 = arith.mulf %8, %13 : vector<256x128xf32>
    %15 = arith.truncf %14 : vector<256x128xf32> to vector<256x128xbf16>
    %c0_8 = arith.constant 0 : index
    %c0_9 = arith.constant 0 : index
    %16 = vector.load %arg4[%c0_8, %c0_9] : memref<128x128xbf16, #tpu.memory_space<vmem>>, vector<128x128xbf16>
    %cst_10 = arith.constant dense<0.000000e+00> : vector<256x128xf32>
    %17 = tpu.matmul %15, %16, %cst_10 {dimension_numbers = #tpu.dot_dimension_numbers<[1], [0], [0], [1], [0, 0, 1, 1], [], []>} : vector<256x128xbf16>, vector<128x128xbf16>, vector<256x128xf32> -> vector<256x128xf32>
    %c0_11 = arith.constant 0 : index
    %c0_12 = arith.constant 0 : index
    %18 = vector.load %arg5[%c0_11, %c0_12] : memref<1x128xf32, #tpu.memory_space<vmem>>, vector<1x128xf32>
    %19 = vector.broadcast %18 : vector<1x128xf32> to vector<256x128xf32>
    %20 = arith.addf %17, %19 : vector<256x128xf32>
    %cst_13 = arith.constant 5.000000e-01 : f32
    %21 = vector.broadcast %cst_13 : f32 to vector<256x128xf32>
    %22 = arith.mulf %21, %20 : vector<256x128xf32>
    %cst_14 = arith.constant 0.707106769 : f32
    %23 = vector.broadcast %cst_14 : f32 to vector<256x128xf32>
    %24 = arith.mulf %20, %23 : vector<256x128xf32>
    %25 = math.erf %24 : vector<256x128xf32>
    %cst_15 = arith.constant 1.000000e+00 : f32
    %26 = vector.broadcast %cst_15 : f32 to vector<256x128xf32>
    %27 = arith.addf %26, %25 : vector<256x128xf32>
    %28 = arith.mulf %22, %27 : vector<256x128xf32>
    %29 = arith.truncf %28 : vector<256x128xf32> to vector<256x128xbf16>
    %c0_16 = arith.constant 0 : index
    %c0_17 = arith.constant 0 : index
    %30 = vector.load %arg6[%c0_16, %c0_17] : memref<128x128xbf16, #tpu.memory_space<vmem>>, vector<128x128xbf16>
    %cst_18 = arith.constant dense<0.000000e+00> : vector<256x128xf32>
    %31 = tpu.matmul %29, %30, %cst_18 {dimension_numbers = #tpu.dot_dimension_numbers<[1], [0], [0], [1], [0, 0, 1, 1], [], []>} : vector<256x128xbf16>, vector<128x128xbf16>, vector<256x128xf32> -> vector<256x128xf32>
    %c0_19 = arith.constant 0 : index
    %c0_20 = arith.constant 0 : index
    %32 = vector.load %arg7[%c0_19, %c0_20] : memref<1x128xf32, #tpu.memory_space<vmem>>, vector<1x128xf32>
    %33 = vector.broadcast %32 : vector<1x128xf32> to vector<256x128xf32>
    %34 = arith.addf %31, %33 : vector<256x128xf32>
    %cst_21 = arith.constant 5.000000e-01 : f32
    %35 = vector.broadcast %cst_21 : f32 to vector<256x128xf32>
    %36 = arith.mulf %35, %34 : vector<256x128xf32>
    %cst_22 = arith.constant 0.707106769 : f32
    %37 = vector.broadcast %cst_22 : f32 to vector<256x128xf32>
    %38 = arith.mulf %34, %37 : vector<256x128xf32>
    %39 = math.erf %38 : vector<256x128xf32>
    %cst_23 = arith.constant 1.000000e+00 : f32
    %40 = vector.broadcast %cst_23 : f32 to vector<256x128xf32>
    %41 = arith.addf %40, %39 : vector<256x128xf32>
    %42 = arith.mulf %36, %41 : vector<256x128xf32>
    %43 = arith.truncf %42 : vector<256x128xf32> to vector<256x128xbf16>
    %c0_24 = arith.constant 0 : index
    %c0_25 = arith.constant 0 : index
    %44 = vector.load %arg8[%c0_24, %c0_25] : memref<128x128xbf16, #tpu.memory_space<vmem>>, vector<128x128xbf16>
    %cst_26 = arith.constant dense<0.000000e+00> : vector<256x128xf32>
    %45 = tpu.matmul %43, %44, %cst_26 {dimension_numbers = #tpu.dot_dimension_numbers<[1], [0], [0], [1], [0, 0, 1, 1], [], []>} : vector<256x128xbf16>, vector<128x128xbf16>, vector<256x128xf32> -> vector<256x128xf32>
    %c0_27 = arith.constant 0 : index
    %c0_28 = arith.constant 0 : index
    %46 = vector.load %arg9[%c0_27, %c0_28] : memref<1x128xf32, #tpu.memory_space<vmem>>, vector<1x128xf32>
    %47 = vector.broadcast %46 : vector<1x128xf32> to vector<256x128xf32>
    %48 = arith.addf %45, %47 : vector<256x128xf32>
    %49 = arith.subf %48, %0 : vector<256x128xf32>
    %50 = arith.mulf %49, %49 : vector<256x128xf32>
    %c256_i32 = arith.constant 256 : i32
    %51 = arith.muli %arg0, %c256_i32 : i32
    %52 = tpu.iota {dimensions = array<i32: 0>} : vector<256x128xi32>
    %53 = vector.broadcast %51 : i32 to vector<256x128xi32>
    %54 = arith.addi %53, %52 : vector<256x128xi32>
    %c300_i32 = arith.constant 300 : i32
    %55 = vector.broadcast %c300_i32 : i32 to vector<256x128xi32>
    %56 = arith.cmpi slt, %54, %55 : vector<256x128xi32>
    %cst_29 = arith.constant 0.000000e+00 : f32
    %57 = vector.broadcast %cst_29 : f32 to vector<256x128xf32>
    %58 = arith.select %56, %50, %57 : vector<256x128xi1>, vector<256x128xf32>
    %59 = vector.shape_cast %58 : vector<256x128xf32> to vector<1x256x128xf32>
    %cst_30 = arith.constant dense<0.000000e+00> : vector<1xf32>
    %60 = vector.multi_reduction <add>, %59, %cst_30 [1, 2] : vector<1x256x128xf32> to vector<1xf32>
    %61 = vector.shape_cast %60 : vector<1xf32> to vector<1x1x1xf32>
    %62 = vector.extract %61[0, 0, 0] : f32 from vector<1x1x1xf32>
    %63 = vector.broadcast %62 : f32 to vector<1x8x128xf32>
    %c0_31 = arith.constant 0 : index
    %c0_32 = arith.constant 0 : index
    %c0_33 = arith.constant 0 : index
    %64 = vector.load %arg10[%c0_31, %c0_32, %c0_33] : memref<1x8x128xf32, #tpu.memory_space<vmem>>, vector<1x8x128xf32>
    tpu.vector_store %arg10[%c0_31, %c0_32, %c0_33], %63 {strides = array<i32>} : memref<1x8x128xf32, #tpu.memory_space<vmem>>, vector<1x8x128xf32>,
    return
  }
  func.func @transform_0(%arg0: i32) -> (i32, i32) {
    %c0_i32 = arith.constant 0 : i32
    %c0_i32_0 = arith.constant 0 : i32
    return %arg0, %c0_i32 : i32, i32
  }
  func.func @transform_1(%arg0: i32) -> (i32, i32) {
    %c0_i32 = arith.constant 0 : i32
    %c0_i32_0 = arith.constant 0 : i32
    %c0_i32_1 = arith.constant 0 : i32
    return %c0_i32, %c0_i32_0 : i32, i32
  }
  func.func @transform_2(%arg0: i32) -> (i32, i32) {
    %c0_i32 = arith.constant 0 : i32
    %c0_i32_0 = arith.constant 0 : i32
    %c0_i32_1 = arith.constant 0 : i32
    return %c0_i32, %c0_i32_0 : i32, i32
  }
  func.func @transform_3(%arg0: i32) -> (i32, i32) {
    %c0_i32 = arith.constant 0 : i32
    %c0_i32_0 = arith.constant 0 : i32
    %c0_i32_1 = arith.constant 0 : i32
    return %c0_i32, %c0_i32_0 : i32, i32
  }
  func.func @transform_4(%arg0: i32) -> (i32, i32) {
    %c0_i32 = arith.constant 0 : i32
    %c0_i32_0 = arith.constant 0 : i32
    %c0_i32_1 = arith.constant 0 : i32
    return %c0_i32, %c0_i32_0 : i32, i32
  }
  func.func @transform_5(%arg0: i32) -> (i32, i32) {
    %c0_i32 = arith.constant 0 : i32
    %c0_i32_0 = arith.constant 0 : i32
    %c0_i32_1 = arith.constant 0 : i32
    return %c0_i32, %c0_i32_0 : i32, i32
  }
  func.func @transform_6(%arg0: i32) -> (i32, i32) {
    %c0_i32 = arith.constant 0 : i32
    %c0_i32_0 = arith.constant 0 : i32
    %c0_i32_1 = arith.constant 0 : i32
    return %c0_i32, %c0_i32_0 : i32, i32
  }
  func.func @transform_7(%arg0: i32) -> (i32, i32) {
    %c0_i32 = arith.constant 0 : i32
    %c0_i32_0 = arith.constant 0 : i32
    %c0_i32_1 = arith.constant 0 : i32
    return %c0_i32, %c0_i32_0 : i32, i32
  }
  func.func @transform_8(%arg0: i32) -> (i32, i32) {
    %c0_i32 = arith.constant 0 : i32
    %c0_i32_0 = arith.constant 0 : i32
    %c0_i32_1 = arith.constant 0 : i32
    return %c0_i32, %c0_i32_0 : i32, i32
  }
  func.func @transform_9(%arg0: i32) -> (i32, i32, i32) {
    %c0_i32 = arith.constant 0 : i32
    %c0_i32_0 = arith.constant 0 : i32
    %c0_i32_1 = arith.constant 0 : i32
    return %arg0, %c0_i32, %c0_i32_0 : i32, i32, i32
  }
}

</mosaic_0001>

<bundles_post_ra>
// kernel: tpu_custom_call.1
= control target key start
LH: loop header
LB: loop body
LE: loop exit
PB: predicated region body
PF: predicated region fallthrough
CT: control target
= control target key end

     0   :  { %s11100_s0 = inlined_call_operand.hbm [shape: f32[512,128], index: 0, kind: input, shape index: {}]   ;;  %s11101_s1 = inlined_call_operand.hbm [shape: bf16[128,128], index: 1, kind: input, shape index: {}]   ;;  %s11102_s2 = inlined_call_operand.vmem [shape: f32[1,128], index: 2, kind: input, shape index: {}]   ;;  %s11103_s3 = inlined_call_operand.hbm [shape: bf16[128,128], index: 3, kind: input, shape index: {}]   ;;  %s11104_s4 = inlined_call_operand.vmem [shape: f32[1,128], index: 4, kind: input, shape index: {}]   ;;  %s11105_s5 = inlined_call_operand.hbm [shape: bf16[128,128], index: 5, kind: input, shape index: {}]   ;;  %s11106_s6 = inlined_call_operand.vmem [shape: f32[1,128], index: 6, kind: input, shape index: {}]   ;;  %s11107_s7 = inlined_call_operand.hbm [shape: bf16[128,128], index: 7, kind: input, shape index: {}]   ;;  %s11108_s8 = inlined_call_operand.vmem [shape: f32[1,128], index: 8, kind: input, shape index: {}]   ;;  %s11109_s9 = inlined_call_operand.hbm [shape: f32[2,8,128], index: 9, kind: output, shape index: {}]  }
   0x1   :  { %11116 = sst [smem:[#allocation26_spill]] %s11101_s1 }
   0x2   :  { %11117 = sst [smem:[#allocation27_spill]] %s11103_s3 }
   0x3   :  { %11118 = sst [smem:[#allocation28_spill]] %s11105_s5 }
   0x4   :  { %14 = vsyncpa [#allocation3], 0 }
   0x5   :  { %16 = vsyncpa [#allocation3 + $0x1], 0 }
   0x6   :  { %17 = vsyncpa [#allocation6], 0 }
   0x7   :  { %18 = vsyncpa [#allocation9], 0 }
   0x8   :  { %19 = vsyncpa [#allocation4], 0 }
   0x9   :  { %21 = vsyncpa [#allocation4 + $0x1], 0  ;;  %s6623_s30 = smov 0   ;;  %s6625_s10 = smov 0  }
   0xa   :  { %s6627_s11 = smov 0   ;;  %s6629_s12 = smov 0  }
   0xb LB: > { %s6644_s13 = sadd.s32 4294967295, %s6563_s12   ;;  %s5729_s14 = sadd.s32 4294967294, %s6563_s12   ;;  %s6563_s12 = sphi %s6629_s12, %s11293_s12   ;;  %s6559_s11 = sphi %s6627_s11, %s11292_s11   ;;  %s6555_s10 = sphi %s6625_s10, %s11291_s10   ;;  %s6551_s30 = sphi %s6623_s30, %s11290_s30  }
   0xc   : > { %p47_p0 = scmp.ne.s32.totalorder %s6555_s10, %s6551_s30  ;;  %p48_p1 = scmp.eq.s32.totalorder %s6644_s13, 0 }
   0xd   : > { %p239_p2 = scmp.eq.s32.totalorder %s6644_s13, 1  ;;  %p245_p3 = scmp.eq.s32.totalorder %s5729_s14, 1 }
   0xe   : > { %p6653_p4 = por %p48_p1, %p47_p0  ;;  %p5730_p5 = scmp.ge.s32.totalorder %s6563_s12, 1 }
   0xf   : > { %p6658_p6 = por %p245_p3, %p47_p0  ;;  %p252_p7 = scmp.lt.s32.totalorder %s6563_s12, 3 }
  0x10   : > { %s11121_s1 = sld [smem:[#allocation26_spill]]  ;;  %s6565_s21 = smov [#allocation5]  }
  0x11   : > { %p6666_p8 = pnand %p5730_p5, %p252_p7  ;;  %s265_s22 = sshll.u32 %s6565_s21, 4  ;;  %s266_s22 = int_to_ptr.vmem [resolvable:$true] %s265_s22 }
  0x12   : > { %s11124_s5 = sld [smem:[#allocation28_spill]]  ;;  %s6566_s27 = smov 64  }
  0x13   : > { %p6030_p9 = pneg %p6666_p8  ;;  %s6567_s28 = smov 4  }
  0x14   : > { %s6568_s29 = smov [#allocation8]   ;;  %s11125_s3 = sld [smem:[#allocation27_spill]] }
  0x15   : > { %p6674_p10 = pnand %p6030_p9, %p48_p1  ;;  %s299_s14 = sshll.u32 %s6568_s29, 4  ;;  %s300_s14 = int_to_ptr.vmem [resolvable:$true] %s299_s14 }
  0x16   : > { %s263_s19 = sshll.u32 %s11121_s1, 4  ;;  %s6570_s17 = smov [#allocation10]   ;;  %s264_s19 = int_to_ptr.hbm [resolvable:$true] %s263_s19 }
  0x17   : > { %6033 = dma.hbm_to_vmem [thread:$0]  (!%p6674_p10), %s264_s19, 1024, %s266_s22, [#allocation6], %s6566_s27, %s6566_s27, %s6567_s28  }
  0x18   : > { %s297_s26 = sshll.u32 %s11124_s5, 4  ;;  %s314_s19 = sshll.u32 %s11107_s7, 4  ;;  %s298_s26 = int_to_ptr.hbm [resolvable:$true] %s297_s26  ;;  %s315_s19 = int_to_ptr.hbm [resolvable:$true] %s314_s19 }
  0x19   : > { %6039 = dma.hbm_to_vmem [thread:$0]  (!%p6674_p10), %s298_s26, 1024, %s300_s14, [#allocation9], %s6566_s27, %s6566_s27, %s6567_s28  }
  0x1a   : > { %s280_s21 = sshll.u32 %s11125_s3, 4  ;;  %s6569_s22 = smov [#allocation7]   ;;  %s281_s21 = int_to_ptr.hbm [resolvable:$true] %s280_s21 }
  0x1b   : > { %s282_s29 = sshll.u32 %s6569_s22, 4  ;;  %s316_s18 = sshll.u32 %s6570_s17, 4  ;;  %s283_s29 = int_to_ptr.vmem [resolvable:$true] %s282_s29  ;;  %s317_s18 = int_to_ptr.vmem [resolvable:$true] %s316_s18 }
  0x1c   : > { %6036 = dma.hbm_to_vmem [thread:$0]  (!%p6674_p10), %s281_s21, 1024, %s283_s29, [#allocation6], %s6566_s27, %s6566_s27, %s6567_s28  }
  0x1d   : > { %6042 = dma.hbm_to_vmem [thread:$0]  (!%p6674_p10), %s315_s19, 1024, %s317_s18, [#allocation9], %s6566_s27, %s6566_s27, %s6567_s28  }
  0x1e   : > { %s6697_s26 = sadd.s32 1, %s6563_s12   ;;  %s34_s14 = sadd.s32 1, %s6559_s11 }
  0x1f   : > { %s31_s24 = ssub.s32 %s6563_s12, %s6697_s26  ;;  %p41_p12 = scmp.ne.s32.totalorder %s6559_s11, %s6555_s10 }
  0x20   : > { %p32_p13 = scmp.eq.s32.totalorder %s31_s24, 0  ;;  %p42_p0 = scmp.eq.s32.totalorder %s6563_s12, 0 }
  0x21   : > { %p6707_p3 = por %p239_p2, %p41_p12  ;;  %p6055_p5 = scmp.lt.s32.totalorder %s6563_s12, 2 }
  0x22   : > { %s6713_s21 = scalar_select %p32_p13, %s6559_s11, %s34_s14  }
  0x23   : > { %p43_p7 = por %p42_p0, %p41_p12  ;;  %s333_s22 = sand.u32 1, %s6559_s11  }
  0x24   : > { %s5736_s23 = sshll.u32 %s333_s22, 8  ;;  %s5975_s27 = sshll.u32 %s6563_s12, 8 }
  0x25   : > { %s342_s29 = scalar_lea.hbm %s11100_s0, %s5975_s27  ;;  %s337_s17 = scalar_lea.vmem [#allocation2], %s5736_s23 }
  0x26   : > { %s345_s18 = sshll.u32 %s337_s17, 4  ;;  %s343_s24 = sshll.u32 %s342_s29, 4  ;;  %s346_s18 = int_to_ptr.vmem [resolvable:$true] %s345_s18  ;;  %s344_s24 = int_to_ptr.hbm [resolvable:$true] %s343_s24 }
  0x27   : > { %p6720_p2 = pnand %p6055_p5, %p43_p7  ;;  %s334_s14 = scalar_lea.sflag [#allocation3], %s333_s22 }
  0x28   : > { %s6459_s3 = sshra.s32 %s344_s24, 4  ;;  %s6466_s28 = scalar_lea.hbm %s11100_s0, 512  ;;  %s6460_s3 = int_to_ptr.hbm [resolvable:$true] %s6459_s3 }
  0x29   : > { %s6461_s5 = scalar_lea.hbm %s6460_s3, 256  ;;  %p6463_p10 = pneg %p6720_p2 }
  0x2a   : > { %p6462_p9 = scmp.ne.s32.totalorder %s6460_s3, %s6461_s5  ;;  %p6467_p0 = scmp.lt.s32.totalorder %s6460_s3, %s11100_s0 }
  0x2b   : > { %p6468_p5 = scmp.lt.s32.totalorder %s6466_s28, %s6461_s5 }
  0x2c   : > { %p6464_p12 = pnand %p6463_p10, %p6462_p9 }
  0x2d   : > { %p6469_p7 = por %p6468_p5, %p6467_p0 }
  0x2e   : > { %p6465_p13 = pneg %p6464_p12 }
  0x30   : > { %p6470_p11 = pnand %p6469_p7, %p6465_p13 }
  0x32   : > { %6473 = shalt.err (!%p6470_p11)
}
  0x33   : > { %s6571_s22 = smov 128   ;;  %s6572_s17 = smov 8  }
  0x34   : > { %6046 = dma.hbm_to_vmem [thread:$0]  (!%p6720_p2), %s344_s24, 4096, %s346_s18, %s334_s14, %s6571_s22, %s6571_s22, %s6572_s17  }
  0x35   : > { %357 = sbr.rel (%p6666_p8) target bundleno = 1666 (0x682), region = 56 }
  0x3a   : > { %s6737_s27 = sand.u32 1, %s6555_s10  }
  0x3b   : > { %s5740_s23 = sshll.u32 %s6737_s27, 8  ;;  %s360_s3 = scalar_lea.sflag [#allocation3], %s6737_s27 }
  0x3c   : > { %s6741_s5 = scalar_lea.vmem [#allocation2], %s5740_s23 }
  0x3d   : > { %6534 = dma.done.wait (%p6653_p4), %s360_s3, 4096  }
  0x3e   : > { %6536 = vsyncadd (%p6653_p4), %s360_s3, 4294963200 }
  0x3f   : > { %6538 = dma.done.wait (%p48_p1), [#allocation6], 2048  }
  0x40   : > { %6540 = vsyncadd (%p48_p1), [#allocation6], 4294965248 }
  0x41   : > { %6542 = dma.done.wait (%p48_p1), [#allocation9], 2048  }
  0x42   : > { %6544 = vsyncadd (%p48_p1), [#allocation9], 4294965248  ;;  %v5983_v0 = vld [vmem:[#allocation5 + $0x38] sm:$0xff]  ;;  %v5982_v1 = vld [vmem:[#allocation5 + $0x30] sm:$0xff]  ;;  %s5970_s23 = sshll.u32 %s6644_s13, 8  ;;  %s5972_s18 = sshll.u32 %s6644_s13, 3 }
  0x43   : > { %536 = vmatpush.bf16.msra.mxu0 %v5983_v0  ;;  %v5981_v2 = vld [vmem:[#allocation5 + $0x28] sm:$0xff]  ;;  %v5980_v3 = vld [vmem:[#allocation5 + $0x20] sm:$0xff]  ;;  %v5979_v4 = vld [vmem:[#allocation5 + $0x18] sm:$0xff]  ;;  %s5616_s28 = scalar_lea.hbm %s11109_s9, %s5972_s18  ;;  %s6509_s20 = scalar_lea.hbm %s11109_s9, 16 }
  0x44   : > { %v5978_v5 = vld [vmem:[#allocation5 + $0x10] sm:$0xff]  ;;  %v5977_v6 = vld [vmem:[#allocation5 + $0x8] sm:$0xff]  ;;  %v5976_v7 = vld [vmem:[#allocation5] sm:$0xff]  ;;  %s5620_s22 = sshll.u32 %s5616_s28, 4  ;;  %s5621_s22 = int_to_ptr.hbm [resolvable:$true] %s5620_s22 }
  0x45   : > { %v420_v8 = vld [vmem:[%s6741_s5] sm:$0xff]  ;;  %v421_v9 = vld [vmem:[%s6741_s5 + $0x8] sm:$0xff]  ;;  %v422_v11 = vld [vmem:[%s6741_s5 + $0x10] sm:$0xff]  ;;  %s6503_s3 = sshra.s32 %s5621_s22, 4  ;;  %s6504_s3 = int_to_ptr.hbm [resolvable:$true] %s6503_s3 }
  0x46   : > { %v452_v10 = vpack.c.bf16 %v421_v9, %v420_v8  ;;  %v423_v12 = vld [vmem:[%s6741_s5 + $0x18] sm:$0xff]  ;;  %v424_v14 = vld [vmem:[%s6741_s5 + $0x20] sm:$0xff]  ;;  %v425_v15 = vld [vmem:[%s6741_s5 + $0x28] sm:$0xff]  ;;  %s6505_s1 = scalar_lea.hbm %s6504_s3, 8  ;;  %p6510_p11 = scmp.lt.s32.totalorder %s6504_s3, %s11109_s9 }
  0x47   : > { %537 = vmatpush.bf16.msra.mxu0 %v5982_v1  ;;  %v453_v13 = vpack.c.bf16 %v423_v12, %v422_v11  ;;  %v454_v16 = vpack.c.bf16 %v425_v15, %v424_v14  ;;  %v426_v17 = vld [vmem:[%s6741_s5 + $0x30] sm:$0xff]  ;;  %v427_v18 = vld [vmem:[%s6741_s5 + $0x38] sm:$0xff]  ;;  %v428_v20 = vld [vmem:[%s6741_s5 + $0x40] sm:$0xff]  ;;  %p6506_p1 = scmp.ne.s32.totalorder %s6504_s3, %s6505_s1  ;;  %p6511_p2 = scmp.lt.s32.totalorder %s6509_s20, %s6505_s1 }
  0x48   : > { %v455_v19 = vpack.c.bf16 %v427_v18, %v426_v17  ;;  %v429_v21 = vld [vmem:[%s6741_s5 + $0x48] sm:$0xff]  ;;  %v430_v23 = vld [vmem:[%s6741_s5 + $0x50] sm:$0xff]  ;;  %v431_v24 = vld [vmem:[%s6741_s5 + $0x58] sm:$0xff] }
  0x49   : > { %v456_v22 = vpack.c.bf16 %v429_v21, %v428_v20  ;;  %v457_v25 = vpack.c.bf16 %v431_v24, %v430_v23  ;;  %v432_v26 = vld [vmem:[%s6741_s5 + $0x60] sm:$0xff]  ;;  %v433_v27 = vld [vmem:[%s6741_s5 + $0x68] sm:$0xff]  ;;  %v434_v29 = vld [vmem:[%s6741_s5 + $0x70] sm:$0xff]  ;;  %p6507_p4 = pnand %p6506_p1, %p6707_p3  ;;  %p6512_p9 = por %p6511_p2, %p6510_p11 }
  0x4a   : > { %v458_v28 = vpack.c.bf16 %v433_v27, %v432_v26  ;;  %v435_v30 = vld [vmem:[%s6741_s5 + $0x78] sm:$0xff]  ;;  %v436_v32 = vld [vmem:[%s6741_s5 + $0x80] sm:$0xff]  ;;  %v437_v33 = vld [vmem:[%s6741_s5 + $0x88] sm:$0xff] }
  0x4b   : > { %538 = vmatpush.bf16.msra.mxu0 %v5981_v2  ;;  %v459_v31 = vpack.c.bf16 %v435_v30, %v434_v29  ;;  %v6776_v34 = vld [vmem:[%s11102_s2] ss:$0 sm:$0xff]  ;;  %v460_v35 = vpack.c.bf16 %v437_v33, %v436_v32  ;;  %v5991_v37 = vld [vmem:[#allocation7 + $0x38] sm:$0xff]  ;;  %v5990_v40 = vld [vmem:[#allocation7 + $0x30] sm:$0xff]  ;;  %p6508_p8 = pneg %p6507_p4 }
  0x4c   : > { %2117 = vmatpush.bf16.msra.mxu1 %v5991_v37  ;;  %v5989_v44 = vld [vmem:[#allocation7 + $0x28] sm:$0xff]  ;;  %v438_v50 = vld [vmem:[%s6741_s5 + $0x90] sm:$0xff]  ;;  %v439_v51 = vld [vmem:[%s6741_s5 + $0x98] sm:$0xff] }
  0x4d   : > { %v5988_v52 = vld [vmem:[#allocation7 + $0x20] sm:$0xff]  ;;  %v461_v58 = vpack.c.bf16 %v439_v51, %v438_v50  ;;  %v5987_v60 = vld [vmem:[#allocation7 + $0x18] sm:$0xff]  ;;  %v5985_v15 = vld [vmem:[#allocation7 + $0x8] sm:$0xff]  ;;  %p6513_p10 = pnand %p6512_p9, %p6508_p8 }
  0x4e   : > { %v440_v24 = vld [vmem:[%s6741_s5 + $0xa0] sm:$0xff] }
  0x4f   : > { %539 = vmatpush.bf16.msra.mxu0 %v5980_v3  ;;  %v5984_v26 = vld [vmem:[#allocation7] sm:$0xff] }
  0x50   : > { %2118 = vmatpush.bf16.msra.mxu1 %v5990_v40 }
  0x53   : > { %540 = vmatpush.bf16.msra.mxu0 %v5979_v4 }
  0x54   : > { %2119 = vmatpush.bf16.msra.mxu1 %v5989_v44 }
  0x57   : > { %541 = vmatpush.bf16.msra.mxu0 %v5978_v5  ;;  %v5986_v5 = vld [vmem:[#allocation7 + $0x10] sm:$0xff] }
  0x58   : > { %2120 = vmatpush.bf16.msra.mxu1 %v5988_v52 }
  0x5b   : > { %542 = vmatpush.bf16.msra.mxu0 %v5977_v6 }
  0x5c   : > { %2121 = vmatpush.bf16.msra.mxu1 %v5987_v60 }
  0x5f   : > { %543 = vmatpush.bf16.msra.mxu0 %v5976_v7 }
  0x60   : > { %2122 = vmatpush.bf16.msra.mxu1 %v5986_v5 }
  0x62   : > { %544 = vmatmul.bf16.vlgmr.msra.gmra.mxu0 %v452_v10 }
  0x64   : > { %2123 = vmatpush.bf16.msra.mxu1 %v5985_v15 }
  0x68   : > { %2124 = vmatpush.bf16.msra.mxu1 %v5984_v26 }
  0x72   : > { %549 = vmatmul.bf16.gmra.mxu0 %v453_v13 }
  0x82   : > { %554 = vmatmul.bf16.gmra.mxu0 %v454_v16 }
  0x92   : > { %559 = vmatmul.bf16.gmra.mxu0 %v455_v19 }
  0xa2   : > { %564 = vmatmul.bf16.gmra.mxu0 %v456_v22 }
  0xb2   : > { %569 = vmatmul.bf16.gmra.mxu0 %v457_v25  ;;  %v441_v25 = vld [vmem:[%s6741_s5 + $0xa8] sm:$0xff] }
  0xb3   : > { %v462_v32 = vpack.c.bf16 %v441_v25, %v440_v24 }
  0xc2   : > { %574 = vmatmul.bf16.gmra.mxu0 %v458_v28 }
  0xd2   : > { %579 = vmatmul.bf16.gmra.mxu0 %v459_v31 }
  0xdf   : > { %v545_v36 = vpop.f32.mrf.mxu0 }
  0xe0   : > { %v6779_v38 = vadd.f32 %v6776_v34, %v545_v36 }
  0xe2   : > { %v6782_v39 = vmul.f32 0.70710677, %v6779_v38  ;;  %584 = vmatmul.bf16.gmra.mxu0 %v460_v35 }
  0xe4   : > { %v689_v41 = vmul.f32 %v6782_v39, %v6782_v39 }
  0xe6   : > { %v6786_v42 = vmin.f32 %v689_v41, 16.0 }
  0xe7   : > { %v547_v43 = vpop.f32.mrf.mxu0 }
  0xe8   : > { %v691_v45 = vmul.f32 2.1237322e-06, %v6786_v42  ;;  %v6790_v46 = vadd.f32 %v6776_v34, %v547_v43  ;;  %v702_v47 = vmul.f32 3.8918573e-05, %v6786_v42 }
  0xea   : > { %v692_v48 = vadd.f32 0.00028619796, %v691_v45  ;;  %v6794_v49 = vmul.f32 0.70710677, %v6790_v46  ;;  %v703_v53 = vadd.f32 0.001143296, %v702_v47 }
  0xec   : > { %v729_v54 = vmul.f32 %v6794_v49, %v6794_v49  ;;  %v704_v55 = vmul.f32 %v703_v53, %v6786_v42  ;;  %v693_v56 = vmul.f32 %v692_v48, %v6786_v42 }
  0xee   : > { %v6802_v57 = vmin.f32 %v729_v54, 16.0  ;;  %v705_v61 = vadd.f32 0.014752088, %v704_v55  ;;  %v694_v2 = vadd.f32 0.0036580483, %v693_v56 }
  0xef   : > { %v550_v59 = vpop.f32.mrf.mxu0 }
  0xf0   : > { %v731_v62 = vmul.f32 2.1237322e-06, %v6802_v57  ;;  %v6806_v63 = vadd.f32 %v6776_v34, %v550_v59  ;;  %v742_v0 = vmul.f32 3.8918573e-05, %v6802_v57  ;;  %v706_v1 = vmul.f32 %v705_v61, %v6786_v42 }
  0xf1   : > { %v695_v12 = vmul.f32 %v694_v2, %v6786_v42 }
  0xf2   : > { %v732_v3 = vadd.f32 0.00028619796, %v731_v62  ;;  %589 = vmatmul.bf16.gmra.mxu0 %v461_v58  ;;  %v6811_v4 = vmul.f32 0.70710677, %v6806_v63  ;;  %v707_v6 = vadd.f32 0.112945676, %v706_v1 }
  0xf3   : > { %v743_v8 = vadd.f32 0.001143296, %v742_v0  ;;  %v696_v23 = vadd.f32 0.05243302, %v695_v12 }
  0xf4   : > { %v733_v7 = vmul.f32 %v732_v3, %v6802_v57  ;;  %v769_v9 = vmul.f32 %v6811_v4, %v6811_v4  ;;  %v708_v10 = vmul.f32 %v707_v6, %v6786_v42 }
  0xf5   : > { %v744_v11 = vmul.f32 %v743_v8, %v6802_v57  ;;  %v697_v35 = vmul.f32 %v696_v23, %v6786_v42  ;;  %v442_v8 = vld [vmem:[%s6741_s5 + $0xb0] sm:$0xff] }
  0xf6   : > { %v6819_v13 = vmin.f32 %v769_v9, 16.0  ;;  %v709_v16 = vadd.f32 0.4994258, %v708_v10  ;;  %v734_v17 = vadd.f32 0.0036580483, %v733_v7 }
  0xf7   : > { %v552_v14 = vpop.f32.mrf.mxu0  ;;  %v745_v18 = vadd.f32 0.014752088, %v744_v11  ;;  %v698_v47 = vadd.f32 0.18741608, %v697_v35 }
  0xf8   : > { %v6822_v19 = vadd.f32 %v6776_v34, %v552_v14  ;;  %v710_v20 = vmul.f32 %v709_v16, %v6786_v42  ;;  %v782_v21 = vmul.f32 3.8918573e-05, %v6819_v13  ;;  %v735_v28 = vmul.f32 %v734_v17, %v6802_v57 }
  0xf9   : > { %v746_v22 = vmul.f32 %v745_v18, %v6802_v57  ;;  %v771_v52 = vmul.f32 2.1237322e-06, %v6819_v13  ;;  %v699_v59 = vmul.f32 %v698_v47, %v6786_v42  ;;  %v443_v42 = vld [vmem:[%s6741_s5 + $0xb8] sm:$0xff] }
  0xfa   : > { %v711_v27 = vadd.f32 1.0, %v710_v20  ;;  %v783_v30 = vadd.f32 0.001143296, %v782_v21  ;;  %v6831_v31 = vmul.f32 0.70710677, %v6822_v19 }
  0xfb   : > { %v747_v29 = vadd.f32 0.112945676, %v746_v22  ;;  %v736_v40 = vadd.f32 0.05243302, %v735_v28  ;;  %v772_v62 = vadd.f32 0.00028619796, %v771_v52  ;;  %v463_v22 = vpack.c.bf16 %v443_v42, %v442_v8 }
  0xfc   : > { %6105 = vrcp.f32 %v711_v27  ;;  %v784_v37 = vmul.f32 %v783_v30, %v6819_v13  ;;  %v809_v41 = vmul.f32 %v6831_v31, %v6831_v31  ;;  %v723_v7 = vand.u32 2147483648, %v711_v27 }
  0xfd   : > { %v748_v33 = vmul.f32 %v747_v29, %v6802_v57  ;;  %v737_v51 = vmul.f32 %v736_v40, %v6802_v57  ;;  %vm717_vm1 = vweird.f32 %v711_v27  ;;  %v721_v9 = vand.u32 2147483647, %v711_v27 }
  0xfe   : > { %v785_v44 = vadd.f32 0.014752088, %v784_v37  ;;  %v6842_v54 = vmin.f32 %v809_v41, 16.0  ;;  %v700_v10 = vadd.f32 1.1283791, %v699_v59  ;;  %v773_v12 = vmul.f32 %v772_v62, %v6819_v13 }
  0xff   : > { %v555_v36 = vpop.f32.mrf.mxu0  ;;  %v749_v43 = vadd.f32 0.4994258, %v748_v33  ;;  %v738_v61 = vadd.f32 0.18741608, %v737_v51  ;;  %v724_v23 = vor.u32 1.1754944e-38, %v723_v7  ;;  %vm722_vm3 = vcmp.eq.f32.partialorder %v721_v9, 8.507059e+37 }
 0x100   : > { %v786_v50 = vmul.f32 %v785_v44, %v6819_v13  ;;  %v6849_v0 = vadd.f32 %v6776_v34, %v555_v36  ;;  %v811_v2 = vmul.f32 2.1237322e-06, %v6842_v54  ;;  %v822_v5 = vmul.f32 3.8918573e-05, %v6842_v54  ;;  %v444_v7 = vld [vmem:[%s6741_s5 + $0xc0] sm:$0xff] }
 0x101   : > { %v750_v48 = vmul.f32 %v749_v43, %v6802_v57  ;;  %v739_v11 = vmul.f32 %v738_v61, %v6802_v57  ;;  %v774_v29 = vadd.f32 0.0036580483, %v773_v12 }
 0x102   : > { %594 = vmatmul.bf16.gmra.mxu0 %v462_v32  ;;  %v6106_v45 = vpop.eup %6105  ;;  %v787_v58 = vadd.f32 0.112945676, %v786_v50  ;;  %v812_v17 = vadd.f32 0.00028619796, %v811_v2  ;;  %v6863_v18 = vmul.f32 0.70710677, %v6849_v0 }
 0x103   : > { %v713_v53 = vmul.f32 %v6106_v45, %v711_v27  ;;  %v6844_v55 = vadd.f32 1.0, %v750_v48  ;;  %vm718_vm0 = vweird.f32 %v6106_v45  ;;  %v823_v21 = vadd.f32 0.001143296, %v822_v5 }
 0x104   : > { %v788_v3 = vmul.f32 %v787_v58, %v6819_v13  ;;  %vm6858_vm2 = vmor %vm717_vm1, %vm718_vm0  ;;  %v701_v27 = vmul.f32 %v700_v10, %v6782_v39  ;;  %v740_v28 = vadd.f32 1.1283791, %v739_v11  ;;  %v813_v32 = vmul.f32 %v812_v17, %v6842_v54 }
 0x105   : > { %v714_v56 = vsub.f32 1.0, %v713_v53  ;;  %6107 = vrcp.f32 %v6844_v55  ;;  %v824_v26 = vmul.f32 %v823_v21, %v6842_v54  ;;  %v849_v33 = vmul.f32 %v6863_v18, %v6863_v18 }
 0x106   : > { %v789_v15 = vadd.f32 0.4994258, %v788_v3  ;;  %v761_v40 = vand.u32 2147483647, %v6844_v55  ;;  %v763_v41 = vand.u32 2147483648, %v6844_v55  ;;  %vm757_vm5 = vweird.f32 %v6844_v55 }
 0x107   : > { %v557_v60 = vpop.f32.mrf.mxu0  ;;  %v715_v1 = vmul.f32 %v6106_v45, %v714_v56  ;;  %v825_v39 = vadd.f32 0.014752088, %v824_v26  ;;  %v6885_v47 = vmin.f32 %v849_v33, 16.0  ;;  %v814_v50 = vadd.f32 0.0036580483, %v813_v32 }
 0x108   : > { %v790_v25 = vmul.f32 %v789_v15, %v6819_v13  ;;  %v6879_v37 = vadd.f32 %v6776_v34, %v557_v60  ;;  %v764_v52 = vor.u32 1.1754944e-38, %v763_v41  ;;  %v741_v56 = vmul.f32 %v740_v28, %v6794_v49  ;;  %v445_v49 = vld [vmem:[%s6741_s5 + $0xc8] sm:$0xff] }
 0x109   : > { %v716_v6 = vadd.f32 %v6106_v45, %v715_v1  ;;  %v826_v53 = vmul.f32 %v825_v39, %v6842_v54  ;;  %vm762_vm7 = vcmp.eq.f32.partialorder %v761_v40, 8.507059e+37  ;;  %v862_v3 = vmul.f32 3.8918573e-05, %v6885_v47 }
 0x10a   : > { %v6876_v36 = vadd.f32 1.0, %v790_v25  ;;  %v6889_v51 = vmul.f32 0.70710677, %v6879_v37  ;;  %v815_v5 = vmul.f32 %v814_v50, %v6842_v54  ;;  %v625_v10 = vmul.f32 0.5, %v6779_v38 }
 0x10b   : > { %v6108_v16 = vpop.eup %6107  ;;  %v720_v20 = vsel %vm6858_vm2, %v6106_v45, %v716_v6  ;;  %v775_v45 = vmul.f32 %v774_v29, %v6819_v13  ;;  %v827_v2 = vadd.f32 0.112945676, %v826_v53  ;;  %v851_v12 = vmul.f32 2.1237322e-06, %v6885_v47 }
 0x10c   : > { %v753_v57 = vmul.f32 %v6108_v16, %v6844_v55  ;;  %v725_v30 = vsel %vm722_vm3, %v724_v23, %v720_v20  ;;  %vm758_vm4 = vweird.f32 %v6108_v16  ;;  %6109 = vrcp.f32 %v6876_v36 }
 0x10d   : > { %v726_v43 = vmul.f32 %v725_v30, %v701_v27  ;;  %vm759_vm6 = vmor %vm757_vm5, %vm758_vm4  ;;  %v776_v61 = vadd.f32 0.05243302, %v775_v45  ;;  %v889_v6 = vmul.f32 %v6889_v51, %v6889_v51  ;;  %v828_v14 = vmul.f32 %v827_v2, %v6842_v54 }
 0x10e   : > { %v754_v35 = vsub.f32 1.0, %v753_v57  ;;  %v626_v15 = vmul.f32 0.5, %v6790_v46  ;;  %v464_v17 = vpack.c.bf16 %v445_v49, %v444_v7  ;;  %v863_v20 = vadd.f32 0.001143296, %v862_v3 }
 0x10f   : > { %v6868_v24 = vpop.f32.mrf.mxu0  ;;  %v5778_v59 = vclamps-f32 %v726_v43, 1.0  ;;  %v777_v11 = vmul.f32 %v776_v61, %v6819_v13  ;;  %v816_v21 = vadd.f32 0.05243302, %v815_v5  ;;  %v829_v57 = vadd.f32 0.4994258, %v828_v14 }
 0x110   : > { %v755_v44 = vmul.f32 %v6108_v16, %v754_v35  ;;  %v864_v38 = vmul.f32 %v863_v20, %v6885_v47  ;;  %v852_v28 = vadd.f32 0.00028619796, %v851_v12  ;;  %v6916_v30 = vadd.f32 %v6776_v34, %v6868_v24 }
 0x111   : > { %v1969_v9 = vadd.f32 1.0, %v5778_v59  ;;  %v778_v27 = vadd.f32 0.18741608, %v777_v11  ;;  %v830_v29 = vmul.f32 %v829_v57, %v6842_v54  ;;  %v817_v33 = vmul.f32 %v816_v21, %v6842_v54 }
 0x112   : > { %599 = vmatmul.bf16.gmra.mxu0 %v463_v22  ;;  %v756_v48 = vadd.f32 %v6108_v16, %v755_v44  ;;  %v6895_v55 = vpop.eup %6109  ;;  %v6910_v22 = vmin.f32 %v889_v6, 16.0  ;;  %v865_v39 = vadd.f32 0.014752088, %v864_v38  ;;  %v853_v24 = vmul.f32 %v852_v28, %v6885_v47 }
 0x113   : > { %v793_v8 = vmul.f32 %v6895_v55, %v6876_v36  ;;  %v2001_v25 = vmul.f32 %v1969_v9, %v625_v10  ;;  %v6923_v41 = vadd.f32 1.0, %v830_v29  ;;  %v779_v44 = vmul.f32 %v778_v27, %v6819_v13  ;;  %v446_v9 = vld [vmem:[%s6741_s5 + $0xd0] sm:$0xff]  ;;  %v447_v10 = vld [vmem:[%s6741_s5 + $0xd8] sm:$0xff] }
 0x114   : > { %v760_v60 = vsel %vm759_vm6, %v6108_v16, %v756_v48  ;;  %v891_v35 = vmul.f32 2.1237322e-06, %v6910_v22  ;;  %v902_v43 = vmul.f32 3.8918573e-05, %v6910_v22  ;;  %v6929_v45 = vmul.f32 0.70710677, %v6916_v30 }
 0x115   : > { %v765_v62 = vsel %vm762_vm7, %v764_v52, %v760_v60  ;;  %v794_v23 = vsub.f32 1.0, %v793_v8  ;;  %6111 = vrcp.f32 %v6923_v41  ;;  %v818_v48 = vadd.f32 0.18741608, %v817_v33 }
 0x116   : > { %v766_v1 = vmul.f32 %v765_v62, %v741_v56  ;;  %v892_v50 = vadd.f32 0.00028619796, %v891_v35  ;;  %vm798_vm8 = vweird.f32 %v6895_v55  ;;  %v803_v53 = vand.u32 2147483648, %v6876_v36 }
 0x117   : > { %v6893_v58 = vpop.f32.mrf.mxu0  ;;  %v795_v40 = vmul.f32 %v6895_v55, %v794_v23  ;;  %v866_v56 = vmul.f32 %v865_v39, %v6885_v47  ;;  %v903_v59 = vadd.f32 0.001143296, %v902_v43  ;;  %v780_v13 = vadd.f32 1.1283791, %v779_v44 }
 0x118   : > { %v5779_v42 = vclamps-f32 %v766_v1, 1.0  ;;  %v854_v60 = vadd.f32 0.0036580483, %v853_v24  ;;  %vm797_vm9 = vweird.f32 %v6876_v36  ;;  %v801_v61 = vand.u32 2147483647, %v6876_v36 }
 0x119   : > { %v796_v52 = vadd.f32 %v6895_v55, %v795_v40  ;;  %v929_v62 = vmul.f32 %v6929_v45, %v6929_v45  ;;  %vm6940_vm10 = vmor %vm797_vm9, %vm798_vm8  ;;  %v867_v2 = vadd.f32 0.112945676, %v866_v56  ;;  %v819_v3 = vmul.f32 %v818_v48, %v6842_v54 }
 0x11a   : > { %v1970_v16 = vadd.f32 1.0, %v5779_v42  ;;  %v893_v5 = vmul.f32 %v892_v50, %v6910_v22  ;;  %v904_v7 = vmul.f32 %v903_v59, %v6910_v22  ;;  %v6952_v36 = vadd.f32 %v6776_v34, %v6893_v58 }
 0x11b   : > { %v800_v6 = vsel %vm6940_vm10, %v6895_v55, %v796_v52  ;;  %v6112_v49 = vpop.eup %6111  ;;  %v804_v42 = vor.u32 1.1754944e-38, %v803_v53  ;;  %v868_v54 = vmul.f32 %v867_v2, %v6885_v47  ;;  %v781_v11 = vmul.f32 %v780_v13, %v6811_v4 }
 0x11c   : > { %v2002_v26 = vmul.f32 %v1970_v16, %v626_v15  ;;  %v855_v12 = vmul.f32 %v854_v60, %v6885_v47  ;;  %vm802_vm11 = vcmp.eq.f32.partialorder %v801_v61, 8.507059e+37  ;;  %v833_v55 = vmul.f32 %v6112_v49, %v6923_v41 }
 0x11d   : > { %v6962_v14 = vmin.f32 %v929_v62, 16.0  ;;  %v805_v15 = vsel %vm802_vm11, %v804_v42, %v800_v6  ;;  %v869_v16 = vadd.f32 0.4994258, %v868_v54  ;;  %v905_v58 = vadd.f32 0.014752088, %v904_v7 }
 0x11e   : > { %v2033_v32 = vpack.c.bf16 %v2002_v26, %v2001_v25  ;;  %v894_v20 = vadd.f32 0.0036580483, %v893_v5  ;;  %v834_v21 = vsub.f32 1.0, %v833_v55  ;;  %v465_v23 = vpack.c.bf16 %v447_v10, %v446_v9 }
 0x11f   : > { %v6918_v46 = vpop.f32.mrf.mxu0  ;;  %v6965_v57 = vmul.f32 0.70710677, %v6952_v36  ;;  %v843_v25 = vand.u32 2147483648, %v6923_v41  ;;  %v870_v4 = vmul.f32 %v869_v16, %v6885_v47  ;;  %v906_v26 = vmul.f32 %v905_v58, %v6910_v22  ;;  %v448_v16 = vld [vmem:[%s6741_s5 + $0xe0] sm:$0xff] }
 0x120   : > { %2125 = vmatmul.bf16.vlgmr.msra.gmra.mxu1 %v2033_v32  ;;  %v806_v38 = vmul.f32 %v805_v15, %v781_v11  ;;  %v835_v27 = vmul.f32 %v6112_v49, %v834_v21  ;;  %vm838_vm12 = vweird.f32 %v6112_v49  ;;  %v841_v28 = vand.u32 2147483647, %v6923_v41 }
 0x121   : > { %v6971_v29 = vadd.f32 1.0, %v870_v4  ;;  %v942_v32 = vmul.f32 3.8918573e-05, %v6962_v14  ;;  %v856_v33 = vadd.f32 0.05243302, %v855_v12  ;;  %v895_v35 = vmul.f32 %v894_v20, %v6910_v22 }
 0x122   : > { %604 = vmatmul.bf16.gmra.mxu0 %v464_v17  ;;  %v820_v17 = vadd.f32 1.1283791, %v819_v3  ;;  %v836_v40 = vadd.f32 %v6112_v49, %v835_v27  ;;  %vm837_vm13 = vweird.f32 %v6923_v41  ;;  %v969_v39 = vmul.f32 %v6965_v57, %v6965_v57 }
 0x123   : > { %vm839_vm14 = vmor %vm837_vm13, %vm838_vm12  ;;  %v844_v43 = vor.u32 1.1754944e-38, %v843_v25  ;;  %6113 = vrcp.f32 %v6971_v29  ;;  %v907_v44 = vadd.f32 0.112945676, %v906_v26  ;;  %v5780_v48 = vclamps-f32 %v806_v38, 1.0 }
 0x124   : > { %v821_v24 = vmul.f32 %v820_v17, %v6831_v31  ;;  %v840_v50 = vsel %vm839_vm14, %v6112_v49, %v836_v40  ;;  %vm842_vm15 = vcmp.eq.f32.partialorder %v841_v28, 8.507059e+37  ;;  %v6982_v52 = vadd.f32 %v6776_v34, %v6918_v46 }
 0x125   : > { %v845_v41 = vsel %vm842_vm15, %v844_v43, %v840_v50  ;;  %v943_v56 = vadd.f32 0.001143296, %v942_v32  ;;  %v857_v13 = vmul.f32 %v856_v33, %v6885_v47  ;;  %v896_v60 = vadd.f32 0.05243302, %v895_v35 }
 0x126   : > { %v846_v59 = vmul.f32 %v845_v41, %v821_v24  ;;  %v6987_v61 = vmin.f32 %v969_v39, 16.0  ;;  %v908_v62 = vmul.f32 %v907_v44, %v6910_v22  ;;  %v1971_v1 = vadd.f32 1.0, %v5780_v48 }
 0x127   : > { %v6954_v8 = vpop.f32.mrf.mxu0  ;;  %v6991_v3 = vmul.f32 0.70710677, %v6982_v52  ;;  %v944_v5 = vmul.f32 %v943_v56, %v6962_v14  ;;  %v627_v6 = vmul.f32 0.5, %v6806_v63  ;;  %v628_v7 = vmul.f32 0.5, %v6822_v19  ;;  %v449_v19 = vld [vmem:[%s6741_s5 + $0xe8] sm:$0xff] }
 0x128   : > { %v5781_v31 = vclamps-f32 %v846_v59, 1.0  ;;  %v909_v46 = vadd.f32 0.4994258, %v908_v62  ;;  %v931_v49 = vmul.f32 2.1237322e-06, %v6962_v14  ;;  %v897_v10 = vmul.f32 %v896_v60, %v6910_v22 }
 0x129   : > { %v6114_v2 = vpop.eup %6113  ;;  %v858_v9 = vadd.f32 0.18741608, %v857_v13  ;;  %v971_v54 = vmul.f32 2.1237322e-06, %v6987_v61  ;;  %v7002_v12 = vadd.f32 %v6776_v34, %v6954_v8  ;;  %v2003_v55 = vmul.f32 %v1971_v1, %v627_v6 }
 0x12a   : > { %v1972_v42 = vadd.f32 1.0, %v5781_v31  ;;  %v873_v11 = vmul.f32 %v6114_v2, %v6971_v29  ;;  %v910_v63 = vmul.f32 %v909_v46, %v6910_v22  ;;  %v1009_v58 = vmul.f32 %v6991_v3, %v6991_v3 }
 0x12b   : > { %v945_v20 = vadd.f32 0.014752088, %v944_v5  ;;  %v932_v21 = vadd.f32 0.00028619796, %v931_v49  ;;  %v466_v4 = vpack.c.bf16 %v449_v19, %v448_v16  ;;  %v859_v26 = vmul.f32 %v858_v9, %v6885_v47 }
 0x12c   : > { %v2004_v15 = vmul.f32 %v1972_v42, %v628_v7  ;;  %v874_v17 = vsub.f32 1.0, %v873_v11  ;;  %v7009_v25 = vadd.f32 1.0, %v910_v63  ;;  %v898_v8 = vadd.f32 0.18741608, %v897_v10 }
 0x12d   : > { %v972_v28 = vadd.f32 0.00028619796, %v971_v54  ;;  %v7015_v32 = vmul.f32 0.70710677, %v7002_v12  ;;  %v982_v33 = vmul.f32 3.8918573e-05, %v6987_v61  ;;  %vm878_vm0 = vweird.f32 %v6114_v2 }
 0x12e   : > { %v875_v27 = vmul.f32 %v6114_v2, %v874_v17  ;;  %6115 = vrcp.f32 %v7009_v25  ;;  %v7019_v35 = vmin.f32 %v1009_v58, 16.0  ;;  %v946_v39 = vmul.f32 %v945_v20, %v6962_v14 }
 0x12f   : > { %v6984_v53 = vpop.f32.mrf.mxu0  ;;  %v933_v47 = vmul.f32 %v932_v21, %v6962_v14  ;;  %v883_v43 = vand.u32 2147483648, %v6971_v29  ;;  %v899_v44 = vmul.f32 %v898_v8, %v6910_v22  ;;  %vm877_vm1 = vweird.f32 %v6971_v29 }
 0x130   : > { %v876_v40 = vadd.f32 %v6114_v2, %v875_v27  ;;  %v881_v24 = vand.u32 2147483647, %v6971_v29  ;;  %v860_v48 = vadd.f32 1.1283791, %v859_v26  ;;  %v1049_v50 = vmul.f32 %v7015_v32, %v7015_v32  ;;  %vm879_vm2 = vmor %vm877_vm1, %vm878_vm0 }
 0x131   : > { %v983_v41 = vadd.f32 0.001143296, %v982_v33  ;;  %v973_v56 = vmul.f32 %v972_v28, %v6987_v61  ;;  %v1011_v59 = vmul.f32 2.1237322e-06, %v7019_v35  ;;  %v947_v60 = vadd.f32 0.112945676, %v946_v39 }
 0x132   : > { %609 = vmatmul.bf16.gmra.mxu0 %v465_v23  ;;  %v2034_v23 = vpack.c.bf16 %v2004_v15, %v2003_v55  ;;  %v880_v13 = vsel %vm879_vm2, %v6114_v2, %v876_v40  ;;  %v934_v31 = vadd.f32 0.0036580483, %v933_v47  ;;  %v884_v1 = vor.u32 1.1754944e-38, %v883_v43 }
 0x133   : > { %v900_v22 = vadd.f32 1.1283791, %v899_v44  ;;  %vm882_vm3 = vcmp.eq.f32.partialorder %v881_v24, 8.507059e+37  ;;  %v7032_v29 = vmin.f32 %v1049_v50, 16.0  ;;  %v948_v6 = vmul.f32 %v947_v60, %v6962_v14 }
 0x134   : > { %2130 = vmatmul.bf16.gmra.mxu1 %v2034_v23  ;;  %v6116_v62 = vpop.eup %6115  ;;  %v885_v5 = vsel %vm882_vm3, %v884_v1, %v880_v13  ;;  %v984_v7 = vmul.f32 %v983_v41, %v6987_v61  ;;  %v861_v49 = vmul.f32 %v860_v48, %v6863_v18  ;;  %v974_v42 = vadd.f32 0.0036580483, %v973_v56 }
 0x135   : > { %v913_v46 = vmul.f32 %v6116_v62, %v7009_v25  ;;  %v1012_v9 = vadd.f32 0.00028619796, %v1011_v59  ;;  %v935_v54 = vmul.f32 %v934_v31, %v6962_v14  ;;  %v921_v11 = vand.u32 2147483647, %v7009_v25 }
 0x136   : > { %v923_v55 = vand.u32 2147483648, %v7009_v25  ;;  %v886_v15 = vmul.f32 %v885_v5, %v861_v49  ;;  %vm918_vm4 = vweird.f32 %v6116_v62  ;;  %v1022_v16 = vmul.f32 3.8918573e-05, %v7019_v35 }
 0x137   : > { %v7012_v38 = vpop.f32.mrf.mxu0  ;;  %v914_v10 = vsub.f32 1.0, %v913_v46  ;;  %v901_v19 = vmul.f32 %v900_v22, %v6889_v51  ;;  %v1051_v18 = vmul.f32 2.1237322e-06, %v7032_v29  ;;  %v949_v58 = vadd.f32 0.4994258, %v948_v6 }
 0x138   : > { %v985_v17 = vadd.f32 0.014752088, %v984_v7  ;;  %v975_v20 = vmul.f32 %v974_v42, %v6987_v61  ;;  %v1013_v21 = vmul.f32 %v1012_v9, %v7019_v35  ;;  %vm917_vm5 = vweird.f32 %v7009_v25 }
 0x139   : > { %v915_v63 = vmul.f32 %v6116_v62, %v914_v10  ;;  %vm919_vm6 = vmor %vm917_vm5, %vm918_vm4  ;;  %v950_v26 = vmul.f32 %v949_v58, %v6962_v14  ;;  %v1062_v27 = vmul.f32 3.8918573e-05, %v7032_v29  ;;  %v5782_v51 = vclamps-f32 %v886_v15, 1.0  ;;  %v451_v58 = vld [vmem:[%s6741_s5 + $0xf8] sm:$0xff] }
 0x13a   : > { %v986_v8 = vmul.f32 %v985_v17, %v6987_v61  ;;  %vm922_vm7 = vcmp.eq.f32.partialorder %v921_v11, 8.507059e+37  ;;  %v1023_v33 = vadd.f32 0.001143296, %v1022_v16  ;;  %v1052_v40 = vadd.f32 0.00028619796, %v1051_v18  ;;  %v450_v18 = vld [vmem:[%s6741_s5 + $0xf0] sm:$0xff] }
 0x13b   : > { %v916_v23 = vadd.f32 %v6116_v62, %v915_v63  ;;  %v7053_v39 = vadd.f32 %v6776_v34, %v6984_v53  ;;  %v936_v43 = vadd.f32 0.05243302, %v935_v54  ;;  %v976_v25 = vadd.f32 0.05243302, %v975_v20 }
 0x13c   : > { %v7055_v24 = vadd.f32 1.0, %v950_v26  ;;  %v1014_v48 = vadd.f32 0.0036580483, %v1013_v21  ;;  %v987_v50 = vadd.f32 0.112945676, %v986_v8  ;;  %v1973_v59 = vadd.f32 1.0, %v5782_v51 }
 0x13d   : > { %v920_v28 = vsel %vm919_vm6, %v6116_v62, %v916_v23  ;;  %v1063_v41 = vadd.f32 0.001143296, %v1062_v27  ;;  %v1024_v60 = vmul.f32 %v1023_v33, %v7019_v35  ;;  %v1053_v53 = vmul.f32 %v1052_v40, %v7032_v29 }
 0x13e   : > { %6117 = vrcp.f32 %v7055_v24  ;;  %v7063_v62 = vmul.f32 0.70710677, %v7053_v39  ;;  %v629_v31 = vmul.f32 0.5, %v6849_v0  ;;  %v630_v1 = vmul.f32 0.5, %v6879_v37 }
 0x13f   : > { %v7037_v2 = vpop.f32.mrf.mxu0  ;;  %v937_v22 = vmul.f32 %v936_v43, %v6962_v14  ;;  %v977_v5 = vmul.f32 %v976_v25, %v6987_v61  ;;  %v988_v6 = vmul.f32 %v987_v50, %v6987_v61  ;;  %v1064_v7 = vmul.f32 %v1063_v41, %v7032_v29 }
 0x140   : > { %v1015_v49 = vmul.f32 %v1014_v48, %v7019_v35  ;;  %v2005_v42 = vmul.f32 %v1973_v59, %v629_v31  ;;  %v1025_v10 = vadd.f32 0.014752088, %v1024_v60  ;;  %v1054_v54 = vadd.f32 0.0036580483, %v1053_v53 }
 0x141   : > { %v1089_v0 = vmul.f32 %v7063_v62, %v7063_v62  ;;  %v989_v37 = vadd.f32 0.4994258, %v988_v6  ;;  %v7077_v16 = vadd.f32 %v6776_v34, %v7012_v38  ;;  %v1065_v17 = vadd.f32 0.014752088, %v1064_v7 }
 0x142   : > { %614 = vmatmul.bf16.gmra.mxu0 %v466_v4  ;;  %v924_v4 = vor.u32 1.1754944e-38, %v923_v55  ;;  %v938_v55 = vadd.f32 0.18741608, %v937_v22  ;;  %v1026_v63 = vmul.f32 %v1025_v10, %v7019_v35  ;;  %v978_v20 = vadd.f32 0.18741608, %v977_v5 }
 0x143   : > { %v1016_v21 = vadd.f32 0.05243302, %v1015_v49  ;;  %v990_v23 = vmul.f32 %v989_v37, %v6987_v61  ;;  %v1055_v26 = vmul.f32 %v1054_v54, %v7032_v29  ;;  %v7084_v8 = vmin.f32 %v1089_v0, 16.0 }
 0x144   : > { %v925_v47 = vsel %vm922_vm7, %v924_v4, %v920_v28  ;;  %v6118_v11 = vpop.eup %6117  ;;  %v467_v4 = vpack.c.bf16 %v451_v58, %v450_v18  ;;  %v1027_v51 = vadd.f32 0.112945676, %v1026_v63  ;;  %v939_v38 = vmul.f32 %v938_v55, %v6962_v14 }
 0x145   : > { %v926_v44 = vmul.f32 %v925_v47, %v901_v19  ;;  %v953_v19 = vmul.f32 %v6118_v11, %v7055_v24  ;;  %v7089_v33 = vadd.f32 1.0, %v990_v23  ;;  %v7092_v40 = vmul.f32 0.70710677, %v7077_v16 }
 0x146   : > { %v1028_v43 = vmul.f32 %v1027_v51, %v7019_v35  ;;  %v1066_v25 = vmul.f32 %v1065_v17, %v7032_v29  ;;  %v1017_v48 = vmul.f32 %v1016_v21, %v7019_v35  ;;  %vm958_vm8 = vweird.f32 %v6118_v11 }
 0x147   : > { %v5783_v56 = vclamps-f32 %v926_v44, 1.0  ;;  %v7057_v13 = vpop.f32.mrf.mxu0  ;;  %v954_v27 = vsub.f32 1.0, %v953_v19  ;;  %v979_v44 = vmul.f32 %v978_v20, %v6987_v61  ;;  %6119 = vrcp.f32 %v7089_v33 }
 0x148   : > { %v1056_v14 = vadd.f32 0.05243302, %v1055_v26  ;;  %v1091_v50 = vmul.f32 2.1237322e-06, %v7084_v8  ;;  %vm957_vm9 = vweird.f32 %v7055_v24  ;;  %v961_v59 = vand.u32 2147483647, %v7055_v24 }
 0x149   : > { %v1974_v46 = vadd.f32 1.0, %v5783_v56  ;;  %v955_v47 = vmul.f32 %v6118_v11, %v954_v27  ;;  %v963_v56 = vand.u32 2147483648, %v7055_v24  ;;  %v1029_v60 = vadd.f32 0.4994258, %v1028_v43  ;;  %vm7105_vm10 = vmor %vm957_vm9, %vm958_vm8 }
 0x14a   : > { %v1067_v53 = vadd.f32 0.112945676, %v1066_v25  ;;  %v940_v31 = vadd.f32 1.1283791, %v939_v38  ;;  %v1129_v61 = vmul.f32 %v7092_v40, %v7092_v40  ;;  %v1018_v22 = vadd.f32 0.18741608, %v1017_v48 }
 0x14b   : > { %v2006_v9 = vmul.f32 %v1974_v46, %v630_v1  ;;  %v956_v41 = vadd.f32 %v6118_v11, %v955_v47  ;;  %v7111_v46 = vadd.f32 %v6776_v34, %v7037_v2  ;;  %v1030_v24 = vmul.f32 %v1029_v60, %v7019_v35 }
 0x14c   : > { %v7117_v6 = vmul.f32 0.5, %v6916_v30  ;;  %v1057_v7 = vmul.f32 %v1056_v14, %v7032_v29  ;;  %v1092_v49 = vadd.f32 0.00028619796, %v1091_v50  ;;  %v980_v10 = vadd.f32 1.1283791, %v979_v44 }
 0x14d   : > { %v2035_v15 = vpack.c.bf16 %v2006_v9, %v2005_v42  ;;  %v960_v5 = vsel %vm7105_vm10, %v6118_v11, %v956_v41  ;;  %v964_v42 = vor.u32 1.1754944e-38, %v963_v56  ;;  %v6120_v9 = vpop.eup %6119  ;;  %vm962_vm11 = vcmp.eq.f32.partialorder %v961_v59, 8.507059e+37 }
 0x14e   : > { %v7120_v54 = vadd.f32 1.0, %v1030_v24  ;;  %v1068_v2 = vmul.f32 %v1067_v53, %v7032_v29  ;;  %v941_v0 = vmul.f32 %v940_v31, %v6929_v45  ;;  %v7124_v37 = vmin.f32 %v1129_v61, 16.0 }
 0x14f   : > { %2135 = vmatmul.bf16.gmra.mxu1 %v2035_v15  ;;  %v7087_v28 = vpop.f32.mrf.mxu0  ;;  %v965_v11 = vsel %vm962_vm11, %v964_v42, %v960_v5  ;;  %v993_v55 = vmul.f32 %v6120_v9, %v7089_v33  ;;  %v1019_v30 = vmul.f32 %v1018_v22, %v7019_v35  ;;  %v7129_v15 = vmul.f32 0.70710677, %v7111_v46 }
 0x150   : > { %v7133_v63 = vadd.f32 %v6776_v34, %v7057_v13  ;;  %6121 = vrcp.f32 %v7120_v54  ;;  %v632_v45 = vmul.f32 0.5, %v6952_v36  ;;  %v1058_v18 = vadd.f32 0.18741608, %v1057_v7 }
 0x151   : > { %v1093_v58 = vmul.f32 %v1092_v49, %v7084_v8  ;;  %v994_v17 = vsub.f32 1.0, %v993_v55  ;;  %v981_v20 = vmul.f32 %v980_v10, %v6965_v57  ;;  %v966_v35 = vmul.f32 %v965_v11, %v941_v0  ;;  %v7177_v0 = vld [vmem:[%s11102_s2] ss:$0 sm:$0xff] }
 0x152   : > { %619 = vmatmul.bf16.gmra.mxu0 %v467_v4  ;;  %v1003_v21 = vand.u32 2147483648, %v7089_v33  ;;  %v1069_v23 = vadd.f32 0.4994258, %v1068_v2  ;;  %v1131_v4 = vmul.f32 2.1237322e-06, %v7124_v37  ;;  %vm998_vm12 = vweird.f32 %v6120_v9 }
 0x153   : > { %v995_v34 = vmul.f32 %v6120_v9, %v994_v17  ;;  %v1001_v13 = vand.u32 2147483647, %v7089_v33  ;;  %v1020_v26 = vadd.f32 1.1283791, %v1019_v30  ;;  %v1169_v36 = vmul.f32 %v7129_v15, %v7129_v15 }
 0x154   : > { %v7147_v27 = vmul.f32 0.70710677, %v7133_v63  ;;  %v1070_v51 = vmul.f32 %v1069_v23, %v7032_v29  ;;  %v1059_v57 = vmul.f32 %v1058_v18, %v7032_v29  ;;  %v1094_v38 = vadd.f32 0.0036580483, %v1093_v58 }
 0x155   : > { %v996_v47 = vadd.f32 %v6120_v9, %v995_v34  ;;  %vm997_vm13 = vweird.f32 %v7089_v33  ;;  %v5784_v25 = vclamps-f32 %v966_v35, 1.0  ;;  %v1004_v44 = vor.u32 1.1754944e-38, %v1003_v21 }
 0x156   : > { %v6122_v43 = vpop.eup %6121  ;;  %vm999_vm14 = vmor %vm997_vm13, %vm998_vm12  ;;  %v7152_v48 = vadd.f32 1.0, %v1070_v51  ;;  %v1102_v14 = vmul.f32 3.8918573e-05, %v7084_v8  ;;  %v1132_v50 = vadd.f32 0.00028619796, %v1131_v4  ;;  %vm1002_vm15 = vcmp.eq.f32.partialorder %v1001_v13, 8.507059e+37 }
 0x157   : > { %v7135_v19 = vpop.f32.mrf.mxu0  ;;  %v1000_v41 = vsel %vm999_vm14, %v6120_v9, %v996_v47  ;;  %v1033_v56 = vmul.f32 %v6122_v43, %v7120_v54  ;;  %v7156_v59 = vmin.f32 %v1169_v36, 16.0  ;;  %v1209_v29 = vmul.f32 %v7147_v27, %v7147_v27 }
 0x158   : > { %v1005_v60 = vsel %vm1002_vm15, %v1004_v44, %v1000_v41  ;;  %6123 = vrcp.f32 %v7152_v48  ;;  %v7162_v33 = vmul.f32 0.5, %v6982_v52  ;;  %v1021_v53 = vmul.f32 %v1020_v26, %v6991_v3 }
 0x159   : > { %v1006_v31 = vmul.f32 %v1005_v60, %v981_v20  ;;  %v1034_v61 = vsub.f32 1.0, %v1033_v56  ;;  %v1975_v1 = vadd.f32 1.0, %v5784_v25  ;;  %v1041_v5 = vand.u32 2147483647, %v7120_v54 }
 0x15a   : > { %v1043_v24 = vand.u32 2147483648, %v7120_v54  ;;  %v1103_v7 = vadd.f32 0.001143296, %v1102_v14  ;;  %v1095_v49 = vmul.f32 %v1094_v38, %v7084_v8  ;;  %vm1038_vm0 = vweird.f32 %v6122_v43 }
 0x15b   : > { %v5785_v42 = vclamps-f32 %v1006_v31, 1.0  ;;  %v1035_v9 = vmul.f32 %v6122_v43, %v1034_v61  ;;  %v1060_v10 = vadd.f32 1.1283791, %v1059_v57  ;;  %v1133_v52 = vmul.f32 %v1132_v50, %v7124_v37 }
 0x15c   : > { %v1171_v3 = vmul.f32 2.1237322e-06, %v7156_v59  ;;  %v7172_v2 = vmin.f32 %v1209_v29, 16.0  ;;  %v7181_v11 = vadd.f32 %v7177_v0, %v7087_v28  ;;  %vm1037_vm1 = vweird.f32 %v7120_v54 }
 0x15d   : > { %v1976_v55 = vadd.f32 1.0, %v5785_v42  ;;  %v1036_v30 = vadd.f32 %v6122_v43, %v1035_v9  ;;  %v2007_v58 = vmul.f32 %v1975_v1, %v7117_v6  ;;  %vm1039_vm2 = vmor %vm1037_vm1, %vm1038_vm0  ;;  %vm1042_vm3 = vcmp.eq.f32.partialorder %v1041_v5, 8.507059e+37 }
 0x15e   : > { %v6124_v18 = vpop.eup %6123  ;;  %v1044_v17 = vor.u32 1.1754944e-38, %v1043_v24  ;;  %v1104_v20 = vmul.f32 %v1103_v7, %v7084_v8  ;;  %v1142_v4 = vmul.f32 3.8918573e-05, %v7124_v37  ;;  %v1096_v28 = vadd.f32 0.05243302, %v1095_v49 }
 0x15f   : > { %v7165_v22 = vpop.f32.mrf.mxu0  ;;  %v2008_v35 = vmul.f32 %v1976_v55, %v632_v45  ;;  %v1040_v21 = vsel %vm1039_vm2, %v6122_v43, %v1036_v30  ;;  %v1073_v23 = vmul.f32 %v6124_v18, %v7152_v48  ;;  %v1134_v34 = vadd.f32 0.0036580483, %v1133_v52 }
 0x160   : > { %v1172_v13 = vadd.f32 0.00028619796, %v1171_v3  ;;  %v1045_v26 = vsel %vm1042_vm3, %v1044_v17, %v1040_v21  ;;  %v1211_v54 = vmul.f32 2.1237322e-06, %v7172_v2  ;;  %v7190_v36 = vmul.f32 0.70710677, %v7181_v11 }
 0x161   : > { %v2036_v6 = vpack.c.bf16 %v2008_v35, %v2007_v58  ;;  %v1074_v51 = vsub.f32 1.0, %v1073_v23  ;;  %v1046_v57 = vmul.f32 %v1045_v26, %v1021_v53  ;;  %v1081_v38 = vand.u32 2147483647, %v7152_v48 }
 0x162   : > { %v1083_v45 = vand.u32 2147483648, %v7152_v48  ;;  %v1105_v47 = vadd.f32 0.014752088, %v1104_v20  ;;  %vm1078_vm4 = vweird.f32 %v6124_v18  ;;  %v1143_v25 = vadd.f32 0.001143296, %v1142_v4 }
 0x163   : > { %2140 = vmatmul.bf16.gmra.mxu1 %v2036_v6  ;;  %v1075_v43 = vmul.f32 %v6124_v18, %v1074_v51  ;;  %v1182_v44 = vmul.f32 3.8918573e-05, %v7156_v59  ;;  %v1061_v14 = vmul.f32 %v1060_v10, %v7015_v32  ;;  %v1135_v50 = vmul.f32 %v1134_v34, %v7124_v37 }
 0x164   : > { %v1173_v41 = vmul.f32 %v1172_v13, %v7156_v59  ;;  %v1106_v29 = vmul.f32 %v1105_v47, %v7084_v8  ;;  %vm1077_vm5 = vweird.f32 %v7152_v48  ;;  %v1144_v53 = vmul.f32 %v1143_v25, %v7124_v37 }
 0x165   : > { %v1076_v60 = vadd.f32 %v6124_v18, %v1075_v43  ;;  %v1183_v31 = vadd.f32 0.001143296, %v1182_v44  ;;  %v1212_v61 = vadd.f32 0.00028619796, %v1211_v54  ;;  %v1249_v1 = vmul.f32 %v7190_v36, %v7190_v36  ;;  %vm1079_vm6 = vmor %vm1077_vm5, %vm1078_vm4 }
 0x166   : > { %v5786_v5 = vclamps-f32 %v1046_v57, 1.0  ;;  %v1084_v32 = vor.u32 1.1754944e-38, %v1083_v45  ;;  %vm1082_vm7 = vcmp.eq.f32.partialorder %v1081_v38, 8.507059e+37  ;;  %v1107_v7 = vadd.f32 0.112945676, %v1106_v29 }
 0x167   : > { %v7198_v56 = vpop.f32.mrf.mxu0  ;;  %v1080_v24 = vsel %vm1079_vm6, %v6124_v18, %v1076_v60  ;;  %v1145_v49 = vadd.f32 0.014752088, %v1144_v53  ;;  %v1097_v42 = vmul.f32 %v1096_v28, %v7084_v8  ;;  %v1136_v9 = vadd.f32 0.05243302, %v1135_v50 }
 0x168   : > { %v1174_v10 = vadd.f32 0.0036580483, %v1173_v41  ;;  %v1085_v48 = vsel %vm1082_vm7, %v1084_v32, %v1080_v24  ;;  %v1108_v3 = vmul.f32 %v1107_v7, %v7084_v8  ;;  %v1184_v30 = vmul.f32 %v1183_v31, %v7156_v59 }
 0x169   : > { %v1086_v52 = vmul.f32 %v1085_v48, %v1061_v14  ;;  %v1146_v55 = vmul.f32 %v1145_v49, %v7124_v37  ;;  %v634_v58 = vmul.f32 0.5, %v7002_v12  ;;  %v1213_v17 = vmul.f32 %v1212_v61, %v7172_v2 }
 0x16a   : > { %v1977_v18 = vadd.f32 1.0, %v5786_v5  ;;  %v1222_v20 = vmul.f32 3.8918573e-05, %v7172_v2  ;;  %v7213_v35 = vmin.f32 %v1249_v1, 16.0  ;;  %v1109_v23 = vadd.f32 0.4994258, %v1108_v3 }
 0x16b   : > { %v5787_v21 = vclamps-f32 %v1086_v52, 1.0  ;;  %v1147_v4 = vadd.f32 0.112945676, %v1146_v55  ;;  %v1098_v28 = vadd.f32 0.18741608, %v1097_v42  ;;  %v1137_v34 = vmul.f32 %v1136_v9, %v7124_v37 }
 0x16c   : > { %v1185_v13 = vadd.f32 0.014752088, %v1184_v30  ;;  %v1223_v26 = vadd.f32 0.001143296, %v1222_v20  ;;  %v1175_v54 = vmul.f32 %v1174_v10, %v7156_v59  ;;  %v1110_v12 = vmul.f32 %v1109_v23, %v7084_v8 }
 0x16d   : > { %v1978_v6 = vadd.f32 1.0, %v5787_v21  ;;  %v1148_v51 = vmul.f32 %v1147_v4, %v7124_v37  ;;  %v1214_v57 = vadd.f32 0.0036580483, %v1213_v17  ;;  %v2009_v38 = vmul.f32 %v1977_v18, %v7162_v33 }
 0x16e   : > { %v1186_v47 = vmul.f32 %v1185_v13, %v7156_v59  ;;  %v1224_v43 = vmul.f32 %v1223_v26, %v7172_v2  ;;  %v7224_v44 = vadd.f32 1.0, %v1110_v12  ;;  %v1262_v50 = vmul.f32 3.8918573e-05, %v7213_v35 }
 0x16f   : > { %v7220_v45 = vpop.f32.mrf.mxu0  ;;  %v2010_v25 = vmul.f32 %v1978_v6, %v634_v58  ;;  %v1149_v14 = vadd.f32 0.4994258, %v1148_v51  ;;  %v1138_v41 = vadd.f32 0.18741608, %v1137_v34  ;;  %v1176_v53 = vadd.f32 0.05243302, %v1175_v54 }
 0x170   : > { %v1187_v29 = vadd.f32 0.112945676, %v1186_v47  ;;  %v1225_v60 = vadd.f32 0.014752088, %v1224_v43  ;;  %v7229_v31 = vadd.f32 %v7177_v0, %v7135_v19  ;;  %6125 = vrcp.f32 %v7224_v44 }
 0x171   : > { %v2037_v33 = vpack.c.bf16 %v2010_v25, %v2009_v38  ;;  %v1099_v61 = vmul.f32 %v1098_v28, %v7084_v8  ;;  %v1150_v1 = vmul.f32 %v1149_v14, %v7124_v37  ;;  %v1215_v5 = vmul.f32 %v1214_v57, %v7172_v2 }
 0x172   : > { %v1188_v32 = vmul.f32 %v1187_v29, %v7156_v59  ;;  %v1226_v24 = vmul.f32 %v1225_v60, %v7172_v2  ;;  %v1263_v7 = vadd.f32 0.001143296, %v1262_v50  ;;  %v1139_v49 = vmul.f32 %v1138_v41, %v7124_v37 }
 0x173   : > { %2145 = vmatmul.bf16.gmra.mxu1 %v2037_v33  ;;  %v7238_v42 = vadd.f32 1.0, %v1150_v1  ;;  %v1177_v19 = vmul.f32 %v1176_v53, %v7156_v59  ;;  %v1251_v9 = vmul.f32 2.1237322e-06, %v7213_v35  ;;  %v7243_v8 = vmul.f32 0.70710677, %v7229_v31 }
 0x174   : > { %v1189_v10 = vadd.f32 0.4994258, %v1188_v32  ;;  %v1100_v48 = vadd.f32 1.1283791, %v1099_v61  ;;  %v1216_v3 = vadd.f32 0.05243302, %v1215_v5  ;;  %v1264_v37 = vmul.f32 %v1263_v7, %v7213_v35 }
 0x175   : > { %6127 = vrcp.f32 %v7238_v42  ;;  %v1227_v30 = vadd.f32 0.112945676, %v1226_v24  ;;  %v1140_v58 = vadd.f32 1.1283791, %v1139_v49  ;;  %v1178_v20 = vadd.f32 0.18741608, %v1177_v19 }
 0x176   : > { %v6126_v52 = vpop.eup %6125  ;;  %v1190_v55 = vmul.f32 %v1189_v10, %v7156_v59  ;;  %v1252_v21 = vadd.f32 0.00028619796, %v1251_v9  ;;  %v1289_v23 = vmul.f32 %v7243_v8, %v7243_v8  ;;  %v1101_v28 = vmul.f32 %v1100_v48, %v7063_v62 }
 0x177   : > { %v1113_v17 = vmul.f32 %v6126_v52, %v7224_v44  ;;  %v7249_v18 = vpop.f32.mrf.mxu0  ;;  %v7258_v34 = vadd.f32 %v7177_v0, %v7165_v22  ;;  %v1228_v26 = vmul.f32 %v1227_v30, %v7172_v2  ;;  %v1217_v54 = vmul.f32 %v1216_v3, %v7172_v2 }
 0x178   : > { %v7253_v4 = vadd.f32 1.0, %v1190_v55  ;;  %v1123_v6 = vand.u32 2147483648, %v7224_v44  ;;  %v1265_v12 = vadd.f32 0.014752088, %v1264_v37  ;;  %v1141_v57 = vmul.f32 %v1140_v58, %v7092_v40 }
 0x179   : > { %v1114_v13 = vsub.f32 1.0, %v1113_v17  ;;  %vm1118_vm8 = vweird.f32 %v6126_v52  ;;  %v1121_v62 = vand.u32 2147483647, %v7224_v44  ;;  %v1179_v22 = vmul.f32 %v1178_v20, %v7156_v59 }
 0x17a   : > { %6129 = vrcp.f32 %v7253_v4  ;;  %v1253_v47 = vmul.f32 %v1252_v21, %v7213_v35  ;;  %v7268_v43 = vmin.f32 %v1289_v23, 16.0  ;;  %v7272_v14 = vmul.f32 0.70710677, %v7258_v34 }
 0x17b   : > { %v6128_v51 = vpop.eup %6127  ;;  %v1115_v38 = vmul.f32 %v6126_v52, %v1114_v13  ;;  %vm1117_vm9 = vweird.f32 %v7224_v44  ;;  %v1229_v41 = vadd.f32 0.4994258, %v1228_v26  ;;  %v1218_v40 = vadd.f32 0.18741608, %v1217_v54 }
 0x17c   : > { %v1153_v25 = vmul.f32 %v6128_v51, %v7238_v42  ;;  %vm1119_vm10 = vmor %vm1117_vm9, %vm1118_vm8  ;;  %v1124_v29 = vor.u32 1.1754944e-38, %v1123_v6  ;;  %v1266_v53 = vmul.f32 %v1265_v12, %v7213_v35  ;;  %vm1122_vm11 = vcmp.eq.f32.partialorder %v1121_v62, 8.507059e+37 }
 0x17d   : > { %v1116_v50 = vadd.f32 %v6126_v52, %v1115_v38  ;;  %v1163_v33 = vand.u32 2147483648, %v7238_v42  ;;  %v1230_v61 = vmul.f32 %v1229_v41, %v7172_v2  ;;  %vm1158_vm12 = vweird.f32 %v6128_v51 }
 0x17e   : > { %v1154_v60 = vsub.f32 1.0, %v1153_v25  ;;  %v1161_v24 = vand.u32 2147483647, %v7238_v42  ;;  %v1291_v44 = vmul.f32 2.1237322e-06, %v7268_v43  ;;  %v1329_v7 = vmul.f32 %v7272_v14, %v7272_v14 }
 0x17f   : > { %v1120_v59 = vsel %vm1119_vm10, %v6126_v52, %v1116_v50  ;;  %v7282_v19 = vpop.f32.mrf.mxu0  ;;  %vm1157_vm13 = vweird.f32 %v7238_v42  ;;  %v7286_v48 = vadd.f32 1.0, %v1230_v61  ;;  %v1267_v52 = vadd.f32 0.112945676, %v1266_v53 }
 0x180   : > { %v6130_v1 = vpop.eup %6129  ;;  %v1125_v5 = vsel %vm1122_vm11, %v1124_v29, %v1120_v59  ;;  %v1155_v32 = vmul.f32 %v6128_v51, %v1154_v60  ;;  %v1254_v3 = vadd.f32 0.0036580483, %v1253_v47  ;;  %v7290_v55 = vadd.f32 %v7177_v0, %v7198_v56  ;;  %vm1159_vm14 = vmor %vm1157_vm13, %vm1158_vm12 }
 0x181   : > { %v1126_v49 = vmul.f32 %v1125_v5, %v1101_v28  ;;  %v1193_v9 = vmul.f32 %v6130_v1, %v7253_v4  ;;  %v1164_v30 = vor.u32 1.1754944e-38, %v1163_v33  ;;  %vm1162_vm15 = vcmp.eq.f32.partialorder %v1161_v24, 8.507059e+37 }
 0x182   : > { %v1156_v10 = vadd.f32 %v6128_v51, %v1155_v32  ;;  %6131 = vrcp.f32 %v7286_v48  ;;  %v1292_v20 = vadd.f32 0.00028619796, %v1291_v44  ;;  %vm1198_vm0 = vweird.f32 %v6130_v1 }
 0x183   : > { %v1194_v37 = vsub.f32 1.0, %v1193_v9  ;;  %v5788_v58 = vclamps-f32 %v1126_v49, 1.0  ;;  %v7293_v42 = vmin.f32 %v1329_v7, 16.0  ;;  %v1203_v13 = vand.u32 2147483648, %v7253_v4 }
 0x184   : > { %v1160_v17 = vsel %vm1159_vm14, %v6128_v51, %v1156_v10  ;;  %v1268_v56 = vmul.f32 %v1267_v52, %v7213_v35  ;;  %v7298_v26 = vmul.f32 0.70710677, %v7290_v55  ;;  %vm1197_vm1 = vweird.f32 %v7253_v4 }
 0x185   : > { %v1165_v21 = vsel %vm1162_vm15, %v1164_v30, %v1160_v17  ;;  %v1195_v23 = vmul.f32 %v6130_v1, %v1194_v37  ;;  %v1201_v6 = vand.u32 2147483647, %v7253_v4  ;;  %v635_v12 = vmul.f32 0.5, %v7053_v39  ;;  %vm7304_vm2 = vmor %vm1197_vm1, %vm1198_vm0 }
 0x186   : > { %v1166_v28 = vmul.f32 %v1165_v21, %v1141_v57  ;;  %v636_v51 = vmul.f32 0.5, %v7077_v16  ;;  %v1979_v62 = vadd.f32 1.0, %v5788_v58  ;;  %v1180_v47 = vadd.f32 1.1283791, %v1179_v22 }
 0x187   : > { %v1196_v54 = vadd.f32 %v6130_v1, %v1195_v23  ;;  %v1219_v25 = vmul.f32 %v1218_v40, %v7172_v2  ;;  %v1293_v50 = vmul.f32 %v1292_v20, %v7268_v43  ;;  %v1331_v4 = vmul.f32 2.1237322e-06, %v7293_v42  ;;  %v7317_v2 = vpop.f32.mrf.mxu0 }
 0x188   : > { %v5789_v38 = vclamps-f32 %v1166_v28, 1.0  ;;  %v6132_v29 = vpop.eup %6131  ;;  %v1204_v60 = vor.u32 1.1754944e-38, %v1203_v13  ;;  %v1269_v16 = vadd.f32 0.4994258, %v1268_v56  ;;  %v1255_v53 = vmul.f32 %v1254_v3, %v7213_v35 }
 0x189   : > { %v1200_v41 = vsel %vm7304_vm2, %v6130_v1, %v1196_v54  ;;  %v1369_v59 = vmul.f32 %v7298_v26, %v7298_v26  ;;  %vm1202_vm3 = vcmp.eq.f32.partialorder %v1201_v6, 8.507059e+37  ;;  %v1233_v22 = vmul.f32 %v6132_v29, %v7286_v48 }
 0x18a   : > { %v1980_v39 = vadd.f32 1.0, %v5789_v38  ;;  %v2011_v40 = vmul.f32 %v1979_v62, %v635_v12  ;;  %v1205_v61 = vsel %vm1202_vm3, %v1204_v60, %v1200_v41  ;;  %v1302_v1 = vmul.f32 3.8918573e-05, %v7268_v43 }
 0x18b   : > { %v1181_v5 = vmul.f32 %v1180_v47, %v7129_v15  ;;  %v1220_v32 = vadd.f32 1.1283791, %v1219_v25  ;;  %v1294_v24 = vadd.f32 0.0036580483, %v1293_v50  ;;  %v1234_v44 = vsub.f32 1.0, %v1233_v22 }
 0x18c   : > { %v2012_v33 = vmul.f32 %v1980_v39, %v636_v51  ;;  %v1332_v7 = vadd.f32 0.00028619796, %v1331_v4  ;;  %v1243_v9 = vand.u32 2147483648, %v7286_v48  ;;  %v1270_v10 = vmul.f32 %v1269_v16, %v7213_v35 }
 0x18d   : > { %v1206_v52 = vmul.f32 %v1205_v61, %v1181_v5  ;;  %v1235_v3 = vmul.f32 %v6132_v29, %v1234_v44  ;;  %vm1238_vm4 = vweird.f32 %v6132_v29  ;;  %v1241_v30 = vand.u32 2147483647, %v7286_v48 }
 0x18e   : > { %v2038_v49 = vpack.c.bf16 %v2012_v33, %v2011_v40  ;;  %v1256_v37 = vadd.f32 0.05243302, %v1255_v53  ;;  %v7324_v58 = vmin.f32 %v1369_v59, 16.0  ;;  %v7326_v17 = vadd.f32 1.0, %v1270_v10 }
 0x18f   : > { %v1303_v15 = vadd.f32 0.001143296, %v1302_v1  ;;  %v1221_v20 = vmul.f32 %v1220_v32, %v7147_v27  ;;  %v7331_v21 = vadd.f32 %v7177_v0, %v7220_v45  ;;  %v1236_v23 = vadd.f32 %v6132_v29, %v1235_v3  ;;  %v7343_v62 = vpop.f32.mrf.mxu0 }
 0x190   : > { %2150 = vmatmul.bf16.gmra.mxu1 %v2038_v49  ;;  %vm1237_vm5 = vweird.f32 %v7286_v48  ;;  %v1295_v28 = vmul.f32 %v1294_v24, %v7268_v43  ;;  %v1244_v13 = vor.u32 1.1754944e-38, %v1243_v9  ;;  %6133 = vrcp.f32 %v7326_v17 }
 0x191   : > { %vm1239_vm6 = vmor %vm1237_vm5, %vm1238_vm4  ;;  %v1342_v56 = vmul.f32 3.8918573e-05, %v7293_v42  ;;  %v1333_v54 = vmul.f32 %v1332_v7, %v7293_v42  ;;  %v5790_v6 = vclamps-f32 %v1206_v52, 1.0  ;;  %vm1242_vm7 = vcmp.eq.f32.partialorder %v1241_v30, 8.507059e+37 }
 0x192   : > { %v1240_v12 = vsel %vm1239_vm6, %v6132_v29, %v1236_v23  ;;  %v1371_v27 = vmul.f32 2.1237322e-06, %v7324_v58  ;;  %v1304_v51 = vmul.f32 %v1303_v15, %v7268_v43  ;;  %v7341_v48 = vmul.f32 0.70710677, %v7331_v21 }
 0x193   : > { %v1245_v45 = vsel %vm1242_vm7, %v1244_v13, %v1240_v12  ;;  %v1257_v57 = vmul.f32 %v1256_v37, %v7213_v35  ;;  %v1296_v47 = vadd.f32 0.05243302, %v1295_v28  ;;  %v1343_v50 = vadd.f32 0.001143296, %v1342_v56 }
 0x194   : > { %v1246_v38 = vmul.f32 %v1245_v45, %v1221_v20  ;;  %v1305_v25 = vadd.f32 0.014752088, %v1304_v51  ;;  %v1334_v41 = vadd.f32 0.0036580483, %v1333_v54  ;;  %v1981_v29 = vadd.f32 1.0, %v5790_v6 }
 0x195   : > { %v1382_v39 = vmul.f32 3.8918573e-05, %v7324_v58  ;;  %v637_v16 = vmul.f32 0.5, %v7111_v46  ;;  %v1372_v53 = vadd.f32 0.00028619796, %v1371_v27  ;;  %v1344_v22 = vmul.f32 %v1343_v50, %v7293_v42 }
 0x196   : > { %v5791_v4 = vclamps-f32 %v1246_v38, 1.0  ;;  %v7347_v60 = vpop.eup %6133  ;;  %v1306_v59 = vmul.f32 %v1305_v25, %v7268_v43  ;;  %v638_v40 = vmul.f32 0.5, %v7133_v63  ;;  %v1409_v33 = vmul.f32 %v7341_v48, %v7341_v48 }
 0x197   : > { %v1273_v1 = vmul.f32 %v7347_v60, %v7326_v17  ;;  %v1258_v5 = vadd.f32 0.18741608, %v1257_v57  ;;  %v1297_v32 = vmul.f32 %v1296_v47, %v7268_v43  ;;  %v1345_v44 = vadd.f32 0.014752088, %v1344_v22  ;;  %v7366_v54 = vpop.f32.mrf.mxu0 }
 0x198   : > { %v1982_v61 = vadd.f32 1.0, %v5791_v4  ;;  %v1307_v24 = vadd.f32 0.112945676, %v1306_v59  ;;  %v1335_v46 = vmul.f32 %v1334_v41, %v7293_v42  ;;  %v2013_v7 = vmul.f32 %v1981_v29, %v637_v16 }
 0x199   : > { %v1383_v9 = vadd.f32 0.001143296, %v1382_v39  ;;  %v1373_v10 = vmul.f32 %v1372_v53, %v7324_v58  ;;  %v1346_v52 = vmul.f32 %v1345_v44, %v7293_v42  ;;  %v7362_v3 = vmin.f32 %v1409_v33, 16.0 }
 0x19a   : > { %v2014_v49 = vmul.f32 %v1982_v61, %v638_v40  ;;  %v1308_v63 = vmul.f32 %v1307_v24, %v7268_v43  ;;  %v1274_v37 = vsub.f32 1.0, %v1273_v1  ;;  %v1298_v20 = vadd.f32 0.18741608, %v1297_v32 }
 0x19b   : > { %v1384_v15 = vmul.f32 %v1383_v9, %v7324_v58  ;;  %v1347_v28 = vadd.f32 0.112945676, %v1346_v52  ;;  %v1259_v13 = vmul.f32 %v1258_v5, %v7213_v35  ;;  %v1336_v56 = vadd.f32 0.05243302, %v1335_v46 }
 0x19c   : > { %v2039_v30 = vpack.c.bf16 %v2014_v49, %v2013_v7  ;;  %v1309_v23 = vadd.f32 0.4994258, %v1308_v63  ;;  %v1374_v6 = vadd.f32 0.0036580483, %v1373_v10  ;;  %v7370_v12 = vadd.f32 %v7177_v0, %v7249_v18 }
 0x19d   : > { %v1385_v45 = vadd.f32 0.014752088, %v1384_v15  ;;  %v1411_v51 = vmul.f32 2.1237322e-06, %v7362_v3  ;;  %v7376_v38 = vadd.f32 %v7177_v0, %v7282_v19  ;;  %v1275_v35 = vmul.f32 %v7347_v60, %v1274_v37 }
 0x19e   : > { %v1310_v27 = vmul.f32 %v1309_v23, %v7268_v43  ;;  %v1299_v57 = vmul.f32 %v1298_v20, %v7268_v43  ;;  %v1348_v25 = vmul.f32 %v1347_v28, %v7293_v42  ;;  %v7384_v18 = vmul.f32 0.5, %v7181_v11 }
 0x19f   : > { %v1260_v50 = vadd.f32 1.1283791, %v1259_v13  ;;  %v1337_v41 = vmul.f32 %v1336_v56, %v7293_v42  ;;  %v1375_v4 = vmul.f32 %v1374_v6, %v7324_v58  ;;  %v7389_v29 = vmul.f32 0.70710677, %v7370_v12  ;;  %v605_v1 = vpop.f32.mrf.mxu0  ;;  %v2126_v13 = vpop.f32.mrf.mxu1 }
 0x1a0   : > { %2155 = vmatmul.bf16.gmra.mxu1 %v2039_v30  ;;  %v7380_v47 = vadd.f32 1.0, %v1310_v27  ;;  %v1386_v19 = vmul.f32 %v1385_v45, %v7324_v58  ;;  %v1412_v43 = vadd.f32 0.00028619796, %v1411_v51  ;;  %v7394_v39 = vmul.f32 0.70710677, %v7376_v38 }
 0x1a1   : > { %v1276_v16 = vadd.f32 %v7347_v60, %v1275_v35  ;;  %vm1278_vm8 = vweird.f32 %v7347_v60  ;;  %v7399_v11 = vmul.f32 0.5, %v7229_v31  ;;  %v1300_v53 = vadd.f32 1.1283791, %v1299_v57 }
 0x1a2   : > { %6135 = vrcp.f32 %v7380_v47  ;;  %v1283_v59 = vand.u32 2147483648, %v7326_v17  ;;  %v1349_v22 = vadd.f32 0.4994258, %v1348_v25  ;;  %v1261_v40 = vmul.f32 %v1260_v50, %v7190_v36 }
 0x1a3   : > { %v1338_v33 = vadd.f32 0.18741608, %v1337_v41  ;;  %vm1277_vm9 = vweird.f32 %v7326_v17  ;;  %v1281_v61 = vand.u32 2147483647, %v7326_v17  ;;  %v1376_v5 = vadd.f32 0.05243302, %v1375_v4 }
 0x1a4   : > { %v1449_v32 = vmul.f32 %v7389_v29, %v7389_v29  ;;  %vm7407_vm10 = vmor %vm1277_vm9, %vm1278_vm8  ;;  %v1350_v31 = vmul.f32 %v1349_v22, %v7293_v42  ;;  %v1387_v44 = vadd.f32 0.112945676, %v1386_v19  ;;  %v1413_v46 = vmul.f32 %v1412_v43, %v7362_v3 }
 0x1a5   : > { %v1489_v36 = vmul.f32 %v7394_v39, %v7394_v39  ;;  %v1280_v17 = vsel %vm7407_vm10, %v7347_v60, %v1276_v16  ;;  %v7419_v7 = vadd.f32 %v7177_v0, %v605_v1  ;;  %v1301_v9 = vmul.f32 %v1300_v53, %v7243_v8 }
 0x1a6   : > { %v7424_v10 = vadd.f32 %v7177_v0, %v7317_v2  ;;  %v1284_v63 = vor.u32 1.1754944e-38, %v1283_v59  ;;  %v7426_v52 = vadd.f32 1.0, %v1350_v31  ;;  %v7429_v30 = vmul.f32 %v1338_v33, %v7293_v42  ;;  %v7439_v2 = vld [vmem:[%s11104_s4] ss:$0 sm:$0xff] }
 0x1a7   : > { %vm1282_vm11 = vcmp.eq.f32.partialorder %v1281_v61, 8.507059e+37  ;;  %v1388_v60 = vmul.f32 %v1387_v44, %v7324_v58  ;;  %v1377_v15 = vmul.f32 %v1376_v5, %v7324_v58  ;;  %v7434_v20 = vmin.f32 %v1449_v32, 16.0 }
 0x1a8   : > { %v6136_v49 = vpop.eup %6135  ;;  %v1285_v8 = vsel %vm1282_vm11, %v1284_v63, %v1280_v17  ;;  %6137 = vrcp.f32 %v7426_v52  ;;  %v7442_v23 = vadd.f32 0.0036580483, %v1413_v46  ;;  %v7444_v42 = vmin.f32 %v1489_v36, 16.0 }
 0x1a9   : > { %v1313_v37 = vmul.f32 %v6136_v49, %v7380_v47  ;;  %v7447_v56 = vmul.f32 0.70710677, %v7419_v7  ;;  %v7450_v6 = vmul.f32 0.70710677, %v7424_v10  ;;  %v7454_v27 = vadd.f32 %v7177_v0, %v7343_v62 }
 0x1aa   : > { %v1323_v45 = vand.u32 2147483648, %v7380_v47  ;;  %v1389_v51 = vadd.f32 0.4994258, %v1388_v60  ;;  %v1286_v35 = vmul.f32 %v1285_v8, %v1261_v40  ;;  %vm1318_vm12 = vweird.f32 %v6136_v49 }
 0x1ab   : > { %v1314_v28 = vsub.f32 1.0, %v1313_v37  ;;  %v1321_v25 = vand.u32 2147483647, %v7380_v47  ;;  %v1378_v50 = vadd.f32 0.18741608, %v1377_v15  ;;  %v7461_v4 = vadd.f32 %v7177_v0, %v7366_v54 }
 0x1ac   : > { %v1451_v41 = vmul.f32 2.1237322e-06, %v7434_v20  ;;  %v7464_v19 = vadd.f32 %v7439_v2, %v2126_v13  ;;  %vm1317_vm13 = vweird.f32 %v7380_v47  ;;  %v1649_v43 = vmul.f32 %v7447_v56, %v7447_v56 }
 0x1ad   : > { %v1315_v57 = vmul.f32 %v6136_v49, %v1314_v28  ;;  %v1390_v16 = vmul.f32 %v1389_v51, %v7324_v58  ;;  %v1491_v59 = vmul.f32 2.1237322e-06, %v7444_v42  ;;  %v1529_v22 = vmul.f32 %v7450_v6, %v7450_v6  ;;  %vm1319_vm14 = vmor %vm1317_vm13, %vm1318_vm12 }
 0x1ae   : > { %v7470_v53 = vpop.eup %6137  ;;  %v7476_v54 = vmul.f32 0.70710677, %v7454_v27  ;;  %v1324_v40 = vor.u32 1.1754944e-38, %v1323_v45  ;;  %v5792_v33 = vclamps-f32 %v1286_v35, 1.0  ;;  %vm1322_vm15 = vcmp.eq.f32.partialorder %v1321_v25, 8.507059e+37 }
 0x1af   : > { %v1316_v62 = vadd.f32 %v6136_v49, %v1315_v57  ;;  %v1353_v47 = vmul.f32 %v7470_v53, %v7426_v52  ;;  %v7481_v5 = vmul.f32 0.70710677, %v7461_v4  ;;  %v7484_v32 = vmul.f32 0.70710677, %v7464_v19 }
 0x1b0   : > { %v1422_v24 = vmul.f32 3.8918573e-05, %v7362_v3  ;;  %v7487_v44 = vmin.f32 %v1649_v43, 16.0  ;;  %v7489_v36 = vadd.f32 1.0, %v1390_v16  ;;  %v1379_v17 = vmul.f32 %v1378_v50, %v7324_v58 }
 0x1b1   : > { %v1320_v61 = vsel %vm1319_vm14, %v6136_v49, %v1316_v62  ;;  %v1354_v46 = vsub.f32 1.0, %v1353_v47  ;;  %v1452_v49 = vadd.f32 0.00028619796, %v1451_v41  ;;  %v7492_v63 = vmin.f32 %v1529_v22, 16.0 }
 0x1b2   : > { %v1325_v1 = vsel %vm1322_vm15, %v1324_v40, %v1320_v61  ;;  %v1569_v37 = vmul.f32 %v7476_v54, %v7476_v54  ;;  %v1983_v15 = vadd.f32 1.0, %v5792_v33  ;;  %6139 = vrcp.f32 %v7489_v36 }
 0x1b3   : > { %v1326_v31 = vmul.f32 %v1325_v1, %v1301_v9  ;;  %v1355_v8 = vmul.f32 %v7470_v53, %v1354_v46  ;;  %v1492_v9 = vadd.f32 0.00028619796, %v1491_v59  ;;  %v1609_v28 = vmul.f32 %v7481_v5, %v7481_v5 }
 0x1b4   : > { %v2270_v13 = vmul.f32 %v7484_v32, %v7484_v32  ;;  %v1423_v58 = vadd.f32 0.001143296, %v1422_v24  ;;  %v1662_v51 = vmul.f32 3.8918573e-05, %v7487_v44  ;;  %vm1358_vm0 = vweird.f32 %v7470_v53 }
 0x1b5   : > { %v5793_v60 = vclamps-f32 %v1326_v31, 1.0  ;;  %v1356_v35 = vadd.f32 %v7470_v53, %v1355_v8  ;;  %v1453_v57 = vmul.f32 %v1452_v49, %v7434_v20  ;;  %v1531_v25 = vmul.f32 2.1237322e-06, %v7492_v63 }
 0x1b6   : > { %v7507_v50 = vmin.f32 %v1569_v37, 16.0  ;;  %v1363_v41 = vand.u32 2147483648, %v7426_v52  ;;  %v2015_v62 = vmul.f32 %v1983_v15, %v7384_v18  ;;  %vm1357_vm1 = vweird.f32 %v7426_v52 }
 0x1b7   : > { %v1984_v45 = vadd.f32 1.0, %v5793_v60  ;;  %v1361_v16 = vand.u32 2147483647, %v7426_v52  ;;  %v1340_v59 = vadd.f32 1.1283791, %v7429_v30  ;;  %v1493_v22 = vmul.f32 %v1492_v9, %v7444_v42  ;;  %vm7518_vm2 = vmor %vm1357_vm1, %vm1358_vm0 }
 0x1b8   : > { %v7516_v40 = vmin.f32 %v1609_v28, 16.0  ;;  %v1424_v61 = vmul.f32 %v1423_v58, %v7362_v3  ;;  %v6140_v47 = vpop.eup %6139  ;;  %v7523_v1 = vmin.f32 %v2270_v13, 16.0  ;;  %v1360_v52 = vsel %vm7518_vm2, %v7470_v53, %v1356_v35 }
 0x1b9   : > { %v2016_v43 = vmul.f32 %v1984_v45, %v7399_v11  ;;  %v1663_v11 = vadd.f32 0.001143296, %v1662_v51  ;;  %v1532_v30 = vadd.f32 0.00028619796, %v1531_v25  ;;  %v1571_v24 = vmul.f32 2.1237322e-06, %v7507_v50 }
 0x1ba   : > { %v1364_v31 = vor.u32 1.1754944e-38, %v1363_v41  ;;  %v1393_v46 = vmul.f32 %v6140_v47, %v7489_v36  ;;  %v1380_v49 = vadd.f32 1.1283791, %v1379_v17  ;;  %v1415_v37 = vmul.f32 %v7442_v23, %v7362_v3 }
 0x1bb   : > { %v2040_v18 = vpack.c.bf16 %v2016_v43, %v2015_v62  ;;  %v1454_v60 = vadd.f32 0.0036580483, %v1453_v57  ;;  %vm1362_vm3 = vcmp.eq.f32.partialorder %v1361_v16, 8.507059e+37  ;;  %v1611_v15 = vmul.f32 2.1237322e-06, %v7516_v40 }
 0x1bc   : > { %v1365_v8 = vsel %vm1362_vm3, %v1364_v31, %v1360_v52  ;;  %v1394_v9 = vsub.f32 1.0, %v1393_v46  ;;  %v1425_v28 = vadd.f32 0.014752088, %v1424_v61  ;;  %v1341_v53 = vmul.f32 %v1340_v59, %v7272_v14  ;;  %v607_v61 = vpop.f32.mrf.mxu0 }
 0x1bd   : > { %2160 = vmatmul.bf16.gmra.mxu1 %v2040_v18  ;;  %v1494_v13 = vadd.f32 0.0036580483, %v1493_v22  ;;  %v2272_v58 = vmul.f32 2.1237322e-06, %v7523_v1  ;;  %v1664_v45 = vmul.f32 %v1663_v11, %v7487_v44  ;;  %v1533_v17 = vmul.f32 %v1532_v30, %v7492_v63 }
 0x1be   : > { %v1572_v51 = vadd.f32 0.00028619796, %v1571_v24  ;;  %v1395_v35 = vmul.f32 %v6140_v47, %v1394_v9  ;;  %v1403_v23 = vand.u32 2147483648, %v7489_v36  ;;  %v1416_v57 = vadd.f32 0.05243302, %v1415_v37 }
 0x1bf   : > { %v1366_v25 = vmul.f32 %v1365_v8, %v1341_v53  ;;  %vm1398_vm4 = vweird.f32 %v6140_v47  ;;  %v1401_v41 = vand.u32 2147483647, %v7489_v36  ;;  %v1381_v62 = vmul.f32 %v1380_v49, %v7298_v26 }
 0x1c0   : > { %v1455_v14 = vmul.f32 %v1454_v60, %v7434_v20  ;;  %v1612_v43 = vadd.f32 0.00028619796, %v1611_v15  ;;  %v1426_v16 = vmul.f32 %v1425_v28, %v7362_v3  ;;  %v2273_v59 = vadd.f32 0.00028619796, %v2272_v58 }
 0x1c1   : > { %v1665_v22 = vadd.f32 0.014752088, %v1664_v45  ;;  %v1396_v33 = vadd.f32 %v6140_v47, %v1395_v35  ;;  %vm1397_vm5 = vweird.f32 %v7489_v36  ;;  %v1495_v18 = vmul.f32 %v1494_v13, %v7444_v42 }
 0x1c2   : > { %v1534_v11 = vadd.f32 0.0036580483, %v1533_v17  ;;  %v1573_v52 = vmul.f32 %v1572_v51, %v7507_v50  ;;  %vm1399_vm6 = vmor %vm1397_vm5, %vm1398_vm4  ;;  %v1404_v30 = vor.u32 1.1754944e-38, %v1403_v23  ;;  %v1651_v26 = vmul.f32 2.1237322e-06, %v7487_v44 }
 0x1c3   : > { %v5794_v24 = vclamps-f32 %v1366_v25, 1.0  ;;  %v1400_v31 = vsel %vm1399_vm6, %v6140_v47, %v1396_v33  ;;  %vm1402_vm7 = vcmp.eq.f32.partialorder %v1401_v41, 8.507059e+37  ;;  %v1613_v46 = vmul.f32 %v1612_v43, %v7516_v40 }
 0x1c4   : > { %v1405_v49 = vsel %vm1402_vm7, %v1404_v30, %v1400_v31  ;;  %v1427_v37 = vadd.f32 0.112945676, %v1426_v16  ;;  %v2274_v60 = vmul.f32 %v2273_v59, %v7523_v1  ;;  %v1666_v36 = vmul.f32 %v1665_v22, %v7487_v44 }
 0x1c5   : > { %v1406_v15 = vmul.f32 %v1405_v49, %v1381_v62  ;;  %v1417_v8 = vmul.f32 %v1416_v57, %v7362_v3  ;;  %v1456_v9 = vadd.f32 0.05243302, %v1455_v14  ;;  %v1496_v28 = vadd.f32 0.05243302, %v1495_v18  ;;  %v610_v18 = vpop.f32.mrf.mxu0 }
 0x1c6   : > { %v1535_v53 = vmul.f32 %v1534_v11, %v7492_v63  ;;  %v1574_v13 = vadd.f32 0.0036580483, %v1573_v52  ;;  %v1652_v58 = vadd.f32 0.00028619796, %v1651_v26  ;;  %v1985_v47 = vadd.f32 1.0, %v5794_v24  ;;  %v2128_v24 = vpop.f32.mrf.mxu1 }
 0x1c7   : > { %v5795_v45 = vclamps-f32 %v1406_v15, 1.0  ;;  %v641_v17 = vmul.f32 0.5, %v7258_v34  ;;  %v642_v51 = vmul.f32 0.5, %v7290_v55  ;;  %v1614_v35 = vadd.f32 0.0036580483, %v1613_v46 }
 0x1c8   : > { %v1428_v23 = vmul.f32 %v1427_v37, %v7362_v3  ;;  %v2275_v25 = vadd.f32 0.0036580483, %v2274_v60  ;;  %v1667_v41 = vadd.f32 0.112945676, %v1666_v36  ;;  %v7555_v57 = vadd.f32 %v7177_v0, %v607_v61 }
 0x1c9   : > { %v1986_v62 = vadd.f32 1.0, %v5795_v45  ;;  %v1418_v14 = vadd.f32 0.18741608, %v1417_v8  ;;  %v1457_v43 = vmul.f32 %v1456_v9, %v7434_v20  ;;  %v1497_v16 = vmul.f32 %v1496_v28, %v7444_v42 }
 0x1ca   : > { %v1536_v59 = vadd.f32 0.05243302, %v1535_v53  ;;  %v1575_v22 = vmul.f32 %v1574_v13, %v7507_v50  ;;  %v1653_v34 = vmul.f32 %v1652_v58, %v7487_v44  ;;  %v2017_v55 = vmul.f32 %v1985_v47, %v641_v17 }
 0x1cb   : > { %v2018_v33 = vmul.f32 %v1986_v62, %v642_v51  ;;  %v1615_v11 = vmul.f32 %v1614_v35, %v7516_v40  ;;  %v1429_v52 = vadd.f32 0.4994258, %v1428_v23  ;;  %v2276_v30 = vmul.f32 %v2275_v25, %v7523_v1 }
 0x1cc   : > { %v1668_v61 = vmul.f32 %v1667_v41, %v7487_v44  ;;  %v7565_v31 = vmul.f32 0.70710677, %v7555_v57  ;;  %v1419_v46 = vmul.f32 %v1418_v14, %v7362_v3  ;;  %v1458_v49 = vadd.f32 0.18741608, %v1457_v43 }
 0x1cd   : > { %v2041_v26 = vpack.c.bf16 %v2018_v33, %v2017_v55  ;;  %v1498_v37 = vadd.f32 0.18741608, %v1497_v16  ;;  %v7569_v60 = vadd.f32 %v7177_v0, %v610_v18  ;;  %v1537_v36 = vmul.f32 %v1536_v59, %v7492_v63 }
 0x1ce   : > { %v1576_v15 = vadd.f32 0.05243302, %v1575_v22  ;;  %v1654_v8 = vadd.f32 0.0036580483, %v1653_v34  ;;  %v1616_v9 = vadd.f32 0.05243302, %v1615_v11  ;;  %v7573_v28 = vadd.f32 %v7439_v2, %v2128_v24 }
 0x1cf   : > { %2165 = vmatmul.bf16.gmra.mxu1 %v2041_v26  ;;  %v1430_v53 = vmul.f32 %v1429_v52, %v7362_v3  ;;  %v2277_v13 = vadd.f32 0.05243302, %v2276_v30  ;;  %v1669_v58 = vadd.f32 0.4994258, %v1668_v61  ;;  %v1689_v45 = vmul.f32 %v7565_v31, %v7565_v31 }
 0x1d0   : > { %v1420_v47 = vadd.f32 1.1283791, %v1419_v46  ;;  %v1459_v0 = vmul.f32 %v1458_v49, %v7434_v20  ;;  %v1499_v17 = vmul.f32 %v1498_v37, %v7444_v42  ;;  %v7581_v51 = vmul.f32 0.70710677, %v7569_v60 }
 0x1d1   : > { %v1538_v35 = vadd.f32 0.18741608, %v1537_v36  ;;  %v1577_v23 = vmul.f32 %v1576_v15, %v7507_v50  ;;  %v1655_v25 = vmul.f32 %v1654_v8, %v7487_v44  ;;  %v7586_v3 = vmul.f32 0.5, %v7331_v21 }
 0x1d2   : > { %v1617_v41 = vmul.f32 %v1616_v9, %v7516_v40  ;;  %v7590_v62 = vmul.f32 0.70710677, %v7573_v28  ;;  %v7592_v14 = vadd.f32 1.0, %v1430_v53  ;;  %v7595_v43 = vmul.f32 0.5, %v7370_v12 }
 0x1d3   : > { %v2278_v16 = vmul.f32 %v2277_v13, %v7523_v1  ;;  %v1670_v59 = vmul.f32 %v1669_v58, %v7487_v44  ;;  %v7599_v22 = vmin.f32 %v1689_v45, 16.0  ;;  %v7602_v34 = vmul.f32 %v1420_v47, %v7341_v48 }
 0x1d4   : > { %v1460_v21 = vadd.f32 1.1283791, %v1459_v0  ;;  %v1500_v55 = vadd.f32 1.1283791, %v1499_v17  ;;  %v1729_v33 = vmul.f32 %v7581_v51, %v7581_v51  ;;  %v7607_v18 = vmul.f32 0.5, %v7376_v38 }
 0x1d5   : > { %v1539_v12 = vmul.f32 %v1538_v35, %v7492_v63  ;;  %v1578_v11 = vadd.f32 0.18741608, %v1577_v23  ;;  %v1656_v52 = vadd.f32 0.05243302, %v1655_v25  ;;  %v1618_v30 = vadd.f32 0.18741608, %v1617_v41 }
 0x1d6   : > { %v2310_v61 = vmul.f32 %v7590_v62, %v7590_v62  ;;  %6141 = vrcp.f32 %v7592_v14  ;;  %v1462_v48 = vmul.f32 3.8918573e-05, %v7434_v20  ;;  %v7615_v26 = vmul.f32 0.5, %v7424_v10 }
 0x1d7   : > { %v2279_v24 = vadd.f32 0.18741608, %v2278_v16  ;;  %v7617_v46 = vadd.f32 1.0, %v1670_v59  ;;  %v1702_v38 = vmul.f32 3.8918573e-05, %v7599_v22  ;;  %v7621_v49 = vmul.f32 %v1460_v21, %v7389_v29 }
 0x1d8   : > { %v7624_v37 = vmul.f32 %v1500_v55, %v7394_v39  ;;  %v7627_v36 = vmul.f32 0.5, %v7454_v27  ;;  %v7629_v15 = vmin.f32 %v1729_v33, 16.0  ;;  %v1540_v8 = vadd.f32 1.1283791, %v1539_v12  ;;  %v2131_v39 = vpop.f32.mrf.mxu1 }
 0x1d9   : > { %v1579_v10 = vmul.f32 %v1578_v11, %v7507_v50  ;;  %v7633_v9 = vmul.f32 0.5, %v7461_v4  ;;  %v1657_v53 = vmul.f32 %v1656_v52, %v7487_v44  ;;  %v7637_v13 = vmul.f32 0.5, %v7464_v19 }
 0x1da   : > { %11140 = vst [vmem:[#allocation16_spill] sm:$0xff] %v7627_v36  ;;  %v7639_v29 = vmin.f32 %v2310_v61, 16.0  ;;  %v1463_v58 = vadd.f32 0.001143296, %v1462_v48  ;;  %v1502_v27 = vmul.f32 3.8918573e-05, %v7444_v42  ;;  %v1619_v45 = vmul.f32 %v1618_v30, %v7516_v40 }
 0x1db   : > { %11141 = vst [vmem:[#allocation17_spill] sm:$0xff] %v7633_v9  ;;  %v2280_v47 = vmul.f32 %v2279_v24, %v7523_v1  ;;  %6143 = vrcp.f32 %v7617_v46  ;;  %v1703_v0 = vadd.f32 0.001143296, %v1702_v38  ;;  %v1742_v17 = vmul.f32 3.8918573e-05, %v7629_v15 }
 0x1dc   : > { %11142 = vst [vmem:[#allocation18_spill] sm:$0xff] %v7637_v13  ;;  %v7645_v4 = vpop.eup %6141  ;;  %v1464_v19 = vmul.f32 %v1463_v58, %v7434_v20  ;;  %v1503_v35 = vadd.f32 0.001143296, %v1502_v27  ;;  %v1542_v23 = vmul.f32 3.8918573e-05, %v7492_v63  ;;  %v7651_v25 = vmul.f32 %v1540_v8, %v7450_v6 }
 0x1dd   : > { %v1580_v41 = vadd.f32 1.1283791, %v1579_v10  ;;  %v1658_v16 = vadd.f32 0.18741608, %v1657_v53  ;;  %v7654_v59 = vadd.f32 %v7439_v2, %v2131_v39  ;;  %v2312_v21 = vmul.f32 2.1237322e-06, %v7639_v29 }
 0x1de   : > { %v1465_v55 = vadd.f32 0.014752088, %v1464_v19  ;;  %v1504_v33 = vmul.f32 %v1503_v35, %v7444_v42  ;;  %v1543_v12 = vadd.f32 0.001143296, %v1542_v23  ;;  %v1620_v11 = vadd.f32 1.1283791, %v1619_v45 }
 0x1df   : > { %v2281_v52 = vadd.f32 1.1283791, %v2280_v47  ;;  %v1704_v30 = vmul.f32 %v1703_v0, %v7599_v22  ;;  %v1433_v61 = vmul.f32 %v7645_v4, %v7592_v14  ;;  %v1743_v6 = vadd.f32 0.001143296, %v1742_v17 }
 0x1e0   : > { %v1466_v48 = vmul.f32 %v1465_v55, %v7434_v20  ;;  %v1505_v24 = vadd.f32 0.014752088, %v1504_v33  ;;  %v1544_v38 = vmul.f32 %v1543_v12, %v7492_v63  ;;  %v7666_v10 = vmul.f32 %v1580_v41, %v7476_v54 }
 0x1e1   : > { %v7663_v8 = vpop.eup %6143  ;;  %v7669_v53 = vmul.f32 0.5, %v7419_v7  ;;  %v1659_v39 = vmul.f32 %v1658_v16, %v7487_v44  ;;  %v7673_v58 = vmul.f32 0.70710677, %v7654_v59  ;;  %v2313_v27 = vadd.f32 0.00028619796, %v2312_v21 }
 0x1e2   : > { %11143 = vst [vmem:[#allocation19_spill] sm:$0xff] %v7666_v10  ;;  %v1467_v45 = vadd.f32 0.112945676, %v1466_v48  ;;  %v1506_v47 = vmul.f32 %v1505_v24, %v7444_v42  ;;  %v1545_v0 = vadd.f32 0.014752088, %v1544_v38  ;;  %v7677_v17 = vmul.f32 %v1620_v11, %v7481_v5 }
 0x1e3   : > { %v7680_v19 = vmul.f32 %v2281_v52, %v7484_v32  ;;  %v1691_v54 = vmul.f32 2.1237322e-06, %v7599_v22  ;;  %v1705_v7 = vadd.f32 0.014752088, %v1704_v30  ;;  %v1744_v35 = vmul.f32 %v1743_v6, %v7629_v15  ;;  %v612_v6 = vpop.f32.mrf.mxu0 }
 0x1e4   : > { %11144 = vst [vmem:[#allocation20_spill] sm:$0xff] %v7677_v17  ;;  %v1434_v44 = vsub.f32 1.0, %v1433_v61  ;;  %v1468_v23 = vmul.f32 %v1467_v45, %v7434_v20  ;;  %v1507_v41 = vadd.f32 0.112945676, %v1506_v47  ;;  %v1660_v16 = vadd.f32 1.1283791, %v1659_v39 }
 0x1e5   : > { %11145 = vst [vmem:[#allocation21_spill] sm:$0xff] %v7680_v19  ;;  %v1673_v21 = vmul.f32 %v7663_v8, %v7617_v46  ;;  %v2350_v5 = vmul.f32 %v7673_v58, %v7673_v58  ;;  %v1546_v55 = vmul.f32 %v1545_v0, %v7492_v63  ;;  %v7691_v32 = vmul.f32 0.5, %v7573_v28  ;;  %v7704_v28 = vld [vmem:[%s11102_s2] ss:$0 sm:$0xff] }
 0x1e6   : > { %v2314_v33 = vmul.f32 %v2313_v27, %v7639_v29  ;;  %v1469_v12 = vadd.f32 0.4994258, %v1468_v23  ;;  %v1508_v11 = vmul.f32 %v1507_v41, %v7444_v42  ;;  %v7696_v52 = vmul.f32 0.5, %v7555_v57 }
 0x1e7   : > { %11146 = vst [vmem:[#allocation22_spill] sm:$0xff] %v7691_v32  ;;  %v1692_v30 = vadd.f32 0.00028619796, %v1691_v54  ;;  %v1706_v61 = vmul.f32 %v1705_v7, %v7599_v22  ;;  %v1547_v48 = vadd.f32 0.112945676, %v1546_v55  ;;  %v1435_v38 = vmul.f32 %v7645_v4, %v1434_v44 }
 0x1e8   : > { %v1745_v24 = vadd.f32 0.014752088, %v1744_v35  ;;  %v1470_v39 = vmul.f32 %v1469_v12, %v7434_v20  ;;  %v7707_v27 = vadd.f32 %v7704_v28, %v612_v6  ;;  %v7710_v57 = vmul.f32 %v1660_v16, %v7447_v56 }
 0x1e9   : > { %v1674_v45 = vsub.f32 1.0, %v1673_v21  ;;  %v1681_v47 = vand.u32 2147483647, %v7617_v46  ;;  %v7713_v0 = vmin.f32 %v2350_v5, 16.0  ;;  %v1683_v54 = vand.u32 2147483648, %v7617_v46 }
 0x1ea   : > { %v2315_v7 = vadd.f32 0.0036580483, %v2314_v33  ;;  %v7716_v20 = vadd.f32 1.0, %v1470_v39  ;;  %v1509_v35 = vadd.f32 0.4994258, %v1508_v11  ;;  %vm1677_vm8 = vweird.f32 %v7617_v46 }
 0x1eb   : > { %v1693_v44 = vmul.f32 %v1692_v30, %v7599_v22  ;;  %v1707_v23 = vadd.f32 0.112945676, %v1706_v61  ;;  %v7721_v41 = vmul.f32 0.70710677, %v7707_v27  ;;  %v1548_v56 = vmul.f32 %v1547_v48, %v7492_v63 }
 0x1ec   : > { %v1746_v16 = vmul.f32 %v1745_v24, %v7629_v15  ;;  %v1436_v21 = vadd.f32 %v7645_v4, %v1435_v38  ;;  %vm1438_vm9 = vweird.f32 %v7645_v4  ;;  %6145 = vrcp.f32 %v7716_v20 }
 0x1ed   : > { %v1675_v5 = vmul.f32 %v7663_v8, %v1674_v45  ;;  %v2352_v55 = vmul.f32 2.1237322e-06, %v7713_v0  ;;  %v1443_v33 = vand.u32 2147483648, %v7592_v14  ;;  %v1769_v12 = vmul.f32 %v7721_v41, %v7721_v41 }
 0x1ee   : > { %v2316_v11 = vmul.f32 %v2315_v7, %v7639_v29  ;;  %vm1437_vm10 = vweird.f32 %v7592_v14  ;;  %v1441_v30 = vand.u32 2147483647, %v7592_v14  ;;  %v1510_v61 = vmul.f32 %v1509_v35, %v7444_v42 }
 0x1ef   : > { %vm1678_vm11 = vweird.f32 %v7663_v8  ;;  %vm7738_vm12 = vcmp.eq.f32.partialorder %v1681_v47, 8.507059e+37  ;;  %v1694_v48 = vadd.f32 0.0036580483, %v1693_v44  ;;  %vm7742_vm13 = vmor %vm1437_vm10, %vm1438_vm9  ;;  %v7746_v38 = vmin.f32 %v1769_v12, 16.0 }
 0x1f0   : > { %v1549_v39 = vadd.f32 0.4994258, %v1548_v56  ;;  %v1708_v45 = vmul.f32 %v1707_v23, %v7599_v22  ;;  %v1747_v7 = vadd.f32 0.112945676, %v1746_v16  ;;  %v1440_v42 = vsel %vm7742_vm13, %v7645_v4, %v1436_v21  ;;  %vm7766_vm15 = vmor %vm1677_vm8, %vm1678_vm11 }
 0x1f1   : > { %v7752_v14 = vadd.f32 1.0, %v1510_v61  ;;  %v1676_v47 = vadd.f32 %v7663_v8, %v1675_v5  ;;  %v2353_v35 = vadd.f32 0.00028619796, %v2352_v55  ;;  %v1444_v44 = vor.u32 1.1754944e-38, %v1443_v33 }
 0x1f2   : > { %v1782_v32 = vmul.f32 3.8918573e-05, %v7746_v38  ;;  %v6146_v13 = vpop.eup %6145  ;;  %v1684_v19 = vor.u32 1.1754944e-38, %v1683_v54  ;;  %v2317_v12 = vadd.f32 0.05243302, %v2316_v11  ;;  %vm1442_vm14 = vcmp.eq.f32.partialorder %v1441_v30, 8.507059e+37 }
 0x1f3   : > { %6147 = vrcp.f32 %v7752_v14  ;;  %v7758_v23 = vmul.f32 0.5, %v7654_v59  ;;  %v1445_v56 = vsel %vm1442_vm14, %v1444_v44, %v1440_v42  ;;  %v1473_v4 = vmul.f32 %v6146_v13, %v7716_v20  ;;  %v2133_v59 = vpop.f32.mrf.mxu1  ;;  %v5999_v11 = vld [vmem:[#allocation8 + $0x38] sm:$0xff] }
 0x1f4   : > { %v1550_v16 = vmul.f32 %v1549_v39, %v7492_v63  ;;  %v1695_v54 = vmul.f32 %v1694_v48, %v7599_v22  ;;  %v1709_v5 = vadd.f32 0.4994258, %v1708_v45  ;;  %v1748_v55 = vmul.f32 %v1747_v7, %v7629_v15  ;;  %3698 = vmatpush.bf16.msra.mxu2 %v5999_v11 }
 0x1f5   : > { %11151 = vst [vmem:[#allocation23_spill] sm:$0xff] %v7758_v23  ;;  %v1783_v33 = vadd.f32 0.001143296, %v1782_v32  ;;  %v1680_v63 = vsel %vm7766_vm15, %v7663_v8, %v1676_v47  ;;  %v2354_v30 = vmul.f32 %v2353_v35, %v7713_v0  ;;  %v1731_v46 = vmul.f32 2.1237322e-06, %v7629_v15 }
 0x1f6   : > { %v1474_v61 = vsub.f32 1.0, %v1473_v4  ;;  %v2318_v24 = vmul.f32 %v2317_v12, %v7639_v29  ;;  %v1446_v39 = vmul.f32 %v1445_v56, %v7602_v34  ;;  %v1483_v48 = vand.u32 2147483648, %v7716_v20  ;;  %v615_v12 = vpop.f32.mrf.mxu0 }
 0x1f7   : > { %v1784_v45 = vmul.f32 %v1783_v33, %v7746_v38  ;;  %vm1478_vm0 = vweird.f32 %v6146_v13  ;;  %v1481_v7 = vand.u32 2147483647, %v7716_v20  ;;  %v7782_v42 = vadd.f32 1.0, %v1550_v16 }
 0x1f8   : > { %v1475_v32 = vmul.f32 %v6146_v13, %v1474_v61  ;;  %v1685_v47 = vsel %vm7738_vm12, %v1684_v19, %v1680_v63  ;;  %v1710_v35 = vmul.f32 %v1709_v5, %v7599_v22  ;;  %v1749_v44 = vadd.f32 0.4994258, %v1748_v55 }
 0x1f9   : > { %v7784_v8 = vpop.eup %6147  ;;  %v1785_v34 = vadd.f32 0.014752088, %v1784_v45  ;;  %v1696_v56 = vadd.f32 0.05243302, %v1695_v54  ;;  %v1732_v4 = vadd.f32 0.00028619796, %v1731_v46  ;;  %vm1477_vm1 = vweird.f32 %v7716_v20 }
 0x1fa   : > { %v1476_v21 = vadd.f32 %v6146_v13, %v1475_v32  ;;  %v5796_v33 = vclamps-f32 %v1446_v39, 1.0  ;;  %vm1479_vm2 = vmor %vm1477_vm1, %vm1478_vm0  ;;  %v1484_v11 = vor.u32 1.1754944e-38, %v1483_v48  ;;  %v7791_v16 = vadd.f32 %v7439_v2, %v2133_v59 }
 0x1fb   : > { %v1513_v6 = vmul.f32 %v7784_v8, %v7752_v14  ;;  %vm1482_vm3 = vcmp.eq.f32.partialorder %v1481_v7, 8.507059e+37  ;;  %v7796_v5 = vadd.f32 %v7704_v28, %v615_v12  ;;  %6149 = vrcp.f32 %v7782_v42  ;;  %v2136_v7 = vpop.f32.mrf.mxu1 }
 0x1fc   : > { %v1480_v19 = vsel %vm1479_vm2, %v6146_v13, %v1476_v21  ;;  %v7799_v54 = vadd.f32 1.0, %v1710_v35  ;;  %v1750_v20 = vmul.f32 %v1749_v44, %v7629_v15  ;;  %v1786_v63 = vmul.f32 %v1785_v34, %v7746_v38 }
 0x1fd   : > { %v1485_v55 = vsel %vm1482_vm3, %v1484_v11, %v1480_v19  ;;  %v2355_v46 = vadd.f32 0.0036580483, %v2354_v30  ;;  %v7804_v59 = vmul.f32 0.5, %v7569_v60  ;;  %v1514_v13 = vsub.f32 1.0, %v1513_v6 }
 0x1fe   : > { %v1486_v61 = vmul.f32 %v1485_v55, %v7621_v49  ;;  %v1686_v39 = vmul.f32 %v1685_v47, %v7710_v57  ;;  %v2319_v48 = vadd.f32 0.18741608, %v2318_v24  ;;  %v1987_v45 = vadd.f32 1.0, %v5796_v33 }
 0x1ff   : > { %v7809_v32 = vmul.f32 0.70710677, %v7791_v16  ;;  %v1697_v35 = vmul.f32 %v1696_v56, %v7599_v22  ;;  %v7813_v34 = vmul.f32 0.70710677, %v7796_v5  ;;  %v1515_v60 = vmul.f32 %v7784_v8, %v1514_v13 }
 0x200   : > { %v5797_v44 = vclamps-f32 %v1486_v61, 1.0  ;;  %6151 = vrcp.f32 %v7799_v54  ;;  %v1733_v49 = vmul.f32 %v1732_v4, %v7629_v15  ;;  %v7818_v30 = vadd.f32 1.0, %v1750_v20 }
 0x201   : > { %v1787_v57 = vadd.f32 0.112945676, %v1786_v63  ;;  %v7820_v24 = vpop.eup %6149  ;;  %v7823_v12 = vadd.f32 %v7439_v2, %v2136_v7  ;;  %v1516_v56 = vadd.f32 %v7784_v8, %v1515_v60  ;;  %vm1518_vm4 = vweird.f32 %v7784_v8 }
 0x202   : > { %v1988_v47 = vadd.f32 1.0, %v5797_v44  ;;  %v2356_v21 = vmul.f32 %v2355_v46, %v7713_v0  ;;  %v2019_v33 = vmul.f32 %v1987_v45, %v7586_v3  ;;  %v2390_v4 = vmul.f32 %v7809_v32, %v7809_v32 }
 0x203   : > { %v1523_v11 = vand.u32 2147483648, %v7752_v14  ;;  %v1809_v19 = vmul.f32 %v7813_v34, %v7813_v34  ;;  %vm1517_vm5 = vweird.f32 %v7752_v14  ;;  %v1521_v2 = vand.u32 2147483647, %v7752_v14 }
 0x204   : > { %v2020_v6 = vmul.f32 %v1988_v47, %v7595_v43  ;;  %v5802_v20 = vclamps-f32 %v1686_v39, 1.0  ;;  %v1734_v55 = vadd.f32 0.0036580483, %v1733_v49  ;;  %v1788_v63 = vmul.f32 %v1787_v57, %v7746_v38  ;;  %vm7838_vm6 = vmor %vm1517_vm5, %vm1518_vm4  ;;  %v5998_v47 = vld [vmem:[#allocation8 + $0x30] sm:$0xff] }
 0x205   : > { %v1553_v46 = vmul.f32 %v7820_v24, %v7782_v42  ;;  %6153 = vrcp.f32 %v7818_v30  ;;  %v7846_v61 = vmul.f32 0.70710677, %v7823_v12  ;;  %v1520_v14 = vsel %vm7838_vm6, %v7784_v8, %v1516_v56  ;;  %3699 = vmatpush.bf16.msra.mxu2 %v5998_v47 }
 0x206   : > { %v2042_v43 = vpack.c.bf16 %v2020_v6, %v2019_v33  ;;  %v7851_v13 = vpop.eup %6151  ;;  %v1698_v39 = vadd.f32 0.18741608, %v1697_v35  ;;  %v7853_v45 = vmin.f32 %v2390_v4, 16.0  ;;  %v1524_v7 = vor.u32 1.1754944e-38, %v1523_v11 }
 0x207   : > { %v1582_v44 = vmul.f32 3.8918573e-05, %v7507_v50  ;;  %v7857_v60 = vmul.f32 %v2319_v48, %v7639_v29  ;;  %v2357_v49 = vadd.f32 0.05243302, %v2356_v21  ;;  %v7859_v57 = vmin.f32 %v1809_v19, 16.0 }
 0x208   : > { %2170 = vmatmul.bf16.gmra.mxu1 %v2042_v43  ;;  %vm1522_vm7 = vcmp.eq.f32.partialorder %v1521_v2, 8.507059e+37  ;;  %v1771_v33 = vmul.f32 2.1237322e-06, %v7746_v38  ;;  %v1789_v8 = vadd.f32 0.4994258, %v1788_v63  ;;  %v1554_v6 = vsub.f32 1.0, %v1553_v46 }
 0x209   : > { %v1525_v56 = vsel %vm1522_vm7, %v1524_v7, %v1520_v14  ;;  %v7862_v35 = vadd.f32 1.0, %v5802_v20  ;;  %v1713_v4 = vmul.f32 %v7851_v13, %v7799_v54  ;;  %v1735_v11 = vmul.f32 %v1734_v55, %v7629_v15  ;;  %v5997_v43 = vld [vmem:[#allocation8 + $0x28] sm:$0xff] }
 0x20a   : > { %v2430_v48 = vmul.f32 %v7846_v61, %v7846_v61  ;;  %v2392_v21 = vmul.f32 2.1237322e-06, %v7853_v45  ;;  %v1555_v19 = vmul.f32 %v7820_v24, %v1554_v6  ;;  %vm1558_vm8 = vweird.f32 %v7820_v24  ;;  %3700 = vmatpush.bf16.msra.mxu2 %v5997_v43  ;;  %v617_v43 = vpop.f32.mrf.mxu0 }
 0x20b   : > { %v1583_v2 = vadd.f32 0.001143296, %v1582_v44  ;;  %v7872_v63 = vpop.eup %6153  ;;  %v1822_v20 = vmul.f32 3.8918573e-05, %v7859_v57  ;;  %v1526_v3 = vmul.f32 %v1525_v56, %v7624_v37  ;;  %v1561_v46 = vand.u32 2147483647, %v7782_v42 }
 0x20c   : > { %v1563_v55 = vand.u32 2147483648, %v7782_v42  ;;  %v1772_v14 = vadd.f32 0.00028619796, %v1771_v33  ;;  %v1790_v7 = vmul.f32 %v1789_v8, %v7746_v38  ;;  %v1556_v47 = vadd.f32 %v7820_v24, %v1555_v19 }
 0x20d   : > { %vm1557_vm9 = vweird.f32 %v7782_v42  ;;  %v1699_v44 = vmul.f32 %v1698_v39, %v7599_v22  ;;  %v2358_v6 = vmul.f32 %v2357_v49, %v7713_v0  ;;  %v1736_v23 = vadd.f32 0.05243302, %v1735_v11  ;;  %v5996_v22 = vld [vmem:[#allocation8 + $0x20] sm:$0xff] }
 0x20e   : > { %v7883_v9 = vmin.f32 %v2430_v48, 16.0  ;;  %vm1559_vm10 = vmor %vm1557_vm9, %vm1558_vm8  ;;  %v1714_v37 = vsub.f32 1.0, %v1713_v4  ;;  %v1753_v33 = vmul.f32 %v7872_v63, %v7818_v30  ;;  %v1564_v56 = vor.u32 1.1754944e-38, %v1563_v55  ;;  %3701 = vmatpush.bf16.msra.mxu2 %v5996_v22 }
 0x20f   : > { %v1560_v8 = vsel %vm1559_vm10, %v7820_v24, %v1556_v47  ;;  %v1823_v19 = vadd.f32 0.001143296, %v1822_v20  ;;  %v5798_v42 = vclamps-f32 %v1526_v3, 1.0  ;;  %vm1562_vm11 = vcmp.eq.f32.partialorder %v1561_v46, 8.507059e+37  ;;  %v5995_v47 = vld [vmem:[#allocation8 + $0x18] sm:$0xff] }
 0x210   : > { %v1584_v39 = vmul.f32 %v1583_v2, %v7507_v50  ;;  %v2393_v49 = vadd.f32 0.00028619796, %v2392_v21  ;;  %v1773_v11 = vmul.f32 %v1772_v14, %v7746_v38  ;;  %v7892_v48 = vadd.f32 1.0, %v1790_v7 }
 0x211   : > { %v1565_v36 = vsel %vm1562_vm11, %v1564_v56, %v1560_v8  ;;  %v1700_v4 = vadd.f32 1.1283791, %v1699_v44  ;;  %v2359_v17 = vadd.f32 0.18741608, %v2358_v6  ;;  %v2432_v10 = vmul.f32 2.1237322e-06, %v7883_v9 }
 0x212   : > { %v1566_v24 = vmul.f32 %v1565_v36, %v7651_v25  ;;  %v1715_v20 = vmul.f32 %v7851_v13, %v1714_v37  ;;  %v1737_v3 = vmul.f32 %v1736_v23, %v7629_v15  ;;  %v1754_v46 = vsub.f32 1.0, %v1753_v33  ;;  %3702 = vmatpush.bf16.msra.mxu2 %v5995_v47 }
 0x213   : > { %v1811_v21 = vmul.f32 2.1237322e-06, %v7859_v57  ;;  %v1824_v2 = vmul.f32 %v1823_v19, %v7859_v57  ;;  %v1989_v14 = vadd.f32 1.0, %v5798_v42  ;;  %v7901_v7 = vadd.f32 %v7704_v28, %v617_v43 }
 0x214   : > { %v5799_v55 = vclamps-f32 %v1566_v24, 1.0  ;;  %v2394_v44 = vmul.f32 %v2393_v49, %v7853_v45  ;;  %v1774_v6 = vadd.f32 0.0036580483, %v1773_v11  ;;  %6155 = vrcp.f32 %v7892_v48 }
 0x215   : > { %v1585_v36 = vadd.f32 0.014752088, %v1584_v39  ;;  %v1721_v25 = vand.u32 2147483647, %v7799_v54  ;;  %v1723_v23 = vand.u32 2147483648, %v7799_v54  ;;  %vm1718_vm12 = vweird.f32 %v7851_v13 }
 0x216   : > { %v2433_v37 = vadd.f32 0.00028619796, %v2432_v10  ;;  %v1990_v33 = vadd.f32 1.0, %v5799_v55  ;;  %v1738_v8 = vadd.f32 0.18741608, %v1737_v3  ;;  %v1755_v56 = vmul.f32 %v7872_v63, %v1754_v46 }
 0x217   : > { %v1812_v19 = vadd.f32 0.00028619796, %v1811_v21  ;;  %v1825_v42 = vadd.f32 0.014752088, %v1824_v2  ;;  %v2021_v22 = vmul.f32 %v1989_v14, %v7607_v18  ;;  %v7912_v39 = vmul.f32 0.70710677, %v7901_v7 }
 0x218   : > { %v2022_v49 = vmul.f32 %v1990_v33, %v7615_v26  ;;  %v1716_v11 = vadd.f32 %v7851_v13, %v1715_v20  ;;  %v2395_v43 = vadd.f32 0.0036580483, %v2394_v44  ;;  %v1775_v10 = vmul.f32 %v1774_v6, %v7746_v38 }
 0x219   : > { %v1586_v24 = vmul.f32 %v1585_v36, %v7507_v50  ;;  %v1701_v3 = vmul.f32 %v1700_v4, %v7565_v31  ;;  %vm1717_vm13 = vweird.f32 %v7799_v54  ;;  %v2434_v46 = vmul.f32 %v2433_v37, %v7883_v9  ;;  %v620_v37 = vpop.f32.mrf.mxu0 }
 0x21a   : > { %v2043_v21 = vpack.c.bf16 %v2022_v49, %v2021_v22  ;;  %v7920_v18 = vpop.eup %6155  ;;  %vm7922_vm14 = vcmp.eq.f32.partialorder %v1721_v25, 8.507059e+37  ;;  %v1724_v2 = vor.u32 1.1754944e-38, %v1723_v23  ;;  %v1739_v20 = vmul.f32 %v1738_v8, %v7629_v15  ;;  %vm7930_vm15 = vmor %vm1717_vm13, %vm1718_vm12 }
 0x21b   : > { %v1813_v55 = vmul.f32 %v1812_v19, %v7859_v57  ;;  %v1756_v54 = vadd.f32 %v7872_v63, %v1755_v56  ;;  %vm1758_vm0 = vweird.f32 %v7872_v63  ;;  %v1826_v4 = vmul.f32 %v1825_v42, %v7859_v57  ;;  %v2138_v42 = vpop.f32.mrf.mxu1 }
 0x21c   : > { %2175 = vmatmul.bf16.gmra.mxu1 %v2043_v21  ;;  %v1849_v14 = vmul.f32 %v7912_v39, %v7912_v39  ;;  %v1720_v15 = vsel %vm7930_vm15, %v7851_v13, %v1716_v11  ;;  %v2396_v47 = vmul.f32 %v2395_v43, %v7853_v45  ;;  %v1776_v44 = vadd.f32 0.05243302, %v1775_v10 }
 0x21d   : > { %v1587_v6 = vadd.f32 0.112945676, %v1586_v24  ;;  %vm1757_vm1 = vweird.f32 %v7818_v30  ;;  %v1763_v36 = vand.u32 2147483648, %v7818_v30  ;;  %v1793_v25 = vmul.f32 %v7920_v18, %v7892_v48 }
 0x21e   : > { %v2435_v23 = vadd.f32 0.0036580483, %v2434_v46  ;;  %v2360_v33 = vmul.f32 %v2359_v17, %v7713_v0  ;;  %v1740_v8 = vadd.f32 1.1283791, %v1739_v20  ;;  %vm7950_vm2 = vmor %vm1757_vm1, %vm1758_vm0  ;;  %v1761_v56 = vand.u32 2147483647, %v7818_v30 }
 0x21f   : > { %v1814_v19 = vadd.f32 0.0036580483, %v1813_v55  ;;  %v1725_v22 = vsel %vm7922_vm14, %v1724_v2, %v1720_v15  ;;  %v1760_v49 = vsel %vm7950_vm2, %v7872_v63, %v1756_v54  ;;  %v1827_v11 = vadd.f32 0.112945676, %v1826_v4  ;;  %v7971_v2 = vld [vmem:[%s11104_s4] ss:$0 sm:$0xff] }
 0x220   : > { %v7960_v17 = vmin.f32 %v1849_v14, 16.0  ;;  %v2397_v43 = vadd.f32 0.05243302, %v2396_v47  ;;  %v1777_v10 = vmul.f32 %v1776_v44, %v7746_v38  ;;  %v7964_v24 = vadd.f32 %v7704_v28, %v620_v37 }
 0x221   : > { %v1588_v30 = vmul.f32 %v1587_v6, %v7507_v50  ;;  %v1764_v46 = vor.u32 1.1754944e-38, %v1763_v36  ;;  %v1794_v21 = vsub.f32 1.0, %v1793_v25  ;;  %v2436_v26 = vmul.f32 %v2435_v23, %v7883_v9 }
 0x222   : > { %v7974_v63 = vadd.f32 %v7971_v2, %v2138_v42  ;;  %v2321_v20 = vadd.f32 1.1283791, %v7857_v60  ;;  %v1726_v55 = vmul.f32 %v1725_v22, %v1701_v3  ;;  %vm1762_vm3 = vcmp.eq.f32.partialorder %v1761_v56, 8.507059e+37 }
 0x223   : > { %v1815_v31 = vmul.f32 %v1814_v19, %v7859_v57  ;;  %v2361_v54 = vadd.f32 1.1283791, %v2360_v33  ;;  %v1765_v4 = vsel %vm1762_vm3, %v1764_v46, %v1760_v49  ;;  %v1828_v14 = vmul.f32 %v1827_v11, %v7859_v57 }
 0x224   : > { %v1862_v15 = vmul.f32 3.8918573e-05, %v7960_v17  ;;  %v2398_v47 = vmul.f32 %v2397_v43, %v7853_v45  ;;  %v1778_v44 = vadd.f32 0.18741608, %v1777_v10  ;;  %v7982_v6 = vmul.f32 0.70710677, %v7964_v24 }
 0x225   : > { %v1589_v36 = vadd.f32 0.4994258, %v1588_v30  ;;  %v1741_v25 = vmul.f32 %v1740_v8, %v7581_v51  ;;  %v1795_v60 = vmul.f32 %v7920_v18, %v1794_v21  ;;  %v2437_v3 = vadd.f32 0.05243302, %v2436_v26  ;;  %v2141_v26 = vpop.f32.mrf.mxu1 }
 0x226   : > { %v7987_v23 = vmul.f32 0.70710677, %v7974_v63  ;;  %v7991_v37 = vmul.f32 %v7862_v35, %v7669_v53  ;;  %v7994_v33 = vmul.f32 %v2321_v20, %v7590_v62  ;;  %v5803_v13 = vclamps-f32 %v1726_v55, 1.0 }
 0x227   : > { %v1816_v56 = vadd.f32 0.05243302, %v1815_v31  ;;  %v7997_v19 = vmul.f32 %v2361_v54, %v7673_v58  ;;  %v1766_v42 = vmul.f32 %v1765_v4, %v1741_v25  ;;  %v1829_v51 = vadd.f32 0.4994258, %v1828_v14 }
 0x228   : > { %v1863_v8 = vadd.f32 0.001143296, %v1862_v15  ;;  %v2399_v22 = vadd.f32 0.18741608, %v2398_v47  ;;  %v1779_v49 = vmul.f32 %v1778_v44, %v7746_v38  ;;  %v1889_v11 = vmul.f32 %v7982_v6, %v7982_v6 }
 0x229   : > { %v1590_v53 = vmul.f32 %v1589_v36, %v7507_v50  ;;  %v1796_v35 = vadd.f32 %v7920_v18, %v1795_v60  ;;  %vm1798_vm4 = vweird.f32 %v7920_v18  ;;  %v2438_v62 = vmul.f32 %v2437_v3, %v7883_v9 }
 0x22a   : > { %v2470_v58 = vmul.f32 %v7987_v23, %v7987_v23  ;;  %v1994_v43 = vadd.f32 1.0, %v5803_v13  ;;  %v8009_v10 = vmul.f32 0.5, %v7791_v16  ;;  %v1803_v38 = vand.u32 2147483648, %v7892_v48 }
 0x22b   : > { %v1817_v30 = vmul.f32 %v1816_v56, %v7859_v57  ;;  %vm1797_vm5 = vweird.f32 %v7892_v48  ;;  %v1801_v50 = vand.u32 2147483647, %v7892_v48  ;;  %v1830_v46 = vmul.f32 %v1829_v51, %v7859_v57 }
 0x22c   : > { %v1864_v21 = vmul.f32 %v1863_v8, %v7960_v17  ;;  %v5804_v20 = vclamps-f32 %v1766_v42, 1.0  ;;  %v2400_v55 = vmul.f32 %v2399_v22, %v7853_v45  ;;  %vm8018_vm6 = vmor %vm1797_vm5, %vm1798_vm4  ;;  %v8022_v16 = vmin.f32 %v1889_v11, 16.0 }
 0x22d   : > { %v8024_v54 = vadd.f32 1.0, %v1590_v53  ;;  %v1780_v4 = vadd.f32 1.1283791, %v1779_v49  ;;  %v1800_v48 = vsel %vm8018_vm6, %v7920_v18, %v1796_v35  ;;  %v2439_v14 = vadd.f32 0.18741608, %v2438_v62 }
 0x22e   : > { %v8029_v15 = vmin.f32 %v2470_v58, 16.0  ;;  %v1804_v47 = vor.u32 1.1754944e-38, %v1803_v38  ;;  %v1818_v44 = vadd.f32 0.18741608, %v1817_v30  ;;  %v8032_v36 = vadd.f32 %v7971_v2, %v2141_v26 }
 0x22f   : > { %v1622_v25 = vmul.f32 3.8918573e-05, %v7516_v40  ;;  %v8036_v60 = vmul.f32 0.5, %v7707_v27  ;;  %vm1802_vm7 = vcmp.eq.f32.partialorder %v1801_v50, 8.507059e+37  ;;  %v8038_v3 = vadd.f32 1.0, %v1830_v46 }
 0x230   : > { %v1865_v13 = vadd.f32 0.014752088, %v1864_v21  ;;  %v8041_v56 = vmul.f32 %v1994_v43, %v7696_v52  ;;  %v1805_v18 = vsel %vm1802_vm7, %v1804_v47, %v1800_v48  ;;  %v1902_v42 = vmul.f32 3.8918573e-05, %v8022_v16 }
 0x231   : > { %6157 = vrcp.f32 %v8024_v54  ;;  %v1995_v51 = vadd.f32 1.0, %v5804_v20  ;;  %v1781_v8 = vmul.f32 %v1780_v4, %v7721_v41  ;;  %v2440_v22 = vmul.f32 %v2439_v14, %v7883_v9 }
 0x232   : > { %v2472_v27 = vmul.f32 2.1237322e-06, %v8029_v15  ;;  %v2401_v49 = vadd.f32 1.1283791, %v2400_v55  ;;  %v1819_v11 = vmul.f32 %v1818_v44, %v7859_v57  ;;  %v8050_v53 = vmul.f32 0.70710677, %v8032_v36 }
 0x233   : > { %v1623_v52 = vadd.f32 0.001143296, %v1622_v25  ;;  %v1806_v35 = vmul.f32 %v1805_v18, %v1781_v8  ;;  %6159 = vrcp.f32 %v8038_v3  ;;  %v1851_v62 = vmul.f32 2.1237322e-06, %v7960_v17 }
 0x234   : > { %11164 = vst [vmem:[#allocation24_spill] sm:$0xff] %v8050_v53  ;;  %v1866_v58 = vmul.f32 %v1865_v13, %v7960_v17  ;;  %v1903_v43 = vadd.f32 0.001143296, %v1902_v42  ;;  %v2283_v38 = vmul.f32 3.8918573e-05, %v7523_v1  ;;  %v8059_v57 = vmul.f32 %v1995_v51, %v7804_v59 }
 0x235   : > { %v1624_v41 = vmul.f32 %v1623_v52, %v7516_v40  ;;  %v2323_v30 = vmul.f32 3.8918573e-05, %v7639_v29  ;;  %v8062_v50 = vmul.f32 0.5, %v7823_v12  ;;  %v2441_v46 = vadd.f32 1.1283791, %v2440_v22 }
 0x236   : > { %v2473_v21 = vadd.f32 0.00028619796, %v2472_v27  ;;  %v2510_v20 = vmul.f32 %v8050_v53, %v8050_v53  ;;  %v2284_v31 = vadd.f32 0.001143296, %v2283_v38  ;;  %v8069_v48 = vmul.f32 %v2401_v49, %v7809_v32 }
 0x237   : > { %11165 = vst [vmem:[#allocation25_spill] sm:$0xff] %v8062_v50  ;;  %v8064_v26 = vpop.eup %6157  ;;  %v1625_v55 = vadd.f32 0.014752088, %v1624_v41  ;;  %v2324_v4 = vadd.f32 0.001143296, %v2323_v30  ;;  %v8072_v14 = vmul.f32 0.5, %v7796_v5  ;;  %v1904_v13 = vmul.f32 %v1903_v43, %v8022_v16 }
 0x238   : > { %v1820_v59 = vadd.f32 1.1283791, %v1819_v11  ;;  %v8075_v12 = vmul.f32 0.5, %v7901_v7  ;;  %v5805_v47 = vclamps-f32 %v1806_v35, 1.0  ;;  %v1852_v44 = vadd.f32 0.00028619796, %v1851_v62 }
 0x239   : > { %v1867_v25 = vadd.f32 0.112945676, %v1866_v58  ;;  %v8078_v18 = vpop.eup %6159  ;;  %v1593_v42 = vmul.f32 %v8064_v26, %v8024_v54  ;;  %v1626_v32 = vmul.f32 %v1625_v55, %v7516_v40  ;;  %v2285_v51 = vmul.f32 %v2284_v31, %v7523_v1 }
 0x23a   : > { %v2325_v5 = vmul.f32 %v2324_v4, %v7639_v29  ;;  %v8086_v8 = vmul.f32 %v2441_v46, %v7846_v61  ;;  %v1843_v7 = vand.u32 2147483648, %v8038_v3  ;;  %v2474_v22 = vmul.f32 %v2473_v21, %v8029_v15 }
 0x23b   : > { %v8090_v27 = vmin.f32 %v2510_v20, 16.0  ;;  %v8093_v49 = vmul.f32 %v1820_v59, %v7813_v34  ;;  %v1627_v11 = vadd.f32 0.112945676, %v1626_v32  ;;  %v2286_v52 = vadd.f32 0.014752088, %v2285_v51  ;;  %v5994_v32 = vld [vmem:[#allocation8 + $0x10] sm:$0xff]  ;;  %v622_v51 = vpop.f32.mrf.mxu0 }
 0x23c   : > { %v2326_v35 = vadd.f32 0.014752088, %v2325_v5  ;;  %v1996_v62 = vadd.f32 1.0, %v5805_v47  ;;  %v1833_v58 = vmul.f32 %v8078_v18, %v8038_v3  ;;  %v1853_v43 = vmul.f32 %v1852_v44, %v7960_v17  ;;  %3703 = vmatpush.bf16.msra.mxu2 %v5994_v32 }
 0x23d   : > { %v1868_v61 = vmul.f32 %v1867_v25, %v7960_v17  ;;  %v1905_v41 = vadd.f32 0.014752088, %v1904_v13  ;;  %v1594_v38 = vsub.f32 1.0, %v1593_v42  ;;  %v1628_v30 = vmul.f32 %v1627_v11, %v7516_v40 }
 0x23e   : > { %v2287_v46 = vmul.f32 %v2286_v52, %v7523_v1  ;;  %v1841_v34 = vand.u32 2147483647, %v8038_v3  ;;  %v2475_v21 = vadd.f32 0.0036580483, %v2474_v22  ;;  %v2512_v20 = vmul.f32 2.1237322e-06, %v8090_v27 }
 0x23f   : > { %v2327_v55 = vmul.f32 %v2326_v35, %v7639_v29  ;;  %v8104_v31 = vor.u32 1.1754944e-38, %v1843_v7  ;;  %v8107_v4 = vmul.f32 0.5, %v7964_v24  ;;  %v1629_v59 = vadd.f32 0.4994258, %v1628_v30 }
 0x240   : > { %v2288_v47 = vadd.f32 0.112945676, %v2287_v46  ;;  %v8110_v44 = vmul.f32 %v1996_v62, %v8036_v60  ;;  %v1834_v25 = vsub.f32 1.0, %v1833_v58  ;;  %v1854_v13 = vadd.f32 0.0036580483, %v1853_v43  ;;  %v5993_v60 = vld [vmem:[#allocation8 + $0x8] sm:$0xff] }
 0x241   : > { %v1869_v42 = vadd.f32 0.4994258, %v1868_v61  ;;  %v1906_v5 = vmul.f32 %v1905_v41, %v8022_v16  ;;  %v1595_v22 = vmul.f32 %v8064_v26, %v1594_v38  ;;  %v1630_v7 = vmul.f32 %v1629_v59, %v7516_v40  ;;  %3704 = vmatpush.bf16.msra.mxu2 %v5993_v60 }
 0x242   : > { %v8116_v11 = vadd.f32 %v7704_v28, %v622_v51  ;;  %v2476_v24 = vmul.f32 %v2475_v21, %v8029_v15  ;;  %v2513_v52 = vadd.f32 0.00028619796, %v2512_v20  ;;  %v2289_v35 = vmul.f32 %v2288_v47, %v7523_v1 }
 0x243   : > { %v2328_v62 = vadd.f32 0.112945676, %v2327_v55  ;;  %vm1838_vm8 = vweird.f32 %v8078_v18  ;;  %v1891_v58 = vmul.f32 2.1237322e-06, %v8022_v16  ;;  %v8122_v43 = vadd.f32 1.0, %v1630_v7 }
 0x244   : > { %v2363_v61 = vmul.f32 3.8918573e-05, %v7713_v0  ;;  %v1835_v40 = vmul.f32 %v8078_v18, %v1834_v25  ;;  %vm1837_vm9 = vweird.f32 %v8038_v3  ;;  %v1870_v28 = vmul.f32 %v1869_v42, %v7960_v17  ;;  %v11172_v3 = vld [vmem:[#allocation19_spill] sm:$0xff] }
 0x245   : > { %v8129_v41 = vmul.f32 0.70710677, %v8116_v11  ;;  %v2290_v38 = vadd.f32 0.4994258, %v2289_v35  ;;  %v1907_v30 = vadd.f32 0.112945676, %v1906_v5  ;;  %v1596_v46 = vadd.f32 %v8064_v26, %v1595_v22  ;;  %vm8171_vm15 = vmor %vm1837_vm9, %vm1838_vm8 }
 0x246   : > { %vm1598_vm10 = vweird.f32 %v8064_v26  ;;  %6161 = vrcp.f32 %v8122_v43  ;;  %v2477_v21 = vadd.f32 0.05243302, %v2476_v24  ;;  %v1603_v20 = vand.u32 2147483648, %v8024_v54 }
 0x247   : > { %v1929_v55 = vmul.f32 %v8129_v41, %v8129_v41  ;;  %v2329_v59 = vmul.f32 %v2328_v62, %v7639_v29  ;;  %vm1597_vm11 = vweird.f32 %v8024_v54  ;;  %v1601_v47 = vand.u32 2147483647, %v8024_v54 }
 0x248   : > { %v2291_v25 = vmul.f32 %v2290_v38, %v7523_v1  ;;  %v2364_v42 = vadd.f32 0.001143296, %v2363_v61  ;;  %v1855_v32 = vmul.f32 %v1854_v13, %v7960_v17  ;;  %v2514_v51 = vmul.f32 %v2513_v52, %v8090_v27  ;;  %vm8143_vm12 = vmor %vm1597_vm11, %vm1598_vm10  ;;  %v5992_v13 = vld [vmem:[#allocation8] sm:$0xff] }
 0x249   : > { %v1892_v5 = vadd.f32 0.00028619796, %v1891_v58  ;;  %v8147_v7 = vmin.f32 %v1929_v55, 16.0  ;;  %vm8149_vm13 = vcmp.eq.f32.partialorder %v1841_v34, 8.507059e+37  ;;  %v8153_v60 = vadd.f32 1.0, %v1870_v28  ;;  %3705 = vmatpush.bf16.msra.mxu2 %v5992_v13 }
 0x24a   : > { %v1908_v1 = vmul.f32 %v1907_v30, %v8022_v16  ;;  %v1600_v54 = vsel %vm8143_vm12, %v8064_v26, %v1596_v46  ;;  %v8159_v52 = vadd.f32 1.0, %v2291_v25  ;;  %v1836_v35 = vadd.f32 %v8078_v18, %v1835_v40 }
 0x24b   : > { %v2478_v62 = vmul.f32 %v2477_v21, %v8029_v15  ;;  %v1604_v58 = vor.u32 1.1754944e-38, %v1603_v20  ;;  %v2330_v34 = vadd.f32 0.4994258, %v2329_v59  ;;  %vm1602_vm14 = vcmp.eq.f32.partialorder %v1601_v47, 8.507059e+37 }
 0x24c   : > { %v6162_v61 = vpop.eup %6161  ;;  %v1942_v28 = vmul.f32 3.8918573e-05, %v8147_v7  ;;  %6163 = vrcp.f32 %v8159_v52  ;;  %v2365_v38 = vmul.f32 %v2364_v42, %v7713_v0  ;;  %v1856_v30 = vadd.f32 0.05243302, %v1855_v32 }
 0x24d   : > { %v2515_v26 = vadd.f32 0.0036580483, %v2514_v51  ;;  %v1605_v46 = vsel %vm1602_vm14, %v1604_v58, %v1600_v54  ;;  %v1633_v55 = vmul.f32 %v6162_v61, %v8122_v43  ;;  %6165 = vrcp.f32 %v8153_v60 }
 0x24e   : > { %v1893_v21 = vmul.f32 %v1892_v5, %v8022_v16  ;;  %v1909_v20 = vadd.f32 0.4994258, %v1908_v1  ;;  %v1943_v59 = vadd.f32 0.001143296, %v1942_v28  ;;  %v1840_v47 = vsel %vm8171_vm15, %v8078_v18, %v1836_v35 }
 0x24f   : > { %v8180_v25 = vadd.f32 0.18741608, %v2478_v62  ;;  %v1634_v42 = vsub.f32 1.0, %v1633_v55  ;;  %v2331_v32 = vmul.f32 %v2330_v34, %v7639_v29  ;;  %v1606_v51 = vmul.f32 %v1605_v46, %v11172_v3  ;;  %v11173_v3 = vld [vmem:[#allocation20_spill] sm:$0xff] }
 0x250   : > { %v1643_v22 = vand.u32 2147483648, %v8122_v43  ;;  %v1944_v54 = vmul.f32 %v1943_v59, %v8147_v7  ;;  %v2366_v13 = vadd.f32 0.014752088, %v2365_v38  ;;  %vm1638_vm0 = vweird.f32 %v6162_v61 }
 0x251   : > { %v1635_v58 = vmul.f32 %v6162_v61, %v1634_v42  ;;  %v1641_v5 = vand.u32 2147483647, %v8122_v43  ;;  %v8187_v1 = vadd.f32 1.0, %v2331_v32  ;;  %v1857_v18 = vmul.f32 %v1856_v30, %v7960_v17 }
 0x252   : > { %v6164_v28 = vpop.eup %6163  ;;  %v1894_v35 = vadd.f32 0.0036580483, %v1893_v21  ;;  %v1910_v62 = vmul.f32 %v1909_v20, %v8022_v16  ;;  %v1945_v29 = vadd.f32 0.014752088, %v1944_v54  ;;  %v1845_v34 = vsel %vm8149_vm13, %v8104_v31, %v1840_v47 }
 0x253   : > { %v1636_v46 = vadd.f32 %v6162_v61, %v1635_v58  ;;  %vm1637_vm1 = vweird.f32 %v8122_v43  ;;  %v2294_v38 = vmul.f32 %v6164_v28, %v8159_v52  ;;  %v8196_v55 = vpop.eup %6165  ;;  %v5800_v40 = vclamps-f32 %v1606_v51, 1.0 }
 0x254   : > { %vm1639_vm2 = vmor %vm1637_vm1, %vm1638_vm0  ;;  %v1644_v59 = vor.u32 1.1754944e-38, %v1643_v22  ;;  %6167 = vrcp.f32 %v8187_v1  ;;  %v2367_v30 = vmul.f32 %v2366_v13, %v7713_v0  ;;  %vm1642_vm3 = vcmp.eq.f32.partialorder %v1641_v5, 8.507059e+37 }
 0x255   : > { %v1640_v21 = vsel %vm1639_vm2, %v6162_v61, %v1636_v46  ;;  %v1946_v20 = vmul.f32 %v1945_v29, %v8147_v7  ;;  %v2295_v24 = vsub.f32 1.0, %v2294_v38  ;;  %v8202_v31 = vmul.f32 %v2515_v26, %v8090_v27  ;;  %v2143_v38 = vpop.f32.mrf.mxu1 }
 0x256   : > { %v1895_v43 = vmul.f32 %v1894_v35, %v8022_v16  ;;  %v8205_v47 = vadd.f32 1.0, %v1910_v62  ;;  %v1645_v42 = vsel %vm1642_vm3, %v1644_v59, %v1640_v21  ;;  %v1873_v32 = vmul.f32 %v8196_v55, %v8153_v60 }
 0x257   : > { %v1646_v51 = vmul.f32 %v1645_v42, %v11173_v3  ;;  %v2296_v22 = vmul.f32 %v6164_v28, %v2295_v24  ;;  %vm2299_vm4 = vweird.f32 %v6164_v28  ;;  %v1991_v61 = vadd.f32 1.0, %v5800_v40  ;;  %v11176_v42 = vld [vmem:[#allocation16_spill] sm:$0xff] }
 0x258   : > { %vm2298_vm5 = vweird.f32 %v8159_v52  ;;  %v2304_v54 = vand.u32 2147483648, %v8159_v52  ;;  %v2368_v13 = vadd.f32 0.112945676, %v2367_v30  ;;  %v1947_v58 = vadd.f32 0.112945676, %v1946_v20 }
 0x259   : > { %v5801_v26 = vclamps-f32 %v1646_v51, 1.0  ;;  %v2297_v5 = vadd.f32 %v6164_v28, %v2296_v22  ;;  %v2302_v35 = vand.u32 2147483647, %v8159_v52  ;;  %v8214_v29 = vmul.f32 %v1845_v34, %v8093_v49  ;;  %vm8217_vm6 = vmor %vm2298_vm5, %vm2299_vm4  ;;  %v11177_v51 = vld [vmem:[#allocation17_spill] sm:$0xff] }
 0x25a   : > { %v6168_v62 = vpop.eup %6167  ;;  %v1858_v46 = vadd.f32 0.18741608, %v1857_v18  ;;  %6169 = vrcp.f32 %v8205_v47  ;;  %v2403_v59 = vmul.f32 3.8918573e-05, %v7853_v45  ;;  %v1874_v30 = vsub.f32 1.0, %v1873_v32 }
 0x25b   : > { %v1992_v21 = vadd.f32 1.0, %v5801_v26  ;;  %v1931_v20 = vmul.f32 2.1237322e-06, %v8147_v7  ;;  %v2301_v52 = vsel %vm8217_vm6, %v6164_v28, %v2297_v5  ;;  %v1896_v24 = vadd.f32 0.05243302, %v1895_v43 }
 0x25c   : > { %v2305_v49 = vor.u32 1.1754944e-38, %v2304_v54  ;;  %v2334_v18 = vmul.f32 %v6168_v62, %v8187_v1  ;;  %v2369_v34 = vmul.f32 %v2368_v13, %v7713_v0  ;;  %v2023_v3 = vmul.f32 %v1991_v61, %v11176_v42 }
 0x25d   : > { %v2024_v22 = vmul.f32 %v1992_v21, %v11177_v51  ;;  %v1948_v50 = vmul.f32 %v1947_v58, %v8147_v7  ;;  %vm2303_vm7 = vcmp.eq.f32.partialorder %v2302_v35, 8.507059e+37  ;;  %v8232_v32 = vmul.f32 %v8180_v25, %v8029_v15 }
 0x25e   : > { %v2306_v26 = vsel %vm2303_vm7, %v2305_v49, %v2301_v52  ;;  %v2335_v40 = vsub.f32 1.0, %v2334_v18  ;;  %v2404_v28 = vadd.f32 0.001143296, %v2403_v59  ;;  %v1859_v43 = vmul.f32 %v1858_v46, %v7960_v17  ;;  %v11178_v52 = vld [vmem:[#allocation21_spill] sm:$0xff] }
 0x25f   : > { %v1875_v54 = vmul.f32 %v8196_v55, %v1874_v30  ;;  %v2044_v5 = vpack.c.bf16 %v2024_v22, %v2023_v3  ;;  %v1932_v13 = vadd.f32 0.00028619796, %v1931_v20  ;;  %v1897_v61 = vmul.f32 %v1896_v24, %v8022_v16 }
 0x260   : > { %v8236_v53 = vpop.eup %6169  ;;  %v2342_v58 = vand.u32 2147483647, %v8187_v1  ;;  %v2344_v35 = vand.u32 2147483648, %v8187_v1  ;;  %v2370_v21 = vadd.f32 0.4994258, %v2369_v34  ;;  %v2307_v49 = vmul.f32 %v2306_v26, %v11178_v52  ;;  %v8254_v34 = vpop.f32.mrf.mxu1 }
 0x261   : > { %2180 = vmatmul.bf16.gmra.mxu1 %v2044_v5  ;;  %v1949_v25 = vadd.f32 0.4994258, %v1948_v50  ;;  %v2336_v59 = vmul.f32 %v6168_v62, %v2335_v40  ;;  %vm2339_vm8 = vweird.f32 %v6168_v62  ;;  %vm1877_vm9 = vweird.f32 %v8153_v60 }
 0x262   : > { %v1883_v17 = vand.u32 2147483648, %v8153_v60  ;;  %v8245_v46 = vadd.f32 %v7971_v2, %v2143_v38  ;;  %v2405_v30 = vmul.f32 %v2404_v28, %v7853_v45  ;;  %v1876_v20 = vadd.f32 %v8196_v55, %v1875_v54 }
 0x263   : > { %vm1878_vm10 = vweird.f32 %v8196_v55  ;;  %v2337_v24 = vadd.f32 %v6168_v62, %v2336_v59  ;;  %vm2338_vm11 = vweird.f32 %v8187_v1  ;;  %v1913_v50 = vmul.f32 %v8236_v53, %v8205_v47 }
 0x264   : > { %v1933_v18 = vmul.f32 %v1932_v13, %v8147_v7  ;;  %vm2340_vm12 = vmor %vm2338_vm11, %vm2339_vm8  ;;  %vm2343_vm13 = vcmp.eq.f32.partialorder %v2342_v58, 8.507059e+37  ;;  %v2345_v38 = vor.u32 1.1754944e-38, %v2344_v35  ;;  %v1950_v42 = vmul.f32 %v1949_v25, %v8147_v7 }
 0x265   : > { %v5842_v3 = vclamps-f32 %v2307_v49, 1.0  ;;  %v2341_v51 = vsel %vm2340_vm12, %v6168_v62, %v2337_v24  ;;  %v2371_v22 = vmul.f32 %v2370_v21, %v7713_v0  ;;  %v8259_v26 = vmul.f32 0.70710677, %v8245_v46  ;;  %vm8266_vm14 = vmor %vm1877_vm9, %vm1878_vm10 }
 0x266   : > { %v2346_v1 = vsel %vm2343_vm13, %v2345_v38, %v2341_v51  ;;  %v2406_v40 = vadd.f32 0.014752088, %v2405_v30  ;;  %v2443_v28 = vmul.f32 3.8918573e-05, %v7883_v9  ;;  %v1860_v54 = vadd.f32 1.1283791, %v1859_v43 }
 0x267   : > { %v1881_v62 = vand.u32 2147483647, %v8153_v60  ;;  %v1898_v13 = vadd.f32 0.18741608, %v1897_v61  ;;  %v2347_v0 = vmul.f32 %v2346_v1, %v7994_v33  ;;  %v1880_v58 = vsel %vm8266_vm14, %v8196_v55, %v1876_v20  ;;  %v11181_v38 = vld [vmem:[#allocation18_spill] sm:$0xff] }
 0x268   : > { %v1914_v35 = vsub.f32 1.0, %v1913_v50  ;;  %v1934_v21 = vadd.f32 0.0036580483, %v1933_v18  ;;  %v8275_v43 = vadd.f32 1.0, %v2371_v22  ;;  %v8277_v25 = vadd.f32 1.0, %v1950_v42 }
 0x269   : > { %v5843_v52 = vclamps-f32 %v2347_v0, 1.0  ;;  %v3550_v49 = vadd.f32 1.0, %v5842_v3  ;;  %v2444_v59 = vadd.f32 0.001143296, %v2443_v28  ;;  %v1884_v30 = vor.u32 1.1754944e-38, %v1883_v17  ;;  %v11182_v3 = vld [vmem:[#allocation22_spill] sm:$0xff] }
 0x26a   : > { %v2550_v60 = vmul.f32 %v8259_v26, %v8259_v26  ;;  %6171 = vrcp.f32 %v8275_v43  ;;  %v2407_v33 = vmul.f32 %v2406_v40, %v7853_v45  ;;  %vm1882_vm15 = vcmp.eq.f32.partialorder %v1881_v62, 8.507059e+37  ;;  %v8297_v40 = vpop.f32.mrf.mxu1 }
 0x26b   : > { %v2517_v55 = vadd.f32 0.05243302, %v8202_v31  ;;  %v1899_v61 = vmul.f32 %v1898_v13, %v8022_v16  ;;  %v3551_v20 = vadd.f32 1.0, %v5843_v52  ;;  %v1885_v24 = vsel %vm1882_vm15, %v1884_v30, %v1880_v58 }
 0x26c   : > { %v1915_v50 = vmul.f32 %v8236_v53, %v1914_v35  ;;  %v1935_v18 = vmul.f32 %v1934_v21, %v8147_v7  ;;  %v2445_v17 = vmul.f32 %v2444_v59, %v7883_v9  ;;  %6173 = vrcp.f32 %v8277_v25 }
 0x26d   : > { %v3582_v42 = vmul.f32 %v3550_v49, %v11181_v38  ;;  %v3583_v51 = vmul.f32 %v3551_v20, %v11182_v3  ;;  %v2045_v22 = vpack.c.bf16 %v8041_v56, %v7991_v37  ;;  %v5806_v31 = vclamps-f32 %v8214_v29, 1.0 }
 0x26e   : > { %v1861_v16 = vmul.f32 %v1860_v54, %v7912_v39  ;;  %v8295_v1 = vmin.f32 %v2550_v60, 16.0  ;;  %v2408_v28 = vadd.f32 0.112945676, %v2407_v33  ;;  %v1900_v5 = vadd.f32 1.1283791, %v1899_v61 }
 0x26f   : > { %v1921_v62 = vand.u32 2147483647, %v8205_v47  ;;  %v3614_v13 = vpack.c.bf16 %v3583_v51, %v3582_v42  ;;  %v2446_v0 = vadd.f32 0.014752088, %v2445_v17  ;;  %v1923_v21 = vand.u32 2147483648, %v8205_v47 }
 0x270   : > { %v8300_v58 = vpop.eup %6171  ;;  %v1886_v35 = vmul.f32 %v1885_v24, %v1861_v16  ;;  %v1936_v37 = vadd.f32 0.05243302, %v1935_v18  ;;  %v2409_v56 = vmul.f32 %v2408_v28, %v7853_v45  ;;  %v1916_v39 = vadd.f32 %v8236_v53, %v1915_v50 }
 0x271   : > { %vm1918_vm0 = vweird.f32 %v8236_v53  ;;  %3706 = vmatmul.bf16.vlgmr.msra.gmra.mxu2 %v3614_v13  ;;  %2185 = vmatmul.bf16.gmra.mxu1 %v2045_v22  ;;  %v2374_v29 = vmul.f32 %v8300_v58, %v8275_v43  ;;  %v2447_v54 = vmul.f32 %v2446_v0, %v7883_v9  ;;  %v2518_v52 = vmul.f32 %v2517_v55, %v8090_v27 }
 0x272   : > { %v2552_v49 = vmul.f32 2.1237322e-06, %v8295_v1  ;;  %v2410_v59 = vadd.f32 0.4994258, %v2409_v56  ;;  %v2483_v30 = vmul.f32 3.8918573e-05, %v8029_v15  ;;  %v8312_v60 = vpop.eup %6173  ;;  %vm1917_vm1 = vweird.f32 %v8205_v47  ;;  %v2151_v0 = vpop.f32.mrf.mxu1 }
 0x273   : > { %v8317_v33 = vadd.f32 %v7971_v2, %v8254_v34  ;;  %v2375_v61 = vsub.f32 1.0, %v2374_v29  ;;  %v2448_v20 = vadd.f32 0.112945676, %v2447_v54  ;;  %vm8319_vm2 = vmor %vm1917_vm1, %vm1918_vm0  ;;  %vm8323_vm3 = vcmp.eq.f32.partialorder %v1921_v62, 8.507059e+37 }
 0x274   : > { %v1924_v50 = vor.u32 1.1754944e-38, %v1923_v21  ;;  %v1937_v18 = vmul.f32 %v1936_v37, %v8147_v7  ;;  %v2411_v17 = vmul.f32 %v2410_v59, %v7853_v45  ;;  %v5807_v47 = vclamps-f32 %v1886_v35, 1.0 }
 0x275   : > { %v1920_v34 = vsel %vm8319_vm2, %v8236_v53, %v1916_v39  ;;  %v2376_v38 = vmul.f32 %v8300_v58, %v2375_v61  ;;  %v2449_v42 = vmul.f32 %v2448_v20, %v7883_v9  ;;  %v2553_v3 = vadd.f32 0.00028619796, %v2552_v49 }
 0x276   : > { %v1953_v51 = vmul.f32 %v8312_v60, %v8277_v25  ;;  %v8336_v22 = vadd.f32 1.0, %v2411_v17  ;;  %v2484_v16 = vadd.f32 0.001143296, %v2483_v30  ;;  %v8339_v28 = vmul.f32 0.70710677, %v8317_v33 }
 0x277   : > { %v2377_v45 = vadd.f32 %v8300_v58, %v2376_v38  ;;  %vm2379_vm4 = vweird.f32 %v8300_v58  ;;  %v2450_v62 = vadd.f32 0.4994258, %v2449_v42  ;;  %v1925_v53 = vsel %vm8323_vm3, %v1924_v50, %v1920_v34 }
 0x278   : > { %v1938_v13 = vadd.f32 0.18741608, %v1937_v18  ;;  %v2384_v35 = vand.u32 2147483648, %v8275_v43  ;;  %6175 = vrcp.f32 %v8336_v22  ;;  %v1997_v21 = vadd.f32 1.0, %v5806_v31 }
 0x279   : > { %v1901_v37 = vmul.f32 %v1900_v5, %v7982_v6  ;;  %vm2378_vm5 = vweird.f32 %v8275_v43  ;;  %v2382_v56 = vand.u32 2147483647, %v8275_v43  ;;  %v1998_v39 = vadd.f32 1.0, %v5807_v47 }
 0x27a   : > { %v1954_v29 = vsub.f32 1.0, %v1953_v51  ;;  %vm8350_vm6 = vmor %vm2378_vm5, %vm2379_vm4  ;;  %v2451_v49 = vmul.f32 %v2450_v62, %v7883_v9  ;;  %v2485_v59 = vmul.f32 %v2484_v16, %v8029_v15  ;;  %v2554_v31 = vmul.f32 %v2553_v3, %v8295_v1  ;;  %v8396_v16 = vpop.f32.mrf.mxu1 }
 0x27b   : > { %v8356_v30 = vmul.f32 %v1925_v53, %v1901_v37  ;;  %v2590_v6 = vmul.f32 %v8339_v28, %v8339_v28  ;;  %v2381_v43 = vsel %vm8350_vm6, %v8300_v58, %v2377_v45  ;;  %v8365_v5 = vadd.f32 1.1283791, %v8232_v32 }
 0x27c   : > { %v1939_v61 = vmul.f32 %v1938_v13, %v8147_v7  ;;  %v2385_v20 = vor.u32 1.1754944e-38, %v2384_v35  ;;  %v8368_v9 = vadd.f32 1.0, %v2451_v49  ;;  %v8371_v24 = vmul.f32 %v1997_v21, %v8072_v14 }
 0x27d   : > { %v8373_v55 = vadd.f32 0.18741608, %v2518_v52  ;;  %vm2383_vm7 = vcmp.eq.f32.partialorder %v2382_v56, 8.507059e+37  ;;  %v2046_v50 = vpack.c.bf16 %v8110_v44, %v8059_v57  ;;  %v8378_v58 = vmul.f32 %v1998_v39, %v8075_v12 }
 0x27e   : > { %v6176_v18 = vpop.eup %6175  ;;  %v1955_v32 = vmul.f32 %v8312_v60, %v1954_v29  ;;  %v2386_v17 = vsel %vm2383_vm7, %v2385_v20, %v2381_v43  ;;  %v2486_v7 = vadd.f32 0.014752088, %v2485_v59  ;;  %v5808_v47 = vclamps-f32 %v8356_v30, 1.0 }
 0x27f   : > { %v2555_v34 = vadd.f32 0.0036580483, %v2554_v31  ;;  %v8382_v38 = vmin.f32 %v2590_v6, 16.0  ;;  %v2414_v14 = vmul.f32 %v6176_v18, %v8336_v22  ;;  %v1940_v52 = vadd.f32 1.1283791, %v1939_v61 }
 0x280   : > { %vm1957_vm8 = vweird.f32 %v8277_v25  ;;  %v8388_v57 = vadd.f32 %v7971_v2, %v8297_v40  ;;  %6177 = vrcp.f32 %v8368_v9  ;;  %vm1958_vm9 = vweird.f32 %v8312_v60 }
 0x281   : > { %v1963_v12 = vand.u32 2147483648, %v8277_v25  ;;  %v2387_v44 = vmul.f32 %v2386_v17, %v7997_v19  ;;  %v2415_v42 = vsub.f32 1.0, %v2414_v14  ;;  %2190 = vmatmul.bf16.gmra.mxu1 %v2046_v50  ;;  %v1956_v3 = vadd.f32 %v8312_v60, %v1955_v32  ;;  %vm8412_vm11 = vmor %vm1957_vm8, %vm1958_vm9 }
 0x282   : > { %v2424_v51 = vand.u32 2147483648, %v8336_v22  ;;  %v2487_v45 = vmul.f32 %v2486_v7, %v8029_v15  ;;  %v2523_v40 = vmul.f32 3.8918573e-05, %v8090_v27  ;;  %v1961_v62 = vand.u32 2147483647, %v8277_v25 }
 0x283   : > { %v2416_v53 = vmul.f32 %v6176_v18, %v2415_v42  ;;  %vm2419_vm10 = vweird.f32 %v6176_v18  ;;  %v2422_v13 = vand.u32 2147483647, %v8336_v22  ;;  %v8403_v19 = vmul.f32 0.70710677, %v8388_v57 }
 0x284   : > { %v8406_v35 = vadd.f32 %v7971_v2, %v2151_v0  ;;  %v2488_v21 = vadd.f32 0.112945676, %v2487_v45  ;;  %v2524_v37 = vadd.f32 0.001143296, %v2523_v40  ;;  %v1964_v39 = vor.u32 1.1754944e-38, %v1963_v12 }
 0x285   : > { %v5844_v29 = vclamps-f32 %v2387_v44, 1.0  ;;  %v2417_v54 = vadd.f32 %v6176_v18, %v2416_v53  ;;  %vm2418_vm12 = vweird.f32 %v8336_v22  ;;  %v1960_v2 = vsel %vm8412_vm11, %v8312_v60, %v1956_v3 }
 0x286   : > { %v8417_v49 = vpop.eup %6177  ;;  %vm2420_vm13 = vmor %vm2418_vm12, %vm2419_vm10  ;;  %v2425_v0 = vor.u32 1.1754944e-38, %v2424_v51  ;;  %v2489_v59 = vmul.f32 %v2488_v21, %v8029_v15  ;;  %v2525_v25 = vmul.f32 %v2524_v37, %v8090_v27  ;;  %vm2423_vm14 = vcmp.eq.f32.partialorder %v2422_v13, 8.507059e+37  ;;  %v11191_v13 = vld [vmem:[#allocation23_spill] sm:$0xff] }
 0x287   : > { %v2421_v31 = vsel %vm2420_vm13, %v6176_v18, %v2417_v54  ;;  %v2454_v6 = vmul.f32 %v8417_v49, %v8368_v9  ;;  %v2563_v43 = vmul.f32 3.8918573e-05, %v8295_v1  ;;  %v2630_v22 = vmul.f32 %v8403_v19, %v8403_v19 }
 0x288   : > { %v2426_v61 = vsel %vm2423_vm14, %v2425_v0, %v2421_v31  ;;  %v2490_v20 = vadd.f32 0.4994258, %v2489_v59  ;;  %v2526_v50 = vadd.f32 0.014752088, %v2525_v25  ;;  %vm1962_vm15 = vcmp.eq.f32.partialorder %v1961_v62, 8.507059e+37  ;;  %v8441_v62 = vpop.f32.mrf.mxu1 }
 0x289   : > { %v2427_v60 = vmul.f32 %v2426_v61, %v8069_v48  ;;  %v3552_v32 = vadd.f32 1.0, %v5844_v29  ;;  %v2455_v17 = vsub.f32 1.0, %v2454_v6  ;;  %v2556_v7 = vmul.f32 %v2555_v34, %v8295_v1 }
 0x28a   : > { %v1965_v18 = vsel %vm1962_vm15, %v1964_v39, %v1960_v2  ;;  %v2491_v14 = vmul.f32 %v2490_v20, %v8029_v15  ;;  %v2527_v12 = vmul.f32 %v2526_v50, %v8090_v27  ;;  %v1941_v44 = vmul.f32 %v1940_v52, %v8129_v41 }
 0x28b   : > { %v5845_v42 = vclamps-f32 %v2427_v60, 1.0  ;;  %v2456_v3 = vmul.f32 %v8417_v49, %v2455_v17  ;;  %v2564_v51 = vadd.f32 0.001143296, %v2563_v43  ;;  %v2592_v45 = vmul.f32 2.1237322e-06, %v8382_v38 }
 0x28c   : > { %v8436_v40 = vmin.f32 %v2630_v22, 16.0  ;;  %v8439_v48 = vmul.f32 0.70710677, %v8406_v35  ;;  %v8443_v34 = vadd.f32 1.0, %v2491_v14  ;;  %v1966_v15 = vmul.f32 %v1965_v18, %v1941_v44 }
 0x28d   : > { %v3553_v53 = vadd.f32 1.0, %v5845_v42  ;;  %v3584_v21 = vmul.f32 %v3552_v32, %v11191_v13  ;;  %v2047_v41 = vpack.c.bf16 %v8378_v58, %v8371_v24  ;;  %v2457_v52 = vadd.f32 %v8417_v49, %v2456_v3 }
 0x28e   : > { %vm2459_vm0 = vweird.f32 %v8417_v49  ;;  %6179 = vrcp.f32 %v8443_v34  ;;  %v2528_v37 = vadd.f32 0.112945676, %v2527_v12  ;;  %v2464_v39 = vand.u32 2147483648, %v8368_v9 }
 0x28f   : > { %v3585_v56 = vmul.f32 %v3553_v53, %v8009_v10  ;;  %v2565_v29 = vmul.f32 %v2564_v51, %v8295_v1  ;;  %v2603_v54 = vmul.f32 3.8918573e-05, %v8382_v38  ;;  %v1999_v2 = vadd.f32 1.0, %v5808_v47 }
 0x290   : > { %v2557_v0 = vadd.f32 0.05243302, %v2556_v7  ;;  %vm2458_vm1 = vweird.f32 %v8368_v9  ;;  %v2462_v24 = vand.u32 2147483647, %v8368_v9  ;;  %v8461_v58 = vmul.f32 %v8365_v5, %v7987_v23  ;;  %v8485_v12 = vpop.f32.mrf.mxu1 }
 0x291   : > { %v2593_v59 = vadd.f32 0.00028619796, %v2592_v45  ;;  %v2670_v10 = vmul.f32 %v8439_v48, %v8439_v48  ;;  %v3615_v25 = vpack.c.bf16 %v3585_v56, %v3584_v21  ;;  %vm8467_vm2 = vmor %vm2458_vm1, %vm2459_vm0  ;;  %2195 = vmatmul.bf16.gmra.mxu1 %v2047_v41  ;;  %v5809_v30 = vclamps-f32 %v1966_v15, 1.0 }
 0x292   : > { %v2632_v47 = vmul.f32 2.1237322e-06, %v8436_v40  ;;  %v2461_v23 = vsel %vm8467_vm2, %v8417_v49, %v2457_v52  ;;  %v2529_v5 = vmul.f32 %v2528_v37, %v8090_v27  ;;  %v2520_v9 = vmul.f32 %v8373_v55, %v8090_v27 }
 0x293   : > { %3711 = vmatmul.bf16.gmra.mxu2 %v3615_v25  ;;  %v2465_v6 = vor.u32 1.1754944e-38, %v2464_v39  ;;  %v2566_v43 = vadd.f32 0.014752088, %v2565_v29  ;;  %v2604_v22 = vadd.f32 0.001143296, %v2603_v54  ;;  %v2031_v20 = vmul.f32 %v1999_v2, %v8107_v4 }
 0x294   : > { %v6180_v61 = vpop.eup %6179  ;;  %v2558_v50 = vmul.f32 %v2557_v0, %v8295_v1  ;;  %v656_v60 = vmul.f32 0.5, %v8116_v11  ;;  %vm2463_vm3 = vcmp.eq.f32.partialorder %v2462_v24, 8.507059e+37  ;;  %v2594_v32 = vmul.f32 %v2593_v59, %v8382_v38 }
 0x295   : > { %v2466_v49 = vsel %vm2463_vm3, %v2465_v6, %v2461_v23  ;;  %v2494_v17 = vmul.f32 %v6180_v61, %v8443_v34  ;;  %v2530_v7 = vadd.f32 0.4994258, %v2529_v5  ;;  %v2000_v18 = vadd.f32 1.0, %v5809_v30 }
 0x296   : > { %v2633_v55 = vadd.f32 0.00028619796, %v2632_v47  ;;  %v8483_v14 = vmin.f32 %v2670_v10, 16.0  ;;  %v2567_v44 = vmul.f32 %v2566_v43, %v8295_v1  ;;  %v2605_v11 = vmul.f32 %v2604_v22, %v8382_v38 }
 0x297   : > { %v2495_v4 = vsub.f32 1.0, %v2494_v17  ;;  %v2531_v42 = vmul.f32 %v2530_v7, %v8090_v27  ;;  %v2643_v3 = vmul.f32 3.8918573e-05, %v8436_v40  ;;  %v2467_v51 = vmul.f32 %v2466_v49, %v8086_v8  ;;  %v8500_v27 = vld [vmem:[%s11104_s4] ss:$0 sm:$0xff] }
 0x298   : > { %v2502_v45 = vand.u32 2147483647, %v8443_v34  ;;  %v2504_v15 = vand.u32 2147483648, %v8443_v34  ;;  %v2568_v53 = vadd.f32 0.112945676, %v2567_v44  ;;  %vm2499_vm4 = vweird.f32 %v6180_v61 }
 0x299   : > { %v2496_v13 = vmul.f32 %v6180_v61, %v2495_v4  ;;  %v8494_v21 = vadd.f32 1.0, %v2531_v42  ;;  %v2606_v41 = vadd.f32 0.014752088, %v2605_v11  ;;  %v2595_v52 = vadd.f32 0.0036580483, %v2594_v32 }
 0x29a   : > { %v2672_v37 = vmul.f32 2.1237322e-06, %v8483_v14  ;;  %v8504_v8 = vadd.f32 %v8500_v27, %v8396_v16  ;;  %v2569_v56 = vmul.f32 %v2568_v53, %v8295_v1  ;;  %v2032_v39 = vmul.f32 %v2000_v18, %v656_v60  ;;  %v8518_v60 = vpop.f32.mrf.mxu1  ;;  %v11194_v18 = vld [vmem:[#allocation24_spill] sm:$0xff] }
 0x29b   : > { %v2497_v29 = vadd.f32 %v6180_v61, %v2496_v13  ;;  %vm2498_vm5 = vweird.f32 %v8443_v34  ;;  %6181 = vrcp.f32 %v8494_v21  ;;  %v2634_v54 = vmul.f32 %v2633_v55, %v8436_v40 }
 0x29c   : > { %vm2500_vm6 = vmor %vm2498_vm5, %vm2499_vm4  ;;  %v2505_v2 = vor.u32 1.1754944e-38, %v2504_v15  ;;  %v2570_v0 = vadd.f32 0.4994258, %v2569_v56  ;;  %v2644_v24 = vadd.f32 0.001143296, %v2643_v3  ;;  %v5846_v59 = vclamps-f32 %v2467_v51, 1.0 }
 0x29d   : > { %v2501_v10 = vsel %vm2500_vm6, %v6180_v61, %v2497_v29  ;;  %vm2503_vm7 = vcmp.eq.f32.partialorder %v2502_v45, 8.507059e+37  ;;  %v2607_v16 = vmul.f32 %v2606_v41, %v8382_v38  ;;  %v2521_v25 = vadd.f32 1.1283791, %v2520_v9  ;;  %v11195_v45 = vld [vmem:[#allocation25_spill] sm:$0xff] }
 0x29e   : > { %v2559_v31 = vadd.f32 0.18741608, %v2558_v50  ;;  %v2596_v30 = vmul.f32 %v2595_v52, %v8382_v38  ;;  %v2506_v47 = vsel %vm2503_vm7, %v2505_v2, %v2501_v10  ;;  %v8513_v34 = vmul.f32 0.70710677, %v8504_v8 }
 0x29f   : > { %v2507_v23 = vmul.f32 %v2506_v47, %v8461_v58  ;;  %v2571_v5 = vmul.f32 %v2570_v0, %v8295_v1  ;;  %v2048_v6 = vpack.c.bf16 %v2032_v39, %v2031_v20  ;;  %v2211_v43 = vmul.f32 0.5, %v7974_v63 }
 0x2a0   : > { %v2635_v22 = vadd.f32 0.0036580483, %v2634_v54  ;;  %v2673_v61 = vadd.f32 0.00028619796, %v2672_v37  ;;  %v2645_v9 = vmul.f32 %v2644_v24, %v8436_v40  ;;  %v3554_v49 = vadd.f32 1.0, %v5846_v59 }
 0x2a1   : > { %v6182_v50 = vpop.eup %6181  ;;  %v5847_v32 = vclamps-f32 %v2507_v23, 1.0  ;;  %v8521_v17 = vadd.f32 1.0, %v2571_v5  ;;  %2200 = vmatmul.bf16.gmra.mxu1 %v2048_v6  ;;  %v2608_v7 = vadd.f32 0.112945676, %v2607_v16  ;;  %v8524_v58 = vmul.f32 0.5, %v8032_v36 }
 0x2a2   : > { %v2522_v20 = vmul.f32 %v2521_v25, %v11194_v18  ;;  %v2560_v63 = vmul.f32 %v2559_v31, %v8295_v1  ;;  %v2534_v55 = vmul.f32 %v6182_v50, %v8494_v21  ;;  %v2597_v44 = vadd.f32 0.05243302, %v2596_v30 }
 0x2a3   : > { %v2710_v4 = vmul.f32 %v8513_v34, %v8513_v34  ;;  %v3555_v42 = vadd.f32 1.0, %v5847_v32  ;;  %6183 = vrcp.f32 %v8521_v17  ;;  %v2636_v11 = vmul.f32 %v2635_v22, %v8436_v40 }
 0x2a4   : > { %v2674_v3 = vmul.f32 %v2673_v61, %v8483_v14  ;;  %v2535_v51 = vsub.f32 1.0, %v2534_v55  ;;  %v2646_v36 = vadd.f32 0.014752088, %v2645_v9  ;;  %v3586_v15 = vmul.f32 %v3554_v49, %v11195_v45 }
 0x2a5   : > { %v3587_v53 = vmul.f32 %v3555_v42, %v2211_v43  ;;  %v2544_v1 = vand.u32 2147483648, %v8494_v21  ;;  %v2609_v13 = vmul.f32 %v2608_v7, %v8382_v38  ;;  %v2561_v41 = vadd.f32 1.1283791, %v2560_v63 }
 0x2a6   : > { %v2536_v52 = vmul.f32 %v6182_v50, %v2535_v51  ;;  %vm2539_vm8 = vweird.f32 %v6182_v50  ;;  %v2542_v37 = vand.u32 2147483647, %v8494_v21  ;;  %v2598_v56 = vmul.f32 %v2597_v44, %v8382_v38 }
 0x2a7   : > { %v8539_v39 = vmin.f32 %v2710_v4, 16.0  ;;  %v3616_v29 = vpack.c.bf16 %v3587_v53, %v3586_v15  ;;  %v2610_v54 = vadd.f32 0.4994258, %v2609_v13  ;;  %v2675_v2 = vadd.f32 0.0036580483, %v2674_v3 }
 0x2a8   : > { %v2537_v0 = vadd.f32 %v6182_v50, %v2536_v52  ;;  %vm2538_vm9 = vweird.f32 %v8494_v21  ;;  %v2647_v24 = vmul.f32 %v2646_v36, %v8436_v40  ;;  %v2637_v10 = vadd.f32 0.05243302, %v2636_v11  ;;  %v8550_v21 = vpop.f32.mrf.mxu1 }
 0x2a9   : > { %v6184_v59 = vpop.eup %6183  ;;  %v8545_v16 = vadd.f32 %v8500_v27, %v8441_v62  ;;  %3716 = vmatmul.bf16.gmra.mxu2 %v3616_v29  ;;  %vm2540_vm10 = vmor %vm2538_vm9, %vm2539_vm8  ;;  %v2545_v25 = vor.u32 1.1754944e-38, %v2544_v1  ;;  %v2611_v31 = vmul.f32 %v2610_v54, %v8382_v38  ;;  %v2562_v30 = vmul.f32 %v2561_v41, %v8259_v26 }
 0x2aa   : > { %v2541_v47 = vsel %vm2540_vm10, %v6182_v50, %v2537_v0  ;;  %vm2543_vm11 = vcmp.eq.f32.partialorder %v2542_v37, 8.507059e+37  ;;  %v2574_v23 = vmul.f32 %v6184_v59, %v8521_v17  ;;  %v2599_v5 = vadd.f32 0.18741608, %v2598_v56 }
 0x2ab   : > { %v2712_v6 = vmul.f32 2.1237322e-06, %v8539_v39  ;;  %v2546_v43 = vsel %vm2543_vm11, %v2545_v25, %v2541_v47  ;;  %v8553_v22 = vadd.f32 1.0, %v2611_v31  ;;  %v2676_v62 = vmul.f32 %v2675_v2, %v8483_v14 }
 0x2ac   : > { %v2575_v61 = vsub.f32 1.0, %v2574_v23  ;;  %v2648_v9 = vadd.f32 0.112945676, %v2647_v24  ;;  %v2683_v32 = vmul.f32 3.8918573e-05, %v8483_v14  ;;  %v2638_v26 = vmul.f32 %v2637_v10, %v8436_v40 }
 0x2ad   : > { %v8559_v50 = vmul.f32 0.70710677, %v8545_v16  ;;  %v2584_v49 = vand.u32 2147483648, %v8521_v17  ;;  %6185 = vrcp.f32 %v8553_v22  ;;  %v2547_v7 = vmul.f32 %v2546_v43, %v2522_v20 }
 0x2ae   : > { %v2576_v18 = vmul.f32 %v6184_v59, %v2575_v61  ;;  %vm2579_vm12 = vweird.f32 %v6184_v59  ;;  %v2582_v63 = vand.u32 2147483647, %v8521_v17  ;;  %v2600_v55 = vmul.f32 %v2599_v5, %v8382_v38 }
 0x2af   : > { %v2713_v44 = vadd.f32 0.00028619796, %v2712_v6  ;;  %v8567_v4 = vadd.f32 %v8500_v27, %v8485_v12  ;;  %v2649_v42 = vmul.f32 %v2648_v9, %v8436_v40  ;;  %v2677_v11 = vadd.f32 0.05243302, %v2676_v62 }
 0x2b0   : > { %v2577_v3 = vadd.f32 %v6184_v59, %v2576_v18  ;;  %vm2578_vm13 = vweird.f32 %v8521_v17  ;;  %v2684_v51 = vadd.f32 0.001143296, %v2683_v32  ;;  %v2639_v36 = vadd.f32 0.18741608, %v2638_v26  ;;  %v8580_v54 = vpop.f32.mrf.mxu1 }
 0x2b1   : > { %v2750_v20 = vmul.f32 %v8559_v50, %v8559_v50  ;;  %vm2580_vm14 = vmor %vm2578_vm13, %vm2579_vm12  ;;  %v2585_v45 = vor.u32 1.1754944e-38, %v2584_v49  ;;  %v2650_v15 = vadd.f32 0.4994258, %v2649_v42  ;;  %v5848_v38 = vclamps-f32 %v2547_v7, 1.0 }
 0x2b2   : > { %v2581_v53 = vsel %vm2580_vm14, %v6184_v59, %v2577_v3  ;;  %vm2583_vm15 = vcmp.eq.f32.partialorder %v2582_v63, 8.507059e+37  ;;  %v2685_v12 = vmul.f32 %v2684_v51, %v8483_v14  ;;  %v2714_v13 = vmul.f32 %v2713_v44, %v8539_v39 }
 0x2b3   : > { %v6186_v1 = vpop.eup %6185  ;;  %v8576_v41 = vmul.f32 0.70710677, %v8567_v4  ;;  %v2586_v17 = vsel %vm2583_vm15, %v2585_v45, %v2581_v53  ;;  %v2651_v52 = vmul.f32 %v2650_v15, %v8436_v40  ;;  %v2213_v37 = vmul.f32 0.5, %v8245_v46 }
 0x2b4   : > { %v2601_v56 = vadd.f32 1.1283791, %v2600_v55  ;;  %v2587_v29 = vmul.f32 %v2586_v17, %v2562_v30  ;;  %v2614_v2 = vmul.f32 %v6186_v1, %v8553_v22  ;;  %v2640_v0 = vmul.f32 %v2639_v36, %v8436_v40 }
 0x2b5   : > { %v8584_v24 = vmin.f32 %v2750_v20, 16.0  ;;  %v8586_v59 = vadd.f32 1.0, %v2651_v52  ;;  %v2686_v10 = vadd.f32 0.014752088, %v2685_v12  ;;  %v2678_v25 = vmul.f32 %v2677_v11, %v8483_v14 }
 0x2b6   : > { %v5849_v31 = vclamps-f32 %v2587_v29, 1.0  ;;  %v3556_v47 = vadd.f32 1.0, %v5848_v38  ;;  %v2615_v23 = vsub.f32 1.0, %v2614_v2  ;;  %v2715_v5 = vadd.f32 0.0036580483, %v2714_v13 }
 0x2b7   : > { %v2790_v46 = vmul.f32 %v8576_v41, %v8576_v41  ;;  %v2624_v30 = vand.u32 2147483648, %v8553_v22  ;;  %6187 = vrcp.f32 %v8586_v59  ;;  %vm2619_vm0 = vweird.f32 %v6186_v1 }
 0x2b8   : > { %v3557_v6 = vadd.f32 1.0, %v5849_v31  ;;  %v2616_v40 = vmul.f32 %v6186_v1, %v2615_v23  ;;  %v2723_v43 = vmul.f32 3.8918573e-05, %v8539_v39  ;;  %v2641_v62 = vadd.f32 1.1283791, %v2640_v0  ;;  %v8609_v38 = vpop.f32.mrf.mxu1 }
 0x2b9   : > { %v2752_v61 = vmul.f32 2.1237322e-06, %v8584_v24  ;;  %v2622_v9 = vand.u32 2147483647, %v8553_v22  ;;  %v2687_v32 = vmul.f32 %v2686_v10, %v8483_v14  ;;  %v3588_v26 = vmul.f32 %v3556_v47, %v8524_v58 }
 0x2ba   : > { %v3589_v49 = vmul.f32 %v3557_v6, %v2213_v37  ;;  %v2617_v7 = vadd.f32 %v6186_v1, %v2616_v40  ;;  %vm2618_vm1 = vweird.f32 %v8553_v22  ;;  %v2716_v18 = vmul.f32 %v2715_v5, %v8539_v39 }
 0x2bb   : > { %v8600_v63 = vmin.f32 %v2790_v46, 16.0  ;;  %v8604_v55 = vadd.f32 %v8500_v27, %v8518_v60  ;;  %vm2620_vm2 = vmor %vm2618_vm1, %vm2619_vm0  ;;  %v2625_v44 = vor.u32 1.1754944e-38, %v2624_v30  ;;  %v2688_v3 = vadd.f32 0.112945676, %v2687_v32 }
 0x2bc   : > { %v3617_v42 = vpack.c.bf16 %v3589_v49, %v3588_v26  ;;  %v2621_v11 = vsel %vm2620_vm2, %v6186_v1, %v2617_v7  ;;  %v2724_v51 = vadd.f32 0.001143296, %v2723_v43  ;;  %v2602_v58 = vmul.f32 %v2601_v56, %v8339_v28 }
 0x2bd   : > { %v6188_v36 = vpop.eup %6187  ;;  %vm2623_vm3 = vcmp.eq.f32.partialorder %v2622_v9, 8.507059e+37  ;;  %v2642_v22 = vmul.f32 %v2641_v62, %v8403_v19  ;;  %v2679_v20 = vadd.f32 0.18741608, %v2678_v25  ;;  %v2753_v60 = vadd.f32 0.00028619796, %v2752_v61 }
 0x2be   : > { %3721 = vmatmul.bf16.gmra.mxu2 %v3617_v42  ;;  %v2626_v45 = vsel %vm2623_vm3, %v2625_v44, %v2621_v11  ;;  %v2654_v15 = vmul.f32 %v6188_v36, %v8586_v59  ;;  %v2792_v53 = vmul.f32 2.1237322e-06, %v8600_v63  ;;  %v8613_v12 = vmul.f32 0.70710677, %v8604_v55 }
 0x2bf   : > { %v2689_v1 = vmul.f32 %v2688_v3, %v8483_v14  ;;  %v2717_v13 = vadd.f32 0.05243302, %v2716_v18  ;;  %v2725_v17 = vmul.f32 %v2724_v51, %v8539_v39  ;;  %v2763_v19 = vmul.f32 3.8918573e-05, %v8584_v24 }
 0x2c0   : > { %v2655_v28 = vsub.f32 1.0, %v2654_v15  ;;  %v2627_v52 = vmul.f32 %v2626_v45, %v2602_v58  ;;  %v2662_v37 = vand.u32 2147483647, %v8586_v59  ;;  %v2664_v56 = vand.u32 2147483648, %v8586_v59  ;;  %v8638_v44 = vpop.f32.mrf.mxu1 }
 0x2c1   : > { %v2690_v29 = vadd.f32 0.4994258, %v2689_v1  ;;  %vm2659_vm4 = vweird.f32 %v6188_v36  ;;  %v2726_v0 = vadd.f32 0.014752088, %v2725_v17  ;;  %v2764_v10 = vadd.f32 0.001143296, %v2763_v19 }
 0x2c2   : > { %v2656_v2 = vmul.f32 %v6188_v36, %v2655_v28  ;;  %v2754_v25 = vmul.f32 %v2753_v60, %v8584_v24  ;;  %v2793_v31 = vadd.f32 0.00028619796, %v2792_v53  ;;  %v2830_v47 = vmul.f32 %v8613_v12, %v8613_v12 }
 0x2c3   : > { %v2691_v23 = vmul.f32 %v2690_v29, %v8483_v14  ;;  %vm2658_vm5 = vweird.f32 %v8586_v59  ;;  %v2727_v46 = vmul.f32 %v2726_v0, %v8539_v39  ;;  %v2765_v30 = vmul.f32 %v2764_v10, %v8584_v24 }
 0x2c4   : > { %v2657_v5 = vadd.f32 %v6188_v36, %v2656_v2  ;;  %v8629_v6 = vadd.f32 %v8500_v27, %v8550_v21  ;;  %vm2660_vm6 = vmor %vm2658_vm5, %vm2659_vm4  ;;  %vm2663_vm7 = vcmp.eq.f32.partialorder %v2662_v37, 8.507059e+37  ;;  %v2665_v40 = vor.u32 1.1754944e-38, %v2664_v56 }
 0x2c5   : > { %v8631_v43 = vadd.f32 1.0, %v2691_v23  ;;  %v5850_v62 = vclamps-f32 %v2627_v52, 1.0  ;;  %v2728_v9 = vadd.f32 0.112945676, %v2727_v46  ;;  %v2766_v32 = vadd.f32 0.014752088, %v2765_v30 }
 0x2c6   : > { %v2661_v61 = vsel %vm2660_vm6, %v6188_v36, %v2657_v5  ;;  %v8633_v26 = vmin.f32 %v2830_v47, 16.0  ;;  %v2803_v49 = vmul.f32 3.8918573e-05, %v8600_v63  ;;  %v2718_v7 = vmul.f32 %v2717_v13, %v8539_v39 }
 0x2c7   : > { %v2666_v59 = vsel %vm2663_vm7, %v2665_v40, %v2661_v61  ;;  %6189 = vrcp.f32 %v8631_v43  ;;  %v2755_v21 = vadd.f32 0.0036580483, %v2754_v25  ;;  %v2794_v42 = vmul.f32 %v2793_v31, %v8600_v63 }
 0x2c8   : > { %v2667_v18 = vmul.f32 %v2666_v59, %v2642_v22  ;;  %v8642_v11 = vmul.f32 0.70710677, %v8629_v6  ;;  %v2729_v3 = vmul.f32 %v2728_v9, %v8539_v39  ;;  %v2767_v51 = vmul.f32 %v2766_v32, %v8584_v24 }
 0x2c9   : > { %v2214_v36 = vmul.f32 0.5, %v8317_v33  ;;  %v3558_v45 = vadd.f32 1.0, %v5850_v62  ;;  %v2680_v15 = vmul.f32 %v2679_v20, %v8483_v14  ;;  %v2804_v53 = vadd.f32 0.001143296, %v2803_v49 }
 0x2ca   : > { %v5851_v58 = vclamps-f32 %v2667_v18, 1.0  ;;  %v2730_v60 = vadd.f32 0.4994258, %v2729_v3  ;;  %v2843_v22 = vmul.f32 3.8918573e-05, %v8633_v26  ;;  %v2215_v1 = vmul.f32 0.5, %v8388_v57 }
 0x2cb   : > { %v2719_v13 = vadd.f32 0.18741608, %v2718_v7  ;;  %v2768_v17 = vadd.f32 0.112945676, %v2767_v51  ;;  %v2756_v52 = vmul.f32 %v2755_v21, %v8584_v24  ;;  %v2795_v37 = vadd.f32 0.0036580483, %v2794_v42 }
 0x2cc   : > { %v3559_v28 = vadd.f32 1.0, %v5851_v58  ;;  %v2870_v33 = vmul.f32 %v8642_v11, %v8642_v11  ;;  %v2731_v56 = vmul.f32 %v2730_v60, %v8539_v39  ;;  %v3590_v29 = vmul.f32 %v3558_v45, %v2214_v36 }
 0x2cd   : > { %v6190_v19 = vpop.eup %6189  ;;  %v2769_v2 = vmul.f32 %v2768_v17, %v8584_v24  ;;  %v2681_v0 = vadd.f32 1.1283791, %v2680_v15  ;;  %v2805_v10 = vmul.f32 %v2804_v53, %v8600_v63  ;;  %v2844_v25 = vadd.f32 0.001143296, %v2843_v22 }
 0x2ce   : > { %v3591_v14 = vmul.f32 %v3559_v28, %v2215_v1  ;;  %v2694_v20 = vmul.f32 %v6190_v19, %v8631_v43  ;;  %v8656_v57 = vadd.f32 1.0, %v2731_v56  ;;  %v2720_v31 = vmul.f32 %v2719_v13, %v8539_v39  ;;  %v8669_v39 = vpop.f32.mrf.mxu1 }
 0x2cf   : > { %v2770_v5 = vadd.f32 0.4994258, %v2769_v2  ;;  %v2757_v46 = vadd.f32 0.05243302, %v2756_v52  ;;  %v2832_v30 = vmul.f32 2.1237322e-06, %v8633_v26  ;;  %v8663_v40 = vadd.f32 %v8500_v27, %v8580_v54 }
 0x2d0   : > { %v3618_v47 = vpack.c.bf16 %v3591_v14, %v3590_v29  ;;  %v2695_v23 = vsub.f32 1.0, %v2694_v20  ;;  %6191 = vrcp.f32 %v8656_v57  ;;  %v2796_v62 = vmul.f32 %v2795_v37, %v8600_v63 }
 0x2d1   : > { %v8667_v61 = vmin.f32 %v2870_v33, 16.0  ;;  %vm2699_vm8 = vweird.f32 %v6190_v19  ;;  %v2704_v32 = vand.u32 2147483648, %v8631_v43  ;;  %v2771_v59 = vmul.f32 %v2770_v5, %v8584_v24 }
 0x2d2   : > { %3726 = vmatmul.bf16.gmra.mxu2 %v3618_v47  ;;  %v2696_v9 = vmul.f32 %v6190_v19, %v2695_v23  ;;  %v2806_v49 = vadd.f32 0.014752088, %v2805_v10  ;;  %v2845_v7 = vmul.f32 %v2844_v25, %v8633_v26  ;;  %v2721_v54 = vadd.f32 1.1283791, %v2720_v31 }
 0x2d3   : > { %vm2698_vm9 = vweird.f32 %v8631_v43  ;;  %v2702_v18 = vand.u32 2147483647, %v8631_v43  ;;  %v8677_v42 = vmul.f32 0.5, %v8406_v35  ;;  %v8680_v3 = vmul.f32 0.5, %v8504_v8 }
 0x2d4   : > { %v2697_v21 = vadd.f32 %v6190_v19, %v2696_v9  ;;  %v8683_v51 = vmul.f32 0.70710677, %v8663_v40  ;;  %vm8685_vm10 = vmor %vm2698_vm9, %vm2699_vm8  ;;  %v8689_v58 = vadd.f32 1.0, %v2771_v59  ;;  %v2758_v45 = vmul.f32 %v2757_v46, %v8584_v24 }
 0x2d5   : > { %v2797_v15 = vadd.f32 0.05243302, %v2796_v62  ;;  %v2833_v60 = vadd.f32 0.00028619796, %v2832_v30  ;;  %v2872_v8 = vmul.f32 2.1237322e-06, %v8667_v61  ;;  %v2807_v22 = vmul.f32 %v2806_v49, %v8600_v63 }
 0x2d6   : > { %v2701_v35 = vsel %vm8685_vm10, %v6190_v19, %v2697_v21  ;;  %v6192_v43 = vpop.eup %6191  ;;  %v2705_v53 = vor.u32 1.1754944e-38, %v2704_v32  ;;  %v2846_v1 = vadd.f32 0.014752088, %v2845_v7  ;;  %v2682_v13 = vmul.f32 %v2681_v0, %v8439_v48  ;;  %v8711_v25 = vpop.f32.mrf.mxu1 }
 0x2d7   : > { %v2722_v28 = vmul.f32 %v2721_v54, %v8513_v34  ;;  %vm2703_vm11 = vcmp.eq.f32.partialorder %v2702_v18, 8.507059e+37  ;;  %v2734_v17 = vmul.f32 %v6192_v43, %v8656_v57  ;;  %v2910_v52 = vmul.f32 %v8683_v51, %v8683_v51 }
 0x2d8   : > { %v8703_v19 = vadd.f32 %v8500_v27, %v8609_v38  ;;  %v2706_v37 = vsel %vm2703_vm11, %v2705_v53, %v2701_v35  ;;  %6193 = vrcp.f32 %v8689_v58  ;;  %v2759_v33 = vadd.f32 0.18741608, %v2758_v45 }
 0x2d9   : > { %v2798_v56 = vmul.f32 %v2797_v15, %v8600_v63  ;;  %v2834_v48 = vmul.f32 %v2833_v60, %v8633_v26  ;;  %v2735_v29 = vsub.f32 1.0, %v2734_v17  ;;  %v2873_v34 = vadd.f32 0.00028619796, %v2872_v8 }
 0x2da   : > { %v2744_v14 = vand.u32 2147483648, %v8656_v57  ;;  %v2808_v20 = vadd.f32 0.112945676, %v2807_v22  ;;  %v2847_v2 = vmul.f32 %v2846_v1, %v8633_v26  ;;  %v2707_v0 = vmul.f32 %v2706_v37, %v2682_v13 }
 0x2db   : > { %v2736_v10 = vmul.f32 %v6192_v43, %v2735_v29  ;;  %vm2739_vm12 = vweird.f32 %v6192_v43  ;;  %v2742_v38 = vand.u32 2147483647, %v8656_v57  ;;  %v8713_v31 = vmin.f32 %v2910_v52, 16.0 }
 0x2dc   : > { %v8716_v47 = vmul.f32 0.70710677, %v8703_v19  ;;  %v2809_v23 = vmul.f32 %v2808_v20, %v8600_v63  ;;  %v2848_v5 = vadd.f32 0.112945676, %v2847_v2  ;;  %v2799_v46 = vadd.f32 0.18741608, %v2798_v56 }
 0x2dd   : > { %v2835_v30 = vadd.f32 0.0036580483, %v2834_v48  ;;  %v2737_v62 = vadd.f32 %v6192_v43, %v2736_v10  ;;  %vm2738_vm13 = vweird.f32 %v8656_v57  ;;  %v2874_v32 = vmul.f32 %v2873_v34, %v8667_v61 }
 0x2de   : > { %v6194_v9 = vpop.eup %6193  ;;  %vm2740_vm14 = vmor %vm2738_vm13, %vm2739_vm12  ;;  %v2745_v59 = vor.u32 1.1754944e-38, %v2744_v14  ;;  %v2810_v49 = vadd.f32 0.4994258, %v2809_v23  ;;  %v2849_v7 = vmul.f32 %v2848_v5, %v8633_v26  ;;  %v5852_v54 = vclamps-f32 %v2707_v0, 1.0 }
 0x2df   : > { %v2741_v21 = vsel %vm2740_vm14, %v6192_v43, %v2737_v62  ;;  %vm2743_vm15 = vcmp.eq.f32.partialorder %v2742_v38, 8.507059e+37  ;;  %v2774_v18 = vmul.f32 %v6194_v9, %v8689_v58  ;;  %v2912_v36 = vmul.f32 2.1237322e-06, %v8713_v31 }
 0x2e0   : > { %v2950_v45 = vmul.f32 %v8716_v47, %v8716_v47  ;;  %v2746_v15 = vsel %vm2743_vm15, %v2745_v59, %v2741_v21  ;;  %v2811_v57 = vmul.f32 %v2810_v49, %v8600_v63  ;;  %v2760_v60 = vmul.f32 %v2759_v33, %v8584_v24  ;;  %v8737_v33 = vpop.f32.mrf.mxu1 }
 0x2e1   : > { %v2747_v35 = vmul.f32 %v2746_v15, %v2722_v28  ;;  %v2775_v8 = vsub.f32 1.0, %v2774_v18  ;;  %v2850_v53 = vadd.f32 0.4994258, %v2849_v7  ;;  %v2800_v22 = vmul.f32 %v2799_v46, %v8600_v63 }
 0x2e2   : > { %v2836_v43 = vmul.f32 %v2835_v30, %v8633_v26  ;;  %v2875_v1 = vadd.f32 0.0036580483, %v2874_v32  ;;  %v8730_v13 = vadd.f32 1.0, %v2811_v57  ;;  %v3560_v52 = vadd.f32 1.0, %v5852_v54 }
 0x2e3   : > { %v5853_v17 = vclamps-f32 %v2747_v35, 1.0  ;;  %v2776_v37 = vmul.f32 %v6194_v9, %v2775_v8  ;;  %v2851_v56 = vmul.f32 %v2850_v53, %v8633_v26  ;;  %v2913_v48 = vadd.f32 0.00028619796, %v2912_v36 }
 0x2e4   : > { %v8733_v29 = vmin.f32 %v2950_v45, 16.0  ;;  %vm2779_vm0 = vweird.f32 %v6194_v9  ;;  %6195 = vrcp.f32 %v8730_v13  ;;  %v2784_v63 = vand.u32 2147483648, %v8689_v58 }
 0x2e5   : > { %v3561_v24 = vadd.f32 1.0, %v5853_v17  ;;  %v2777_v28 = vadd.f32 %v6194_v9, %v2776_v37  ;;  %v2883_v34 = vmul.f32 3.8918573e-05, %v8667_v61  ;;  %v2837_v14 = vadd.f32 0.05243302, %v2836_v43 }
 0x2e6   : > { %vm2778_vm1 = vweird.f32 %v8689_v58  ;;  %v2782_v20 = vand.u32 2147483647, %v8689_v58  ;;  %v8742_v2 = vadd.f32 1.0, %v2851_v56  ;;  %v2761_v0 = vadd.f32 1.1283791, %v2760_v60 }
 0x2e7   : > { %v3592_v10 = vmul.f32 %v3560_v52, %v8677_v42  ;;  %v3593_v38 = vmul.f32 %v3561_v24, %v8680_v3  ;;  %vm2780_vm2 = vmor %vm2778_vm1, %vm2779_vm0  ;;  %v2876_v23 = vmul.f32 %v2875_v1, %v8667_v61  ;;  %v2914_v5 = vmul.f32 %v2913_v48, %v8713_v31 }
 0x2e8   : > { %v2952_v46 = vmul.f32 2.1237322e-06, %v8733_v29  ;;  %v2781_v30 = vsel %vm2780_vm2, %v6194_v9, %v2777_v28  ;;  %v2785_v32 = vor.u32 1.1754944e-38, %v2784_v63  ;;  %6197 = vrcp.f32 %v8742_v2  ;;  %v8760_v43 = vpop.f32.mrf.mxu1 }
 0x2e9   : > { %v3619_v62 = vpack.c.bf16 %v3593_v38, %v3592_v10  ;;  %v2884_v58 = vadd.f32 0.001143296, %v2883_v34  ;;  %v2801_v49 = vadd.f32 1.1283791, %v2800_v22  ;;  %v2838_v7 = vmul.f32 %v2837_v14, %v8633_v26 }
 0x2ea   : > { %v6196_v59 = vpop.eup %6195  ;;  %vm2783_vm3 = vcmp.eq.f32.partialorder %v2782_v20, 8.507059e+37  ;;  %v2762_v54 = vmul.f32 %v2761_v0, %v8559_v50  ;;  %v2877_v21 = vadd.f32 0.05243302, %v2876_v23  ;;  %v2915_v18 = vadd.f32 0.0036580483, %v2914_v5 }
 0x2eb   : > { %3731 = vmatmul.bf16.gmra.mxu2 %v3619_v62  ;;  %v2786_v42 = vsel %vm2783_vm3, %v2785_v32, %v2781_v30  ;;  %v2814_v3 = vmul.f32 %v6196_v59, %v8730_v13  ;;  %v2953_v36 = vadd.f32 0.00028619796, %v2952_v46  ;;  %v2885_v45 = vmul.f32 %v2884_v58, %v8667_v61 }
 0x2ec   : > { %v2923_v15 = vmul.f32 3.8918573e-05, %v8713_v31  ;;  %v2802_v57 = vmul.f32 %v2801_v49, %v8576_v41  ;;  %v2839_v60 = vadd.f32 0.18741608, %v2838_v7  ;;  %v2787_v35 = vmul.f32 %v2786_v42, %v2762_v54 }
 0x2ed   : > { %v2815_v9 = vsub.f32 1.0, %v2814_v3  ;;  %v2824_v8 = vand.u32 2147483648, %v8730_v13  ;;  %vm2819_vm4 = vweird.f32 %v6196_v59  ;;  %v2822_v50 = vand.u32 2147483647, %v8730_v13 }
 0x2ee   : > { %v8757_v53 = vpop.eup %6197  ;;  %v2886_v1 = vadd.f32 0.014752088, %v2885_v45  ;;  %v2878_v17 = vmul.f32 %v2877_v21, %v8667_v61  ;;  %v2916_v52 = vmul.f32 %v2915_v18, %v8713_v31  ;;  %v2954_v37 = vmul.f32 %v2953_v36, %v8733_v29 }
 0x2ef   : > { %v2816_v22 = vmul.f32 %v6196_v59, %v2815_v9  ;;  %vm2818_vm5 = vweird.f32 %v8730_v13  ;;  %v2854_v56 = vmul.f32 %v8757_v53, %v8742_v2  ;;  %v2924_v24 = vadd.f32 0.001143296, %v2923_v15 }
 0x2f0   : > { %v2887_v48 = vmul.f32 %v2886_v1, %v8667_v61  ;;  %v8771_v28 = vadd.f32 %v8500_v27, %v8638_v44  ;;  %v5854_v63 = vclamps-f32 %v2787_v35, 1.0  ;;  %vm2820_vm6 = vmor %vm2818_vm5, %vm2819_vm4  ;;  %v2825_v34 = vor.u32 1.1754944e-38, %v2824_v8  ;;  %v8791_v35 = vpop.f32.mrf.mxu1 }
 0x2f1   : > { %v2817_v41 = vadd.f32 %v6196_v59, %v2816_v22  ;;  %v2963_v14 = vmul.f32 3.8918573e-05, %v8733_v29  ;;  %vm2823_vm7 = vcmp.eq.f32.partialorder %v2822_v50, 8.507059e+37  ;;  %v2925_v13 = vmul.f32 %v2924_v24, %v8713_v31 }
 0x2f2   : > { %v2888_v0 = vadd.f32 0.112945676, %v2887_v48  ;;  %v2879_v10 = vadd.f32 0.18741608, %v2878_v17  ;;  %v2955_v38 = vadd.f32 0.0036580483, %v2954_v37  ;;  %v2840_v21 = vmul.f32 %v2839_v60, %v8633_v26 }
 0x2f3   : > { %v2821_v20 = vsel %vm2820_vm6, %v6196_v59, %v2817_v41  ;;  %v2964_v5 = vadd.f32 0.001143296, %v2963_v14  ;;  %v2855_v30 = vsub.f32 1.0, %v2854_v56  ;;  %v2926_v44 = vadd.f32 0.014752088, %v2925_v13 }
 0x2f4   : > { %v2826_v23 = vsel %vm2823_vm7, %v2825_v34, %v2821_v20  ;;  %v2889_v62 = vmul.f32 %v2888_v0, %v8667_v61  ;;  %v2917_v32 = vadd.f32 0.05243302, %v2916_v52  ;;  %v8777_v58 = vmul.f32 0.70710677, %v8771_v28 }
 0x2f5   : > { %v2827_v46 = vmul.f32 %v2826_v23, %v2802_v57  ;;  %v3562_v49 = vadd.f32 1.0, %v5854_v63  ;;  %v2965_v59 = vmul.f32 %v2964_v5, %v8733_v29  ;;  %v2218_v7 = vmul.f32 0.5, %v8545_v16 }
 0x2f6   : > { %v2890_v3 = vadd.f32 0.4994258, %v2889_v62  ;;  %v2927_v54 = vmul.f32 %v2926_v44, %v8713_v31  ;;  %v2956_v18 = vmul.f32 %v2955_v38, %v8733_v29  ;;  %v8786_v36 = vadd.f32 %v8500_v27, %v8669_v39 }
 0x2f7   : > { %v5855_v42 = vclamps-f32 %v2827_v46, 1.0  ;;  %v2966_v9 = vadd.f32 0.014752088, %v2965_v59  ;;  %v2219_v45 = vmul.f32 0.5, %v8567_v4  ;;  %v2856_v57 = vmul.f32 %v8757_v53, %v2855_v30 }
 0x2f8   : > { %v2891_v16 = vmul.f32 %v2890_v3, %v8667_v61  ;;  %v2880_v8 = vmul.f32 %v2879_v10, %v8667_v61  ;;  %v2918_v26 = vmul.f32 %v2917_v32, %v8713_v31  ;;  %v2990_v60 = vmul.f32 %v8777_v58, %v8777_v58 }
 0x2f9   : > { %v3563_v15 = vadd.f32 1.0, %v5855_v42  ;;  %v3594_v22 = vmul.f32 %v3562_v49, %v2218_v7  ;;  %v2928_v1 = vadd.f32 0.112945676, %v2927_v54  ;;  %v2967_v4 = vmul.f32 %v2966_v9, %v8733_v29 }
 0x2fa   : > { %v8797_v50 = vadd.f32 1.0, %v2891_v16  ;;  %v2841_v17 = vadd.f32 1.1283791, %v2840_v21  ;;  %v2957_v52 = vadd.f32 0.05243302, %v2956_v18  ;;  %v8805_v61 = vadd.f32 %v8500_v27, %v8711_v25 }
 0x2fb   : > { %v3595_v39 = vmul.f32 %v3563_v15, %v2219_v45  ;;  %v8801_v37 = vmul.f32 0.70710677, %v8786_v36  ;;  %v2857_v56 = vadd.f32 %v8757_v53, %v2856_v57  ;;  %vm2859_vm8 = vweird.f32 %v8757_v53 }
 0x2fc   : > { %6199 = vrcp.f32 %v8797_v50  ;;  %v2881_v48 = vadd.f32 1.1283791, %v2880_v8  ;;  %v2919_v24 = vadd.f32 0.18741608, %v2918_v26  ;;  %v8810_v63 = vmin.f32 %v2990_v60, 16.0 }
 0x2fd   : > { %v3620_v41 = vpack.c.bf16 %v3595_v39, %v3594_v22  ;;  %v2864_v34 = vand.u32 2147483648, %v8742_v2  ;;  %vm2858_vm9 = vweird.f32 %v8742_v2  ;;  %v2862_v14 = vand.u32 2147483647, %v8742_v2 }
 0x2fe   : > { %v2929_v25 = vmul.f32 %v2928_v1, %v8713_v31  ;;  %v2968_v20 = vadd.f32 0.112945676, %v2967_v4  ;;  %v8817_v0 = vmul.f32 0.5, %v8604_v55  ;;  %v8820_v13 = vmul.f32 0.5, %v8629_v6  ;;  %vm8827_vm10 = vmor %vm2858_vm9, %vm2859_vm8 }
 0x2ff   : > { %3736 = vmatmul.bf16.gmra.mxu2 %v3620_v41  ;;  %v2958_v10 = vmul.f32 %v2957_v52, %v8733_v29  ;;  %v3030_v38 = vmul.f32 %v8801_v37, %v8801_v37  ;;  %v8832_v2 = vmul.f32 0.70710677, %v8805_v61  ;;  %v8836_v55 = vadd.f32 %v8500_v27, %v8737_v33  ;;  %v2186_v33 = vpop.f32.mrf.mxu1 }
 0x300   : > { %v2861_v6 = vsel %vm8827_vm10, %v8757_v53, %v2857_v56  ;;  %v2930_v5 = vadd.f32 0.4994258, %v2929_v25  ;;  %v2842_v46 = vmul.f32 %v2841_v17, %v8613_v12  ;;  %v2882_v30 = vmul.f32 %v2881_v48, %v8642_v11 }
 0x301   : > { %v2865_v62 = vor.u32 1.1754944e-38, %v2864_v34  ;;  %v2969_v44 = vmul.f32 %v2968_v20, %v8733_v29  ;;  %v2920_v49 = vmul.f32 %v2919_v24, %v8713_v31  ;;  %v2992_v59 = vmul.f32 2.1237322e-06, %v8810_v63 }
 0x302   : > { %v6200_v32 = vpop.eup %6199  ;;  %vm2863_vm11 = vcmp.eq.f32.partialorder %v2862_v14, 8.507059e+37  ;;  %v2931_v7 = vmul.f32 %v2930_v5, %v8713_v31  ;;  %v2959_v42 = vadd.f32 0.18741608, %v2958_v10  ;;  %v8848_v12 = vmin.f32 %v3030_v38, 16.0 }
 0x303   : > { %v2866_v3 = vsel %vm2863_vm11, %v2865_v62, %v2861_v6  ;;  %v2894_v53 = vmul.f32 %v6200_v32, %v8797_v50  ;;  %v2970_v54 = vadd.f32 0.4994258, %v2969_v44  ;;  %v3070_v11 = vmul.f32 %v8832_v2, %v8832_v2 }
 0x304   : > { %v8853_v21 = vmul.f32 0.70710677, %v8836_v55  ;;  %v8855_v18 = vadd.f32 1.0, %v2931_v7  ;;  %v8859_v9 = vadd.f32 %v8500_v27, %v8760_v43  ;;  %v8862_v45 = vadd.f32 %v8500_v27, %v2186_v33 }
 0x305   : > { %v2895_v31 = vsub.f32 1.0, %v2894_v53  ;;  %v2971_v15 = vmul.f32 %v2970_v54, %v8733_v29  ;;  %v2867_v57 = vmul.f32 %v2866_v3, %v2842_v46  ;;  %v2904_v16 = vand.u32 2147483648, %v8797_v50 }
 0x306   : > { %6201 = vrcp.f32 %v8855_v18  ;;  %v3003_v8 = vmul.f32 3.8918573e-05, %v8810_v63  ;;  %vm2899_vm12 = vweird.f32 %v6200_v32  ;;  %v2902_v60 = vand.u32 2147483647, %v8797_v50 }
 0x307   : > { %v2896_v26 = vmul.f32 %v6200_v32, %v2895_v31  ;;  %v8869_v22 = vadd.f32 1.0, %v2971_v15  ;;  %v2921_v43 = vadd.f32 1.1283791, %v2920_v49  ;;  %v2960_v39 = vmul.f32 %v2959_v42, %v8733_v29 }
 0x308   : > { %v2993_v1 = vadd.f32 0.00028619796, %v2992_v59  ;;  %v3032_v4 = vmul.f32 2.1237322e-06, %v8848_v12  ;;  %v3110_v17 = vmul.f32 %v8853_v21, %v8853_v21  ;;  %vm2898_vm13 = vweird.f32 %v8797_v50 }
 0x309   : > { %v2897_v52 = vadd.f32 %v6200_v32, %v2896_v26  ;;  %v8877_v41 = vmul.f32 0.70710677, %v8862_v45  ;;  %v8880_v56 = vmul.f32 0.70710677, %v8859_v9  ;;  %v5856_v48 = vclamps-f32 %v2867_v57, 1.0  ;;  %vm2900_vm14 = vmor %vm2898_vm13, %vm2899_vm12 }
 0x30a   : > { %v2905_v24 = vor.u32 1.1754944e-38, %v2904_v16  ;;  %6203 = vrcp.f32 %v8869_v22  ;;  %v8883_v29 = vmin.f32 %v3070_v11, 16.0  ;;  %vm2903_vm15 = vcmp.eq.f32.partialorder %v2902_v60, 8.507059e+37 }
 0x30b   : > { %v2901_v34 = vsel %vm2900_vm14, %v6200_v32, %v2897_v52  ;;  %v3004_v14 = vadd.f32 0.001143296, %v3003_v8  ;;  %v2922_v20 = vmul.f32 %v2921_v43, %v8683_v51  ;;  %v3033_v50 = vadd.f32 0.00028619796, %v3032_v4 }
 0x30c   : > { %v6202_v25 = vpop.eup %6201  ;;  %v2906_v10 = vsel %vm2903_vm15, %v2905_v24, %v2901_v34  ;;  %v8888_v38 = vadd.f32 %v8500_v27, %v8791_v35  ;;  %v2994_v23 = vmul.f32 %v2993_v1, %v8810_v63  ;;  %v3230_v5 = vmul.f32 %v8877_v41, %v8877_v41 }
 0x30d   : > { %v2907_v6 = vmul.f32 %v2906_v10, %v2882_v30  ;;  %v2934_v46 = vmul.f32 %v6202_v25, %v8855_v18  ;;  %v2961_v62 = vadd.f32 1.1283791, %v2960_v39  ;;  %v8894_v44 = vmin.f32 %v3110_v17, 16.0 }
 0x30e   : > { %v3150_v51 = vmul.f32 %v8880_v56, %v8880_v56  ;;  %v3564_v32 = vadd.f32 1.0, %v5856_v48  ;;  %v3072_v49 = vmul.f32 2.1237322e-06, %v8883_v29  ;;  %v3005_v35 = vmul.f32 %v3004_v14, %v8810_v63 }
 0x30f   : > { %v5857_v59 = vclamps-f32 %v2907_v6, 1.0  ;;  %v2935_v27 = vsub.f32 1.0, %v2934_v46  ;;  %v3034_v30 = vmul.f32 %v3033_v50, %v8848_v12  ;;  %v8902_v7 = vmul.f32 0.70710677, %v8888_v38 }
 0x310   : > { %v6204_v33 = vpop.eup %6203  ;;  %v2942_v42 = vand.u32 2147483647, %v8855_v18  ;;  %v2944_v3 = vand.u32 2147483648, %v8855_v18  ;;  %v8906_v54 = vmin.f32 %v3230_v5, 16.0  ;;  %vm2939_vm0 = vweird.f32 %v6202_v25 }
 0x311   : > { %v3565_v53 = vadd.f32 1.0, %v5857_v59  ;;  %v2936_v11 = vmul.f32 %v6202_v25, %v2935_v27  ;;  %v3112_v31 = vmul.f32 2.1237322e-06, %v8894_v44  ;;  %v8909_v15 = vmin.f32 %v3150_v51, 16.0  ;;  %v2188_v59 = vpop.f32.mrf.mxu1 }
 0x312   : > { %v3596_v57 = vmul.f32 %v3564_v32, %v8817_v0  ;;  %v2974_v16 = vmul.f32 %v6204_v33, %v8869_v22  ;;  %vm2938_vm1 = vweird.f32 %v8855_v18  ;;  %v3006_v60 = vadd.f32 0.014752088, %v3005_v35 }
 0x313   : > { %v3597_v8 = vmul.f32 %v3565_v53, %v8820_v13  ;;  %v2937_v26 = vadd.f32 %v6202_v25, %v2936_v11  ;;  %v3190_v43 = vmul.f32 %v8902_v7, %v8902_v7  ;;  %vm2940_vm2 = vmor %vm2938_vm1, %vm2939_vm0  ;;  %vm2943_vm3 = vcmp.eq.f32.partialorder %v2942_v42, 8.507059e+37 }
 0x314   : > { %v2945_v39 = vor.u32 1.1754944e-38, %v2944_v3  ;;  %v2975_v1 = vsub.f32 1.0, %v2974_v16  ;;  %v3243_v17 = vmul.f32 3.8918573e-05, %v8906_v54  ;;  %v2984_v0 = vand.u32 2147483648, %v8869_v22 }
 0x315   : > { %v3621_v4 = vpack.c.bf16 %v3597_v8, %v3596_v57  ;;  %v2941_v52 = vsel %vm2940_vm2, %v6202_v25, %v2937_v26  ;;  %vm2979_vm4 = vweird.f32 %v6204_v33  ;;  %v2982_v13 = vand.u32 2147483647, %v8869_v22  ;;  %v8936_v16 = vld [vmem:[%s11106_s6] ss:$0 sm:$0xff] }
 0x316   : > { %v2946_v48 = vsel %vm2943_vm3, %v2945_v39, %v2941_v52  ;;  %v2976_v24 = vmul.f32 %v6204_v33, %v2975_v1  ;;  %v2995_v18 = vadd.f32 0.0036580483, %v2994_v23  ;;  %v3152_v34 = vmul.f32 2.1237322e-06, %v8909_v15 }
 0x317   : > { %3741 = vmatmul.bf16.gmra.mxu2 %v3621_v4  ;;  %v2947_v14 = vmul.f32 %v2946_v48, %v2922_v20  ;;  %v3007_v50 = vmul.f32 %v3006_v60, %v8810_v63  ;;  %v3035_v10 = vadd.f32 0.0036580483, %v3034_v30  ;;  %v3073_v6 = vadd.f32 0.00028619796, %v3072_v49 }
 0x318   : > { %v2977_v5 = vadd.f32 %v6204_v33, %v2976_v24  ;;  %vm2978_vm5 = vweird.f32 %v8869_v22  ;;  %v2962_v25 = vmul.f32 %v2961_v62, %v8716_v47  ;;  %v3113_v46 = vadd.f32 0.00028619796, %v3112_v31 }
 0x319   : > { %v3244_v51 = vadd.f32 0.001143296, %v3243_v17  ;;  %vm2980_vm6 = vmor %vm2978_vm5, %vm2979_vm4  ;;  %v2985_v32 = vor.u32 1.1754944e-38, %v2984_v0  ;;  %v8924_v27 = vmin.f32 %v3190_v43, 16.0  ;;  %v5858_v23 = vclamps-f32 %v2947_v14, 1.0  ;;  %v3707_v43 = vpop.f32.mrf.mxu2 }
 0x31a   : > { %v2981_v35 = vsel %vm2980_vm6, %v6204_v33, %v2977_v5  ;;  %vm2983_vm7 = vcmp.eq.f32.partialorder %v2982_v13, 8.507059e+37  ;;  %v2996_v20 = vmul.f32 %v2995_v18, %v8810_v63  ;;  %v3153_v42 = vadd.f32 0.00028619796, %v3152_v34  ;;  %v8944_v17 = vld [vmem:[%s11104_s4] ss:$0 sm:$0xff] }
 0x31b   : > { %v2986_v30 = vsel %vm2983_vm7, %v2985_v32, %v2981_v35  ;;  %v3008_v49 = vadd.f32 0.112945676, %v3007_v50  ;;  %v3036_v3 = vmul.f32 %v3035_v10, %v8848_v12  ;;  %v3074_v22 = vmul.f32 %v3073_v6, %v8883_v29  ;;  %v2191_v10 = vpop.f32.mrf.mxu1 }
 0x31c   : > { %v2987_v47 = vmul.f32 %v2986_v30, %v2962_v25  ;;  %v2222_v62 = vmul.f32 0.5, %v8663_v40  ;;  %v3114_v53 = vmul.f32 %v3113_v46, %v8894_v44  ;;  %v3245_v11 = vmul.f32 %v3244_v51, %v8906_v54 }
 0x31d   : > { %v3192_v31 = vmul.f32 2.1237322e-06, %v8924_v27  ;;  %v3566_v57 = vadd.f32 1.0, %v5858_v23  ;;  %v2223_v8 = vmul.f32 0.5, %v8703_v19  ;;  %v2997_v26 = vadd.f32 0.05243302, %v2996_v20 }
 0x31e   : > { %v5859_v33 = vclamps-f32 %v2987_v47, 1.0  ;;  %v3154_v60 = vmul.f32 %v3153_v42, %v8909_v15  ;;  %v3009_v40 = vmul.f32 %v3008_v49, %v8810_v63  ;;  %v3037_v39 = vadd.f32 0.05243302, %v3036_v3 }
 0x31f   : > { %v3075_v1 = vadd.f32 0.0036580483, %v3074_v22  ;;  %v8947_v52 = vadd.f32 %v8944_v17, %v2188_v59  ;;  %v3115_v0 = vadd.f32 0.0036580483, %v3114_v53  ;;  %v3232_v19 = vmul.f32 2.1237322e-06, %v8906_v54 }
 0x320   : > { %v3567_v4 = vadd.f32 1.0, %v5859_v33  ;;  %v3246_v48 = vadd.f32 0.014752088, %v3245_v11  ;;  %v3193_v24 = vadd.f32 0.00028619796, %v3192_v31  ;;  %v3598_v13 = vmul.f32 %v3566_v57, %v2222_v62 }
 0x321   : > { %v8951_v34 = vadd.f32 %v8936_v16, %v3707_v43  ;;  %v2998_v14 = vmul.f32 %v2997_v26, %v8810_v63  ;;  %v3155_v50 = vadd.f32 0.0036580483, %v3154_v60  ;;  %v3010_v6 = vadd.f32 0.4994258, %v3009_v40 }
 0x322   : > { %v3599_v18 = vmul.f32 %v3567_v4, %v2223_v8  ;;  %v3038_v5 = vmul.f32 %v3037_v39, %v8848_v12  ;;  %v3076_v25 = vmul.f32 %v3075_v1, %v8883_v29  ;;  %v8957_v51 = vmul.f32 0.70710677, %v8947_v52 }
 0x323   : > { %v3116_v32 = vmul.f32 %v3115_v0, %v8894_v44  ;;  %v3233_v59 = vadd.f32 0.00028619796, %v3232_v19  ;;  %v3247_v23 = vmul.f32 %v3246_v48, %v8906_v54  ;;  %v3194_v35 = vmul.f32 %v3193_v24, %v8924_v27 }
 0x324   : > { %v3622_v46 = vpack.c.bf16 %v3599_v18, %v3598_v13  ;;  %v8963_v20 = vmul.f32 0.70710677, %v8951_v34  ;;  %v8966_v42 = vadd.f32 %v8944_v17, %v2191_v10  ;;  %v2999_v30 = vadd.f32 0.18741608, %v2998_v14 }
 0x325   : > { %v3156_v49 = vmul.f32 %v3155_v50, %v8909_v15  ;;  %v3011_v3 = vmul.f32 %v3010_v6, %v8810_v63  ;;  %v3039_v22 = vadd.f32 0.18741608, %v3038_v5  ;;  %v3077_v47 = vadd.f32 0.05243302, %v3076_v25 }
 0x326   : > { %v3270_v62 = vmul.f32 %v8957_v51, %v8957_v51  ;;  %v3117_v53 = vadd.f32 0.05243302, %v3116_v32  ;;  %v3234_v11 = vmul.f32 %v3233_v59, %v8906_v54  ;;  %v3248_v31 = vadd.f32 0.112945676, %v3247_v23 }
 0x327   : > { %3746 = vmatmul.bf16.gmra.mxu2 %v3622_v46  ;;  %v3043_v33 = vmul.f32 3.8918573e-05, %v8848_v12  ;;  %v3195_v57 = vadd.f32 0.0036580483, %v3194_v35  ;;  %v3851_v8 = vmul.f32 %v8963_v20, %v8963_v20  ;;  %v8977_v26 = vmul.f32 0.70710677, %v8966_v42  ;;  %v3709_v46 = vpop.f32.mrf.mxu2 }
 0x328   : > { %v3000_v60 = vmul.f32 %v2999_v30, %v8810_v63  ;;  %v3157_v43 = vadd.f32 0.05243302, %v3156_v49  ;;  %v8980_v40 = vadd.f32 1.0, %v3011_v3  ;;  %v3040_v39 = vmul.f32 %v3039_v22, %v8848_v12 }
 0x329   : > { %v3078_v1 = vmul.f32 %v3077_v47, %v8883_v29  ;;  %v8984_v4 = vmin.f32 %v3270_v62, 16.0  ;;  %v3118_v0 = vmul.f32 %v3117_v53, %v8894_v44  ;;  %v3235_v19 = vadd.f32 0.0036580483, %v3234_v11 }
 0x32a   : > { %v3249_v48 = vmul.f32 %v3248_v31, %v8906_v54  ;;  %v3044_v24 = vadd.f32 0.001143296, %v3043_v33  ;;  %v3196_v13 = vmul.f32 %v3195_v57, %v8924_v27  ;;  %v8989_v18 = vmin.f32 %v3851_v8, 16.0 }
 0x32b   : > { %v3310_v63 = vmul.f32 %v8977_v26, %v8977_v26  ;;  %v8994_v14 = vmul.f32 0.5, %v8771_v28  ;;  %v3001_v50 = vadd.f32 1.1283791, %v3000_v60  ;;  %v3158_v10 = vmul.f32 %v3157_v43, %v8909_v15 }
 0x32c   : > { %6205 = vrcp.f32 %v8980_v40  ;;  %v3041_v6 = vadd.f32 1.1283791, %v3040_v39  ;;  %v3079_v5 = vadd.f32 0.18741608, %v3078_v1  ;;  %v3283_v25 = vmul.f32 3.8918573e-05, %v8984_v4 }
 0x32d   : > { %v3119_v32 = vadd.f32 0.18741608, %v3118_v0  ;;  %v3236_v59 = vmul.f32 %v3235_v19, %v8906_v54  ;;  %v3250_v23 = vadd.f32 0.4994258, %v3249_v48  ;;  %v3045_v35 = vmul.f32 %v3044_v24, %v8848_v12 }
 0x32e   : > { %v9002_v30 = vmul.f32 0.5, %v8786_v36  ;;  %v3197_v28 = vadd.f32 0.05243302, %v3196_v13  ;;  %v3853_v49 = vmul.f32 2.1237322e-06, %v8989_v18  ;;  %v9005_v3 = vmin.f32 %v3310_v63, 16.0 }
 0x32f   : > { %v9008_v22 = vmul.f32 %v3001_v50, %v8777_v58  ;;  %v9011_v47 = vmul.f32 0.5, %v8805_v61  ;;  %v3159_v62 = vadd.f32 0.18741608, %v3158_v10  ;;  %v9014_v53 = vadd.f32 %v8936_v16, %v3709_v46 }
 0x330   : > { %v9017_v11 = vmul.f32 %v3041_v6, %v8801_v37  ;;  %v3080_v36 = vmul.f32 %v3079_v5, %v8883_v29  ;;  %v9021_v31 = vmul.f32 0.5, %v8836_v55  ;;  %v3284_v33 = vadd.f32 0.001143296, %v3283_v25 }
 0x331   : > { %v3120_v58 = vmul.f32 %v3119_v32, %v8894_v44  ;;  %v3237_v8 = vadd.f32 0.05243302, %v3236_v59  ;;  %v3251_v61 = vmul.f32 %v3250_v23, %v8906_v54  ;;  %v3046_v60 = vadd.f32 0.014752088, %v3045_v35 }
 0x332   : > { %v9023_v57 = vpop.eup %6205  ;;  %v3198_v43 = vmul.f32 %v3197_v28, %v8924_v27  ;;  %v3854_v39 = vadd.f32 0.00028619796, %v3853_v49  ;;  %v3323_v37 = vmul.f32 3.8918573e-05, %v9005_v3  ;;  %v3083_v1 = vmul.f32 3.8918573e-05, %v8883_v29 }
 0x333   : > { %v9031_v0 = vmul.f32 0.5, %v8859_v9  ;;  %v3160_v55 = vmul.f32 %v3159_v62, %v8909_v15  ;;  %v9035_v19 = vmul.f32 0.70710677, %v9014_v53  ;;  %v3047_v48 = vmul.f32 %v3046_v60, %v8848_v12 }
 0x334   : > { %v3081_v24 = vadd.f32 1.1283791, %v3080_v36  ;;  %v3285_v13 = vmul.f32 %v3284_v33, %v8984_v4  ;;  %v3014_v63 = vmul.f32 %v9023_v57, %v8980_v40  ;;  %v3084_v50 = vadd.f32 0.001143296, %v3083_v1 }
 0x335   : > { %11200 = vst [vmem:[#allocation19_spill] sm:$0xff] %v9031_v0  ;;  %v3121_v10 = vadd.f32 1.1283791, %v3120_v58  ;;  %v3238_v6 = vmul.f32 %v3237_v8, %v8906_v54  ;;  %v9042_v5 = vadd.f32 1.0, %v3251_v61  ;;  %v3048_v9 = vadd.f32 0.112945676, %v3047_v48 }
 0x336   : > { %v3199_v25 = vadd.f32 0.18741608, %v3198_v43  ;;  %v3855_v46 = vmul.f32 %v3854_v39, %v8989_v18  ;;  %v3324_v32 = vadd.f32 0.001143296, %v3323_v37  ;;  %v3085_v59 = vmul.f32 %v3084_v50, %v8883_v29 }
 0x337   : > { %v3161_v23 = vadd.f32 1.1283791, %v3160_v55  ;;  %v3272_v35 = vmul.f32 2.1237322e-06, %v8984_v4  ;;  %v3891_v28 = vmul.f32 %v9035_v19, %v9035_v19  ;;  %v3049_v49 = vmul.f32 %v3048_v9, %v8848_v12 }
 0x338   : > { %v9051_v62 = vmul.f32 %v3081_v24, %v8832_v2  ;;  %v3286_v36 = vadd.f32 0.014752088, %v3285_v13  ;;  %v3015_v33 = vsub.f32 1.0, %v3014_v63  ;;  %v3086_v58 = vadd.f32 0.014752088, %v3085_v59  ;;  %v2193_v24 = vpop.f32.mrf.mxu1 }
 0x339   : > { %v9054_v8 = vmul.f32 0.5, %v8888_v38  ;;  %v3239_v61 = vadd.f32 0.18741608, %v3238_v6  ;;  %6207 = vrcp.f32 %v9042_v5  ;;  %v3050_v60 = vadd.f32 0.4994258, %v3049_v49 }
 0x33a   : > { %v3200_v43 = vmul.f32 %v3199_v25, %v8924_v27  ;;  %v3856_v39 = vadd.f32 0.0036580483, %v3855_v46  ;;  %v3325_v37 = vmul.f32 %v3324_v32, %v9005_v3  ;;  %v3087_v1 = vmul.f32 %v3086_v58, %v8883_v29 }
 0x33b   : > { %11201 = vst [vmem:[#allocation20_spill] sm:$0xff] %v9054_v8  ;;  %v9061_v2 = vmul.f32 %v3121_v10, %v8853_v21  ;;  %v9064_v55 = vmul.f32 0.5, %v8862_v45  ;;  %v3273_v48 = vadd.f32 0.00028619796, %v3272_v35  ;;  %v9066_v38 = vmin.f32 %v3891_v28, 16.0 }
 0x33c   : > { %v9069_v13 = vmul.f32 %v3161_v23, %v8880_v56  ;;  %v3287_v63 = vmul.f32 %v3286_v36, %v8984_v4  ;;  %v3016_v50 = vmul.f32 %v9023_v57, %v3015_v33  ;;  %v3051_v6 = vmul.f32 %v3050_v60, %v8848_v12 }
 0x33d   : > { %v3240_v9 = vmul.f32 %v3239_v61, %v8906_v54  ;;  %v9076_v21 = vmul.f32 0.5, %v8951_v34  ;;  %v9079_v45 = vadd.f32 %v8944_v17, %v2193_v24  ;;  %v3088_v10 = vadd.f32 0.112945676, %v3087_v1 }
 0x33e   : > { %11202 = vst [vmem:[#allocation16_spill] sm:$0xff] %v9069_v13  ;;  %v3201_v25 = vadd.f32 1.1283791, %v3200_v43  ;;  %v3857_v46 = vmul.f32 %v3856_v39, %v8989_v18  ;;  %v3326_v56 = vadd.f32 0.014752088, %v3325_v37  ;;  %v9082_v32 = vadd.f32 1.0, %v3051_v6 }
 0x33f   : > { %11203 = vst [vmem:[#allocation17_spill] sm:$0xff] %v9076_v21  ;;  %v9084_v59 = vpop.eup %6207  ;;  %v3274_v23 = vmul.f32 %v3273_v48, %v8984_v4  ;;  %v3893_v12 = vmul.f32 2.1237322e-06, %v9066_v38  ;;  %v9089_v54 = vmul.f32 0.70710677, %v9079_v45  ;;  %v3089_v34 = vmul.f32 %v3088_v10, %v8883_v29 }
 0x340   : > { %v3288_v35 = vadd.f32 0.112945676, %v3287_v63  ;;  %v3017_v28 = vadd.f32 %v9023_v57, %v3016_v50  ;;  %vm3019_vm8 = vweird.f32 %v9023_v57  ;;  %6209 = vrcp.f32 %v9082_v32 }
 0x341   : > { %v9095_v49 = vadd.f32 1.1283791, %v3240_v9  ;;  %v3312_v36 = vmul.f32 2.1237322e-06, %v9005_v3  ;;  %v3024_v33 = vand.u32 2147483648, %v8980_v40  ;;  %v3350_v58 = vmul.f32 %v9089_v54, %v9089_v54 }
 0x342   : > { %v3254_v61 = vmul.f32 %v9084_v59, %v9042_v5  ;;  %v3327_v60 = vmul.f32 %v3326_v56, %v9005_v3  ;;  %vm3018_vm9 = vweird.f32 %v8980_v40  ;;  %v3022_v43 = vand.u32 2147483647, %v8980_v40 }
 0x343   : > { %v9107_v39 = vmul.f32 %v3201_v25, %v8902_v7  ;;  %v3858_v37 = vadd.f32 0.05243302, %v3857_v46  ;;  %v3275_v1 = vadd.f32 0.0036580483, %v3274_v23  ;;  %vm9109_vm10 = vmor %vm3018_vm9, %vm3019_vm8  ;;  %v3090_v24 = vadd.f32 0.4994258, %v3089_v34 }
 0x344   : > { %v3289_v63 = vmul.f32 %v3288_v35, %v8984_v4  ;;  %v3894_v50 = vadd.f32 0.00028619796, %v3893_v12  ;;  %v3021_v6 = vsel %vm9109_vm10, %v9023_v57, %v3017_v28  ;;  %v3123_v9 = vmul.f32 3.8918573e-05, %v8894_v44 }
 0x345   : > { %11204 = vst [vmem:[#allocation21_spill] sm:$0xff] %v9107_v39  ;;  %v3262_v40 = vand.u32 2147483647, %v9042_v5  ;;  %v3313_v7 = vadd.f32 0.00028619796, %v3312_v36  ;;  %v3025_v10 = vor.u32 1.1754944e-38, %v3024_v33  ;;  %v3859_v12 = vmul.f32 %v3858_v37, %v8989_v18 }
 0x346   : > { %v9119_v25 = vmin.f32 %v3350_v58, 16.0  ;;  %v6210_v46 = vpop.eup %6209  ;;  %v3255_v56 = vsub.f32 1.0, %v3254_v61  ;;  %v3264_v23 = vand.u32 2147483648, %v9042_v5  ;;  %v3328_v34 = vadd.f32 0.112945676, %v3327_v60 }
 0x347   : > { %vm3023_vm11 = vcmp.eq.f32.partialorder %v3022_v43, 8.507059e+37  ;;  %v3054_v48 = vmul.f32 %v6210_v46, %v9082_v32  ;;  %v3091_v57 = vmul.f32 %v3090_v24, %v8883_v29  ;;  %vm3258_vm12 = vweird.f32 %v9042_v5 }
 0x348   : > { %v3026_v35 = vsel %vm3023_vm11, %v3025_v10, %v3021_v6  ;;  %v3276_v28 = vmul.f32 %v3275_v1, %v8984_v4  ;;  %v3290_v36 = vadd.f32 0.4994258, %v3289_v63  ;;  %v3895_v33 = vmul.f32 %v3894_v50, %v9066_v38  ;;  %v3712_v50 = vpop.f32.mrf.mxu2 }
 0x349   : > { %v3124_v58 = vadd.f32 0.001143296, %v3123_v9  ;;  %vm3259_vm13 = vweird.f32 %v9084_v59  ;;  %v3314_v61 = vmul.f32 %v3313_v7, %v9005_v3  ;;  %v3055_v60 = vsub.f32 1.0, %v3054_v48 }
 0x34a   : > { %v3363_v43 = vmul.f32 3.8918573e-05, %v9119_v25  ;;  %v3256_v37 = vmul.f32 %v9084_v59, %v3255_v56  ;;  %v3329_v6 = vmul.f32 %v3328_v34, %v9005_v3  ;;  %v3027_v29 = vmul.f32 %v3026_v35, %v9008_v22  ;;  %vm9154_vm2 = vmor %vm3258_vm12, %vm3259_vm13 }
 0x34b   : > { %v3064_v24 = vand.u32 2147483648, %v9082_v32  ;;  %v3056_v1 = vmul.f32 %v6210_v46, %v3055_v60  ;;  %vm3059_vm14 = vweird.f32 %v6210_v46  ;;  %v3062_v63 = vand.u32 2147483647, %v9082_v32 }
 0x34c   : > { %v9136_v9 = vadd.f32 1.0, %v3091_v57  ;;  %v3277_v10 = vadd.f32 0.05243302, %v3276_v28  ;;  %v3291_v7 = vmul.f32 %v3290_v36, %v8984_v4  ;;  %v3896_v48 = vadd.f32 0.0036580483, %v3895_v33  ;;  %v2196_v36 = vpop.f32.mrf.mxu1 }
 0x34d   : > { %v3125_v21 = vmul.f32 %v3124_v58, %v8894_v44  ;;  %v3315_v56 = vadd.f32 0.0036580483, %v3314_v61  ;;  %v3057_v8 = vadd.f32 %v6210_v46, %v3056_v1  ;;  %vm3058_vm15 = vweird.f32 %v9082_v32 }
 0x34e   : > { %v3364_v22 = vadd.f32 0.001143296, %v3363_v43  ;;  %v3257_v34 = vadd.f32 %v9084_v59, %v3256_v37  ;;  %v3330_v35 = vadd.f32 0.4994258, %v3329_v6  ;;  %v5860_v60 = vclamps-f32 %v3027_v29, 1.0  ;;  %vm3060_vm0 = vmor %vm3058_vm15, %vm3059_vm14 }
 0x34f   : > { %v3065_v0 = vor.u32 1.1754944e-38, %v3064_v24  ;;  %v3061_v57 = vsel %vm3060_vm0, %v6210_v46, %v3057_v8  ;;  %vm3063_vm1 = vcmp.eq.f32.partialorder %v3062_v63, 8.507059e+37  ;;  %v9144_v28 = vadd.f32 %v8936_v16, %v3712_v50 }
 0x350   : > { %6211 = vrcp.f32 %v9136_v9  ;;  %v3278_v33 = vmul.f32 %v3277_v10, %v8984_v4  ;;  %v9148_v58 = vadd.f32 1.0, %v3291_v7  ;;  %v3126_v61 = vadd.f32 0.014752088, %v3125_v21 }
 0x351   : > { %v3066_v32 = vsel %vm3063_vm1, %v3065_v0, %v3061_v57  ;;  %vm9158_vm3 = vcmp.eq.f32.partialorder %v3262_v40, 8.507059e+37  ;;  %v3316_v46 = vmul.f32 %v3315_v56, %v9005_v3  ;;  %v3365_v6 = vmul.f32 %v3364_v22, %v9119_v25 }
 0x352   : > { %v3067_v37 = vmul.f32 %v3066_v32, %v9017_v11  ;;  %v3261_v0 = vsel %vm9154_vm2, %v9084_v59, %v3257_v34  ;;  %v3897_v5 = vmul.f32 %v3896_v48, %v9066_v38  ;;  %v3331_v21 = vmul.f32 %v3330_v35, %v9005_v3 }
 0x353   : > { %v9171_v29 = vadd.f32 %v8944_v17, %v2196_v36  ;;  %v3265_v40 = vor.u32 1.1754944e-38, %v3264_v23  ;;  %v3568_v1 = vadd.f32 1.0, %v5860_v60  ;;  %v9174_v63 = vmul.f32 0.70710677, %v9144_v28  ;;  %v3714_v23 = vpop.f32.mrf.mxu2 }
 0x354   : > { %v5861_v24 = vclamps-f32 %v3067_v37, 1.0  ;;  %v3860_v11 = vadd.f32 0.18741608, %v3859_v12  ;;  %v3279_v50 = vadd.f32 0.18741608, %v3278_v33  ;;  %6213 = vrcp.f32 %v9148_v58 }
 0x355   : > { %11211 = vst [vmem:[#allocation18_spill] sm:$0xff] %v9174_v63  ;;  %v3127_v10 = vmul.f32 %v3126_v61, %v8894_v44  ;;  %v3266_v7 = vsel %vm9158_vm3, %v3265_v40, %v3261_v0  ;;  %v3317_v48 = vadd.f32 0.05243302, %v3316_v46  ;;  %v3366_v22 = vadd.f32 0.014752088, %v3365_v6 }
 0x356   : > { %v9178_v59 = vpop.eup %6211  ;;  %v3569_v56 = vadd.f32 1.0, %v5861_v24  ;;  %v3242_v34 = vmul.f32 %v9095_v49, %v8877_v41  ;;  %v3898_v35 = vadd.f32 0.05243302, %v3897_v5  ;;  %v9184_v60 = vadd.f32 1.0, %v3331_v21 }
 0x357   : > { %v9187_v12 = vmul.f32 0.70710677, %v9171_v29  ;;  %v3600_v57 = vmul.f32 %v3568_v1, %v8994_v14  ;;  %v3931_v33 = vmul.f32 %v9174_v63, %v9174_v63  ;;  %v3163_v32 = vmul.f32 3.8918573e-05, %v8909_v15 }
 0x358   : > { %v3601_v36 = vmul.f32 %v3569_v56, %v9002_v30  ;;  %v3267_v61 = vmul.f32 %v3266_v7, %v3242_v34  ;;  %v9195_v43 = vadd.f32 %v8936_v16, %v3714_v23  ;;  %v3094_v41 = vmul.f32 %v9178_v59, %v9136_v9 }
 0x359   : > { %11212 = vst [vmem:[#allocation22_spill] sm:$0xff] %v9187_v12  ;;  %v3128_v49 = vadd.f32 0.112945676, %v3127_v10  ;;  %v9200_v8 = vmul.f32 0.5, %v8947_v52  ;;  %v3318_v14 = vmul.f32 %v3317_v48, %v9005_v3  ;;  %v3367_v30 = vmul.f32 %v3366_v22, %v9119_v25 }
 0x35a   : > { %v3623_v46 = vpack.c.bf16 %v3601_v36, %v3600_v57  ;;  %v9204_v37 = vpop.eup %6213  ;;  %v3280_v6 = vmul.f32 %v3279_v50, %v8984_v4  ;;  %v9208_v0 = vmul.f32 0.5, %v9014_v53  ;;  %6215 = vrcp.f32 %v9184_v60 }
 0x35b   : > { %v3390_v5 = vmul.f32 %v9187_v12, %v9187_v12  ;;  %v3861_v52 = vmul.f32 %v3860_v11, %v8989_v18  ;;  %v3899_v21 = vmul.f32 %v3898_v35, %v9066_v38  ;;  %v9215_v40 = vmin.f32 %v3931_v33, 16.0 }
 0x35c   : > { %11213 = vst [vmem:[#allocation23_spill] sm:$0xff] %v9208_v0  ;;  %3751 = vmatmul.bf16.gmra.mxu2 %v3623_v46  ;;  %v3164_v24 = vadd.f32 0.001143296, %v3163_v32  ;;  %v5866_v1 = vclamps-f32 %v3267_v61, 1.0  ;;  %v9218_v10 = vmul.f32 0.70710677, %v9195_v43  ;;  %v3129_v53 = vmul.f32 %v3128_v49, %v8894_v44 }
 0x35d   : > { %v3095_v4 = vsub.f32 1.0, %v3094_v41  ;;  %v3294_v50 = vmul.f32 %v9204_v37, %v9148_v58  ;;  %v9224_v7 = vmul.f32 0.5, %v8966_v42  ;;  %v3319_v11 = vadd.f32 0.18741608, %v3318_v14 }
 0x35e   : > { %11214 = vst [vmem:[#allocation24_spill] sm:$0xff] %v9218_v10  ;;  %v3368_v48 = vadd.f32 0.112945676, %v3367_v30  ;;  %v3281_v56 = vadd.f32 1.1283791, %v3280_v6  ;;  %v3304_v22 = vand.u32 2147483648, %v9148_v58  ;;  %v3165_v33 = vmul.f32 %v3164_v24, %v8909_v15 }
 0x35f   : > { %v9227_v23 = vmin.f32 %v3390_v5, 16.0  ;;  %v3130_v34 = vadd.f32 0.4994258, %v3129_v53  ;;  %v9229_v35 = vadd.f32 1.1283791, %v3861_v52  ;;  %v9237_v42 = vadd.f32 1.0, %v5866_v1 }
 0x360   : > { %v9231_v57 = vadd.f32 0.18741608, %v3899_v21  ;;  %v3933_v36 = vmul.f32 2.1237322e-06, %v9215_v40  ;;  %v9235_v32 = vpop.eup %6215  ;;  %v3971_v61 = vmul.f32 %v9218_v10, %v9218_v10  ;;  %v3096_v41 = vmul.f32 %v9178_v59, %v3095_v4  ;;  %v6007_v1 = vld [vmem:[#allocation10 + $0x38] sm:$0xff] }
 0x361   : > { %v3131_v49 = vmul.f32 %v3130_v34, %v8894_v44  ;;  %v3295_v14 = vsub.f32 1.0, %v3294_v50  ;;  %v3320_v30 = vmul.f32 %v3319_v11, %v9005_v3  ;;  %v3369_v6 = vmul.f32 %v3368_v48, %v9119_v25  ;;  %5279 = vmatpush.bf16.msra.mxu3 %v6007_v1  ;;  %v2198_v34 = vpop.f32.mrf.mxu1 }
 0x362   : > { %v9247_v5 = vmul.f32 %v3281_v56, %v8957_v51  ;;  %v9249_v52 = vor.u32 1.1754944e-38, %v3304_v22  ;;  %v3403_v21 = vmul.f32 3.8918573e-05, %v9227_v23  ;;  %v3334_v44 = vmul.f32 %v9235_v32, %v9184_v60 }
 0x363   : > { %v9252_v24 = vadd.f32 1.0, %v3131_v49  ;;  %v3934_v4 = vadd.f32 0.00028619796, %v3933_v36  ;;  %v3352_v53 = vmul.f32 2.1237322e-06, %v9119_v25  ;;  %v9257_v3 = vmin.f32 %v3971_v61, 16.0 }
 0x364   : > { %v3166_v50 = vadd.f32 0.014752088, %v3165_v33  ;;  %v3097_v11 = vadd.f32 %v9178_v59, %v3096_v41  ;;  %vm3099_vm4 = vweird.f32 %v9178_v59  ;;  %v3296_v51 = vmul.f32 %v9204_v37, %v3295_v14  ;;  %v6006_v41 = vld [vmem:[#allocation10 + $0x30] sm:$0xff] }
 0x365   : > { %6217 = vrcp.f32 %v9252_v24  ;;  %v9263_v48 = vadd.f32 1.1283791, %v3320_v30  ;;  %v3370_v56 = vadd.f32 0.4994258, %v3369_v6  ;;  %v3104_v22 = vand.u32 2147483648, %v9136_v9  ;;  %5280 = vmatpush.bf16.msra.mxu3 %v6006_v41 }
 0x366   : > { %vm3299_vm5 = vweird.f32 %v9204_v37  ;;  %v3344_v36 = vand.u32 2147483648, %v9184_v60  ;;  %v3404_v33 = vadd.f32 0.001143296, %v3403_v21  ;;  %vm3098_vm6 = vweird.f32 %v9136_v9 }
 0x367   : > { %v3102_v61 = vand.u32 2147483647, %v9136_v9  ;;  %v3335_v49 = vsub.f32 1.0, %v3334_v44  ;;  %v3342_v1 = vand.u32 2147483647, %v9184_v60  ;;  %vm9273_vm7 = vmor %vm3098_vm6, %vm3099_vm4  ;;  %v9278_v30 = vadd.f32 %v8944_v17, %v2198_v34 }
 0x368   : > { %v3167_v6 = vmul.f32 %v3166_v50, %v8909_v15  ;;  %vm3298_vm8 = vweird.f32 %v9148_v58  ;;  %v3935_v21 = vmul.f32 %v3934_v4, %v9215_v40  ;;  %v3353_v9 = vadd.f32 0.00028619796, %v3352_v53 }
 0x369   : > { %11217 = vst [vmem:[#allocation25_spill] sm:$0xff] %v9278_v30  ;;  %v3973_v44 = vmul.f32 2.1237322e-06, %v9257_v3  ;;  %v3101_v46 = vsel %vm9273_vm7, %v9178_v59, %v3097_v11  ;;  %v3371_v0 = vmul.f32 %v3370_v56, %v9119_v25  ;;  %v3392_v39 = vmul.f32 2.1237322e-06, %v9227_v23  ;;  %v6005_v59 = vld [vmem:[#allocation10 + $0x28] sm:$0xff]  ;;  %vm9330_vm15 = vmor %vm3298_vm8, %vm3299_vm5 }
 0x36a   : > { %v3105_v34 = vor.u32 1.1754944e-38, %v3104_v22  ;;  %v9290_v13 = vmul.f32 0.70710677, %v9278_v30  ;;  %v9293_v12 = vadd.f32 %v9204_v37, %v3296_v51  ;;  %vm3338_vm9 = vweird.f32 %v9184_v60  ;;  %5281 = vmatpush.bf16.msra.mxu3 %v6005_v59 }
 0x36b   : > { %v6218_v50 = vpop.eup %6217  ;;  %v9296_v4 = vor.u32 1.1754944e-38, %v3344_v36  ;;  %v3405_v53 = vmul.f32 %v3404_v33, %v9227_v23  ;;  %vm3103_vm10 = vcmp.eq.f32.partialorder %v3102_v61, 8.507059e+37  ;;  %v3336_v11 = vmul.f32 %v9235_v32, %v3335_v49 }
 0x36c   : > { %v3106_v56 = vsel %vm3103_vm10, %v3105_v34, %v3101_v46  ;;  %v3134_v22 = vmul.f32 %v6218_v50, %v9252_v24  ;;  %v3168_v41 = vadd.f32 0.112945676, %v3167_v6  ;;  %v3936_v14 = vadd.f32 0.0036580483, %v3935_v21 }
 0x36d   : > { %v3354_v30 = vmul.f32 %v3353_v9, %v9119_v25  ;;  %v3974_v10 = vadd.f32 0.00028619796, %v3973_v44  ;;  %v3430_v51 = vmul.f32 %v9290_v13, %v9290_v13  ;;  %vm3339_vm11 = vweird.f32 %v9235_v32 }
 0x36e   : > { %v9305_v36 = vadd.f32 1.0, %v3371_v0  ;;  %v3393_v33 = vadd.f32 0.00028619796, %v3392_v39  ;;  %v3135_v61 = vsub.f32 1.0, %v3134_v22  ;;  %v3406_v63 = vadd.f32 0.014752088, %v3405_v53  ;;  %v2201_v22 = vpop.f32.mrf.mxu1  ;;  %vm9346_vm2 = vmor %vm3338_vm9, %vm3339_vm11 }
 0x36f   : > { %v3107_v46 = vmul.f32 %v3106_v56, %v9051_v62  ;;  %v3142_v49 = vand.u32 2147483647, %v9252_v24  ;;  %v3144_v6 = vand.u32 2147483648, %v9252_v24  ;;  %v11218_v21 = vand.u32 2147483647, %v9148_v58 }
 0x370   : > { %vm9316_vm13 = vcmp.eq.f32.partialorder %v3342_v1, 8.507059e+37  ;;  %v3136_v0 = vmul.f32 %v6218_v50, %v3135_v61  ;;  %vm3139_vm14 = vweird.f32 %v6218_v50  ;;  %v9320_v39 = vmin.f32 %v3430_v51, 16.0 }
 0x371   : > { %vm9312_vm12 = vcmp.eq.f32.partialorder %v11218_v21, 8.507059e+37  ;;  %v3169_v62 = vmul.f32 %v3168_v41, %v8909_v15  ;;  %v3337_v34 = vadd.f32 %v9235_v32, %v3336_v11  ;;  %v3937_v53 = vmul.f32 %v3936_v14, %v9215_v40 }
 0x372   : > { %v3355_v59 = vadd.f32 0.0036580483, %v3354_v30  ;;  %v3975_v56 = vmul.f32 %v3974_v10, %v9257_v3  ;;  %6219 = vrcp.f32 %v9305_v36  ;;  %v3394_v41 = vmul.f32 %v3393_v33, %v9227_v23 }
 0x373   : > { %v3137_v51 = vadd.f32 %v6218_v50, %v3136_v0  ;;  %vm3138_vm0 = vweird.f32 %v9252_v24  ;;  %v3407_v30 = vmul.f32 %v3406_v63, %v9227_v23  ;;  %v3145_v10 = vor.u32 1.1754944e-38, %v3144_v6 }
 0x374   : > { %vm3140_vm1 = vmor %vm3138_vm0, %vm3139_vm14  ;;  %v3443_v11 = vmul.f32 3.8918573e-05, %v9320_v39  ;;  %v9340_v14 = vadd.f32 %v8944_v17, %v2201_v22  ;;  %v5862_v33 = vclamps-f32 %v3107_v46, 1.0  ;;  %vm3143_vm3 = vcmp.eq.f32.partialorder %v3142_v49, 8.507059e+37 }
 0x375   : > { %v3141_v61 = vsel %vm3140_vm1, %v6218_v50, %v3137_v51  ;;  %v3170_v24 = vadd.f32 0.4994258, %v3169_v62  ;;  %v3301_v63 = vsel %vm9330_vm15, %v9204_v37, %v9293_v12  ;;  %v3341_v17 = vsel %vm9346_vm2, %v9235_v32, %v3337_v34  ;;  %v3717_v62 = vpop.f32.mrf.mxu2 }
 0x376   : > { %v3356_v6 = vmul.f32 %v3355_v59, %v9119_v25  ;;  %v3146_v60 = vsel %vm3143_vm3, %v3145_v10, %v3141_v61  ;;  %v3938_v21 = vadd.f32 0.05243302, %v3937_v53  ;;  %v3976_v0 = vadd.f32 0.0036580483, %v3975_v56 }
 0x377   : > { %v3147_v22 = vmul.f32 %v3146_v60, %v9061_v2  ;;  %v3444_v46 = vadd.f32 0.001143296, %v3443_v11  ;;  %v3901_v50 = vmul.f32 %v9231_v57, %v9066_v38  ;;  %v3408_v49 = vadd.f32 0.112945676, %v3407_v30 }
 0x378   : > { %v9362_v1 = vmul.f32 0.70710677, %v9340_v14  ;;  %v3203_v12 = vmul.f32 3.8918573e-05, %v8924_v27  ;;  %v9365_v37 = vpop.eup %6219  ;;  %v3395_v32 = vadd.f32 0.0036580483, %v3394_v41  ;;  %v3171_v53 = vmul.f32 %v3170_v24, %v8909_v15 }
 0x379   : > { %v5863_v34 = vclamps-f32 %v3147_v22, 1.0  ;;  %v3570_v59 = vadd.f32 1.0, %v5862_v33  ;;  %v3306_v2 = vsel %vm9312_vm12, %v9249_v52, %v3301_v63  ;;  %v3322_v57 = vmul.f32 %v9263_v48, %v8977_v26 }
 0x37a   : > { %v3346_v56 = vsel %vm9316_vm13, %v9296_v4, %v3341_v17  ;;  %v3357_v51 = vadd.f32 0.05243302, %v3356_v6  ;;  %v9377_v10 = vadd.f32 %v8936_v16, %v3717_v62  ;;  %v3445_v41 = vmul.f32 %v3444_v46, %v9320_v39 }
 0x37b   : > { %v3571_v30 = vadd.f32 1.0, %v5863_v34  ;;  %v3470_v15 = vmul.f32 %v9362_v1, %v9362_v1  ;;  %v3939_v9 = vmul.f32 %v3938_v21, %v9215_v40  ;;  %v3977_v52 = vmul.f32 %v3976_v0, %v9257_v3 }
 0x37c   : > { %v3409_v26 = vmul.f32 %v3408_v49, %v9227_v23  ;;  %v3204_v48 = vadd.f32 0.001143296, %v3203_v12  ;;  %v3396_v44 = vmul.f32 %v3395_v32, %v9227_v23  ;;  %v3602_v4 = vmul.f32 %v3570_v59, %v9011_v47 }
 0x37d   : > { %v3603_v11 = vmul.f32 %v3571_v30, %v9021_v31  ;;  %v9388_v58 = vadd.f32 1.0, %v3171_v53  ;;  %v3307_v33 = vmul.f32 %v3306_v2, %v9247_v5  ;;  %v3902_v61 = vadd.f32 1.1283791, %v3901_v50  ;;  %v3719_v30 = vpop.f32.mrf.mxu2 }
 0x37e   : > { %v3347_v24 = vmul.f32 %v3346_v56, %v3322_v57  ;;  %v3374_v63 = vmul.f32 %v9365_v37, %v9305_v36  ;;  %v9394_v6 = vmul.f32 0.70710677, %v9377_v10  ;;  %v3446_v60 = vadd.f32 0.014752088, %v3445_v41 }
 0x37f   : > { %v3624_v17 = vpack.c.bf16 %v3603_v11, %v3602_v4  ;;  %v9396_v21 = vmin.f32 %v3470_v15, 16.0  ;;  %v9400_v47 = vmul.f32 %v9229_v35, %v8963_v20  ;;  %v3978_v31 = vadd.f32 0.05243302, %v3977_v52 }
 0x380   : > { %v3410_v0 = vadd.f32 0.4994258, %v3409_v26  ;;  %v3205_v5 = vmul.f32 %v3204_v48, %v8924_v27  ;;  %v3940_v22 = vadd.f32 0.18741608, %v3939_v9  ;;  %v3358_v46 = vmul.f32 %v3357_v51, %v9119_v25 }
 0x381   : > { %v3397_v50 = vadd.f32 0.05243302, %v3396_v44  ;;  %3756 = vmatmul.bf16.gmra.mxu2 %v3624_v17  ;;  %6221 = vrcp.f32 %v9388_v58  ;;  %v9407_v49 = vmul.f32 %v9237_v42, %v9064_v55  ;;  %v5867_v62 = vclamps-f32 %v3307_v33, 1.0 }
 0x382   : > { %v9410_v12 = vmul.f32 %v3902_v61, %v9035_v19  ;;  %v3375_v20 = vsub.f32 1.0, %v3374_v63  ;;  %v5868_v35 = vclamps-f32 %v3347_v24, 1.0  ;;  %v4011_v32 = vmul.f32 %v9394_v6, %v9394_v6 }
 0x383   : > { %v3447_v34 = vmul.f32 %v3446_v60, %v9320_v39  ;;  %v3483_v59 = vmul.f32 3.8918573e-05, %v9396_v21  ;;  %v9417_v53 = vmul.f32 0.5, %v9144_v28  ;;  %v3979_v2 = vmul.f32 %v3978_v31, %v9257_v3 }
 0x384   : > { %v3411_v55 = vmul.f32 %v3410_v0, %v9227_v23  ;;  %v3206_v42 = vadd.f32 0.014752088, %v3205_v5  ;;  %v3941_v19 = vmul.f32 %v3940_v22, %v9215_v40  ;;  %v9423_v57 = vmul.f32 0.5, %v9079_v45 }
 0x385   : > { %v3359_v56 = vadd.f32 0.18741608, %v3358_v46  ;;  %v3398_v51 = vmul.f32 %v3397_v50, %v9227_v23  ;;  %v3575_v41 = vadd.f32 1.0, %v5867_v62  ;;  %v3376_v15 = vmul.f32 %v9365_v37, %v3375_v20 }
 0x386   : > { %v9428_v28 = vmul.f32 0.5, %v9195_v43  ;;  %v9431_v9 = vmul.f32 0.5, %v9171_v29  ;;  %v3576_v26 = vadd.f32 1.0, %v5868_v35  ;;  %v9435_v48 = vmin.f32 %v4011_v32, 16.0 }
 0x387   : > { %v9433_v52 = vpop.eup %6221  ;;  %v3448_v45 = vadd.f32 0.112945676, %v3447_v34  ;;  %v3484_v44 = vadd.f32 0.001143296, %v3483_v59  ;;  %v3980_v4 = vadd.f32 0.18741608, %v3979_v2  ;;  %v9440_v33 = vadd.f32 %v8936_v16, %v3719_v30 }
 0x388   : > { %v9437_v11 = vadd.f32 1.0, %v3411_v55  ;;  %v3207_v61 = vmul.f32 %v3206_v42, %v8924_v27  ;;  %v3942_v43 = vadd.f32 1.1283791, %v3941_v19  ;;  %v3360_v24 = vmul.f32 %v3359_v56, %v9119_v25 }
 0x389   : > { %v3384_v29 = vand.u32 2147483648, %v9305_v36  ;;  %v3399_v63 = vadd.f32 0.18741608, %v3398_v51  ;;  %v3377_v17 = vadd.f32 %v9365_v37, %v3376_v15  ;;  %vm3378_vm4 = vweird.f32 %v9305_v36  ;;  %v6004_v15 = vld [vmem:[#allocation10 + $0x20] sm:$0xff] }
 0x38a   : > { %vm3379_vm5 = vweird.f32 %v9365_v37  ;;  %v3174_v60 = vmul.f32 %v9433_v52, %v9388_v58  ;;  %v3382_v16 = vand.u32 2147483647, %v9305_v36  ;;  %v4013_v31 = vmul.f32 2.1237322e-06, %v9435_v48  ;;  %5282 = vmatpush.bf16.msra.mxu3 %v6004_v15 }
 0x38b   : > { %v3449_v0 = vmul.f32 %v3448_v45, %v9320_v39  ;;  %v3485_v25 = vmul.f32 %v3484_v44, %v9396_v21  ;;  %v3981_v5 = vmul.f32 %v3980_v4, %v9257_v3  ;;  %6223 = vrcp.f32 %v9437_v11  ;;  %vm9459_vm6 = vmor %vm3378_vm4, %vm3379_vm5 }
 0x38c   : > { %v9457_v22 = vmul.f32 0.70710677, %v9440_v33  ;;  %v3208_v46 = vadd.f32 0.112945676, %v3207_v61  ;;  %v3361_v50 = vadd.f32 1.1283791, %v3360_v24  ;;  %v3400_v20 = vmul.f32 %v3399_v63, %v9227_v23  ;;  %v2203_v63 = vpop.f32.mrf.mxu1 }
 0x38d   : > { %v3385_v36 = vor.u32 1.1754944e-38, %v3384_v29  ;;  %v3432_v35 = vmul.f32 2.1237322e-06, %v9320_v39  ;;  %v3381_v32 = vsel %vm9459_vm6, %v9365_v37, %v3377_v17  ;;  %v3175_v34 = vsub.f32 1.0, %v3174_v60  ;;  %v6003_v29 = vld [vmem:[#allocation10 + $0x18] sm:$0xff]  ;;  %v11229_v60 = vld [vmem:[#allocation18_spill] sm:$0xff] }
 0x38e   : > { %v3209_v59 = vmul.f32 %v3208_v46, %v8924_v27  ;;  %v3864_v2 = vmul.f32 3.8918573e-05, %v8989_v18  ;;  %v9471_v55 = vmul.f32 %v3575_v41, %v9200_v8  ;;  %v4014_v42 = vadd.f32 0.00028619796, %v4013_v31  ;;  %v11231_v46 = vld [vmem:[#allocation22_spill] sm:$0xff]  ;;  %5283 = vmatpush.bf16.msra.mxu3 %v6003_v29 }
 0x38f   : > { %v3450_v19 = vadd.f32 0.4994258, %v3449_v0  ;;  %v3486_v56 = vadd.f32 0.014752088, %v3485_v25  ;;  %vm3383_vm7 = vcmp.eq.f32.partialorder %v3382_v16, 8.507059e+37  ;;  %v4051_v23 = vmul.f32 %v9457_v22, %v9457_v22 }
 0x390   : > { %v3982_v51 = vadd.f32 1.1283791, %v3981_v5  ;;  %v3210_v30 = vadd.f32 0.4994258, %v3209_v59  ;;  %v9476_v37 = vmul.f32 %v3576_v26, %v9224_v7  ;;  %v3386_v45 = vsel %vm3383_vm7, %v3385_v36, %v3381_v32  ;;  %v6302_v36 = vld [vmem:[%s11104_s4] ss:$0 sm:$0xff] }
 0x391   : > { %v3401_v44 = vadd.f32 1.1283791, %v3400_v20  ;;  %v3433_v4 = vadd.f32 0.00028619796, %v3432_v35  ;;  %v9478_v61 = vpop.eup %6223  ;;  %v3362_v8 = vmul.f32 %v3361_v50, %v9089_v54  ;;  %v3176_v41 = vmul.f32 %v9433_v52, %v3175_v34  ;;  %v11230_v54 = vld [vmem:[#allocation24_spill] sm:$0xff] }
 0x392   : > { %v3211_v24 = vmul.f32 %v3210_v30, %v8924_v27  ;;  %v3865_v17 = vadd.f32 0.001143296, %v3864_v2  ;;  %v9484_v16 = vmul.f32 %v3942_v43, %v11229_v60  ;;  %v4015_v7 = vmul.f32 %v4014_v42, %v9435_v48 }
 0x393   : > { %v3451_v26 = vmul.f32 %v3450_v19, %v9320_v39  ;;  %v3487_v31 = vmul.f32 %v3486_v56, %v9396_v21  ;;  %v9489_v0 = vmul.f32 %v3386_v45, %v3362_v8  ;;  %v9492_v25 = vmul.f32 %v3982_v51, %v11230_v54 }
 0x394   : > { %v9494_v5 = vmin.f32 %v4051_v23, 16.0  ;;  %v9496_v27 = vadd.f32 1.0, %v3211_v24  ;;  %v9499_v50 = vmul.f32 %v3401_v44, %v11231_v46  ;;  %v3414_v43 = vmul.f32 %v9478_v61, %v9437_v11  ;;  %v6002_v23 = vld [vmem:[#allocation10 + $0x10] sm:$0xff] }
 0x395   : > { %v3434_v62 = vmul.f32 %v3433_v4, %v9320_v39  ;;  %v9507_v20 = vadd.f32 %v6302_v36, %v2203_v63  ;;  %v3177_v35 = vadd.f32 %v9433_v52, %v3176_v41  ;;  %vm3179_vm8 = vweird.f32 %v9433_v52  ;;  %5284 = vmatpush.bf16.msra.mxu3 %v6002_v23 }
 0x396   : > { %6225 = vrcp.f32 %v9496_v27  ;;  %v3866_v32 = vmul.f32 %v3865_v17, %v8989_v18  ;;  %v4016_v34 = vadd.f32 0.0036580483, %v4015_v7  ;;  %v9513_v59 = vadd.f32 1.0, %v3451_v26 }
 0x397   : > { %v3488_v2 = vadd.f32 0.112945676, %v3487_v31  ;;  %v3184_v42 = vand.u32 2147483648, %v9388_v58  ;;  %v4053_v56 = vmul.f32 2.1237322e-06, %v9494_v5  ;;  %vm3178_vm9 = vweird.f32 %v9388_v58  ;;  %v6001_v31 = vld [vmem:[#allocation10 + $0x8] sm:$0xff] }
 0x398   : > { %v3182_v51 = vand.u32 2147483647, %v9388_v58  ;;  %v3415_v30 = vsub.f32 1.0, %v3414_v43  ;;  %v3424_v45 = vand.u32 2147483648, %v9437_v11  ;;  %vm9524_vm10 = vmor %vm3178_vm9, %vm3179_vm8  ;;  %v9529_v4 = vmul.f32 0.70710677, %v9507_v20 }
 0x399   : > { %v3435_v8 = vadd.f32 0.0036580483, %v3434_v62  ;;  %v3472_v41 = vmul.f32 2.1237322e-06, %v9396_v21  ;;  %v3181_v58 = vsel %vm9524_vm10, %v9433_v52, %v3177_v35  ;;  %v3867_v24 = vadd.f32 0.014752088, %v3866_v32  ;;  %5285 = vmatpush.bf16.msra.mxu3 %v6001_v31 }
 0x39a   : > { %6227 = vrcp.f32 %v9513_v59  ;;  %v3489_v29 = vmul.f32 %v3488_v2, %v9396_v21  ;;  %v3185_v63 = vor.u32 1.1754944e-38, %v3184_v42  ;;  %v3510_v17 = vmul.f32 %v9529_v4, %v9529_v4 }
 0x39b   : > { %vm3418_vm11 = vweird.f32 %v9437_v11  ;;  %v4017_v7 = vmul.f32 %v4016_v34, %v9435_v48  ;;  %v4054_v26 = vadd.f32 0.00028619796, %v4053_v56  ;;  %vm3183_vm12 = vcmp.eq.f32.partialorder %v3182_v51, 8.507059e+37 }
 0x39c   : > { %v6226_v60 = vpop.eup %6225  ;;  %v3868_v52 = vmul.f32 %v3867_v24, %v8989_v18  ;;  %v3425_v54 = vor.u32 1.1754944e-38, %v3424_v45  ;;  %v3186_v46 = vsel %vm3183_vm12, %v3185_v63, %v3181_v58  ;;  %v9543_v62 = vmin.f32 %v3510_v17, 16.0  ;;  %v11234_v45 = vld [vmem:[#allocation16_spill] sm:$0xff]  ;;  %v6000_v24 = vld [vmem:[#allocation10] sm:$0xff] }
 0x39d   : > { %v3214_v43 = vmul.f32 %v6226_v60, %v9496_v27  ;;  %v3416_v36 = vmul.f32 %v9478_v61, %v3415_v30  ;;  %v3436_v35 = vmul.f32 %v3435_v8, %v9320_v39  ;;  %v3473_v32 = vadd.f32 0.00028619796, %v3472_v41  ;;  %5286 = vmatpush.bf16.msra.mxu3 %v6000_v24 }
 0x39e   : > { %v3869_v2 = vadd.f32 0.112945676, %v3868_v52  ;;  %vm3419_vm13 = vweird.f32 %v9478_v61  ;;  %v3490_v34 = vadd.f32 0.4994258, %v3489_v29  ;;  %v3523_v56 = vmul.f32 3.8918573e-05, %v9543_v62 }
 0x39f   : > { %v3215_v42 = vsub.f32 1.0, %v3214_v43  ;;  %v4018_v51 = vadd.f32 0.05243302, %v4017_v7  ;;  %v4055_v23 = vmul.f32 %v4054_v26, %v9494_v5  ;;  %v3187_v44 = vmul.f32 %v3186_v46, %v11234_v45  ;;  %vm9568_vm1 = vmor %vm3418_vm11, %vm3419_vm13 }
 0x3a0   : > { %v3224_v58 = vand.u32 2147483648, %v9496_v27  ;;  %v9552_v30 = vpop.eup %6227  ;;  %vm3219_vm14 = vweird.f32 %v6226_v60  ;;  %v3222_v41 = vand.u32 2147483647, %v9496_v27  ;;  %v3524_v63 = vadd.f32 0.001143296, %v3523_v56 }
 0x3a1   : > { %v3216_v8 = vmul.f32 %v6226_v60, %v3215_v42  ;;  %v3417_v29 = vadd.f32 %v9478_v61, %v3416_v36  ;;  %v3437_v17 = vadd.f32 0.05243302, %v3436_v35  ;;  %v3474_v31 = vmul.f32 %v3473_v32, %v9396_v21 }
 0x3a2   : > { %v3870_v7 = vmul.f32 %v3869_v2, %v8989_v18  ;;  %v3491_v26 = vmul.f32 %v3490_v34, %v9396_v21  ;;  %vm3218_vm15 = vweird.f32 %v9496_v27  ;;  %v3525_v46 = vmul.f32 %v3524_v63, %v9543_v62 }
 0x3a3   : > { %v3217_v52 = vadd.f32 %v6226_v60, %v3216_v8  ;;  %v3454_v43 = vmul.f32 %v9552_v30, %v9513_v59  ;;  %vm3220_vm0 = vmor %vm3218_vm15, %vm3219_vm14  ;;  %v3225_v42 = vor.u32 1.1754944e-38, %v3224_v58  ;;  %v3904_v36 = vmul.f32 3.8918573e-05, %v9066_v38 }
 0x3a4   : > { %v3871_v56 = vadd.f32 0.4994258, %v3870_v7  ;;  %v5864_v32 = vclamps-f32 %v3187_v44, 1.0  ;;  %vm3223_vm2 = vcmp.eq.f32.partialorder %v3222_v41, 8.507059e+37  ;;  %v3526_v2 = vadd.f32 0.014752088, %v3525_v46  ;;  %v3722_v46 = vpop.f32.mrf.mxu2 }
 0x3a5   : > { %v3221_v27 = vsel %vm3220_vm0, %v6226_v60, %v3217_v52  ;;  %v3421_v34 = vsel %vm9568_vm1, %v9478_v61, %v3417_v29  ;;  %v4056_v45 = vadd.f32 0.0036580483, %v4055_v23  ;;  %v3475_v58 = vadd.f32 0.0036580483, %v3474_v31  ;;  %v11237_v7 = vld [vmem:[#allocation21_spill] sm:$0xff] }
 0x3a6   : > { %v3226_v24 = vsel %vm3223_vm2, %v3225_v42, %v3221_v27  ;;  %v3438_v8 = vmul.f32 %v3437_v17, %v9320_v39  ;;  %v9576_v63 = vadd.f32 1.0, %v3491_v26  ;;  %v3527_v19 = vmul.f32 %v3526_v2, %v9543_v62 }
 0x3a7   : > { %v3227_v15 = vmul.f32 %v3226_v24, %v11237_v7  ;;  %v11238_v44 = vclamps-f32 %v9489_v0, 1.0  ;;  %v11239_v41 = vand.u32 2147483647, %v9437_v11  ;;  %v3455_v52 = vsub.f32 1.0, %v3454_v43 }
 0x3a8   : > { %v3872_v61 = vmul.f32 %v3871_v56, %v8989_v18  ;;  %v3572_v31 = vadd.f32 1.0, %v5864_v32  ;;  %v3905_v17 = vadd.f32 0.001143296, %v3904_v36  ;;  %v4019_v26 = vmul.f32 %v4018_v51, %v9435_v48  ;;  %v11240_v51 = vld [vmem:[#allocation19_spill] sm:$0xff]  ;;  %v11241_v36 = vld [vmem:[#allocation20_spill] sm:$0xff] }
 0x3a9   : > { %v3577_v60 = vadd.f32 1.0, %v11238_v44  ;;  %vm3423_vm3 = vcmp.eq.f32.partialorder %v11239_v41, 8.507059e+37  ;;  %v5865_v29 = vclamps-f32 %v3227_v15, 1.0  ;;  %v4057_v42 = vmul.f32 %v4056_v45, %v9494_v5  ;;  %v9596_v15 = vld [vmem:[%s11106_s6] ss:$0 sm:$0xff] }
 0x3aa   : > { %v3426_v23 = vsel %vm3423_vm3, %v3425_v54, %v3421_v34  ;;  %v3476_v35 = vmul.f32 %v3475_v58, %v9396_v21  ;;  %v3528_v27 = vadd.f32 0.112945676, %v3527_v19  ;;  %v3439_v0 = vadd.f32 0.18741608, %v3438_v8  ;;  %v11242_v34 = vld [vmem:[#allocation25_spill] sm:$0xff] }
 0x3ab   : > { %6229 = vrcp.f32 %v9576_v63  ;;  %v3573_v11 = vadd.f32 1.0, %v5865_v29  ;;  %v9589_v2 = vadd.f32 1.0, %v3872_v61  ;;  %v3427_v43 = vmul.f32 %v3426_v23, %v9499_v50 }
 0x3ac   : > { %v3456_v18 = vmul.f32 %v9552_v30, %v3455_v52  ;;  %v9599_v54 = vadd.f32 %v9596_v15, %v3722_v46  ;;  %v3512_v19 = vmul.f32 2.1237322e-06, %v9543_v62  ;;  %v3604_v56 = vmul.f32 %v3572_v31, %v11240_v51 }
 0x3ad   : > { %v3605_v32 = vmul.f32 %v3573_v11, %v11241_v36  ;;  %6231 = vrcp.f32 %v9589_v2  ;;  %v3906_v50 = vmul.f32 %v3905_v17, %v9066_v38  ;;  %v9607_v45 = vmul.f32 0.5, %v11242_v34 }
 0x3ae   : > { %v3477_v58 = vadd.f32 0.05243302, %v3476_v35  ;;  %v3529_v24 = vmul.f32 %v3528_v27, %v9543_v62  ;;  %v3944_v8 = vmul.f32 3.8918573e-05, %v9215_v40  ;;  %v4020_v7 = vadd.f32 0.18741608, %v4019_v26  ;;  %v3724_v35 = vpop.f32.mrf.mxu2 }
 0x3af   : > { %v3440_v44 = vmul.f32 %v3439_v0, %v9320_v39  ;;  %v4058_v41 = vadd.f32 0.05243302, %v4057_v42  ;;  %v3625_v52 = vpack.c.bf16 %v3605_v32, %v3604_v56  ;;  %v9613_v46 = vmul.f32 %v3577_v60, %v9423_v57 }
 0x3b0   : > { %v5870_v61 = vclamps-f32 %v3427_v43, 1.0  ;;  %v9616_v23 = vmul.f32 0.70710677, %v9599_v54  ;;  %v3513_v29 = vadd.f32 0.00028619796, %v3512_v19  ;;  %v3457_v17 = vadd.f32 %v9552_v30, %v3456_v18 }
 0x3b1   : > { %v9618_v31 = vpop.eup %6229  ;;  %vm3459_vm4 = vweird.f32 %v9552_v30  ;;  %v3462_v26 = vand.u32 2147483647, %v9513_v59  ;;  %3761 = vmatmul.bf16.gmra.mxu2 %v3625_v52  ;;  %v3907_v39 = vadd.f32 0.014752088, %v3906_v50  ;;  %v3464_v42 = vand.u32 2147483648, %v9513_v59 }
 0x3b2   : > { %11243 = vst [vmem:[#allocation18_spill] sm:$0xff] %v9616_v23  ;;  %v3478_v57 = vmul.f32 %v3477_v58, %v9396_v21  ;;  %v3530_v60 = vadd.f32 0.4994258, %v3529_v24  ;;  %v3945_v27 = vadd.f32 0.001143296, %v3944_v8  ;;  %v9628_v11 = vmul.f32 %v4020_v7, %v9435_v48 }
 0x3b3   : > { %v9625_v0 = vpop.eup %6231  ;;  %v3441_v43 = vadd.f32 1.1283791, %v3440_v44  ;;  %vm3458_vm5 = vweird.f32 %v9513_v59  ;;  %v9632_v18 = vmul.f32 %v4058_v41, %v9494_v5  ;;  %v3578_v19 = vadd.f32 1.0, %v5870_v61 }
 0x3b4   : > { %vm9636_vm6 = vmor %vm3458_vm5, %vm3459_vm4  ;;  %v3494_v56 = vmul.f32 %v9618_v31, %v9576_v63  ;;  %v4091_v36 = vmul.f32 %v9616_v23, %v9616_v23  ;;  %v3514_v32 = vmul.f32 %v3513_v29, %v9543_v62  ;;  %v3875_v50 = vmul.f32 %v9625_v0, %v9589_v2 }
 0x3b5   : > { %v3461_v59 = vsel %vm9636_vm6, %v9552_v30, %v3457_v17  ;;  %v3908_v34 = vmul.f32 %v3907_v39, %v9066_v38  ;;  %v3946_v58 = vmul.f32 %v3945_v27, %v9215_v40  ;;  %vm3463_vm7 = vcmp.eq.f32.partialorder %v3462_v26, 8.507059e+37 }
 0x3b6   : > { %v3465_v24 = vor.u32 1.1754944e-38, %v3464_v42  ;;  %v3479_v8 = vadd.f32 0.18741608, %v3478_v57  ;;  %v3531_v7 = vmul.f32 %v3530_v60, %v9543_v62  ;;  %v3442_v44 = vmul.f32 %v3441_v43, %v9290_v13 }
 0x3b7   : > { %v3909_v41 = vadd.f32 0.112945676, %v3908_v34  ;;  %v3947_v52 = vadd.f32 0.014752088, %v3946_v58  ;;  %v3984_v61 = vmul.f32 3.8918573e-05, %v9257_v3  ;;  %v9660_v57 = vmul.f32 %v3578_v19, %v9431_v9  ;;  %v3727_v19 = vpop.f32.mrf.mxu2 }
 0x3b8   : > { %v3466_v29 = vsel %vm3463_vm7, %v3465_v24, %v3461_v59  ;;  %v3495_v30 = vsub.f32 1.0, %v3494_v56  ;;  %v9655_v17 = vmin.f32 %v4091_v36, 16.0  ;;  %v3515_v51 = vadd.f32 0.0036580483, %v3514_v32 }
 0x3b9   : > { %v3876_v23 = vsub.f32 1.0, %v3875_v50  ;;  %v3910_v39 = vmul.f32 %v3909_v41, %v9066_v38  ;;  %v3948_v26 = vmul.f32 %v3947_v52, %v9215_v40  ;;  %v3985_v42 = vadd.f32 0.001143296, %v3984_v61 }
 0x3ba   : > { %v3480_v13 = vmul.f32 %v3479_v8, %v9396_v21  ;;  %v9663_v60 = vadd.f32 1.0, %v3531_v7  ;;  %v9666_v27 = vadd.f32 %v9596_v15, %v3724_v35  ;;  %v3467_v43 = vmul.f32 %v3466_v29, %v3442_v44 }
 0x3bb   : > { %v3911_v56 = vadd.f32 0.4994258, %v3910_v39  ;;  %v3949_v36 = vadd.f32 0.112945676, %v3948_v26  ;;  %v3986_v32 = vmul.f32 %v3985_v42, %v9257_v3  ;;  %v3496_v59 = vmul.f32 %v9618_v31, %v3495_v30 }
 0x3bc   : > { %vm3498_vm8 = vweird.f32 %v9576_v63  ;;  %v4093_v50 = vmul.f32 2.1237322e-06, %v9655_v17  ;;  %v3516_v9 = vmul.f32 %v3515_v51, %v9543_v62  ;;  %v3626_v21 = vpack.c.bf16 %v9471_v55, %v9407_v49 }
 0x3bd   : > { %v3877_v35 = vmul.f32 %v9625_v0, %v3876_v23  ;;  %v3912_v34 = vmul.f32 %v3911_v56, %v9066_v38  ;;  %v3950_v58 = vmul.f32 %v3949_v36, %v9215_v40  ;;  %6233 = vrcp.f32 %v9663_v60 }
 0x3be   : > { %v9680_v24 = vmul.f32 0.70710677, %v9666_v27  ;;  %v3987_v8 = vadd.f32 0.014752088, %v3986_v32  ;;  %v4024_v7 = vmul.f32 3.8918573e-05, %v9435_v48  ;;  %vm3499_vm9 = vweird.f32 %v9618_v31 }
 0x3bf   : > { %v5871_v44 = vclamps-f32 %v3467_v43, 1.0  ;;  %v3504_v41 = vand.u32 2147483648, %v9576_v63  ;;  %v9685_v49 = vadd.f32 1.0, %v3912_v34  ;;  %v3497_v55 = vadd.f32 %v9618_v31, %v3496_v59  ;;  %vm9700_vm11 = vmor %vm3498_vm8, %vm3499_vm9 }
 0x3c0   : > { %v4094_v38 = vadd.f32 0.00028619796, %v4093_v50  ;;  %v3517_v23 = vadd.f32 0.05243302, %v3516_v9  ;;  %v3951_v52 = vadd.f32 0.4994258, %v3950_v58  ;;  %v3878_v61 = vadd.f32 %v9625_v0, %v3877_v35  ;;  %v9727_v58 = vpop.f32.mrf.mxu2 }
 0x3c1   : > { %3766 = vmatmul.bf16.gmra.mxu2 %v3626_v21  ;;  %vm3880_vm10 = vweird.f32 %v9625_v0  ;;  %6235 = vrcp.f32 %v9685_v49  ;;  %v3988_v29 = vmul.f32 %v3987_v8, %v9257_v3  ;;  %v3502_v30 = vand.u32 2147483647, %v9576_v63 }
 0x3c2   : > { %v4131_v51 = vmul.f32 %v9680_v24, %v9680_v24  ;;  %v3885_v39 = vand.u32 2147483648, %v9589_v2  ;;  %v4025_v26 = vadd.f32 0.001143296, %v4024_v7  ;;  %v3481_v42 = vadd.f32 1.1283791, %v3480_v13 }
 0x3c3   : > { %vm3879_vm12 = vweird.f32 %v9589_v2  ;;  %v3883_v56 = vand.u32 2147483647, %v9589_v2  ;;  %v3952_v36 = vmul.f32 %v3951_v52, %v9215_v40  ;;  %v9707_v32 = vpop.eup %6233  ;;  %v3579_v59 = vadd.f32 1.0, %v5871_v44 }
 0x3c4   : > { %v3501_v13 = vsel %vm9700_vm11, %v9618_v31, %v3497_v55  ;;  %v3505_v50 = vor.u32 1.1754944e-38, %v3504_v41  ;;  %v4095_v63 = vmul.f32 %v4094_v38, %v9655_v17  ;;  %vm9715_vm13 = vmor %vm3879_vm12, %vm3880_vm10  ;;  %v3518_v2 = vmul.f32 %v3517_v23, %v9543_v62 }
 0x3c5   : > { %v3882_v40 = vsel %vm9715_vm13, %v9625_v0, %v3878_v61  ;;  %v9723_v21 = vadd.f32 1.0, %v3952_v36  ;;  %v3989_v35 = vadd.f32 0.112945676, %v3988_v29  ;;  %vm3503_vm14 = vcmp.eq.f32.partialorder %v3502_v30, 8.507059e+37 }
 0x3c6   : > { %v9725_v31 = vmin.f32 %v4131_v51, 16.0  ;;  %v3886_v34 = vor.u32 1.1754944e-38, %v3885_v39  ;;  %v4026_v8 = vmul.f32 %v4025_v26, %v9435_v48  ;;  %v3506_v44 = vsel %vm3503_vm14, %v3505_v50, %v3501_v13 }
 0x3c7   : > { %v6236_v7 = vpop.eup %6235  ;;  %v3534_v41 = vmul.f32 %v9707_v32, %v9663_v60  ;;  %vm3884_vm15 = vcmp.eq.f32.partialorder %v3883_v56, 8.507059e+37  ;;  %6237 = vrcp.f32 %v9723_v21  ;;  %v9734_v0 = vmul.f32 %v3579_v59, %v9607_v45 }
 0x3c8   : > { %v3482_v55 = vmul.f32 %v3481_v42, %v9362_v1  ;;  %v3887_v38 = vsel %vm3884_vm15, %v3886_v34, %v3882_v40  ;;  %v3915_v23 = vmul.f32 %v6236_v7, %v9685_v49  ;;  %v9738_v52 = vadd.f32 0.0036580483, %v4095_v63 }
 0x3c9   : > { %v3519_v61 = vadd.f32 0.18741608, %v3518_v2  ;;  %v9741_v29 = vadd.f32 %v9596_v15, %v3727_v19  ;;  %v3990_v30 = vmul.f32 %v3989_v35, %v9257_v3  ;;  %v9747_v39 = vmul.f32 2.1237322e-06, %v9725_v31 }
 0x3ca   : > { %v9744_v51 = vmul.f32 %v3506_v44, %v3482_v55  ;;  %v3916_v45 = vsub.f32 1.0, %v3915_v23  ;;  %v4027_v26 = vadd.f32 0.014752088, %v4026_v8  ;;  %v3535_v43 = vsub.f32 1.0, %v3534_v41  ;;  %v9766_v55 = vpop.f32.mrf.mxu2 }
 0x3cb   : > { %v3888_v1 = vmul.f32 %v3887_v38, %v9400_v47  ;;  %v3925_v42 = vand.u32 2147483648, %v9685_v49  ;;  %v3991_v56 = vadd.f32 0.4994258, %v3990_v30  ;;  %vm3920_vm0 = vweird.f32 %v6236_v7 }
 0x3cc   : > { %v3917_v36 = vmul.f32 %v6236_v7, %v3916_v45  ;;  %v3923_v19 = vand.u32 2147483647, %v9685_v49  ;;  %v4028_v59 = vmul.f32 %v4027_v26, %v9435_v48  ;;  %v3520_v50 = vmul.f32 %v3519_v61, %v9543_v62 }
 0x3cd   : > { %v6238_v13 = vpop.eup %6237  ;;  %v9755_v63 = vmul.f32 0.70710677, %v9741_v29  ;;  %v3627_v9 = vpack.c.bf16 %v9613_v46, %v9476_v37  ;;  %v3992_v47 = vmul.f32 %v3991_v56, %v9257_v3  ;;  %vm3919_vm1 = vweird.f32 %v9685_v49 }
 0x3ce   : > { %v3918_v2 = vadd.f32 %v6236_v7, %v3917_v36  ;;  %v3955_v40 = vmul.f32 %v6238_v13, %v9723_v21  ;;  %v4064_v35 = vmul.f32 3.8918573e-05, %v9494_v5  ;;  %v3536_v34 = vmul.f32 %v9707_v32, %v3535_v43  ;;  %vm3921_vm2 = vmor %vm3919_vm1, %vm3920_vm0 }
 0x3cf   : > { %v5906_v8 = vclamps-f32 %v3888_v1, 1.0  ;;  %v3926_v62 = vor.u32 1.1754944e-38, %v3925_v42  ;;  %v9764_v44 = vadd.f32 1.0, %v3992_v47  ;;  %vm3924_vm3 = vcmp.eq.f32.partialorder %v3923_v19, 8.507059e+37 }
 0x3d0   : > { %v3922_v41 = vsel %vm3921_vm2, %v6236_v7, %v3918_v2  ;;  %v3956_v37 = vsub.f32 1.0, %v3955_v40  ;;  %v4029_v3 = vadd.f32 0.112945676, %v4028_v59  ;;  %vm3539_vm4 = vweird.f32 %v9707_v32  ;;  %v11252_v2 = vld [vmem:[#allocation17_spill] sm:$0xff] }
 0x3d1   : > { %v3544_v46 = vand.u32 2147483648, %v9663_v60  ;;  %v3927_v49 = vsel %vm3924_vm3, %v3926_v62, %v3922_v41  ;;  %3771 = vmatmul.bf16.gmra.mxu2 %v3627_v9  ;;  %6239 = vrcp.f32 %v9764_v44  ;;  %vm3960_vm5 = vweird.f32 %v6238_v13 }
 0x3d2   : > { %v3928_v38 = vmul.f32 %v3927_v49, %v9410_v12  ;;  %v3957_v23 = vmul.f32 %v6238_v13, %v3956_v37  ;;  %v3965_v61 = vand.u32 2147483648, %v9723_v21  ;;  %v3537_v7 = vadd.f32 %v9707_v32, %v3536_v34  ;;  %v11253_v34 = vld [vmem:[#allocation23_spill] sm:$0xff] }
 0x3d3   : > { %v5131_v30 = vadd.f32 1.0, %v5906_v8  ;;  %v3963_v45 = vand.u32 2147483647, %v9723_v21  ;;  %v4030_v26 = vmul.f32 %v4029_v3, %v9435_v48  ;;  %vm3959_vm6 = vweird.f32 %v9723_v21 }
 0x3d4   : > { %v5907_v43 = vclamps-f32 %v3928_v38, 1.0  ;;  %v3958_v1 = vadd.f32 %v6238_v13, %v3957_v23  ;;  %v4065_v42 = vadd.f32 0.001143296, %v4064_v35  ;;  %v3521_v56 = vadd.f32 1.1283791, %v3520_v50  ;;  %vm3961_vm8 = vmor %vm3959_vm6, %vm3960_vm5  ;;  %v9803_v23 = vpop.f32.mrf.mxu2 }
 0x3d5   : > { %vm3538_vm7 = vweird.f32 %v9663_v60  ;;  %v3542_v12 = vand.u32 2147483647, %v9663_v60  ;;  %v3545_v36 = vor.u32 1.1754944e-38, %v3544_v46  ;;  %v9787_v9 = vadd.f32 %v9596_v15, %v9727_v58 }
 0x3d6   : > { %vm9781_vm9 = vmor %vm3538_vm7, %vm3539_vm4  ;;  %v5132_v59 = vadd.f32 1.0, %v5907_v43  ;;  %v3962_v21 = vsel %vm3961_vm8, %v6238_v13, %v3958_v1  ;;  %v3966_v47 = vor.u32 1.1754944e-38, %v3965_v61  ;;  %v5163_v40 = vmul.f32 %v5131_v30, %v11252_v2 }
 0x3d7   : > { %v6240_v50 = vpop.eup %6239  ;;  %v3541_v60 = vsel %vm9781_vm9, %v9707_v32, %v3537_v7  ;;  %vm3964_vm10 = vcmp.eq.f32.partialorder %v3963_v45, 8.507059e+37  ;;  %v4031_v35 = vadd.f32 0.4994258, %v4030_v26  ;;  %v4066_v37 = vmul.f32 %v4065_v42, %v9494_v5 }
 0x3d8   : > { %v5164_v8 = vmul.f32 %v5132_v59, %v11253_v34  ;;  %v3967_v62 = vsel %vm3964_vm10, %v3966_v47, %v3962_v21  ;;  %v3995_v41 = vmul.f32 %v6240_v50, %v9764_v44  ;;  %v3522_v58 = vmul.f32 %v3521_v56, %v9529_v4 }
 0x3d9   : > { %vm3543_vm11 = vcmp.eq.f32.partialorder %v3542_v12, 8.507059e+37  ;;  %v4134_v13 = vadd.f32 0.00028619796, %v9747_v39  ;;  %v4171_v3 = vmul.f32 %v9755_v63, %v9755_v63  ;;  %v9801_v49 = vmul.f32 0.70710677, %v9787_v9 }
 0x3da   : > { %v3546_v32 = vsel %vm3543_vm11, %v3545_v36, %v3541_v60  ;;  %v5195_v46 = vpack.c.bf16 %v5164_v8, %v5163_v40  ;;  %v3996_v38 = vsub.f32 1.0, %v3995_v41  ;;  %v3968_v61 = vmul.f32 %v3967_v62, %v9484_v16 }
 0x3db   : > { %v4003_v7 = vand.u32 2147483647, %v9764_v44  ;;  %v4005_v4 = vand.u32 2147483648, %v9764_v44  ;;  %v4032_v30 = vmul.f32 %v4031_v35, %v9435_v48  ;;  %vm4000_vm12 = vweird.f32 %v6240_v50 }
 0x3dc   : > { %5287 = vmatmul.bf16.vlgmr.msra.gmra.mxu3 %v5195_v46  ;;  %v3997_v39 = vmul.f32 %v6240_v50, %v3996_v38  ;;  %v4067_v45 = vadd.f32 0.014752088, %v4066_v37  ;;  %v4104_v26 = vmul.f32 3.8918573e-05, %v9655_v17  ;;  %v3547_v43 = vmul.f32 %v3546_v32, %v3522_v58  ;;  %v9834_v58 = vpop.f32.mrf.mxu2 }
 0x3dd   : > { %v4135_v1 = vmul.f32 %v4134_v13, %v9725_v31  ;;  %v3628_v42 = vpack.c.bf16 %v9734_v0, %v9660_v57  ;;  %v9813_v56 = vadd.f32 1.0, %v4032_v30  ;;  %v9815_v16 = vmin.f32 %v4171_v3, 16.0 }
 0x3de   : > { %v3998_v12 = vadd.f32 %v6240_v50, %v3997_v39  ;;  %vm3999_vm13 = vweird.f32 %v9764_v44  ;;  %v4068_v48 = vmul.f32 %v4067_v45, %v9494_v5  ;;  %v4211_v36 = vmul.f32 %v9801_v49, %v9801_v49 }
 0x3df   : > { %vm4001_vm14 = vmor %vm3999_vm13, %vm4000_vm12  ;;  %v4006_v19 = vor.u32 1.1754944e-38, %v4005_v4  ;;  %6241 = vrcp.f32 %v9813_v56  ;;  %v4105_v59 = vadd.f32 0.001143296, %v4104_v26  ;;  %v2236_v21 = vmul.f32 0.5, %v9340_v14 }
 0x3e0   : > { %v5908_v57 = vclamps-f32 %v3968_v61, 1.0  ;;  %v4002_v0 = vsel %vm4001_vm14, %v6240_v50, %v3998_v12  ;;  %vm4004_vm15 = vcmp.eq.f32.partialorder %v4003_v7, 8.507059e+37  ;;  %v5872_v47 = vclamps-f32 %v9744_v51, 1.0 }
 0x3e1   : > { %v4097_v44 = vmul.f32 %v9738_v52, %v9655_v17  ;;  %v5873_v60 = vclamps-f32 %v3547_v43, 1.0  ;;  %v4007_v2 = vsel %vm4004_vm15, %v4006_v19, %v4002_v0  ;;  %3776 = vmatmul.bf16.gmra.mxu2 %v3628_v42  ;;  %v4022_v40 = vadd.f32 1.1283791, %v9628_v11 }
 0x3e2   : > { %v4136_v35 = vadd.f32 0.0036580483, %v4135_v1  ;;  %v4008_v34 = vmul.f32 %v4007_v2, %v9492_v25  ;;  %v4069_v8 = vadd.f32 0.112945676, %v4068_v48  ;;  %v4060_v62 = vadd.f32 0.18741608, %v9632_v18 }
 0x3e3   : > { %v4173_v14 = vmul.f32 2.1237322e-06, %v9815_v16  ;;  %v9830_v50 = vmin.f32 %v4211_v36, 16.0  ;;  %v4106_v51 = vmul.f32 %v4105_v59, %v9655_v17  ;;  %v2237_v41 = vmul.f32 0.5, %v9507_v20 }
 0x3e4   : > { %v5909_v52 = vclamps-f32 %v4008_v34, 1.0  ;;  %v5133_v37 = vadd.f32 1.0, %v5908_v57  ;;  %v4070_v11 = vmul.f32 %v4069_v8, %v9494_v5  ;;  %v3580_v25 = vadd.f32 1.0, %v5872_v47 }
 0x3e5   : > { %v9837_v13 = vpop.eup %6241  ;;  %v4098_v3 = vadd.f32 0.05243302, %v4097_v44  ;;  %v3581_v32 = vadd.f32 1.0, %v5873_v60  ;;  %v4107_v18 = vadd.f32 0.014752088, %v4106_v51  ;;  %v4137_v46 = vmul.f32 %v4136_v35, %v9725_v31 }
 0x3e6   : > { %v5134_v38 = vadd.f32 1.0, %v5909_v52  ;;  %v4035_v61 = vmul.f32 %v9837_v13, %v9813_v56  ;;  %v4071_v7 = vadd.f32 0.4994258, %v4070_v11  ;;  %v4174_v20 = vadd.f32 0.00028619796, %v4173_v14  ;;  %v9868_v14 = vpop.f32.mrf.mxu2 }
 0x3e7   : > { %v4213_v4 = vmul.f32 2.1237322e-06, %v9830_v50  ;;  %v9845_v30 = vadd.f32 %v9596_v15, %v9766_v55  ;;  %v4108_v39 = vmul.f32 %v4107_v18, %v9655_v17  ;;  %v5165_v45 = vmul.f32 %v5133_v37, %v9417_v53 }
 0x3e8   : > { %v5166_v26 = vmul.f32 %v5134_v38, %v9428_v28  ;;  %v4036_v43 = vsub.f32 1.0, %v4035_v61  ;;  %v4072_v1 = vmul.f32 %v4071_v7, %v9494_v5  ;;  %v3612_v42 = vmul.f32 %v3580_v25, %v2236_v21 }
 0x3e9   : > { %v3613_v12 = vmul.f32 %v3581_v32, %v2237_v41  ;;  %v4109_v48 = vadd.f32 0.112945676, %v4108_v39  ;;  %v4144_v36 = vmul.f32 3.8918573e-05, %v9725_v31  ;;  %v4184_v55 = vmul.f32 3.8918573e-05, %v9815_v16 }
 0x3ea   : > { %v5196_v19 = vpack.c.bf16 %v5166_v26, %v5165_v45  ;;  %v4037_v59 = vmul.f32 %v9837_v13, %v4036_v43  ;;  %v9853_v57 = vadd.f32 1.0, %v4072_v1  ;;  %v4138_v0 = vadd.f32 0.05243302, %v4137_v46 }
 0x3eb   : > { %v4175_v53 = vmul.f32 %v4174_v20, %v9815_v16  ;;  %v9858_v28 = vmul.f32 0.70710677, %v9845_v30  ;;  %v4110_v47 = vmul.f32 %v4109_v48, %v9655_v17  ;;  %v4214_v21 = vadd.f32 0.00028619796, %v4213_v4 }
 0x3ec   : > { %5292 = vmatmul.bf16.gmra.mxu3 %v5196_v19  ;;  %v4038_v44 = vadd.f32 %v9837_v13, %v4037_v59  ;;  %vm4040_vm0 = vweird.f32 %v9837_v13  ;;  %6243 = vrcp.f32 %v9853_v57  ;;  %v4061_v60 = vmul.f32 %v4060_v62, %v9494_v5 }
 0x3ed   : > { %v4045_v2 = vand.u32 2147483648, %v9813_v56  ;;  %v3629_v35 = vpack.c.bf16 %v3613_v12, %v3612_v42  ;;  %v4111_v34 = vadd.f32 0.4994258, %v4110_v47  ;;  %vm4039_vm1 = vweird.f32 %v9813_v56 }
 0x3ee   : > { %v4043_v8 = vand.u32 2147483647, %v9813_v56  ;;  %v4145_v51 = vadd.f32 0.001143296, %v4144_v36  ;;  %v4185_v41 = vadd.f32 0.001143296, %v4184_v55  ;;  %v4023_v52 = vmul.f32 %v4022_v40, %v9394_v6  ;;  %vm9875_vm2 = vmor %vm4039_vm1, %vm4040_vm0 }
 0x3ef   : > { %v4099_v37 = vmul.f32 %v4098_v3, %v9655_v17  ;;  %v4139_v11 = vmul.f32 %v4138_v0, %v9725_v31  ;;  %v4176_v25 = vadd.f32 0.0036580483, %v4175_v53  ;;  %v4215_v62 = vmul.f32 %v4214_v21, %v9830_v50 }
 0x3f0   : > { %v4251_v56 = vmul.f32 %v9858_v28, %v9858_v28  ;;  %v4042_v6 = vsel %vm9875_vm2, %v9837_v13, %v4038_v44  ;;  %v4112_v40 = vmul.f32 %v4111_v34, %v9655_v17  ;;  %v4062_v3 = vadd.f32 1.1283791, %v4061_v60 }
 0x3f1   : > { %v9888_v32 = vadd.f32 %v9596_v15, %v9803_v23  ;;  %v4046_v18 = vor.u32 1.1754944e-38, %v4045_v2  ;;  %3781 = vmatmul.bf16.gmra.mxu2 %v3629_v35  ;;  %v4224_v46 = vmul.f32 3.8918573e-05, %v9830_v50  ;;  %vm4044_vm3 = vcmp.eq.f32.partialorder %v4043_v8, 8.507059e+37 }
 0x3f2   : > { %v6244_v38 = vpop.eup %6243  ;;  %v9891_v61 = vadd.f32 1.0, %v4112_v40  ;;  %v4146_v7 = vmul.f32 %v4145_v51, %v9725_v31  ;;  %v4186_v20 = vmul.f32 %v4185_v41, %v9815_v16  ;;  %v4100_v13 = vadd.f32 0.18741608, %v4099_v37 }
 0x3f3   : > { %v4177_v4 = vmul.f32 %v4176_v25, %v9815_v16  ;;  %v4047_v39 = vsel %vm4044_vm3, %v4046_v18, %v4042_v6  ;;  %v4075_v45 = vmul.f32 %v6244_v38, %v9853_v57  ;;  %v4140_v23 = vadd.f32 0.18741608, %v4139_v11 }
 0x3f4   : > { %v4216_v26 = vadd.f32 0.0036580483, %v4215_v62  ;;  %v9897_v43 = vmin.f32 %v4251_v56, 16.0  ;;  %6245 = vrcp.f32 %v9891_v61  ;;  %v4063_v1 = vmul.f32 %v4062_v3, %v9457_v22  ;;  %v9908_v22 = vpop.f32.mrf.mxu2 }
 0x3f5   : > { %v9902_v42 = vmul.f32 0.70710677, %v9888_v32  ;;  %v4076_v12 = vsub.f32 1.0, %v4075_v45  ;;  %v4225_v48 = vadd.f32 0.001143296, %v4224_v46  ;;  %v4048_v36 = vmul.f32 %v4047_v39, %v4023_v52 }
 0x3f6   : > { %v4085_v19 = vand.u32 2147483648, %v9853_v57  ;;  %v4147_v59 = vadd.f32 0.014752088, %v4146_v7  ;;  %v4187_v55 = vadd.f32 0.014752088, %v4186_v20  ;;  %vm4080_vm4 = vweird.f32 %v6244_v38 }
 0x3f7   : > { %v4178_v0 = vadd.f32 0.05243302, %v4177_v4  ;;  %v4077_v53 = vmul.f32 %v6244_v38, %v4076_v12  ;;  %v4083_v47 = vand.u32 2147483647, %v9853_v57  ;;  %v4217_v21 = vmul.f32 %v4216_v26, %v9830_v50 }
 0x3f8   : > { %v4253_v44 = vmul.f32 2.1237322e-06, %v9897_v43  ;;  %v4148_v60 = vmul.f32 %v4147_v59, %v9725_v31  ;;  %v4188_v2 = vmul.f32 %v4187_v55, %v9815_v16  ;;  %v4291_v35 = vmul.f32 %v9902_v42, %v9902_v42 }
 0x3f9   : > { %v4078_v34 = vadd.f32 %v6244_v38, %v4077_v53  ;;  %vm4079_vm5 = vweird.f32 %v9853_v57  ;;  %v4226_v8 = vmul.f32 %v4225_v48, %v9830_v50  ;;  %v5910_v41 = vclamps-f32 %v4048_v36, 1.0 }
 0x3fa   : > { %v9916_v51 = vpop.eup %6245  ;;  %vm4081_vm6 = vmor %vm4079_vm5, %vm4080_vm4  ;;  %v4086_v52 = vor.u32 1.1754944e-38, %v4085_v19  ;;  %v4149_v37 = vadd.f32 0.112945676, %v4148_v60  ;;  %v4189_v11 = vadd.f32 0.112945676, %v4188_v2  ;;  %v4179_v25 = vmul.f32 %v4178_v0, %v9815_v16 }
 0x3fb   : > { %v4082_v5 = vsel %vm4081_vm6, %v6244_v38, %v4078_v34  ;;  %vm4084_vm7 = vcmp.eq.f32.partialorder %v4083_v47, 8.507059e+37  ;;  %v4115_v62 = vmul.f32 %v9916_v51, %v9891_v61  ;;  %v4254_v56 = vadd.f32 0.00028619796, %v4253_v44 }
 0x3fc   : > { %v4087_v6 = vsel %vm4084_vm7, %v4086_v52, %v4082_v5  ;;  %v4150_v57 = vmul.f32 %v4149_v37, %v9725_v31  ;;  %v4190_v40 = vmul.f32 %v4189_v11, %v9815_v16  ;;  %v4218_v3 = vadd.f32 0.05243302, %v4217_v21 }
 0x3fd   : > { %v4088_v18 = vmul.f32 %v4087_v6, %v4063_v1  ;;  %v4116_v46 = vsub.f32 1.0, %v4115_v62  ;;  %v4227_v7 = vadd.f32 0.014752088, %v4226_v8  ;;  %v9923_v20 = vmin.f32 %v4291_v35, 16.0 }
 0x3fe   : > { %v5135_v4 = vadd.f32 1.0, %v5910_v41  ;;  %v4151_v39 = vadd.f32 0.4994258, %v4150_v57  ;;  %v4191_v45 = vadd.f32 0.4994258, %v4190_v40  ;;  %v3791_v38 = vmul.f32 0.5, %v9377_v10 }
 0x3ff   : > { %v3792_v26 = vmul.f32 0.5, %v9440_v33  ;;  %v5911_v12 = vclamps-f32 %v4088_v18, 1.0  ;;  %v4117_v48 = vmul.f32 %v9916_v51, %v4116_v46  ;;  %v4101_v36 = vmul.f32 %v4100_v13, %v9655_v17  ;;  %v9938_v17 = vpop.f32.mrf.mxu2  ;;  %v11258_v18 = vld [vmem:[#allocation18_spill] sm:$0xff] }
 0x400   : > { %v4255_v19 = vmul.f32 %v4254_v56, %v9897_v43  ;;  %v4152_v1 = vmul.f32 %v4151_v39, %v9725_v31  ;;  %v4192_v59 = vmul.f32 %v4191_v45, %v9815_v16  ;;  %v4141_v55 = vmul.f32 %v4140_v23, %v9725_v31 }
 0x401   : > { %v4180_v0 = vadd.f32 0.18741608, %v4179_v25  ;;  %v5136_v53 = vadd.f32 1.0, %v5911_v12  ;;  %v4228_v47 = vmul.f32 %v4227_v7, %v9830_v50  ;;  %v4219_v10 = vmul.f32 %v4218_v3, %v9830_v50 }
 0x402   : > { %v4293_v33 = vmul.f32 2.1237322e-06, %v9923_v20  ;;  %v5167_v21 = vmul.f32 %v5135_v4, %v3791_v38  ;;  %v9936_v44 = vadd.f32 1.0, %v4152_v1  ;;  %v4118_v60 = vadd.f32 %v9916_v51, %v4117_v48 }
 0x403   : > { %v5168_v13 = vmul.f32 %v5136_v53, %v3792_v26  ;;  %vm4120_vm8 = vweird.f32 %v9916_v51  ;;  %v9942_v2 = vadd.f32 1.0, %v4192_v59  ;;  %v4256_v31 = vadd.f32 0.0036580483, %v4255_v19 }
 0x404   : > { %v9946_v23 = vadd.f32 %v9596_v15, %v9834_v58  ;;  %v4125_v35 = vand.u32 2147483648, %v9891_v61  ;;  %6247 = vrcp.f32 %v9936_v44  ;;  %vm4119_vm9 = vweird.f32 %v9891_v61 }
 0x405   : > { %v5197_v34 = vpack.c.bf16 %v5168_v13, %v5167_v21  ;;  %v4123_v8 = vand.u32 2147483647, %v9891_v61  ;;  %v4229_v41 = vadd.f32 0.112945676, %v4228_v47  ;;  %v4102_v52 = vadd.f32 1.1283791, %v4101_v36  ;;  %vm9952_vm10 = vmor %vm4119_vm9, %vm4120_vm8 }
 0x406   : > { %v4220_v37 = vadd.f32 0.18741608, %v4219_v10  ;;  %6249 = vrcp.f32 %v9942_v2  ;;  %v4142_v58 = vadd.f32 1.1283791, %v4141_v55  ;;  %v4181_v25 = vmul.f32 %v4180_v0, %v9815_v16 }
 0x407   : > { %v4294_v5 = vadd.f32 0.00028619796, %v4293_v33  ;;  %5297 = vmatmul.bf16.gmra.mxu3 %v5197_v34  ;;  %v4122_v62 = vsel %vm9952_vm10, %v9916_v51, %v4118_v60  ;;  %v4257_v61 = vmul.f32 %v4256_v31, %v9897_v43  ;;  %v9963_v56 = vmul.f32 0.70710677, %v9946_v23  ;;  %v9987_v36 = vpop.f32.mrf.mxu2 }
 0x408   : > { %v9967_v6 = vadd.f32 %v9596_v15, %v9868_v14  ;;  %v4126_v57 = vor.u32 1.1754944e-38, %v4125_v35  ;;  %v9970_v40 = vmul.f32 0.5, %v9599_v54  ;;  %v9973_v16 = vmul.f32 0.5, %v9666_v27 }
 0x409   : > { %vm4124_vm11 = vcmp.eq.f32.partialorder %v4123_v8, 8.507059e+37  ;;  %v4230_v3 = vmul.f32 %v4229_v41, %v9830_v50  ;;  %v4103_v46 = vmul.f32 %v4102_v52, %v11258_v18  ;;  %v4221_v7 = vmul.f32 %v4220_v37, %v9830_v50 }
 0x40a   : > { %v6248_v51 = vpop.eup %6247  ;;  %v4127_v4 = vsel %vm4124_vm11, %v4126_v57, %v4122_v62  ;;  %v4264_v39 = vmul.f32 3.8918573e-05, %v9897_v43  ;;  %v4143_v14 = vmul.f32 %v4142_v58, %v9680_v24  ;;  %v4182_v45 = vadd.f32 1.1283791, %v4181_v25 }
 0x40b   : > { %v4295_v54 = vmul.f32 %v4294_v5, %v9923_v20  ;;  %v4155_v38 = vmul.f32 %v6248_v51, %v9936_v44  ;;  %v4258_v26 = vadd.f32 0.05243302, %v4257_v61  ;;  %v4331_v12 = vmul.f32 %v9963_v56, %v9963_v56 }
 0x40c   : > { %v6250_v27 = vpop.eup %6249  ;;  %v9985_v48 = vmul.f32 0.70710677, %v9967_v6  ;;  %v4231_v19 = vadd.f32 0.4994258, %v4230_v3  ;;  %v4128_v1 = vmul.f32 %v4127_v4, %v4103_v46  ;;  %v4163_v24 = vand.u32 2147483647, %v9936_v44 }
 0x40d   : > { %v4156_v59 = vsub.f32 1.0, %v4155_v38  ;;  %v4195_v55 = vmul.f32 %v6250_v27, %v9942_v2  ;;  %v4222_v0 = vadd.f32 1.1283791, %v4221_v7  ;;  %v4165_v53 = vand.u32 2147483648, %v9936_v44 }
 0x40e   : > { %v4232_v47 = vmul.f32 %v4231_v19, %v9830_v50  ;;  %v4265_v10 = vadd.f32 0.001143296, %v4264_v39  ;;  %v4296_v33 = vadd.f32 0.0036580483, %v4295_v54  ;;  %vm4160_vm12 = vweird.f32 %v6248_v51 }
 0x40f   : > { %v4157_v21 = vmul.f32 %v6248_v51, %v4156_v59  ;;  %v4196_v13 = vsub.f32 1.0, %v4195_v55  ;;  %v9993_v60 = vmin.f32 %v4331_v12, 16.0  ;;  %v4371_v31 = vmul.f32 %v9985_v48, %v9985_v48 }
 0x410   : > { %vm4159_vm13 = vweird.f32 %v9936_v44  ;;  %v9998_v35 = vadd.f32 1.0, %v4232_v47  ;;  %v5912_v34 = vclamps-f32 %v4128_v1, 1.0  ;;  %vm4164_vm14 = vcmp.eq.f32.partialorder %v4163_v24, 8.507059e+37 }
 0x411   : > { %v4158_v8 = vadd.f32 %v6248_v51, %v4157_v21  ;;  %v4197_v41 = vmul.f32 %v6250_v27, %v4196_v13  ;;  %vm4161_vm15 = vmor %vm4159_vm13, %vm4160_vm12  ;;  %v4166_v50 = vor.u32 1.1754944e-38, %v4165_v53  ;;  %vm4200_vm0 = vweird.f32 %v6250_v27 }
 0x412   : > { %6251 = vrcp.f32 %v9998_v35  ;;  %v4266_v52 = vmul.f32 %v4265_v10, %v9897_v43  ;;  %v4205_v58 = vand.u32 2147483648, %v9942_v2  ;;  %v4304_v25 = vmul.f32 3.8918573e-05, %v9923_v20 }
 0x413   : > { %v4162_v37 = vsel %vm4161_vm15, %v6248_v51, %v4158_v8  ;;  %v4198_v11 = vadd.f32 %v6250_v27, %v4197_v41  ;;  %v4297_v44 = vmul.f32 %v4296_v33, %v9923_v20  ;;  %vm4199_vm1 = vweird.f32 %v9942_v2 }
 0x414   : > { %v4167_v5 = vsel %vm4164_vm14, %v4166_v50, %v4162_v37  ;;  %v4203_v62 = vand.u32 2147483647, %v9942_v2  ;;  %v10008_v61 = vmul.f32 0.5, %v9741_v29  ;;  %v4259_v57 = vmul.f32 %v4258_v26, %v9897_v43  ;;  %vm10013_vm2 = vmor %vm4199_vm1, %vm4200_vm0  ;;  %v10021_v2 = vpop.f32.mrf.mxu2 }
 0x415   : > { %v4333_v3 = vmul.f32 2.1237322e-06, %v9993_v60  ;;  %v4168_v51 = vmul.f32 %v4167_v5, %v4143_v14  ;;  %v10017_v46 = vmin.f32 %v4371_v31, 16.0  ;;  %v5137_v7 = vadd.f32 1.0, %v5912_v34 }
 0x416   : > { %v4202_v4 = vsel %vm10013_vm2, %v6250_v27, %v4198_v11  ;;  %v4267_v29 = vadd.f32 0.014752088, %v4266_v52  ;;  %v4183_v39 = vmul.f32 %v4182_v45, %v9755_v63  ;;  %v4206_v38 = vor.u32 1.1754944e-38, %v4205_v58 }
 0x417   : > { %v5913_v54 = vclamps-f32 %v4168_v51, 1.0  ;;  %v4305_v26 = vadd.f32 0.001143296, %v4304_v25  ;;  %v4223_v12 = vmul.f32 %v4222_v0, %v9801_v49  ;;  %v4298_v19 = vadd.f32 0.05243302, %v4297_v44 }
 0x418   : > { %v6252_v14 = vpop.eup %6251  ;;  %v10027_v1 = vadd.f32 %v9596_v15, %v9908_v22  ;;  %vm4204_vm3 = vcmp.eq.f32.partialorder %v4203_v62, 8.507059e+37  ;;  %v4260_v59 = vadd.f32 0.18741608, %v4259_v57  ;;  %v4334_v53 = vadd.f32 0.00028619796, %v4333_v3 }
 0x419   : > { %v5138_v24 = vadd.f32 1.0, %v5913_v54  ;;  %v4207_v27 = vsel %vm4204_vm3, %v4206_v38, %v4202_v4  ;;  %v4235_v55 = vmul.f32 %v6252_v14, %v9998_v35  ;;  %v4373_v63 = vmul.f32 2.1237322e-06, %v10017_v46 }
 0x41a   : > { %v5169_v45 = vmul.f32 %v5137_v7, %v9970_v40  ;;  %v4268_v47 = vmul.f32 %v4267_v29, %v9897_v43  ;;  %v4306_v10 = vmul.f32 %v4305_v26, %v9923_v20  ;;  %v4344_v22 = vmul.f32 3.8918573e-05, %v9993_v60 }
 0x41b   : > { %v5170_v49 = vmul.f32 %v5138_v24, %v9973_v16  ;;  %v4236_v0 = vsub.f32 1.0, %v4235_v55  ;;  %v4299_v33 = vmul.f32 %v4298_v19, %v9923_v20  ;;  %v10038_v21 = vmul.f32 0.70710677, %v10027_v1 }
 0x41c   : > { %v4208_v13 = vmul.f32 %v4207_v27, %v4183_v39  ;;  %v4245_v31 = vand.u32 2147483648, %v9998_v35  ;;  %vm4240_vm4 = vweird.f32 %v6252_v14  ;;  %v4243_v40 = vand.u32 2147483647, %v9998_v35  ;;  %v10050_v62 = vpop.f32.mrf.mxu2 }
 0x41d   : > { %v5198_v34 = vpack.c.bf16 %v5170_v49, %v5169_v45  ;;  %v4237_v8 = vmul.f32 %v6252_v14, %v4236_v0  ;;  %v4335_v16 = vmul.f32 %v4334_v53, %v9993_v60  ;;  %v4374_v41 = vadd.f32 0.00028619796, %v4373_v63 }
 0x41e   : > { %v10045_v50 = vadd.f32 %v9596_v15, %v9938_v17  ;;  %v4269_v52 = vadd.f32 0.112945676, %v4268_v47  ;;  %vm4239_vm5 = vweird.f32 %v9998_v35  ;;  %v4307_v11 = vadd.f32 0.014752088, %v4306_v10 }
 0x41f   : > { %5302 = vmatmul.bf16.gmra.mxu3 %v5198_v34  ;;  %v4238_v37 = vadd.f32 %v6252_v14, %v4237_v8  ;;  %v4345_v58 = vadd.f32 0.001143296, %v4344_v22  ;;  %v4411_v25 = vmul.f32 %v10038_v21, %v10038_v21  ;;  %v5914_v44 = vclamps-f32 %v4208_v13, 1.0  ;;  %vm4241_vm6 = vmor %vm4239_vm5, %vm4240_vm4 }
 0x420   : > { %v4246_v5 = vor.u32 1.1754944e-38, %v4245_v31  ;;  %v4270_v57 = vmul.f32 %v4269_v52, %v9897_v43  ;;  %vm4244_vm7 = vcmp.eq.f32.partialorder %v4243_v40, 8.507059e+37  ;;  %v4308_v15 = vmul.f32 %v4307_v11, %v9923_v20 }
 0x421   : > { %v4242_v3 = vsel %vm4241_vm6, %v6252_v14, %v4238_v37  ;;  %v4346_v17 = vmul.f32 %v4345_v58, %v9993_v60  ;;  %v4300_v51 = vadd.f32 0.18741608, %v4299_v33  ;;  %v10056_v35 = vmul.f32 0.70710677, %v10045_v50 }
 0x422   : > { %v4247_v18 = vsel %vm4244_vm7, %v4246_v5, %v4242_v3  ;;  %v4271_v7 = vadd.f32 0.4994258, %v4270_v57  ;;  %v4336_v4 = vadd.f32 0.0036580483, %v4335_v16  ;;  %v4309_v39 = vadd.f32 0.112945676, %v4308_v15 }
 0x423   : > { %v4248_v29 = vmul.f32 %v4247_v18, %v4223_v12  ;;  %v4347_v54 = vadd.f32 0.014752088, %v4346_v17  ;;  %v4375_v38 = vmul.f32 %v4374_v41, %v10017_v46  ;;  %v10059_v26 = vmin.f32 %v4411_v25, 16.0  ;;  %v10091_v57 = vld [vmem:[%s11106_s6] ss:$0 sm:$0xff] }
 0x424   : > { %v5139_v14 = vadd.f32 1.0, %v5914_v44  ;;  %v4272_v19 = vmul.f32 %v4271_v7, %v9897_v43  ;;  %v4310_v27 = vmul.f32 %v4309_v39, %v9923_v20  ;;  %v4384_v53 = vmul.f32 3.8918573e-05, %v10017_v46  ;;  %v10079_v40 = vpop.f32.mrf.mxu2 }
 0x425   : > { %v5915_v24 = vclamps-f32 %v4248_v29, 1.0  ;;  %v4348_v55 = vmul.f32 %v4347_v54, %v9993_v60  ;;  %v3796_v63 = vmul.f32 0.5, %v9787_v9  ;;  %v4261_v12 = vmul.f32 %v4260_v59, %v9897_v43 }
 0x426   : > { %v4451_v45 = vmul.f32 %v10056_v35, %v10056_v35  ;;  %v10069_v47 = vadd.f32 1.0, %v4272_v19  ;;  %v4301_v49 = vmul.f32 %v4300_v51, %v9923_v20  ;;  %v4311_v10 = vadd.f32 0.4994258, %v4310_v27 }
 0x427   : > { %v5140_v0 = vadd.f32 1.0, %v5915_v24  ;;  %v4349_v22 = vadd.f32 0.112945676, %v4348_v55  ;;  %v4337_v33 = vmul.f32 %v4336_v4, %v9993_v60  ;;  %v4376_v13 = vadd.f32 0.0036580483, %v4375_v38 }
 0x428   : > { %v4413_v31 = vmul.f32 2.1237322e-06, %v10059_v26  ;;  %6253 = vrcp.f32 %v10069_v47  ;;  %v5171_v9 = vmul.f32 %v5139_v14, %v10008_v61  ;;  %v4312_v59 = vmul.f32 %v4311_v10, %v9923_v20 }
 0x429   : > { %v5172_v43 = vmul.f32 %v5140_v0, %v3796_v63  ;;  %v4385_v34 = vadd.f32 0.001143296, %v4384_v53  ;;  %v10077_v8 = vmin.f32 %v4451_v45, 16.0  ;;  %v4350_v16 = vmul.f32 %v4349_v22, %v9993_v60 }
 0x42a   : > { %v10082_v52 = vadd.f32 1.0, %v4312_v59  ;;  %v4338_v37 = vadd.f32 0.05243302, %v4337_v33  ;;  %v4377_v11 = vmul.f32 %v4376_v13, %v10017_v46  ;;  %v4414_v58 = vadd.f32 0.00028619796, %v4413_v31 }
 0x42b   : > { %v5199_v41 = vpack.c.bf16 %v5172_v43, %v5171_v9  ;;  %v4262_v25 = vadd.f32 1.1283791, %v4261_v12  ;;  %v4302_v44 = vadd.f32 1.1283791, %v4301_v49  ;;  %v4386_v20 = vmul.f32 %v4385_v34, %v10017_v46 }
 0x42c   : > { %6255 = vrcp.f32 %v10082_v52  ;;  %v4453_v5 = vmul.f32 2.1237322e-06, %v10077_v8  ;;  %v10095_v3 = vadd.f32 %v10091_v57, %v9987_v36  ;;  %v4351_v15 = vadd.f32 0.4994258, %v4350_v16  ;;  %v10119_v49 = vpop.f32.mrf.mxu2 }
 0x42d   : > { %v10098_v17 = vmul.f32 0.5, %v9845_v30  ;;  %v10101_v51 = vmul.f32 0.5, %v9888_v32  ;;  %v4339_v7 = vmul.f32 %v4338_v37, %v9993_v60  ;;  %v4378_v4 = vadd.f32 0.05243302, %v4377_v11 }
 0x42e   : > { %v6254_v61 = vpop.eup %6253  ;;  %v4415_v29 = vmul.f32 %v4414_v58, %v10059_v26  ;;  %v4352_v39 = vmul.f32 %v4351_v15, %v9993_v60  ;;  %v4263_v36 = vmul.f32 %v4262_v25, %v9858_v28  ;;  %v4303_v54 = vmul.f32 %v4302_v44, %v9902_v42 }
 0x42f   : > { %5307 = vmatmul.bf16.gmra.mxu3 %v5199_v41  ;;  %v4275_v18 = vmul.f32 %v6254_v61, %v10069_v47  ;;  %v4387_v30 = vadd.f32 0.014752088, %v4386_v20  ;;  %v4454_v14 = vadd.f32 0.00028619796, %v4453_v5  ;;  %v10110_v32 = vmul.f32 0.70710677, %v10095_v3 }
 0x430   : > { %v4285_v19 = vand.u32 2147483648, %v10069_v47  ;;  %v10113_v24 = vadd.f32 1.0, %v4352_v39  ;;  %vm4280_vm8 = vweird.f32 %v6254_v61  ;;  %v4283_v53 = vand.u32 2147483647, %v10069_v47 }
 0x431   : > { %v4276_v38 = vsub.f32 1.0, %v4275_v18  ;;  %v4388_v63 = vmul.f32 %v4387_v30, %v10017_v46  ;;  %v4340_v28 = vadd.f32 0.18741608, %v4339_v7  ;;  %v4379_v42 = vmul.f32 %v4378_v4, %v10017_v46 }
 0x432   : > { %v6256_v27 = vpop.eup %6255  ;;  %v4416_v12 = vadd.f32 0.0036580483, %v4415_v29  ;;  %v10123_v0 = vadd.f32 %v10091_v57, %v10021_v2  ;;  %vm4279_vm9 = vweird.f32 %v10069_v47  ;;  %6257 = vrcp.f32 %v10113_v24 }
 0x433   : > { %v4277_v55 = vmul.f32 %v6254_v61, %v4276_v38  ;;  %v4315_v45 = vmul.f32 %v6256_v27, %v10082_v52  ;;  %v4455_v22 = vmul.f32 %v4454_v14, %v10077_v8  ;;  %v4491_v33 = vmul.f32 %v10110_v32, %v10110_v32  ;;  %vm4281_vm10 = vmor %vm4279_vm9, %vm4280_vm8 }
 0x434   : > { %v4286_v13 = vor.u32 1.1754944e-38, %v4285_v19  ;;  %vm4284_vm11 = vcmp.eq.f32.partialorder %v4283_v53, 8.507059e+37  ;;  %v4325_v43 = vand.u32 2147483648, %v10082_v52  ;;  %v4389_v59 = vadd.f32 0.112945676, %v4388_v63 }
 0x435   : > { %v4278_v10 = vadd.f32 %v6254_v61, %v4277_v55  ;;  %v4316_v31 = vsub.f32 1.0, %v4315_v45  ;;  %vm4320_vm12 = vweird.f32 %v6256_v27  ;;  %v4323_v47 = vand.u32 2147483647, %v10082_v52  ;;  %v10147_v55 = vpop.f32.mrf.mxu2 }
 0x436   : > { %v4380_v16 = vadd.f32 0.18741608, %v4379_v42  ;;  %v10133_v41 = vmul.f32 0.70710677, %v10123_v0  ;;  %v4390_v11 = vmul.f32 %v4389_v59, %v10017_v46  ;;  %v4417_v58 = vmul.f32 %v4416_v12, %v10059_v26 }
 0x437   : > { %v4282_v9 = vsel %vm4281_vm10, %v6254_v61, %v4278_v10  ;;  %v4317_v34 = vmul.f32 %v6256_v27, %v4316_v31  ;;  %vm4319_vm13 = vweird.f32 %v10082_v52  ;;  %v4424_v44 = vmul.f32 3.8918573e-05, %v10059_v26 }
 0x438   : > { %v4287_v2 = vsel %vm4284_vm11, %v4286_v13, %v4282_v9  ;;  %v6258_v20 = vpop.eup %6257  ;;  %v4456_v61 = vadd.f32 0.0036580483, %v4455_v22  ;;  %v10139_v5 = vmin.f32 %v4491_v33, 16.0  ;;  %vm4321_vm14 = vmor %vm4319_vm13, %vm4320_vm12  ;;  %v4326_v15 = vor.u32 1.1754944e-38, %v4325_v43 }
 0x439   : > { %v4288_v37 = vmul.f32 %v4287_v2, %v4263_v36  ;;  %v4318_v25 = vadd.f32 %v6256_v27, %v4317_v34  ;;  %v4391_v18 = vadd.f32 0.4994258, %v4390_v11  ;;  %vm4324_vm15 = vcmp.eq.f32.partialorder %v4323_v47, 8.507059e+37 }
 0x43a   : > { %v4355_v29 = vmul.f32 %v6258_v20, %v10113_v24  ;;  %v4531_v39 = vmul.f32 %v10133_v41, %v10133_v41  ;;  %v4464_v38 = vmul.f32 3.8918573e-05, %v10077_v8  ;;  %v4341_v30 = vmul.f32 %v4340_v28, %v9993_v60 }
 0x43b   : > { %v5916_v7 = vclamps-f32 %v4288_v37, 1.0  ;;  %v4322_v4 = vsel %vm4321_vm14, %v6256_v27, %v4318_v25  ;;  %v4392_v52 = vmul.f32 %v4391_v18, %v10017_v46  ;;  %v4425_v53 = vadd.f32 0.001143296, %v4424_v44 }
 0x43c   : > { %v4327_v36 = vsel %vm4324_vm15, %v4326_v15, %v4322_v4  ;;  %v4356_v19 = vsub.f32 1.0, %v4355_v29  ;;  %v4381_v27 = vmul.f32 %v4380_v16, %v10017_v46  ;;  %v4418_v63 = vadd.f32 0.05243302, %v4417_v58 }
 0x43d   : > { %v4328_v14 = vmul.f32 %v4327_v36, %v4303_v54  ;;  %v4493_v42 = vmul.f32 2.1237322e-06, %v10139_v5  ;;  %v10151_v12 = vadd.f32 1.0, %v4392_v52  ;;  %v4457_v45 = vmul.f32 %v4456_v61, %v10077_v8 }
 0x43e   : > { %v5141_v22 = vadd.f32 1.0, %v5916_v7  ;;  %v4357_v33 = vmul.f32 %v6258_v20, %v4356_v19  ;;  %v10154_v13 = vmin.f32 %v4531_v39, 16.0  ;;  %vm4360_vm0 = vweird.f32 %v6258_v20  ;;  %v10180_v39 = vpop.f32.mrf.mxu2 }
 0x43f   : > { %v5917_v10 = vclamps-f32 %v4328_v14, 1.0  ;;  %6259 = vrcp.f32 %v10151_v12  ;;  %v4465_v60 = vadd.f32 0.001143296, %v4464_v38  ;;  %v4365_v46 = vand.u32 2147483648, %v10113_v24 }
 0x440   : > { %v4358_v28 = vadd.f32 %v6258_v20, %v4357_v33  ;;  %v4426_v31 = vmul.f32 %v4425_v53, %v10059_v26  ;;  %v4342_v9 = vadd.f32 1.1283791, %v4341_v30  ;;  %v4382_v43 = vadd.f32 1.1283791, %v4381_v27 }
 0x441   : > { %v5142_v54 = vadd.f32 1.0, %v5917_v10  ;;  %vm4359_vm1 = vweird.f32 %v10113_v24  ;;  %v4363_v59 = vand.u32 2147483647, %v10113_v24  ;;  %v4419_v2 = vmul.f32 %v4418_v63, %v10059_v26 }
 0x442   : > { %v4494_v34 = vadd.f32 0.00028619796, %v4493_v42  ;;  %v5173_v47 = vmul.f32 %v5141_v22, %v10098_v17  ;;  %vm10165_vm2 = vmor %vm4359_vm1, %vm4360_vm0  ;;  %v4533_v11 = vmul.f32 2.1237322e-06, %v10154_v13  ;;  %v10172_v58 = vadd.f32 %v10091_v57, %v10050_v62 }
 0x443   : > { %v5174_v16 = vmul.f32 %v5142_v54, %v10101_v51  ;;  %v4362_v24 = vsel %vm10165_vm2, %v6258_v20, %v4358_v28  ;;  %v4466_v25 = vmul.f32 %v4465_v60, %v10077_v8  ;;  %v4458_v44 = vadd.f32 0.05243302, %v4457_v45 }
 0x444   : > { %v4366_v61 = vor.u32 1.1754944e-38, %v4365_v46  ;;  %v4427_v51 = vadd.f32 0.014752088, %v4426_v31  ;;  %v4343_v18 = vmul.f32 %v4342_v9, %v9963_v56  ;;  %v4383_v7 = vmul.f32 %v4382_v43, %v9985_v48 }
 0x445   : > { %v5200_v17 = vpack.c.bf16 %v5174_v16, %v5173_v47  ;;  %v6260_v15 = vpop.eup %6259  ;;  %vm4364_vm3 = vcmp.eq.f32.partialorder %v4363_v59, 8.507059e+37  ;;  %v4420_v4 = vadd.f32 0.18741608, %v4419_v2  ;;  %v4495_v36 = vmul.f32 %v4494_v34, %v10139_v5 }
 0x446   : > { %v4367_v29 = vsel %vm4364_vm3, %v4366_v61, %v4362_v24  ;;  %v4395_v62 = vmul.f32 %v6260_v15, %v10151_v12  ;;  %v4428_v20 = vmul.f32 %v4427_v51, %v10059_v26  ;;  %v4534_v52 = vadd.f32 0.00028619796, %v4533_v11  ;;  %v10212_v61 = vpop.f32.mrf.mxu2 }
 0x447   : > { %5312 = vmatmul.bf16.gmra.mxu3 %v5200_v17  ;;  %v10185_v38 = vmul.f32 0.70710677, %v10172_v58  ;;  %v4467_v30 = vadd.f32 0.014752088, %v4466_v25  ;;  %v4459_v56 = vmul.f32 %v4458_v44, %v10077_v8  ;;  %v4504_v19 = vmul.f32 3.8918573e-05, %v10139_v5 }
 0x448   : > { %v4396_v48 = vsub.f32 1.0, %v4395_v62  ;;  %v4429_v14 = vadd.f32 0.112945676, %v4428_v20  ;;  %v4368_v53 = vmul.f32 %v4367_v29, %v4343_v18  ;;  %v4403_v27 = vand.u32 2147483647, %v10151_v12 }
 0x449   : > { %v4405_v63 = vand.u32 2147483648, %v10151_v12  ;;  %v4468_v42 = vmul.f32 %v4467_v30, %v10077_v8  ;;  %vm4400_vm4 = vweird.f32 %v6260_v15  ;;  %v4505_v22 = vadd.f32 0.001143296, %v4504_v19 }
 0x44a   : > { %v4397_v45 = vmul.f32 %v6260_v15, %v4396_v48  ;;  %v4430_v10 = vmul.f32 %v4429_v14, %v10059_v26  ;;  %v4571_v33 = vmul.f32 %v10185_v38, %v10185_v38  ;;  %v10197_v60 = vadd.f32 %v10091_v57, %v10079_v40 }
 0x44b   : > { %vm4399_vm5 = vweird.f32 %v10151_v12  ;;  %v4469_v54 = vadd.f32 0.112945676, %v4468_v42  ;;  %v4506_v31 = vmul.f32 %v4505_v22, %v10139_v5  ;;  %v4544_v9 = vmul.f32 3.8918573e-05, %v10154_v13 }
 0x44c   : > { %v4398_v28 = vadd.f32 %v6260_v15, %v4397_v45  ;;  %v4431_v46 = vadd.f32 0.4994258, %v4430_v10  ;;  %v4496_v43 = vadd.f32 0.0036580483, %v4495_v36  ;;  %v4535_v59 = vmul.f32 %v4534_v52, %v10154_v13  ;;  %vm4401_vm6 = vmor %vm4399_vm5, %vm4400_vm4 }
 0x44d   : > { %v4406_v2 = vor.u32 1.1754944e-38, %v4405_v63  ;;  %v4470_v34 = vmul.f32 %v4469_v54, %v10077_v8  ;;  %v5918_v47 = vclamps-f32 %v4368_v53, 1.0  ;;  %vm4404_vm7 = vcmp.eq.f32.partialorder %v4403_v27, 8.507059e+37 }
 0x44e   : > { %v4402_v16 = vsel %vm4401_vm6, %v6260_v15, %v4398_v28  ;;  %v4432_v40 = vmul.f32 %v4431_v46, %v10059_v26  ;;  %v10205_v12 = vmin.f32 %v4571_v33, 16.0  ;;  %v4507_v24 = vadd.f32 0.014752088, %v4506_v31 }
 0x44f   : > { %v4407_v37 = vsel %vm4404_vm7, %v4406_v2, %v4402_v16  ;;  %v4471_v11 = vadd.f32 0.4994258, %v4470_v34  ;;  %v10208_v25 = vmul.f32 0.70710677, %v10197_v60  ;;  %v4545_v51 = vadd.f32 0.001143296, %v4544_v9 }
 0x450   : > { %v4408_v44 = vmul.f32 %v4407_v37, %v4383_v7  ;;  %v10210_v17 = vadd.f32 1.0, %v4432_v40  ;;  %v3799_v18 = vmul.f32 0.5, %v9946_v23  ;;  %v3800_v15 = vmul.f32 0.5, %v9967_v6 }
 0x451   : > { %v4421_v29 = vmul.f32 %v4420_v4, %v10059_v26  ;;  %v4472_v62 = vmul.f32 %v4471_v11, %v10077_v8  ;;  %v4460_v20 = vadd.f32 0.18741608, %v4459_v56  ;;  %v5143_v52 = vadd.f32 1.0, %v5918_v47 }
 0x452   : > { %v5919_v36 = vclamps-f32 %v4408_v44, 1.0  ;;  %6261 = vrcp.f32 %v10210_v17  ;;  %v4497_v7 = vmul.f32 %v4496_v43, %v10139_v5  ;;  %v4536_v30 = vadd.f32 0.0036580483, %v4535_v59  ;;  %v3767_v43 = vpop.f32.mrf.mxu2 }
 0x453   : > { %v10220_v48 = vadd.f32 1.0, %v4472_v62  ;;  %v4508_v14 = vmul.f32 %v4507_v24, %v10139_v5  ;;  %v4573_v23 = vmul.f32 2.1237322e-06, %v10205_v12  ;;  %v4611_v6 = vmul.f32 %v10208_v25, %v10208_v25 }
 0x454   : > { %v5144_v26 = vadd.f32 1.0, %v5919_v36  ;;  %v4546_v4 = vmul.f32 %v4545_v51, %v10154_v13  ;;  %v4422_v56 = vadd.f32 1.1283791, %v4421_v29  ;;  %v4461_v19 = vmul.f32 %v4460_v20, %v10077_v8 }
 0x455   : > { %6263 = vrcp.f32 %v10220_v48  ;;  %v10231_v53 = vadd.f32 %v10091_v57, %v10119_v49  ;;  %v5175_v27 = vmul.f32 %v5143_v52, %v3799_v18  ;;  %v4498_v42 = vadd.f32 0.05243302, %v4497_v7 }
 0x456   : > { %v5176_v63 = vmul.f32 %v5144_v26, %v3800_v15  ;;  %v4537_v45 = vmul.f32 %v4536_v30, %v10154_v13  ;;  %v4509_v10 = vadd.f32 0.112945676, %v4508_v14  ;;  %v4574_v33 = vadd.f32 0.00028619796, %v4573_v23 }
 0x457   : > { %v10234_v54 = vmin.f32 %v4611_v6, 16.0  ;;  %v4547_v46 = vadd.f32 0.014752088, %v4546_v4  ;;  %v4423_v31 = vmul.f32 %v4422_v56, %v10038_v21  ;;  %v4462_v9 = vadd.f32 1.1283791, %v4461_v19 }
 0x458   : > { %v6262_v22 = vpop.eup %6261  ;;  %v5201_v28 = vpack.c.bf16 %v5176_v63, %v5175_v27  ;;  %v10239_v49 = vmul.f32 0.70710677, %v10231_v53  ;;  %v4510_v59 = vmul.f32 %v4509_v10, %v10139_v5  ;;  %v4499_v47 = vmul.f32 %v4498_v42, %v10139_v5 }
 0x459   : > { %v4435_v8 = vmul.f32 %v6262_v22, %v10210_v17  ;;  %v4548_v2 = vmul.f32 %v4547_v46, %v10154_v13  ;;  %v4538_v16 = vadd.f32 0.05243302, %v4537_v45  ;;  %v4445_v37 = vand.u32 2147483648, %v10210_v17 }
 0x45a   : > { %5317 = vmatmul.bf16.gmra.mxu3 %v5201_v28  ;;  %v4575_v21 = vmul.f32 %v4574_v33, %v10205_v12  ;;  %v4613_v11 = vmul.f32 2.1237322e-06, %v10234_v54  ;;  %v4443_v24 = vand.u32 2147483647, %v10210_v17  ;;  %vm4440_vm8 = vweird.f32 %v6262_v22 }
 0x45b   : > { %v6264_v34 = vpop.eup %6263  ;;  %v4436_v40 = vsub.f32 1.0, %v4435_v8  ;;  %v10250_v18 = vadd.f32 %v10091_v57, %v3767_v43  ;;  %v4511_v15 = vadd.f32 0.4994258, %v4510_v59  ;;  %v4651_v29 = vmul.f32 %v10239_v49, %v10239_v49 }
 0x45c   : > { %v4475_v44 = vmul.f32 %v6264_v34, %v10220_v48  ;;  %vm4439_vm9 = vweird.f32 %v10210_v17  ;;  %v4549_v20 = vadd.f32 0.112945676, %v4548_v2  ;;  %v4446_v52 = vor.u32 1.1754944e-38, %v4445_v37 }
 0x45d   : > { %v4437_v51 = vmul.f32 %v6262_v22, %v4436_v40  ;;  %v4485_v7 = vand.u32 2147483648, %v10220_v48  ;;  %v4512_v30 = vmul.f32 %v4511_v15, %v10139_v5  ;;  %vm4441_vm10 = vmor %vm4439_vm9, %vm4440_vm8  ;;  %vm4480_vm11 = vweird.f32 %v6264_v34 }
 0x45e   : > { %v4476_v62 = vsub.f32 1.0, %v4475_v44  ;;  %v4483_v23 = vand.u32 2147483647, %v10220_v48  ;;  %v4550_v6 = vmul.f32 %v4549_v20, %v10154_v13  ;;  %vm4444_vm12 = vcmp.eq.f32.partialorder %v4443_v24, 8.507059e+37 }
 0x45f   : > { %v4438_v36 = vadd.f32 %v6262_v22, %v4437_v51  ;;  %v10260_v4 = vmul.f32 0.70710677, %v10250_v18  ;;  %v10262_v17 = vadd.f32 1.0, %v4512_v30  ;;  %v4614_v56 = vadd.f32 0.00028619796, %v4613_v11 }
 0x460   : > { %v4477_v14 = vmul.f32 %v6264_v34, %v4476_v62  ;;  %vm4479_vm13 = vweird.f32 %v10220_v48  ;;  %v4486_v42 = vor.u32 1.1754944e-38, %v4485_v7  ;;  %v4551_v45 = vadd.f32 0.4994258, %v4550_v6 }
 0x461   : > { %v4442_v26 = vsel %vm4441_vm10, %v6262_v22, %v4438_v36  ;;  %vm4481_vm14 = vmor %vm4479_vm13, %vm4480_vm11  ;;  %6265 = vrcp.f32 %v10262_v17  ;;  %v4463_v10 = vmul.f32 %v4462_v9, %v10056_v35  ;;  %v10267_v22 = vmin.f32 %v4651_v29, 16.0 }
 0x462   : > { %v4447_v19 = vsel %vm4444_vm12, %v4446_v52, %v4442_v26  ;;  %v4478_v27 = vadd.f32 %v6264_v34, %v4477_v14  ;;  %vm4484_vm15 = vcmp.eq.f32.partialorder %v4483_v23, 8.507059e+37  ;;  %v4811_v8 = vmul.f32 %v10260_v4, %v10260_v4 }
 0x463   : > { %v4448_v63 = vmul.f32 %v4447_v19, %v4423_v31  ;;  %v4584_v43 = vmul.f32 3.8918573e-05, %v10205_v12  ;;  %v4500_v48 = vadd.f32 0.18741608, %v4499_v47  ;;  %v4539_v59 = vmul.f32 %v4538_v16, %v10154_v13 }
 0x464   : > { %v4482_v33 = vsel %vm4481_vm14, %v6264_v34, %v4478_v27  ;;  %v4576_v2 = vadd.f32 0.0036580483, %v4575_v21  ;;  %v4615_v40 = vmul.f32 %v4614_v56, %v10234_v54  ;;  %v4552_v35 = vmul.f32 %v4551_v45, %v10154_v13 }
 0x465   : > { %v5920_v28 = vclamps-f32 %v4448_v63, 1.0  ;;  %v4487_v46 = vsel %vm4484_vm15, %v4486_v42, %v4482_v33  ;;  %v3801_v9 = vmul.f32 0.5, %v10027_v1  ;;  %v10278_v34 = vadd.f32 %v10091_v57, %v10147_v55 }
 0x466   : > { %v4488_v31 = vmul.f32 %v4487_v46, %v4463_v10  ;;  %v4653_v44 = vmul.f32 2.1237322e-06, %v10267_v22  ;;  %v10281_v47 = vmin.f32 %v4811_v8, 16.0  ;;  %v10283_v51 = vadd.f32 1.0, %v4552_v35 }
 0x467   : > { %v5145_v11 = vadd.f32 1.0, %v5920_v28  ;;  %v6266_v24 = vpop.eup %6265  ;;  %v4585_v16 = vadd.f32 0.001143296, %v4584_v43  ;;  %v3802_v21 = vmul.f32 0.5, %v10045_v50  ;;  %v4501_v15 = vmul.f32 %v4500_v48, %v10139_v5 }
 0x468   : > { %v5921_v37 = vclamps-f32 %v4488_v31, 1.0  ;;  %v4515_v1 = vmul.f32 %v6266_v24, %v10262_v17  ;;  %v4540_v62 = vadd.f32 0.18741608, %v4539_v59  ;;  %v4577_v55 = vmul.f32 %v4576_v2, %v10205_v12 }
 0x469   : > { %v4616_v20 = vadd.f32 0.0036580483, %v4615_v40  ;;  %6267 = vrcp.f32 %v10283_v51  ;;  %v10291_v36 = vmul.f32 0.70710677, %v10278_v34  ;;  %v5177_v52 = vmul.f32 %v5145_v11, %v3801_v9 }
 0x46a   : > { %v5146_v29 = vadd.f32 1.0, %v5921_v37  ;;  %v4516_v30 = vsub.f32 1.0, %v4515_v1  ;;  %v4654_v14 = vadd.f32 0.00028619796, %v4653_v44  ;;  %v4824_v50 = vmul.f32 3.8918573e-05, %v10281_v47 }
 0x46b   : > { %v4525_v5 = vand.u32 2147483648, %v10262_v17  ;;  %v4586_v23 = vmul.f32 %v4585_v16, %v10205_v12  ;;  %vm4520_vm0 = vweird.f32 %v6266_v24  ;;  %v4523_v56 = vand.u32 2147483647, %v10262_v17 }
 0x46c   : > { %v5178_v7 = vmul.f32 %v5146_v29, %v3802_v21  ;;  %v4517_v26 = vmul.f32 %v6266_v24, %v4516_v30  ;;  %v4541_v19 = vmul.f32 %v4540_v62, %v10154_v13  ;;  %v4617_v27 = vmul.f32 %v4616_v20, %v10234_v54 }
 0x46d   : > { %v4502_v63 = vadd.f32 1.1283791, %v4501_v15  ;;  %v4691_v42 = vmul.f32 %v10291_v36, %v10291_v36  ;;  %vm4519_vm1 = vweird.f32 %v10262_v17  ;;  %v4655_v33 = vmul.f32 %v4654_v14, %v10267_v22 }
 0x46e   : > { %v5202_v6 = vpack.c.bf16 %v5178_v7, %v5177_v52  ;;  %v4518_v45 = vadd.f32 %v6266_v24, %v4517_v26  ;;  %v4825_v28 = vadd.f32 0.001143296, %v4824_v50  ;;  %vm4521_vm2 = vmor %vm4519_vm1, %vm4520_vm0  ;;  %v4526_v46 = vor.u32 1.1754944e-38, %v4525_v5 }
 0x46f   : > { %v6268_v10 = vpop.eup %6267  ;;  %v4587_v8 = vadd.f32 0.014752088, %v4586_v23  ;;  %v4578_v43 = vadd.f32 0.05243302, %v4577_v55  ;;  %vm4524_vm3 = vcmp.eq.f32.partialorder %v4523_v56, 8.507059e+37  ;;  %v10306_v2 = vadd.f32 %v10091_v57, %v10180_v39 }
 0x470   : > { %5322 = vmatmul.bf16.gmra.mxu3 %v5202_v6  ;;  %v4522_v48 = vsel %vm4521_vm2, %v6266_v24, %v4518_v45  ;;  %v4555_v13 = vmul.f32 %v6268_v10, %v10283_v51  ;;  %v4542_v31 = vadd.f32 1.1283791, %v4541_v19  ;;  %v4618_v59 = vadd.f32 0.05243302, %v4617_v27 }
 0x471   : > { %v4527_v40 = vsel %vm4524_vm3, %v4526_v46, %v4522_v48  ;;  %v4503_v17 = vmul.f32 %v4502_v63, %v10110_v32  ;;  %v10309_v35 = vmin.f32 %v4691_v42, 16.0  ;;  %v4656_v37 = vadd.f32 0.0036580483, %v4655_v33  ;;  %v3769_v48 = vpop.f32.mrf.mxu2 }
 0x472   : > { %v4556_v9 = vsub.f32 1.0, %v4555_v13  ;;  %v4826_v11 = vmul.f32 %v4825_v28, %v10281_v47  ;;  %v4565_v24 = vand.u32 2147483648, %v10283_v51  ;;  %v4588_v44 = vmul.f32 %v4587_v8, %v10205_v12  ;;  %v10336_v28 = vpop.f32.mrf.mxu3 }
 0x473   : > { %v4528_v16 = vmul.f32 %v4527_v40, %v4503_v17  ;;  %vm4560_vm4 = vweird.f32 %v6268_v10  ;;  %v4563_v15 = vand.u32 2147483647, %v10283_v51  ;;  %v4543_v39 = vmul.f32 %v4542_v31, %v10133_v41 }
 0x474   : > { %v4557_v21 = vmul.f32 %v6268_v10, %v4556_v9  ;;  %v4579_v29 = vmul.f32 %v4578_v43, %v10205_v12  ;;  %v4619_v32 = vmul.f32 %v4618_v59, %v10234_v54  ;;  %v10319_v1 = vmul.f32 0.70710677, %v10306_v2 }
 0x475   : > { %v4693_v62 = vmul.f32 2.1237322e-06, %v10309_v35  ;;  %v10324_v55 = vadd.f32 %v10091_v57, %v10212_v61  ;;  %vm4559_vm5 = vweird.f32 %v10283_v51  ;;  %v4657_v52 = vmul.f32 %v4656_v37, %v10267_v22 }
 0x476   : > { %v4558_v20 = vadd.f32 %v6268_v10, %v4557_v21  ;;  %vm4561_vm6 = vmor %vm4559_vm5, %vm4560_vm4  ;;  %v4566_v41 = vor.u32 1.1754944e-38, %v4565_v24  ;;  %v4589_v7 = vadd.f32 0.112945676, %v4588_v44  ;;  %v4624_v30 = vmul.f32 3.8918573e-05, %v10234_v54 }
 0x477   : > { %v4827_v14 = vadd.f32 0.014752088, %v4826_v11  ;;  %v5922_v50 = vclamps-f32 %v4528_v16, 1.0  ;;  %vm4564_vm7 = vcmp.eq.f32.partialorder %v4563_v15, 8.507059e+37  ;;  %v4731_v23 = vmul.f32 %v10319_v1, %v10319_v1 }
 0x478   : > { %v4562_v5 = vsel %vm4561_vm6, %v6268_v10, %v4558_v20  ;;  %v4580_v61 = vadd.f32 0.18741608, %v4579_v29  ;;  %v4620_v26 = vadd.f32 0.18741608, %v4619_v32  ;;  %v10332_v56 = vmul.f32 0.70710677, %v10324_v55 }
 0x479   : > { %v4567_v6 = vsel %vm4564_vm7, %v4566_v41, %v4562_v5  ;;  %v4658_v19 = vadd.f32 0.05243302, %v4657_v52  ;;  %v4694_v27 = vadd.f32 0.00028619796, %v4693_v62  ;;  %v4590_v63 = vmul.f32 %v4589_v7, %v10205_v12 }
 0x47a   : > { %v4568_v51 = vmul.f32 %v4567_v6, %v4543_v39  ;;  %v4625_v42 = vadd.f32 0.001143296, %v4624_v30  ;;  %v4828_v45 = vmul.f32 %v4827_v14, %v10281_v47  ;;  %v5147_v10 = vadd.f32 1.0, %v5922_v50 }
 0x47b   : > { %v3803_v46 = vmul.f32 0.5, %v10095_v3  ;;  %v3804_v8 = vmul.f32 0.5, %v10123_v0  ;;  %v10340_v43 = vmin.f32 %v4731_v23, 16.0  ;;  %v4581_v13 = vmul.f32 %v4580_v61, %v10205_v12  ;;  %v5290_v61 = vpop.f32.mrf.mxu3 }
 0x47c   : > { %v5923_v33 = vclamps-f32 %v4568_v51, 1.0  ;;  %v4771_v31 = vmul.f32 %v10332_v56, %v10332_v56  ;;  %v4591_v40 = vadd.f32 0.4994258, %v4590_v63  ;;  %v4621_v17 = vmul.f32 %v4620_v26, %v10234_v54 }
 0x47d   : > { %v4659_v9 = vmul.f32 %v4658_v19, %v10267_v22  ;;  %v4695_v37 = vmul.f32 %v4694_v27, %v10309_v35  ;;  %v4626_v3 = vmul.f32 %v4625_v42, %v10234_v54  ;;  %v4829_v11 = vadd.f32 0.112945676, %v4828_v45 }
 0x47e   : > { %v5148_v59 = vadd.f32 1.0, %v5923_v33  ;;  %v5179_v0 = vmul.f32 %v5147_v10, %v3803_v46  ;;  %v4592_v44 = vmul.f32 %v4591_v40, %v10205_v12  ;;  %v4733_v16 = vmul.f32 2.1237322e-06, %v10340_v43 }
 0x47f   : > { %v10352_v21 = vadd.f32 %v10091_v57, %v3769_v48  ;;  %v10354_v15 = vmin.f32 %v4771_v31, 16.0  ;;  %v4582_v32 = vadd.f32 1.1283791, %v4581_v13  ;;  %v4622_v62 = vadd.f32 1.1283791, %v4621_v17 }
 0x480   : > { %v5180_v24 = vmul.f32 %v5148_v59, %v3804_v8  ;;  %v10356_v29 = vadd.f32 1.0, %v4592_v44  ;;  %v4627_v20 = vadd.f32 0.014752088, %v4626_v3  ;;  %v4660_v52 = vadd.f32 0.18741608, %v4659_v9 }
 0x481   : > { %v4696_v41 = vadd.f32 0.0036580483, %v4695_v37  ;;  %v4830_v7 = vmul.f32 %v4829_v11, %v10281_v47  ;;  %v4734_v12 = vadd.f32 0.00028619796, %v4733_v16  ;;  %v5433_v30 = vlaneseq  ;;  %v6305_v16 = vld [vmem:[%s6741_s5 + $0x8] sm:$0xff] }
 0x482   : > { %v5203_v39 = vpack.c.bf16 %v5180_v24, %v5179_v0  ;;  %6269 = vrcp.f32 %v10356_v29  ;;  %v10361_v14 = vmul.f32 0.70710677, %v10352_v21  ;;  %v10364_v50 = vmul.f32 0.5, %v10172_v58  ;;  %v3772_v58 = vpop.f32.mrf.mxu2 }
 0x483   : > { %v10367_v5 = vmul.f32 0.5, %v10197_v60  ;;  %v10370_v23 = vmul.f32 0.5, %v10231_v53  ;;  %v4773_v6 = vmul.f32 2.1237322e-06, %v10354_v15  ;;  %v10374_v26 = vmul.f32 %v4582_v32, %v10185_v38  ;;  %v10389_v38 = vld [vmem:[%s11108_s8] ss:$0 sm:$0xff] }
 0x484   : > { %5327 = vmatmul.bf16.gmra.mxu3 %v5203_v39  ;;  %v10377_v51 = vmul.f32 0.5, %v10278_v34  ;;  %v4813_v19 = vmul.f32 2.1237322e-06, %v10281_v47  ;;  %v4628_v27 = vmul.f32 %v4627_v20, %v10234_v54  ;;  %v10382_v60 = vmul.f32 %v4622_v62, %v10208_v25 }
 0x485   : > { %v4661_v53 = vmul.f32 %v4660_v52, %v10267_v22  ;;  %v4697_v63 = vmul.f32 %v4696_v41, %v10309_v35  ;;  %v4831_v42 = vadd.f32 0.4994258, %v4830_v7  ;;  %v4735_v34 = vmul.f32 %v4734_v12, %v10340_v43 }
 0x486   : > { %v10392_v45 = vshrl.u32 %v5433_v30, 7  ;;  %v4851_v33 = vmul.f32 %v10361_v14, %v10361_v14  ;;  %v4629_v10 = vadd.f32 0.112945676, %v4628_v27  ;;  %v10399_v46 = vmul.f32 0.5, %v10306_v2  ;;  %v6306_v30 = vld [vmem:[%s6741_s5] sm:$0xff] }
 0x487   : > { %v4774_v8 = vadd.f32 0.00028619796, %v4773_v6  ;;  %v5291_v48 = vadd.f32 %v10389_v38, %v5290_v61  ;;  %v10404_v13 = vadd.f32 %v10091_v57, %v3772_v58  ;;  %v4814_v31 = vadd.f32 0.00028619796, %v4813_v19  ;;  %v5293_v19 = vpop.f32.mrf.mxu3 }
 0x488   : > { %v10396_v25 = vpop.eup %6269  ;;  %v5435_v59 = vadd.s32 8, %v10392_v45  ;;  %v4664_v17 = vmul.f32 3.8918573e-05, %v10267_v22  ;;  %v4698_v9 = vadd.f32 0.05243302, %v4697_v63  ;;  %v4832_v2 = vmul.f32 %v4831_v42, %v10281_v47 }
 0x489   : > { %v4595_v40 = vmul.f32 %v10396_v25, %v10356_v29  ;;  %v5289_v37 = vadd.f32 %v10389_v38, %v10336_v28  ;;  %v4630_v3 = vmul.f32 %v4629_v10, %v10234_v54  ;;  %v10414_v11 = vadd.f32 1.1283791, %v4661_v53 }
 0x48a   : > { %v4736_v57 = vadd.f32 0.0036580483, %v4735_v34  ;;  %v10416_v0 = vstv %s5970_s23  ;;  %v10418_v24 = vmin.f32 %v4851_v33, 16.0  ;;  %v4775_v44 = vmul.f32 %v4774_v8, %v10354_v15  ;;  %s5606_s23 = scalar_lea.sflag [#allocation4], %s6737_s27 }
 0x48b   : > { %v5369_v39 = vsub.f32 %v5291_v48, %v6305_v16  ;;  %v10423_v32 = vmul.f32 0.70710677, %v10404_v13  ;;  %v4596_v62 = vsub.f32 1.0, %v4595_v40  ;;  %v4815_v28 = vmul.f32 %v4814_v31, %v10281_v47  ;;  %v6307_v40 = vld [vmem:[%s6741_s5 + $0x10] sm:$0xff] }
 0x48c   : > { %v5468_v20 = vadd.s32 %v10416_v0, %v5435_v59  ;;  %v4631_v52 = vadd.f32 0.4994258, %v4630_v3  ;;  %v4665_v41 = vadd.f32 0.001143296, %v4664_v17  ;;  %v4699_v7 = vmul.f32 %v4698_v9, %v10309_v35 }
 0x48d   : > { %v10428_v12 = vadd.f32 1.0, %v4832_v2  ;;  %v5368_v6 = vsub.f32 %v5289_v37, %v6306_v30  ;;  %v5467_v61 = vadd.s32 %v10416_v0, %v10392_v45  ;;  %v4864_v58 = vmul.f32 3.8918573e-05, %v10418_v24 }
 0x48e   : > { %v4632_v27 = vmul.f32 %v4631_v52, %v10234_v54  ;;  %v5294_v53 = vadd.f32 %v10389_v38, %v5293_v19  ;;  %v5436_v63 = vadd.s32 16, %v10392_v45  ;;  %v4776_v42 = vadd.f32 0.0036580483, %v4775_v44 }
 0x48f   : > { %v5401_v34 = vmul.f32 %v5369_v39, %v5369_v39  ;;  %v4891_v33 = vmul.f32 %v10423_v32, %v10423_v32  ;;  %v4597_v10 = vmul.f32 %v10396_v25, %v4596_v62  ;;  %v4816_v8 = vadd.f32 0.0036580483, %v4815_v28 }
 0x490   : > { %vm5500_vm8 = vcmp.lt.s32.totalorder %v5468_v20, 300  ;;  %v10440_v48 = vadd.f32 1.0, %v4632_v27  ;;  %v4666_v31 = vmul.f32 %v4665_v41, %v10267_v22  ;;  %v4737_v59 = vmul.f32 %v4736_v57, %v10340_v43 }
 0x491   : > { %6271 = vrcp.f32 %v10428_v12  ;;  %v5400_v54 = vmul.f32 %v5368_v6, %v5368_v6  ;;  %v5370_v17 = vsub.f32 %v5294_v53, %v6307_v40  ;;  %vm5499_vm9 = vcmp.lt.s32.totalorder %v5467_v61, 300 }
 0x492   : > { %v4865_v9 = vadd.f32 0.001143296, %v4864_v58  ;;  %6273 = vrcp.f32 %v10440_v48  ;;  %v5469_v2 = vadd.s32 %v10416_v0, %v5436_v63  ;;  %v5532_v37 = vsel %vm5500_vm8, %v5401_v34, 0.0 }
 0x493   : > { %v10448_v3 = vmin.f32 %v4891_v33, 16.0  ;;  %v4598_v44 = vadd.f32 %v10396_v25, %v4597_v10  ;;  %vm4600_vm10 = vweird.f32 %v10396_v25  ;;  %v4777_v57 = vmul.f32 %v4776_v42, %v10354_v15 }
 0x494   : > { %v4817_v16 = vmul.f32 %v4816_v8, %v10281_v47  ;;  %v4605_v39 = vand.u32 2147483648, %v10356_v29  ;;  %v4667_v62 = vadd.f32 0.014752088, %v4666_v31  ;;  %v5531_v28 = vsel %vm5499_vm9, %v5400_v54, 0.0 }
 0x495   : > { %vm4599_vm11 = vweird.f32 %v10356_v29  ;;  %v4603_v20 = vand.u32 2147483647, %v10356_v29  ;;  %v5402_v52 = vmul.f32 %v5370_v17, %v5370_v17  ;;  %v4853_v41 = vmul.f32 2.1237322e-06, %v10418_v24 }
 0x496   : > { %v4866_v30 = vmul.f32 %v4865_v9, %v10418_v24  ;;  %v5563_v6 = vadd.f32 %v5532_v37, %v5531_v28  ;;  %vm10459_vm12 = vmor %vm4599_vm11, %vm4600_vm10  ;;  %vm5501_vm13 = vcmp.lt.s32.totalorder %v5469_v2, 300  ;;  %v4738_v58 = vadd.f32 0.05243302, %v4737_v59 }
 0x497   : > { %v10463_v19 = vpop.eup %6271  ;;  %v4904_v27 = vmul.f32 3.8918573e-05, %v10448_v3  ;;  %v4602_v29 = vsel %vm10459_vm12, %v10396_v25, %v4598_v44  ;;  %v5533_v53 = vsel %vm5501_vm13, %v5402_v52, 0.0  ;;  %v4606_v42 = vor.u32 1.1754944e-38, %v4605_v39 }
 0x498   : > { %v6274_v63 = vpop.eup %6273  ;;  %v10469_v34 = vadd.f32 %v5563_v6, %v5533_v53  ;;  %v4668_v33 = vmul.f32 %v4667_v62, %v10267_v22  ;;  %v4704_v10 = vmul.f32 3.8918573e-05, %v10309_v35  ;;  %v4700_v8 = vadd.f32 0.18741608, %v4699_v7 }
 0x499   : > { %v4778_v31 = vadd.f32 0.05243302, %v4777_v57  ;;  %vm4604_vm14 = vcmp.eq.f32.partialorder %v4603_v20, 8.507059e+37  ;;  %v4635_v59 = vmul.f32 %v6274_v63, %v10440_v48  ;;  %v4818_v54 = vadd.f32 0.05243302, %v4817_v16 }
 0x49a   : > { %v4854_v40 = vadd.f32 0.00028619796, %v4853_v41  ;;  %v4867_v17 = vadd.f32 0.014752088, %v4866_v30  ;;  %v4607_v9 = vsel %vm4604_vm14, %v4606_v42, %v4602_v29  ;;  %v4739_v25 = vmul.f32 %v4738_v58, %v10340_v43 }
 0x49b   : > { %v4905_v2 = vadd.f32 0.001143296, %v4904_v27  ;;  %v4636_v37 = vsub.f32 1.0, %v4635_v59  ;;  %v4669_v44 = vadd.f32 0.112945676, %v4668_v33  ;;  %v4835_v39 = vmul.f32 %v10463_v19, %v10428_v12 }
 0x49c   : > { %v4643_v62 = vand.u32 2147483647, %v10440_v48  ;;  %v4645_v7 = vand.u32 2147483648, %v10440_v48  ;;  %v4705_v57 = vadd.f32 0.001143296, %v4704_v10  ;;  %v4608_v28 = vmul.f32 %v4607_v9, %v10374_v26  ;;  %v3774_v10 = vpop.f32.mrf.mxu2 }
 0x49d   : > { %v4637_v20 = vmul.f32 %v6274_v63, %v4636_v37  ;;  %vm4640_vm15 = vweird.f32 %v6274_v63  ;;  %v4670_v16 = vmul.f32 %v4669_v44, %v10267_v22  ;;  %v4701_v52 = vmul.f32 %v4700_v8, %v10309_v35 }
 0x49e   : > { %v4779_v41 = vmul.f32 %v4778_v31, %v10354_v15  ;;  %v4819_v30 = vmul.f32 %v4818_v54, %v10281_v47  ;;  %v4868_v6 = vmul.f32 %v4867_v17, %v10418_v24  ;;  %v4740_v61 = vadd.f32 0.18741608, %v4739_v25 }
 0x49f   : > { %v4906_v58 = vmul.f32 %v4905_v2, %v10448_v3  ;;  %v4638_v27 = vadd.f32 %v6274_v63, %v4637_v20  ;;  %vm4639_vm0 = vweird.f32 %v10440_v48  ;;  %v4836_v29 = vsub.f32 1.0, %v4835_v39  ;;  %v10501_v39 = vld [vmem:[%s11106_s6] ss:$0 sm:$0xff] }
 0x4a0   : > { %v4855_v26 = vmul.f32 %v4854_v40, %v10418_v24  ;;  %vm4641_vm1 = vmor %vm4639_vm0, %vm4640_vm15  ;;  %vm4644_vm2 = vcmp.eq.f32.partialorder %v4643_v62, 8.507059e+37  ;;  %v4646_v53 = vor.u32 1.1754944e-38, %v4645_v7  ;;  %v5924_v42 = vclamps-f32 %v4608_v28, 1.0 }
 0x4a1   : > { %v4642_v33 = vsel %vm4641_vm1, %v6274_v63, %v4638_v27  ;;  %v4671_v8 = vadd.f32 0.4994258, %v4670_v16  ;;  %v4706_v31 = vmul.f32 %v4705_v57, %v10309_v35  ;;  %v4780_v59 = vadd.f32 0.18741608, %v4779_v41 }
 0x4a2   : > { %v4820_v54 = vadd.f32 0.18741608, %v4819_v30  ;;  %v4869_v17 = vadd.f32 0.112945676, %v4868_v6  ;;  %v4647_v9 = vsel %vm4644_vm2, %v4646_v53, %v4642_v33  ;;  %v10491_v25 = vmul.f32 %v10414_v11, %v10239_v49 }
 0x4a3   : > { %v10494_v48 = vmul.f32 0.5, %v10324_v55  ;;  %v4907_v40 = vadd.f32 0.014752088, %v4906_v58  ;;  %v4648_v2 = vmul.f32 %v4647_v9, %v10382_v60  ;;  %v4702_v37 = vadd.f32 1.1283791, %v4701_v52 }
 0x4a4   : > { %v4837_v63 = vmul.f32 %v10463_v19, %v4836_v29  ;;  %v4856_v44 = vadd.f32 0.0036580483, %v4855_v26  ;;  %v10504_v62 = vadd.f32 %v10501_v39, %v3774_v10  ;;  %v5149_v11 = vadd.f32 1.0, %v5924_v42 }
 0x4a5   : > { %v5925_v49 = vclamps-f32 %v4648_v2, 1.0  ;;  %v4672_v55 = vmul.f32 %v4671_v8, %v10267_v22  ;;  %v4707_v7 = vadd.f32 0.014752088, %v4706_v31  ;;  %v4741_v57 = vmul.f32 %v4740_v61, %v10340_v43  ;;  %v5295_v2 = vpop.f32.mrf.mxu3 }
 0x4a6   : > { %v4781_v60 = vmul.f32 %v4780_v59, %v10354_v15  ;;  %v4821_v28 = vmul.f32 %v4820_v54, %v10281_v47  ;;  %v4870_v20 = vmul.f32 %v4869_v17, %v10418_v24  ;;  %v4893_v16 = vmul.f32 2.1237322e-06, %v10448_v3 }
 0x4a7   : > { %v4908_v52 = vmul.f32 %v4907_v40, %v10448_v3  ;;  %v5150_v41 = vadd.f32 1.0, %v5925_v49  ;;  %v10513_v30 = vadd.f32 1.0, %v4672_v55  ;;  %vm4840_vm3 = vweird.f32 %v10463_v19 }
 0x4a8   : > { %v4857_v22 = vmul.f32 %v4856_v44, %v10418_v24  ;;  %v10518_v6 = vmul.f32 0.70710677, %v10504_v62  ;;  %v4708_v61 = vmul.f32 %v4707_v7, %v10309_v35  ;;  %v4838_v47 = vadd.f32 %v10463_v19, %v4837_v63 }
 0x4a9   : > { %v5181_v58 = vmul.f32 %v5149_v11, %v10364_v50  ;;  %v5182_v27 = vmul.f32 %v5150_v41, %v10367_v5  ;;  %6275 = vrcp.f32 %v10513_v30  ;;  %v4822_v29 = vadd.f32 1.1283791, %v4821_v28  ;;  %v3777_v11 = vpop.f32.mrf.mxu2 }
 0x4aa   : > { %vm4839_vm4 = vweird.f32 %v10428_v12  ;;  %v4845_v26 = vand.u32 2147483648, %v10428_v12  ;;  %v4871_v53 = vadd.f32 0.4994258, %v4870_v20  ;;  %v4843_v42 = vand.u32 2147483647, %v10428_v12 }
 0x4ab   : > { %v4894_v33 = vadd.f32 0.00028619796, %v4893_v16  ;;  %v4909_v10 = vadd.f32 0.112945676, %v4908_v52  ;;  %v5204_v8 = vpack.c.bf16 %v5182_v27, %v5181_v58  ;;  %vm10530_vm5 = vmor %vm4839_vm4, %vm4840_vm3  ;;  %v4858_v50 = vadd.f32 0.05243302, %v4857_v22 }
 0x4ac   : > { %v4931_v5 = vmul.f32 %v10518_v6, %v10518_v6  ;;  %v4709_v59 = vadd.f32 0.112945676, %v4708_v61  ;;  %v4744_v54 = vmul.f32 3.8918573e-05, %v10340_v43  ;;  %v10538_v17 = vmul.f32 %v4702_v37, %v10291_v36 }
 0x4ad   : > { %v4742_v12 = vadd.f32 1.1283791, %v4741_v57  ;;  %v10541_v9 = vmul.f32 0.5, %v10250_v18  ;;  %v4842_v40 = vsel %vm10530_vm5, %v10463_v19, %v4838_v47  ;;  %5332 = vmatmul.bf16.gmra.mxu3 %v5204_v8  ;;  %v4782_v63 = vadd.f32 1.1283791, %v4781_v60  ;;  %v6309_v8 = vld [vmem:[%s6741_s5 + $0x18] sm:$0xff] }
 0x4ae   : > { %v4846_v44 = vor.u32 1.1754944e-38, %v4845_v26  ;;  %v4872_v49 = vmul.f32 %v4871_v53, %v10418_v24  ;;  %v4710_v55 = vmul.f32 %v4709_v59, %v10309_v35  ;;  %v4823_v36 = vmul.f32 %v4822_v29, %v10260_v4 }
 0x4af   : > { %v10548_v7 = vpop.eup %6275  ;;  %vm4844_vm6 = vcmp.eq.f32.partialorder %v4843_v42, 8.507059e+37  ;;  %v4895_v18 = vmul.f32 %v4894_v33, %v10448_v3  ;;  %v4910_v37 = vmul.f32 %v4909_v10, %v10448_v3  ;;  %v4859_v19 = vmul.f32 %v4858_v50, %v10418_v24 }
 0x4b0   : > { %v4847_v57 = vsel %vm4844_vm6, %v4846_v44, %v4842_v40  ;;  %v10554_v28 = vmin.f32 %v4931_v5, 16.0  ;;  %v4745_v60 = vadd.f32 0.001143296, %v4744_v54  ;;  %v5296_v20 = vadd.f32 %v10389_v38, %v5295_v2  ;;  %v5298_v2 = vpop.f32.mrf.mxu3 }
 0x4b1   : > { %v5437_v16 = vadd.s32 24, %v10392_v45  ;;  %v10559_v52 = vadd.f32 %v10501_v39, %v3777_v11  ;;  %v4675_v4 = vmul.f32 %v10548_v7, %v10513_v30  ;;  %v10564_v41 = vmul.f32 %v4742_v12, %v10319_v1 }
 0x4b2   : > { %v10567_v22 = vmul.f32 %v4782_v63, %v10332_v56  ;;  %v10569_v61 = vadd.f32 1.0, %v4872_v49  ;;  %v4711_v47 = vadd.f32 0.4994258, %v4710_v55  ;;  %v4848_v58 = vmul.f32 %v4847_v57, %v4823_v36 }
 0x4b3   : > { %v4896_v27 = vadd.f32 0.0036580483, %v4895_v18  ;;  %v4911_v29 = vadd.f32 0.4994258, %v4910_v37  ;;  %v4676_v26 = vsub.f32 1.0, %v4675_v4  ;;  %v4746_v10 = vmul.f32 %v4745_v60, %v10340_v43  ;;  %v6310_v4 = vld [vmem:[%s6741_s5 + $0x20] sm:$0xff] }
 0x4b4   : > { %v4860_v53 = vadd.f32 0.18741608, %v4859_v19  ;;  %v4944_v42 = vmul.f32 3.8918573e-05, %v10554_v28  ;;  %v4712_v33 = vmul.f32 %v4711_v47, %v10309_v35  ;;  %v10575_v1 = vmul.f32 0.5, %v10352_v21 }
 0x4b5   : > { %v5371_v56 = vsub.f32 %v5296_v20, %v6309_v8  ;;  %v5470_v31 = vadd.s32 %v10416_v0, %v5437_v16  ;;  %v10580_v50 = vmul.f32 0.70710677, %v10559_v52  ;;  %6277 = vrcp.f32 %v10569_v61 }
 0x4b6   : > { %v4677_v5 = vmul.f32 %v10548_v7, %v4676_v26  ;;  %v10584_v59 = vadd.f32 1.0, %v4712_v33  ;;  %v5438_v35 = vadd.s32 32, %v10392_v45  ;;  %v5930_v54 = vclamps-f32 %v4848_v58, 1.0  ;;  %v3779_v58 = vpop.f32.mrf.mxu2 }
 0x4b7   : > { %v10588_v12 = vmul.f32 0.5, %v10404_v13  ;;  %v4897_v21 = vmul.f32 %v4896_v27, %v10448_v3  ;;  %v4912_v40 = vmul.f32 %v4911_v29, %v10448_v3  ;;  %v4861_v63 = vmul.f32 %v4860_v53, %v10418_v24 }
 0x4b8   : > { %v4945_v44 = vadd.f32 0.001143296, %v4944_v42  ;;  %6279 = vrcp.f32 %v10584_v59  ;;  %v4747_v49 = vadd.f32 0.014752088, %v4746_v10  ;;  %v5403_v11 = vmul.f32 %v5371_v56, %v5371_v56 }
 0x4b9   : > { %vm5502_vm7 = vcmp.lt.s32.totalorder %v5470_v31, 300  ;;  %v4971_v55 = vmul.f32 %v10580_v50, %v10580_v50  ;;  %v4784_v13 = vmul.f32 3.8918573e-05, %v10354_v15  ;;  %v4678_v36 = vadd.f32 %v10548_v7, %v4677_v5 }
 0x4ba   : > { %vm4680_vm8 = vweird.f32 %v10548_v7  ;;  %v5299_v18 = vadd.f32 %v10389_v38, %v5298_v2  ;;  %v5471_v24 = vadd.s32 %v10416_v0, %v5438_v35  ;;  %v10601_v37 = vadd.f32 1.0, %v5930_v54 }
 0x4bb   : > { %v4898_v57 = vadd.f32 0.05243302, %v4897_v21  ;;  %v10603_v19 = vadd.f32 1.0, %v4912_v40  ;;  %v4685_v60 = vand.u32 2147483648, %v10513_v30  ;;  %v10606_v20 = vpop.eup %6277  ;;  %vm4679_vm9 = vweird.f32 %v10513_v30 }
 0x4bc   : > { %v4683_v16 = vand.u32 2147483647, %v10513_v30  ;;  %v5372_v47 = vsub.f32 %v5299_v18, %v6310_v4  ;;  %v4748_v27 = vmul.f32 %v4747_v49, %v10340_v43  ;;  %v4933_v29 = vmul.f32 2.1237322e-06, %v10554_v28  ;;  %vm10617_vm10 = vmor %vm4679_vm9, %vm4680_vm8 }
 0x4bd   : > { %v4946_v26 = vmul.f32 %v4945_v44, %v10554_v28  ;;  %v5534_v53 = vsel %vm5502_vm7, %v5403_v11, 0.0  ;;  %v4785_v33 = vadd.f32 0.001143296, %v4784_v13  ;;  %v10621_v30 = vmin.f32 %v4971_v55, 16.0 }
 0x4be   : > { %v6280_v10 = vpop.eup %6279  ;;  %v4682_v8 = vsel %vm10617_vm10, %v10548_v7, %v4678_v36  ;;  %v5404_v56 = vmul.f32 %v5372_v47, %v5372_v47  ;;  %vm5503_vm11 = vcmp.lt.s32.totalorder %v5471_v24, 300  ;;  %v4875_v31 = vmul.f32 %v10606_v20, %v10569_v61 }
 0x4bf   : > { %6281 = vrcp.f32 %v10603_v19  ;;  %v4686_v5 = vor.u32 1.1754944e-38, %v4685_v60  ;;  %v10630_v35 = vadd.f32 %v10501_v39, %v3779_v58  ;;  %v5565_v54 = vadd.f32 %v10469_v34, %v5534_v53 }
 0x4c0   : > { %vm4684_vm12 = vcmp.eq.f32.partialorder %v4683_v16, 8.507059e+37  ;;  %v4715_v21 = vmul.f32 %v6280_v10, %v10584_v59  ;;  %v4749_v40 = vadd.f32 0.112945676, %v4748_v27  ;;  %v4947_v2 = vadd.f32 0.014752088, %v4946_v26 }
 0x4c1   : > { %v4687_v44 = vsel %vm4684_vm12, %v4686_v5, %v4682_v8  ;;  %v5535_v7 = vsel %vm5503_vm11, %v5404_v56, 0.0  ;;  %v4786_v49 = vmul.f32 %v4785_v33, %v10354_v15  ;;  %v4934_v11 = vadd.f32 0.00028619796, %v4933_v29 }
 0x4c2   : > { %v4984_v55 = vmul.f32 3.8918573e-05, %v10621_v30  ;;  %v4716_v13 = vsub.f32 1.0, %v4715_v21  ;;  %v10636_v36 = vadd.f32 %v5565_v54, %v5535_v7  ;;  %v4899_v18 = vmul.f32 %v4898_v57, %v10448_v3 }
 0x4c3   : > { %v4723_v24 = vand.u32 2147483647, %v10584_v59  ;;  %v4725_v34 = vand.u32 2147483648, %v10584_v59  ;;  %v10642_v60 = vmul.f32 0.70710677, %v10630_v35  ;;  %v4688_v16 = vmul.f32 %v4687_v44, %v10491_v25 }
 0x4c4   : > { %v4717_v4 = vmul.f32 %v6280_v10, %v4716_v13  ;;  %vm4720_vm13 = vweird.f32 %v6280_v10  ;;  %v4750_v47 = vmul.f32 %v4749_v40, %v10340_v43  ;;  %v4876_v27 = vsub.f32 1.0, %v4875_v31 }
 0x4c5   : > { %v10646_v58 = vpop.eup %6281  ;;  %v4948_v29 = vmul.f32 %v4947_v2, %v10554_v28  ;;  %v5011_v57 = vmul.f32 %v10642_v60, %v10642_v60  ;;  %v4787_v26 = vadd.f32 0.014752088, %v4786_v49  ;;  %v4862_v53 = vadd.f32 1.1283791, %v4861_v63 }
 0x4c6   : > { %v4935_v42 = vmul.f32 %v4934_v11, %v10554_v28  ;;  %v4718_v33 = vadd.f32 %v6280_v10, %v4717_v4  ;;  %vm4719_vm14 = vweird.f32 %v10584_v59  ;;  %v4900_v25 = vadd.f32 0.18741608, %v4899_v18 }
 0x4c7   : > { %v4985_v8 = vadd.f32 0.001143296, %v4984_v55  ;;  %vm4721_vm15 = vmor %vm4719_vm14, %vm4720_vm13  ;;  %vm4724_vm0 = vcmp.eq.f32.partialorder %v4723_v24, 8.507059e+37  ;;  %v4726_v56 = vor.u32 1.1754944e-38, %v4725_v34  ;;  %v5926_v5 = vclamps-f32 %v4688_v16, 1.0 }
 0x4c8   : > { %v4722_v54 = vsel %vm4721_vm15, %v6280_v10, %v4718_v33  ;;  %v10653_v31 = vmin.f32 %v5011_v57, 16.0  ;;  %v4751_v21 = vadd.f32 0.4994258, %v4750_v47  ;;  %v4877_v40 = vmul.f32 %v10606_v20, %v4876_v27  ;;  %v3782_v10 = vpop.f32.mrf.mxu2 }
 0x4c9   : > { %v4949_v2 = vadd.f32 0.112945676, %v4948_v29  ;;  %v4727_v44 = vsel %vm4724_vm0, %v4726_v56, %v4722_v54  ;;  %v4788_v63 = vmul.f32 %v4787_v26, %v10354_v15  ;;  %v10659_v7 = vmul.f32 %v10601_v37, %v10541_v9 }
 0x4ca   : > { %v4915_v59 = vmul.f32 %v10646_v58, %v10603_v19  ;;  %v4936_v49 = vadd.f32 0.0036580483, %v4935_v42  ;;  %v4728_v11 = vmul.f32 %v4727_v44, %v10538_v17  ;;  %vm4880_vm1 = vweird.f32 %v10606_v20 }
 0x4cb   : > { %v4885_v55 = vand.u32 2147483648, %v10569_v61  ;;  %v4901_v13 = vmul.f32 %v4900_v25, %v10448_v3  ;;  %v4986_v18 = vmul.f32 %v4985_v8, %v10621_v30  ;;  %v5151_v34 = vadd.f32 1.0, %v5926_v5 }
 0x4cc   : > { %v5927_v24 = vclamps-f32 %v4728_v11, 1.0  ;;  %v5024_v9 = vmul.f32 3.8918573e-05, %v10653_v31  ;;  %v4752_v37 = vmul.f32 %v4751_v21, %v10340_v43  ;;  %v4878_v16 = vadd.f32 %v10606_v20, %v4877_v40 }
 0x4cd   : > { %v4950_v4 = vmul.f32 %v4949_v2, %v10554_v28  ;;  %v10673_v17 = vadd.f32 %v10501_v39, %v3782_v10  ;;  %v4789_v47 = vadd.f32 0.112945676, %v4788_v63  ;;  %v4916_v27 = vsub.f32 1.0, %v4915_v59 }
 0x4ce   : > { %v4937_v29 = vmul.f32 %v4936_v49, %v10554_v28  ;;  %v5152_v3 = vadd.f32 1.0, %v5927_v24  ;;  %v10676_v57 = vadd.f32 1.0, %v4752_v37  ;;  %vm4879_vm2 = vweird.f32 %v10569_v61 }
 0x4cf   : > { %v4883_v26 = vand.u32 2147483647, %v10569_v61  ;;  %v4902_v42 = vadd.f32 1.1283791, %v4901_v13  ;;  %v4987_v43 = vadd.f32 0.014752088, %v4986_v18  ;;  %vm10682_vm3 = vmor %vm4879_vm2, %vm4880_vm1  ;;  %v5183_v25 = vmul.f32 %v5151_v34, %v10370_v23 }
 0x4d0   : > { %v5184_v8 = vmul.f32 %v5152_v3, %v10377_v51  ;;  %v5025_v56 = vadd.f32 0.001143296, %v5024_v9  ;;  %6283 = vrcp.f32 %v10676_v57  ;;  %v4882_v5 = vsel %vm10682_vm3, %v10606_v20, %v4878_v16  ;;  %v5300_v20 = vpop.f32.mrf.mxu3 }
 0x4d1   : > { %v4951_v61 = vadd.f32 0.4994258, %v4950_v4  ;;  %v10693_v54 = vmul.f32 0.70710677, %v10673_v17  ;;  %v4790_v21 = vmul.f32 %v4789_v47, %v10354_v15  ;;  %v4886_v40 = vor.u32 1.1754944e-38, %v4885_v55 }
 0x4d2   : > { %v4917_v2 = vmul.f32 %v10646_v58, %v4916_v27  ;;  %v4938_v44 = vadd.f32 0.05243302, %v4937_v29  ;;  %v5205_v23 = vpack.c.bf16 %v5184_v8, %v5183_v25  ;;  %v4863_v51 = vmul.f32 %v4862_v53, %v10361_v14 }
 0x4d3   : > { %vm4884_vm4 = vcmp.eq.f32.partialorder %v4883_v26, 8.507059e+37  ;;  %v10699_v63 = vmul.f32 %v4902_v42, %v10423_v32  ;;  %v10702_v59 = vmul.f32 0.5, %v10504_v62  ;;  %vm4919_vm5 = vweird.f32 %v10603_v19 }
 0x4d4   : > { %v4887_v49 = vsel %vm4884_vm4, %v4886_v40, %v4882_v5  ;;  %v4988_v11 = vmul.f32 %v4987_v43, %v10621_v30  ;;  %5337 = vmatmul.bf16.gmra.mxu3 %v5205_v23  ;;  %v5026_v10 = vmul.f32 %v5025_v56, %v10653_v31  ;;  %v4923_v55 = vand.u32 2147483647, %v10603_v19 }
 0x4d5   : > { %v4952_v14 = vmul.f32 %v4951_v61, %v10554_v28  ;;  %v5051_v32 = vmul.f32 %v10693_v54, %v10693_v54  ;;  %v4791_v53 = vadd.f32 0.4994258, %v4790_v21  ;;  %v4918_v62 = vadd.f32 %v10646_v58, %v4917_v2  ;;  %v6311_v61 = vld [vmem:[%s6741_s5 + $0x28] sm:$0xff] }
 0x4d6   : > { %v10711_v13 = vpop.eup %6283  ;;  %vm4920_vm6 = vweird.f32 %v10646_v58  ;;  %v4939_v18 = vmul.f32 %v4938_v44, %v10554_v28  ;;  %v4973_v24 = vmul.f32 2.1237322e-06, %v10621_v30  ;;  %v4888_v34 = vmul.f32 %v4887_v49, %v4863_v51 }
 0x4d7   : > { %v4925_v9 = vand.u32 2147483648, %v10603_v19  ;;  %v5301_v37 = vadd.f32 %v10389_v38, %v5300_v20  ;;  %v4755_v16 = vmul.f32 %v10711_v13, %v10676_v57  ;;  %v4989_v4 = vadd.f32 0.112945676, %v4988_v11  ;;  %vm10725_vm7 = vmor %vm4919_vm5, %vm4920_vm6 }
 0x4d8   : > { %v5027_v47 = vadd.f32 0.014752088, %v5026_v10  ;;  %v5439_v27 = vadd.s32 40, %v10392_v45  ;;  %v4792_v29 = vmul.f32 %v4791_v53, %v10354_v15  ;;  %vm10729_vm8 = vcmp.eq.f32.partialorder %v4923_v55, 8.507059e+37  ;;  %v5303_v20 = vpop.f32.mrf.mxu3 }
 0x4d9   : > { %v10733_v42 = vadd.f32 1.0, %v4952_v14  ;;  %v10735_v43 = vmin.f32 %v5051_v32, 16.0  ;;  %v4756_v33 = vsub.f32 1.0, %v4755_v16  ;;  %v4922_v25 = vsel %vm10725_vm7, %v10646_v58, %v4918_v62 }
 0x4da   : > { %v4940_v15 = vadd.f32 0.18741608, %v4939_v18  ;;  %v4974_v8 = vadd.f32 0.00028619796, %v4973_v24  ;;  %v10740_v19 = vadd.f32 1.0, %v4792_v29  ;;  %v5931_v56 = vclamps-f32 %v4888_v34, 1.0 }
 0x4db   : > { %v4926_v5 = vor.u32 1.1754944e-38, %v4925_v9  ;;  %v5373_v21 = vsub.f32 %v5301_v37, %v6311_v61  ;;  %v4757_v40 = vmul.f32 %v10711_v13, %v4756_v33  ;;  %v4990_v2 = vmul.f32 %v4989_v4, %v10621_v30  ;;  %v6312_v37 = vld [vmem:[%s6741_s5 + $0x30] sm:$0xff]  ;;  %v3784_v4 = vpop.f32.mrf.mxu2 }
 0x4dc   : > { %v5028_v44 = vmul.f32 %v5027_v47, %v10653_v31  ;;  %v5472_v23 = vadd.s32 %v10416_v0, %v5439_v27  ;;  %6285 = vrcp.f32 %v10740_v19  ;;  %v5064_v51 = vmul.f32 3.8918573e-05, %v10735_v43 }
 0x4dd   : > { %v4927_v58 = vsel %vm10729_vm8, %v4926_v5, %v4922_v25  ;;  %6287 = vrcp.f32 %v10733_v42  ;;  %vm4760_vm9 = vweird.f32 %v10711_v13  ;;  %v4941_v49 = vmul.f32 %v4940_v15, %v10554_v28  ;;  %v6313_v28 = vld [vmem:[%s6741_s5 + $0x38] sm:$0xff] }
 0x4de   : > { %v4975_v11 = vmul.f32 %v4974_v8, %v10621_v30  ;;  %v4758_v10 = vadd.f32 %v10711_v13, %v4757_v40  ;;  %v4765_v55 = vand.u32 2147483648, %v10676_v57  ;;  %v5405_v14 = vmul.f32 %v5373_v21, %v5373_v21 }
 0x4df   : > { %vm4759_vm10 = vweird.f32 %v10676_v57  ;;  %v4763_v32 = vand.u32 2147483647, %v10676_v57  ;;  %v5304_v53 = vadd.f32 %v10389_v38, %v5303_v20  ;;  %v10760_v62 = vadd.f32 1.0, %v5931_v56 }
 0x4e0   : > { %v4991_v18 = vadd.f32 0.4994258, %v4990_v2  ;;  %v5029_v24 = vadd.f32 0.112945676, %v5028_v44  ;;  %vm5504_vm11 = vcmp.lt.s32.totalorder %v5472_v23, 300  ;;  %vm10762_vm12 = vmor %vm4759_vm10, %vm4760_vm9  ;;  %v5440_v57 = vadd.s32 48, %v10392_v45  ;;  %v5305_v2 = vpop.f32.mrf.mxu3 }
 0x4e1   : > { %v5065_v34 = vadd.f32 0.001143296, %v5064_v51  ;;  %v4762_v9 = vsel %vm10762_vm12, %v10711_v13, %v4758_v10  ;;  %v5374_v16 = vsub.f32 %v5304_v53, %v6312_v37  ;;  %v10772_v27 = vmul.f32 %v4927_v58, %v10699_v63 }
 0x4e2   : > { %v6286_v47 = vpop.eup %6285  ;;  %v10774_v29 = vadd.f32 1.1283791, %v4941_v49  ;;  %v4976_v3 = vadd.f32 0.0036580483, %v4975_v11  ;;  %v4766_v26 = vor.u32 1.1754944e-38, %v4765_v55  ;;  %v5536_v25 = vsel %vm5504_vm11, %v5405_v14, 0.0 }
 0x4e3   : > { %v10776_v33 = vpop.eup %6287  ;;  %vm4764_vm13 = vcmp.eq.f32.partialorder %v4763_v32, 8.507059e+37  ;;  %v4795_v15 = vmul.f32 %v6286_v47, %v10740_v19  ;;  %v5473_v13 = vadd.s32 %v10416_v0, %v5440_v57  ;;  %v5030_v8 = vmul.f32 %v5029_v24, %v10653_v31 }
 0x4e4   : > { %v4767_v56 = vsel %vm4764_vm13, %v4766_v26, %v4762_v9  ;;  %v5406_v5 = vmul.f32 %v5374_v16, %v5374_v16  ;;  %v10782_v61 = vadd.f32 %v10501_v39, %v3784_v4  ;;  %v4992_v63 = vmul.f32 %v4991_v18, %v10621_v30 }
 0x4e5   : > { %v5066_v21 = vmul.f32 %v5065_v34, %v10735_v43  ;;  %v4796_v40 = vsub.f32 1.0, %v4795_v15  ;;  %vm5505_vm14 = vcmp.lt.s32.totalorder %v5473_v13, 300  ;;  %v10788_v44 = vmul.f32 %v10776_v33, %v10733_v42 }
 0x4e6   : > { %v5013_v23 = vmul.f32 2.1237322e-06, %v10653_v31  ;;  %v5567_v58 = vadd.f32 %v10636_v36, %v5536_v25  ;;  %v4805_v51 = vand.u32 2147483648, %v10740_v19  ;;  %v4768_v39 = vmul.f32 %v4767_v56, %v10564_v41 }
 0x4e7   : > { %v4797_v20 = vmul.f32 %v6286_v47, %v4796_v40  ;;  %vm4800_vm15 = vweird.f32 %v6286_v47  ;;  %v4803_v49 = vand.u32 2147483647, %v10740_v19  ;;  %v5031_v11 = vadd.f32 0.4994258, %v5030_v8 }
 0x4e8   : > { %v5537_v10 = vsel %vm5505_vm14, %v5406_v5, 0.0  ;;  %v10796_v55 = vmul.f32 0.70710677, %v10782_v61  ;;  %v5306_v14 = vadd.f32 %v10389_v38, %v5305_v2  ;;  %v10799_v32 = vadd.f32 1.0, %v4992_v63  ;;  %v5308_v56 = vpop.f32.mrf.mxu3 }
 0x4e9   : > { %v5067_v53 = vadd.f32 0.014752088, %v5066_v21  ;;  %v4798_v36 = vadd.f32 %v6286_v47, %v4797_v20  ;;  %vm4799_vm0 = vweird.f32 %v10740_v19  ;;  %v4806_v41 = vor.u32 1.1754944e-38, %v4805_v51  ;;  %v6314_v20 = vld [vmem:[%s6741_s5 + $0x40] sm:$0xff] }
 0x4ea   : > { %vm4801_vm1 = vmor %vm4799_vm0, %vm4800_vm15  ;;  %v5568_v18 = vadd.f32 %v5567_v58, %v5537_v10  ;;  %v5091_v24 = vmul.f32 %v10796_v55, %v10796_v55  ;;  %v5375_v34 = vsub.f32 %v5306_v14, %v6313_v28  ;;  %v5928_v9 = vclamps-f32 %v4768_v39, 1.0 }
 0x4eb   : > { %v4802_v37 = vsel %vm4801_vm1, %v6286_v47, %v4798_v36  ;;  %vm4804_vm2 = vcmp.eq.f32.partialorder %v4803_v49, 8.507059e+37  ;;  %v5441_v16 = vadd.s32 56, %v10392_v45  ;;  %v5014_v57 = vadd.f32 0.00028619796, %v5013_v23 }
 0x4ec   : > { %v5032_v4 = vmul.f32 %v5031_v11, %v10653_v31  ;;  %v4807_v26 = vsel %vm4804_vm2, %v4806_v41, %v4802_v37  ;;  %v10807_v25 = vmin.f32 %v5091_v24, 16.0  ;;  %v4956_v19 = vsub.f32 1.0, %v10788_v44 }
 0x4ed   : > { %v4977_v15 = vmul.f32 %v4976_v3, %v10621_v30  ;;  %v5068_v13 = vmul.f32 %v5067_v53, %v10735_v43  ;;  %v4808_v8 = vmul.f32 %v4807_v26, %v10567_v22  ;;  %6289 = vrcp.f32 %v10799_v32 }
 0x4ee   : > { %v5104_v47 = vmul.f32 3.8918573e-05, %v10807_v25  ;;  %v5407_v5 = vmul.f32 %v5375_v34, %v5375_v34  ;;  %v5474_v63 = vadd.s32 %v10416_v0, %v5441_v16  ;;  %v5153_v40 = vadd.f32 1.0, %v5928_v9 }
 0x4ef   : > { %v5929_v21 = vclamps-f32 %v4808_v8, 1.0  ;;  %v5309_v2 = vadd.f32 %v10389_v38, %v5308_v56  ;;  %v5442_v44 = vadd.s32 64, %v10392_v45  ;;  %v5015_v3 = vmul.f32 %v5014_v57, %v10653_v31 }
 0x4f0   : > { %v10819_v23 = vadd.f32 1.0, %v5032_v4  ;;  %v5105_v22 = vadd.f32 0.001143296, %v5104_v47  ;;  %vm5506_vm3 = vcmp.lt.s32.totalorder %v5474_v63, 300  ;;  %v4963_v58 = vand.u32 2147483647, %v10733_v42 }
 0x4f1   : > { %v5069_v51 = vadd.f32 0.112945676, %v5068_v13  ;;  %v5154_v39 = vadd.f32 1.0, %v5929_v21  ;;  %v5376_v49 = vsub.f32 %v5309_v2, %v6314_v20  ;;  %vm4959_vm4 = vweird.f32 %v10733_v42 }
 0x4f2   : > { %v4965_v11 = vand.u32 2147483648, %v10733_v42  ;;  %v4978_v10 = vadd.f32 0.05243302, %v4977_v15  ;;  %v5106_v14 = vmul.f32 %v5105_v22, %v10807_v25  ;;  %v5538_v53 = vsel %vm5506_vm3, %v5407_v5, 0.0  ;;  %v5310_v15 = vpop.f32.mrf.mxu3 }
 0x4f3   : > { %v5185_v36 = vmul.f32 %v5153_v40, %v10399_v46  ;;  %v5186_v41 = vmul.f32 %v5154_v39, %v10494_v48  ;;  %v5408_v24 = vmul.f32 %v5376_v49, %v5376_v49  ;;  %v5475_v28 = vadd.s32 %v10416_v0, %v5442_v44  ;;  %v10829_v34 = vpop.eup %6289  ;;  %v6315_v44 = vld [vmem:[%s6741_s5 + $0x48] sm:$0xff] }
 0x4f4   : > { %v4957_v9 = vmul.f32 %v10776_v33, %v4956_v19  ;;  %v5016_v37 = vadd.f32 0.0036580483, %v5015_v3  ;;  %6291 = vrcp.f32 %v10819_v23  ;;  %v5107_v16 = vadd.f32 0.014752088, %v5106_v14 }
 0x4f5   : > { %v5070_v57 = vmul.f32 %v5069_v51, %v10735_v43  ;;  %v5206_v4 = vpack.c.bf16 %v5186_v41, %v5185_v36  ;;  %v5569_v26 = vadd.f32 %v5568_v18, %v5538_v53  ;;  %vm5507_vm5 = vcmp.lt.s32.totalorder %v5475_v28, 300 }
 0x4f6   : > { %vm4960_vm6 = vweird.f32 %v10776_v33  ;;  %v4979_v46 = vmul.f32 %v4978_v10, %v10621_v30  ;;  %v5108_v48 = vmul.f32 %v5107_v16, %v10807_v25  ;;  %v5539_v13 = vsel %vm5507_vm5, %v5408_v24, 0.0 }
 0x4f7   : > { %v4995_v19 = vmul.f32 %v10829_v34, %v10799_v32  ;;  %5342 = vmatmul.bf16.gmra.mxu3 %v5206_v4  ;;  %v5570_v8 = vadd.f32 %v5569_v26, %v5539_v13  ;;  %v5311_v56 = vadd.f32 %v10389_v38, %v5310_v15  ;;  %v5443_v47 = vadd.s32 72, %v10392_v45  ;;  %vm10859_vm8 = vmor %vm4959_vm4, %vm4960_vm6  ;;  %v10873_v26 = vld [vmem:[%s11108_s8] ss:$0 sm:$0xff] }
 0x4f8   : > { %v4958_v18 = vadd.f32 %v10776_v33, %v4957_v9  ;;  %v5017_v5 = vmul.f32 %v5016_v37, %v10653_v31  ;;  %v5093_v63 = vmul.f32 2.1237322e-06, %v10807_v25  ;;  %v5109_v21 = vadd.f32 0.112945676, %v5108_v48 }
 0x4f9   : > { %v5053_v40 = vmul.f32 2.1237322e-06, %v10735_v43  ;;  %v5071_v2 = vadd.f32 0.4994258, %v5070_v57  ;;  %v5377_v3 = vsub.f32 %v5311_v56, %v6315_v44  ;;  %v5476_v22 = vadd.s32 %v10416_v0, %v5443_v47 }
 0x4fa   : > { %v10847_v51 = vpop.eup %6291  ;;  %vm10849_vm7 = vcmp.eq.f32.partialorder %v4963_v58, 8.507059e+37  ;;  %v4966_v39 = vor.u32 1.1754944e-38, %v4965_v11  ;;  %v5110_v20 = vmul.f32 %v5109_v21, %v10807_v25  ;;  %v5444_v49 = vadd.s32 80, %v10392_v45  ;;  %v5313_v16 = vpop.f32.mrf.mxu3 }
 0x4fb   : > { %v4980_v14 = vadd.f32 0.18741608, %v4979_v46  ;;  %v4996_v53 = vsub.f32 1.0, %v4995_v19  ;;  %v5409_v36 = vmul.f32 %v5377_v3, %v5377_v3  ;;  %vm5508_vm9 = vcmp.lt.s32.totalorder %v5476_v22, 300 }
 0x4fc   : > { %v4962_v58 = vsel %vm10859_vm8, %v10776_v33, %v4958_v18  ;;  %v5018_v11 = vadd.f32 0.05243302, %v5017_v5  ;;  %v5094_v41 = vadd.f32 0.00028619796, %v5093_v63  ;;  %v5111_v24 = vadd.f32 0.4994258, %v5110_v20 }
 0x4fd   : > { %v5035_v28 = vmul.f32 %v10847_v51, %v10819_v23  ;;  %v5054_v9 = vadd.f32 0.00028619796, %v5053_v40  ;;  %v5072_v42 = vmul.f32 %v5071_v2, %v10735_v43  ;;  %v5540_v37 = vsel %vm5508_vm9, %v5409_v36, 0.0  ;;  %v6317_v18 = vld [vmem:[%s6741_s5 + $0x50] sm:$0xff] }
 0x4fe   : > { %v5112_v57 = vmul.f32 %v5111_v24, %v10807_v25  ;;  %v5571_v4 = vadd.f32 %v5570_v8, %v5540_v37  ;;  %v5314_v33 = vadd.f32 %v10873_v26, %v5313_v16  ;;  %v5477_v15 = vadd.s32 %v10416_v0, %v5444_v49 }
 0x4ff   : > { %v5188_v46 = vmul.f32 %v10760_v62, %v10575_v1  ;;  %v5932_v48 = vclamps-f32 %v10772_v27, 1.0  ;;  %v4967_v13 = vsel %vm10849_vm7, %v4966_v39, %v4962_v58  ;;  %v4997_v19 = vmul.f32 %v10829_v34, %v4996_v53 }
 0x500   : > { %v5019_v8 = vmul.f32 %v5018_v11, %v10653_v31  ;;  %v5095_v56 = vmul.f32 %v5094_v41, %v10807_v25  ;;  %v10885_v47 = vadd.f32 1.0, %v5112_v57  ;;  %v5378_v5 = vsub.f32 %v5314_v33, %v6317_v18 }
 0x501   : > { %v4943_v63 = vmul.f32 %v10774_v29, %v10518_v6  ;;  %v4981_v1 = vmul.f32 %v4980_v14, %v10621_v30  ;;  %v5036_v62 = vsub.f32 1.0, %v5035_v28  ;;  %v5445_v27 = vadd.s32 88, %v10392_v45 }
 0x502   : > { %vm4999_vm10 = vweird.f32 %v10799_v32  ;;  %v5055_v21 = vmul.f32 %v5054_v9, %v10735_v43  ;;  %v10894_v40 = vadd.f32 1.0, %v5072_v42  ;;  %vm5509_vm11 = vcmp.lt.s32.totalorder %v5477_v15, 300  ;;  %v5315_v20 = vpop.f32.mrf.mxu3  ;;  %v6318_v42 = vld [vmem:[%s6741_s5 + $0x58] sm:$0xff] }
 0x503   : > { %v4968_v2 = vmul.f32 %v4967_v13, %v4943_v63  ;;  %vm5000_vm12 = vweird.f32 %v10829_v34  ;;  %v5207_v44 = vpack.c.bf16 %v5188_v46, %v10659_v7  ;;  %v5410_v3 = vmul.f32 %v5378_v5, %v5378_v5 }
 0x504   : > { %v4998_v6 = vadd.f32 %v10829_v34, %v4997_v19  ;;  %v5020_v29 = vadd.f32 0.18741608, %v5019_v8  ;;  %v5096_v30 = vadd.f32 0.0036580483, %v5095_v56  ;;  %6293 = vrcp.f32 %v10885_v47  ;;  %vm10909_vm13 = vmor %vm4999_vm10, %vm5000_vm12 }
 0x505   : > { %v5005_v22 = vand.u32 2147483648, %v10799_v32  ;;  %v5037_v38 = vmul.f32 %v10847_v51, %v5036_v62  ;;  %v5541_v39 = vsel %vm5509_vm11, %v5410_v3, 0.0  ;;  %v5478_v49 = vadd.s32 %v10416_v0, %v5445_v27 }
 0x506   : > { %v5056_v10 = vadd.f32 0.0036580483, %v5055_v21  ;;  %6295 = vrcp.f32 %v10894_v40  ;;  %v5572_v7 = vadd.f32 %v5571_v4, %v5541_v39  ;;  %v5316_v14 = vadd.f32 %v10873_v26, %v5315_v20 }
 0x507   : > { %v5157_v53 = vadd.f32 1.0, %v5932_v48  ;;  %v5933_v36 = vclamps-f32 %v4968_v2, 1.0  ;;  %v4982_v58 = vadd.f32 1.1283791, %v4981_v1  ;;  %v5003_v41 = vand.u32 2147483647, %v10799_v32  ;;  %5347 = vmatmul.bf16.gmra.mxu3 %v5207_v44 }
 0x508   : > { %v5002_v24 = vsel %vm10909_vm13, %v10829_v34, %v4998_v6  ;;  %v5021_v28 = vmul.f32 %v5020_v29, %v10653_v31  ;;  %v5097_v9 = vmul.f32 %v5096_v30, %v10807_v25  ;;  %v5379_v37 = vsub.f32 %v5316_v14, %v6318_v42 }
 0x509   : > { %v5038_v16 = vadd.f32 %v10847_v51, %v5037_v38  ;;  %vm5040_vm14 = vweird.f32 %v10847_v51  ;;  %vm5510_vm15 = vcmp.lt.s32.totalorder %v5478_v49, 300  ;;  %v5446_v57 = vadd.s32 96, %v10392_v45  ;;  %v6319_v38 = vld [vmem:[%s6741_s5 + $0x60] sm:$0xff] }
 0x50a   : > { %v10923_v4 = vpop.eup %6293  ;;  %v5006_v32 = vor.u32 1.1754944e-38, %v5005_v22  ;;  %v5045_v33 = vand.u32 2147483648, %v10819_v23  ;;  %v5057_v34 = vmul.f32 %v5056_v10, %v10735_v43  ;;  %v5411_v15 = vmul.f32 %v5379_v37, %v5379_v37  ;;  %v5318_v1 = vpop.f32.mrf.mxu3 }
 0x50b   : > { %v5158_v31 = vadd.f32 1.0, %v5933_v36  ;;  %vm5004_vm0 = vcmp.eq.f32.partialorder %v5003_v41, 8.507059e+37  ;;  %vm5039_vm1 = vweird.f32 %v10819_v23  ;;  %v5043_v46 = vand.u32 2147483647, %v10819_v23 }
 0x50c   : > { %v10929_v48 = vpop.eup %6295  ;;  %v5007_v13 = vsel %vm5004_vm0, %v5006_v32, %v5002_v24  ;;  %v5022_v19 = vadd.f32 1.1283791, %v5021_v28  ;;  %vm10933_vm2 = vmor %vm5039_vm1, %vm5040_vm14  ;;  %v5098_v56 = vadd.f32 0.05243302, %v5097_v9  ;;  %v5542_v18 = vsel %vm5510_vm15, %v5411_v15, 0.0 }
 0x50d   : > { %v5042_v5 = vsel %vm10933_vm2, %v10847_v51, %v5038_v16  ;;  %v5115_v23 = vmul.f32 %v10923_v4, %v10885_v47  ;;  %v5573_v63 = vadd.f32 %v5572_v7, %v5542_v18  ;;  %v5479_v62 = vadd.s32 %v10416_v0, %v5446_v57 }
 0x50e   : > { %v4983_v27 = vmul.f32 %v4982_v58, %v10580_v50  ;;  %v5046_v21 = vor.u32 1.1754944e-38, %v5045_v33  ;;  %v5058_v2 = vadd.f32 0.05243302, %v5057_v34  ;;  %v5319_v44 = vadd.f32 %v10873_v26, %v5318_v1  ;;  %v6320_v33 = vld [vmem:[%s6741_s5 + $0x68] sm:$0xff] }
 0x50f   : > { %v5189_v3 = vmul.f32 %v5157_v53, %v10588_v12  ;;  %v5190_v6 = vmul.f32 %v5158_v31, %v10702_v59  ;;  %vm5044_vm3 = vcmp.eq.f32.partialorder %v5043_v46, 8.507059e+37  ;;  %v5075_v51 = vmul.f32 %v10929_v48, %v10894_v40 }
 0x510   : > { %v5008_v29 = vmul.f32 %v5007_v13, %v4983_v27  ;;  %v5047_v30 = vsel %vm5044_vm3, %v5046_v21, %v5042_v5  ;;  %v5099_v22 = vmul.f32 %v5098_v56, %v10807_v25  ;;  %v5380_v39 = vsub.f32 %v5319_v44, %v6319_v38 }
 0x511   : > { %v5023_v50 = vmul.f32 %v5022_v19, %v10642_v60  ;;  %v5116_v20 = vsub.f32 1.0, %v5115_v23  ;;  %vm5511_vm4 = vcmp.lt.s32.totalorder %v5479_v62, 300  ;;  %v5447_v49 = vadd.s32 104, %v10392_v45 }
 0x512   : > { %v5059_v12 = vmul.f32 %v5058_v2, %v10735_v43  ;;  %v5412_v10 = vmul.f32 %v5380_v39, %v5380_v39  ;;  %v5076_v7 = vsub.f32 1.0, %v5075_v51  ;;  %v5208_v14 = vpack.c.bf16 %v5190_v6, %v5189_v3  ;;  %v5320_v24 = vpop.f32.mrf.mxu3 }
 0x513   : > { %v5048_v59 = vmul.f32 %v5047_v30, %v5023_v50  ;;  %v5934_v53 = vclamps-f32 %v5008_v29, 1.0  ;;  %v5100_v36 = vadd.f32 0.18741608, %v5099_v22  ;;  %v5117_v11 = vmul.f32 %v10923_v4, %v5116_v20 }
 0x514   : > { %v5543_v58 = vsel %vm5511_vm4, %v5412_v10, 0.0  ;;  %v5480_v60 = vadd.s32 %v10416_v0, %v5447_v49  ;;  %v5060_v28 = vadd.f32 0.18741608, %v5059_v12  ;;  %v5321_v9 = vadd.f32 %v10873_v26, %v5320_v24 }
 0x515   : > { %v5574_v41 = vadd.f32 %v5573_v63, %v5543_v58  ;;  %v5935_v42 = vclamps-f32 %v5048_v59, 1.0  ;;  %v5077_v37 = vmul.f32 %v10929_v48, %v5076_v7  ;;  %v5159_v16 = vadd.f32 1.0, %v5934_v53 }
 0x516   : > { %v3816_v57 = vmul.f32 0.5, %v10630_v35  ;;  %v5101_v32 = vmul.f32 %v5100_v36, %v10807_v25  ;;  %v5381_v34 = vsub.f32 %v5321_v9, %v6320_v33  ;;  %v5118_v15 = vadd.f32 %v10923_v4, %v5117_v11 }
 0x517   : > { %5352 = vmatmul.bf16.gmra.mxu3 %v5208_v14  ;;  %vm5120_vm5 = vweird.f32 %v10923_v4  ;;  %vm5512_vm6 = vcmp.lt.s32.totalorder %v5480_v60, 300  ;;  %v5448_v31 = vadd.s32 112, %v10392_v45  ;;  %v5061_v46 = vmul.f32 %v5060_v28, %v10735_v43 }
 0x518   : > { %vm5080_vm7 = vweird.f32 %v10929_v48  ;;  %v5125_v13 = vand.u32 2147483648, %v10885_v47  ;;  %v5413_v19 = vmul.f32 %v5381_v34, %v5381_v34  ;;  %v5160_v8 = vadd.f32 1.0, %v5935_v42  ;;  %v6323_v34 = vld [vmem:[%s6741_s5 + $0x80] sm:$0xff] }
 0x519   : > { %v5078_v35 = vadd.f32 %v10929_v48, %v5077_v37  ;;  %vm5119_vm8 = vweird.f32 %v10885_v47  ;;  %v5123_v25 = vand.u32 2147483647, %v10885_v47  ;;  %vm5079_vm9 = vweird.f32 %v10894_v40 }
 0x51a   : > { %v5083_v56 = vand.u32 2147483647, %v10894_v40  ;;  %v5085_v18 = vand.u32 2147483648, %v10894_v40  ;;  %vm10974_vm10 = vmor %vm5119_vm8, %vm5120_vm5  ;;  %v5544_v5 = vsel %vm5512_vm6, %v5413_v19, 0.0  ;;  %v5102_v23 = vadd.f32 1.1283791, %v5101_v32  ;;  %v5323_v62 = vpop.f32.mrf.mxu3 }
 0x51b   : > { %v5122_v63 = vsel %vm10974_vm10, %v10923_v4, %v5118_v15  ;;  %v5575_v1 = vadd.f32 %v5574_v41, %v5544_v5  ;;  %v5481_v47 = vadd.s32 %v10416_v0, %v5448_v31  ;;  %v3815_v27 = vmul.f32 0.5, %v10559_v52  ;;  %vm10985_vm11 = vmor %vm5079_vm9, %vm5080_vm7  ;;  %v6321_v52 = vld [vmem:[%s6741_s5 + $0x70] sm:$0xff] }
 0x51c   : > { %v5126_v21 = vor.u32 1.1754944e-38, %v5125_v13  ;;  %v5324_v2 = vadd.f32 %v10873_v26, %v5323_v62  ;;  %v5192_v44 = vmul.f32 %v5160_v8, %v3816_v57  ;;  %v5062_v3 = vadd.f32 1.1283791, %v5061_v46 }
 0x51d   : > { %v5082_v4 = vsel %vm10985_vm11, %v10929_v48, %v5078_v35  ;;  %vm5124_vm12 = vcmp.eq.f32.partialorder %v5123_v25, 8.507059e+37  ;;  %v5191_v6 = vmul.f32 %v5159_v16, %v3815_v27  ;;  %v5086_v51 = vor.u32 1.1754944e-38, %v5085_v18  ;;  %v6324_v18 = vld [vmem:[%s6741_s5 + $0x88] sm:$0xff]  ;;  %v6325_v27 = vld [vmem:[%s6741_s5 + $0x90] sm:$0xff] }
 0x51e   : > { %v5127_v29 = vsel %vm5124_vm12, %v5126_v21, %v5122_v63  ;;  %v5382_v30 = vsub.f32 %v5324_v2, %v6321_v52  ;;  %vm5084_vm13 = vcmp.eq.f32.partialorder %v5083_v56, 8.507059e+37  ;;  %v5103_v22 = vmul.f32 %v5102_v23, %v10796_v55  ;;  %v6322_v55 = vld [vmem:[%s6741_s5 + $0x78] sm:$0xff] }
 0x51f   : > { %vm5513_vm14 = vcmp.lt.s32.totalorder %v5481_v47, 300  ;;  %v5449_v38 = vadd.s32 120, %v10392_v45  ;;  %v5087_v39 = vsel %vm5084_vm13, %v5086_v51, %v5082_v4  ;;  %v5063_v20 = vmul.f32 %v5062_v3, %v10693_v54 }
 0x520   : > { %v5414_v50 = vmul.f32 %v5382_v30, %v5382_v30  ;;  %v5128_v49 = vmul.f32 %v5127_v29, %v5103_v22  ;;  %v5209_v12 = vpack.c.bf16 %v5192_v44, %v5191_v6  ;;  %v5450_v41 = vadd.s32 128, %v10392_v45  ;;  %v6326_v29 = vld [vmem:[%s6741_s5 + $0x98] sm:$0xff] }
 0x521   : > { %v5088_v10 = vmul.f32 %v5087_v39, %v5063_v20  ;;  %v5482_v14 = vadd.s32 %v10416_v0, %v5449_v38  ;;  %v3818_v9 = vmul.f32 0.5, %v10782_v61  ;;  %v3817_v32 = vmul.f32 0.5, %v10673_v17 }
 0x522   : > { %v5545_v48 = vsel %vm5513_vm14, %v5414_v50, 0.0  ;;  %v5325_v7 = vpop.f32.mrf.mxu3  ;;  %v5937_v36 = vclamps-f32 %v5128_v49, 1.0  ;;  %v5483_v16 = vadd.s32 %v10416_v0, %v5450_v41  ;;  %v5451_v46 = vadd.s32 136, %v10392_v45 }
 0x523   : > { %v5576_v59 = vadd.f32 %v5575_v1, %v5545_v48  ;;  %v5326_v53 = vadd.f32 %v10873_v26, %v5325_v7  ;;  %v5936_v11 = vclamps-f32 %v5088_v10, 1.0  ;;  %vm5514_vm15 = vcmp.lt.s32.totalorder %v5482_v14, 300 }
 0x524   : > { %v5162_v24 = vadd.f32 1.0, %v5937_v36  ;;  %vm5515_vm0 = vcmp.lt.s32.totalorder %v5483_v16, 300  ;;  %v5484_v25 = vadd.s32 %v10416_v0, %v5451_v46  ;;  %v5452_v43 = vadd.s32 144, %v10392_v45 }
 0x525   : > { %v5383_v58 = vsub.f32 %v5326_v53, %v6322_v55  ;;  %v5161_v28 = vadd.f32 1.0, %v5936_v11  ;;  %v5453_v21 = vadd.s32 152, %v10392_v45  ;;  %v5454_v39 = vadd.s32 160, %v10392_v45 }
 0x526   : > { %v5194_v33 = vmul.f32 %v5162_v24, %v3818_v9  ;;  %vm5516_vm1 = vcmp.lt.s32.totalorder %v5484_v25, 300  ;;  %v5485_v62 = vadd.s32 %v10416_v0, %v5452_v43  ;;  %v5455_v24 = vadd.s32 168, %v10392_v45 }
 0x527   : > { %5357 = vmatmul.bf16.gmra.mxu3 %v5209_v12  ;;  %v5415_v54 = vmul.f32 %v5383_v58, %v5383_v58  ;;  %v5193_v31 = vmul.f32 %v5161_v28, %v3817_v32  ;;  %v5486_v6 = vadd.s32 %v10416_v0, %v5453_v21  ;;  %v5487_v20 = vadd.s32 %v10416_v0, %v5454_v39  ;;  %v6327_v12 = vld [vmem:[%s6741_s5 + $0xa0] sm:$0xff]  ;;  %v6334_v39 = vld [vmem:[%s6741_s5 + $0xd8] sm:$0xff] }
 0x528   : > { %vm5517_vm2 = vcmp.lt.s32.totalorder %v5485_v62, 300  ;;  %v5456_v28 = vadd.s32 176, %v10392_v45  ;;  %v5457_v32 = vadd.s32 184, %v10392_v45  ;;  %v5458_v46 = vadd.s32 192, %v10392_v45 }
 0x529   : > { %v5546_v60 = vsel %vm5514_vm15, %v5415_v54, 0.0  ;;  %v5210_v19 = vpack.c.bf16 %v5194_v33, %v5193_v31  ;;  %vm5518_vm3 = vcmp.lt.s32.totalorder %v5486_v6, 300  ;;  %vm5519_vm4 = vcmp.lt.s32.totalorder %v5487_v20, 300  ;;  %v6329_v33 = vld [vmem:[%s6741_s5 + $0xb0] sm:$0xff] }
 0x52a   : > { %v5577_v42 = vadd.f32 %v5576_v59, %v5546_v60  ;;  %v5328_v37 = vpop.f32.mrf.mxu3  ;;  %v5489_v31 = vadd.s32 %v10416_v0, %v5456_v28  ;;  %v5459_v25 = vadd.s32 200, %v10392_v45 }
 0x52b   : > { %v5329_v57 = vadd.f32 %v10873_v26, %v5328_v37 }
 0x52c   : > { %vm5521_vm6 = vcmp.lt.s32.totalorder %v5489_v31, 300  ;;  %v5492_v21 = vadd.s32 %v10416_v0, %v5459_v25 }
 0x52d   : > { %v5384_v15 = vsub.f32 %v5329_v57, %v6323_v34  ;;  %v5488_v57 = vadd.s32 %v10416_v0, %v5455_v24 }
 0x52e   : > { %vm5524_vm9 = vcmp.lt.s32.totalorder %v5492_v21, 300 }
 0x52f   : > { %v5416_v13 = vmul.f32 %v5384_v15, %v5384_v15  ;;  %vm5520_vm5 = vcmp.lt.s32.totalorder %v5488_v57, 300 }
 0x531   : > { %v5547_v8 = vsel %vm5515_vm0, %v5416_v13, 0.0 }
 0x532   : > { %v5578_v61 = vadd.f32 %v5577_v42, %v5547_v8  ;;  %v5330_v35 = vpop.f32.mrf.mxu3  ;;  %v6328_v42 = vld [vmem:[%s6741_s5 + $0xa8] sm:$0xff] }
 0x533   : > { %v5331_v56 = vadd.f32 %v10873_v26, %v5330_v35  ;;  %v5490_v35 = vadd.s32 %v10416_v0, %v5457_v32 }
 0x535   : > { %v5385_v17 = vsub.f32 %v5331_v56, %v6324_v18  ;;  %v6331_v18 = vld [vmem:[%s6741_s5 + $0xc0] sm:$0xff]  ;;  %vm5522_vm7 = vcmp.lt.s32.totalorder %v5490_v35, 300 }
 0x537   : > { %5362 = vmatmul.bf16.gmra.mxu3 %v5210_v19  ;;  %v5417_v5 = vmul.f32 %v5385_v17, %v5385_v17  ;;  %v6330_v19 = vld [vmem:[%s6741_s5 + $0xb8] sm:$0xff] }
 0x539   : > { %v5548_v23 = vsel %vm5516_vm1, %v5417_v5, 0.0  ;;  %v5491_v5 = vadd.s32 %v10416_v0, %v5458_v46 }
 0x53a   : > { %v5579_v63 = vadd.f32 %v5578_v61, %v5548_v23  ;;  %v5333_v1 = vpop.f32.mrf.mxu3  ;;  %v5460_v23 = vadd.s32 208, %v10392_v45 }
 0x53b   : > { %v5334_v47 = vadd.f32 %v10873_v26, %v5333_v1  ;;  %vm5523_vm8 = vcmp.lt.s32.totalorder %v5491_v5, 300 }
 0x53d   : > { %v5386_v40 = vsub.f32 %v5334_v47, %v6325_v27  ;;  %v6332_v47 = vld [vmem:[%s6741_s5 + $0xc8] sm:$0xff] }
 0x53f   : > { %v5418_v2 = vmul.f32 %v5386_v40, %v5386_v40 }
 0x541   : > { %v5549_v44 = vsel %vm5517_vm2, %v5418_v2, 0.0  ;;  %v5461_v2 = vadd.s32 216, %v10392_v45 }
 0x542   : > { %v5580_v3 = vadd.f32 %v5579_v63, %v5549_v44  ;;  %v5335_v4 = vpop.f32.mrf.mxu3 }
 0x543   : > { %v5336_v51 = vadd.f32 %v10873_v26, %v5335_v4  ;;  %v6333_v4 = vld [vmem:[%s6741_s5 + $0xd0] sm:$0xff] }
 0x545   : > { %v5387_v52 = vsub.f32 %v5336_v51, %v6326_v29 }
 0x547   : > { %v5419_v30 = vmul.f32 %v5387_v52, %v5387_v52  ;;  %v5493_v52 = vadd.s32 %v10416_v0, %v5460_v23 }
 0x549   : > { %v5550_v22 = vsel %vm5518_vm3, %v5419_v30, 0.0  ;;  %v5462_v30 = vadd.s32 224, %v10392_v45  ;;  %vm5525_vm10 = vcmp.lt.s32.totalorder %v5493_v52, 300 }
 0x54a   : > { %v5581_v38 = vadd.f32 %v5580_v3, %v5550_v22 }
 0x557   : > { %v5338_v50 = vpop.f32.mrf.mxu3 }
 0x558   : > { %v5339_v49 = vadd.f32 %v10873_v26, %v5338_v50 }
 0x55a   : > { %v5388_v48 = vsub.f32 %v5339_v49, %v6327_v12  ;;  %v5494_v12 = vadd.s32 %v10416_v0, %v5461_v2 }
 0x55c   : > { %v5420_v10 = vmul.f32 %v5388_v48, %v5388_v48  ;;  %v5463_v48 = vadd.s32 232, %v10392_v45  ;;  %vm5526_vm11 = vcmp.lt.s32.totalorder %v5494_v12, 300 }
 0x55e   : > { %v5551_v59 = vsel %vm5519_vm4, %v5420_v10, 0.0 }
 0x55f   : > { %v5582_v7 = vadd.f32 %v5581_v38, %v5551_v59  ;;  %v5340_v14 = vpop.f32.mrf.mxu3 }
 0x560   : > { %v5341_v54 = vadd.f32 %v10873_v26, %v5340_v14 }
 0x562   : > { %v5389_v37 = vsub.f32 %v5341_v54, %v6328_v42  ;;  %v6336_v54 = vld [vmem:[%s6741_s5 + $0xe8] sm:$0xff] }
 0x564   : > { %v5421_v13 = vmul.f32 %v5389_v37, %v5389_v37 }
 0x566   : > { %v5552_v1 = vsel %vm5520_vm5, %v5421_v13, 0.0 }
 0x567   : > { %v5583_v29 = vadd.f32 %v5582_v7, %v5552_v1  ;;  %v6335_v7 = vld [vmem:[%s6741_s5 + $0xe0] sm:$0xff] }
 0x57a   : > { %v5343_v53 = vpop.f32.mrf.mxu3 }
 0x57b   : > { %v5344_v60 = vadd.f32 %v10873_v26, %v5343_v53 }
 0x57d   : > { %v5390_v34 = vsub.f32 %v5344_v60, %v6329_v33  ;;  %v5465_v33 = vadd.s32 248, %v10392_v45 }
 0x57f   : > { %v5422_v56 = vmul.f32 %v5390_v34, %v5390_v34  ;;  %v5498_v35 = vadd.s32 %v10416_v0, %v5465_v33 }
 0x581   : > { %v5553_v44 = vsel %vm5521_vm6, %v5422_v56, 0.0  ;;  %vm5530_vm15 = vcmp.lt.s32.totalorder %v5498_v35, 300 }
 0x582   : > { %v5345_v36 = vpop.f32.mrf.mxu3  ;;  %v5584_v49 = vadd.f32 %v5583_v29, %v5553_v44 }
 0x583   : > { %v5346_v16 = vadd.f32 %v10873_v26, %v5345_v36  ;;  %v5495_v36 = vadd.s32 %v10416_v0, %v5462_v30 }
 0x585   : > { %v5391_v8 = vsub.f32 %v5346_v16, %v6330_v19  ;;  %v6337_v16 = vld [vmem:[%s6741_s5 + $0xf0] sm:$0xff]  ;;  %vm5527_vm12 = vcmp.lt.s32.totalorder %v5495_v36, 300 }
 0x587   : > { %v5423_v62 = vmul.f32 %v5391_v8, %v5391_v8 }
 0x589   : > { %v5554_v22 = vsel %vm5522_vm7, %v5423_v62, 0.0 }
 0x58a   : > { %v5348_v55 = vpop.f32.mrf.mxu3  ;;  %v5585_v53 = vadd.f32 %v5584_v49, %v5554_v22 }
 0x58b   : > { %v5349_v15 = vadd.f32 %v10873_v26, %v5348_v55 }
 0x58d   : > { %v5392_v17 = vsub.f32 %v5349_v15, %v6331_v18 }
 0x58f   : > { %v5424_v3 = vmul.f32 %v5392_v17, %v5392_v17  ;;  %v6338_v17 = vld [vmem:[%s6741_s5 + $0xf8] sm:$0xff]  ;;  %s5745_s5 = sshll.u32 %s6737_s27, 3 }
 0x590   : > { %s418_s19 = scalar_lea.vmem [#allocation11], %s5745_s5 }
 0x591   : > { %v5555_v10 = vsel %vm5523_vm8, %v5424_v3, 0.0  ;;  %s5618_s29 = sshll.u32 %s418_s19, 4  ;;  %s5619_s29 = int_to_ptr.vmem [resolvable:$true] %s5618_s29 }
 0x592   : > { %v5350_v58 = vpop.f32.mrf.mxu3  ;;  %v5586_v28 = vadd.f32 %v5585_v53, %v5555_v10 }
 0x593   : > { %v5351_v61 = vadd.f32 %v10873_v26, %v5350_v58  ;;  %v5464_v58 = vadd.s32 240, %v10392_v45 }
 0x595   : > { %v5393_v27 = vsub.f32 %v5351_v61, %v6332_v47  ;;  %v5497_v34 = vadd.s32 %v10416_v0, %v5464_v58 }
 0x597   : > { %v5425_v38 = vmul.f32 %v5393_v27, %v5393_v27  ;;  %vm5529_vm14 = vcmp.lt.s32.totalorder %v5497_v34, 300 }
 0x59a   : > { %v5353_v11 = vpop.f32.mrf.mxu3 }
 0x59b   : > { %v5354_v43 = vadd.f32 %v10873_v26, %v5353_v11  ;;  %v5556_v11 = vsel %vm5524_vm9, %v5425_v38, 0.0 }
 0x59c   : > { %v5587_v32 = vadd.f32 %v5586_v28, %v5556_v11 }
 0x59d   : > { %v5394_v6 = vsub.f32 %v5354_v43, %v6333_v4 }
 0x59f   : > { %v5426_v59 = vmul.f32 %v5394_v6, %v5394_v6 }
 0x5a1   : > { %v5557_v42 = vsel %vm5525_vm10, %v5426_v59, 0.0 }
 0x5a2   : > { %v5355_v41 = vpop.f32.mrf.mxu3  ;;  %v5588_v46 = vadd.f32 %v5587_v32, %v5557_v42 }
 0x5a3   : > { %v5356_v40 = vadd.f32 %v10873_v26, %v5355_v41 }
 0x5a5   : > { %v5395_v50 = vsub.f32 %v5356_v40, %v6334_v39 }
 0x5a7   : > { %v5427_v41 = vmul.f32 %v5395_v50, %v5395_v50 }
 0x5a9   : > { %v5558_v15 = vsel %vm5526_vm11, %v5427_v41, 0.0 }
 0x5aa   : > { %v5358_v9 = vpop.f32.mrf.mxu3  ;;  %v5589_v8 = vadd.f32 %v5588_v46, %v5558_v15 }
 0x5ab   : > { %v5359_v51 = vadd.f32 %v10873_v26, %v5358_v9  ;;  %v5496_v9 = vadd.s32 %v10416_v0, %v5463_v48 }
 0x5ad   : > { %v5396_v14 = vsub.f32 %v5359_v51, %v6335_v7  ;;  %vm5528_vm13 = vcmp.lt.s32.totalorder %v5496_v9, 300 }
 0x5af   : > { %v5428_v37 = vmul.f32 %v5396_v14, %v5396_v14 }
 0x5b1   : > { %v5559_v13 = vsel %vm5527_vm12, %v5428_v37, 0.0 }
 0x5b2   : > { %v5360_v63 = vpop.f32.mrf.mxu3  ;;  %v5590_v18 = vadd.f32 %v5589_v8, %v5559_v13 }
 0x5b3   : > { %v5361_v20 = vadd.f32 %v10873_v26, %v5360_v63 }
 0x5b5   : > { %v5397_v24 = vsub.f32 %v5361_v20, %v6336_v54 }
 0x5b7   : > { %v5429_v31 = vmul.f32 %v5397_v24, %v5397_v24 }
 0x5b9   : > { %v5560_v56 = vsel %vm5528_vm13, %v5429_v31, 0.0 }
 0x5ba   : > { %v5363_v55 = vpop.f32.mrf.mxu3  ;;  %v5591_v5 = vadd.f32 %v5590_v18, %v5560_v56 }
 0x5bb   : > { %v5364_v60 = vadd.f32 %v10873_v26, %v5363_v55 }
 0x5bd   : > { %v5398_v57 = vsub.f32 %v5364_v60, %v6337_v16 }
 0x5bf   : > { %v5430_v19 = vmul.f32 %v5398_v57, %v5398_v57 }
 0x5c1   : > { %v5561_v45 = vsel %vm5529_vm14, %v5430_v19, 0.0 }
 0x5c2   : > { %v5365_v61 = vpop.f32.mrf.mxu3  ;;  %v5592_v63 = vadd.f32 %v5591_v5, %v5561_v45 }
 0x5c3   : > { %v5366_v25 = vadd.f32 %v10873_v26, %v5365_v61 }
 0x5c5   : > { %v5399_v43 = vsub.f32 %v5366_v25, %v6338_v17 }
 0x5c7   : > { %v5431_v23 = vmul.f32 %v5399_v43, %v5399_v43 }
 0x5c9   : > { %v5562_v1 = vsel %vm5530_vm15, %v5431_v23, 0.0 }
 0x5ca   : > { %v5593_v62 = vadd.f32 %v5592_v63, %v5562_v1 }
 0x5cc   : > { %5594 = vadd.xlane.f32.xlu0 %v5593_v62 }
 0x63f   : > { %v5595_v47 = vpop.xlane.xlu0 %5594 }
 0x640   : > { %v5596_v27 = vrot.slane %v5595_v47, 4 }
 0x642   : > { %v5597_v0 = vadd.f32 %v5596_v27, %v5595_v47 }
 0x644   : > { %v5598_v40 = vrot.slane %v5597_v0, 2 }
 0x646   : > { %v5599_v26 = vadd.f32 %v5598_v40, %v5597_v0 }
 0x648   : > { %v5600_v21 = vrot.slane %v5599_v26, 1 }
 0x64a   : > { %v5601_v2 = vadd.f32 %v5600_v21, %v5599_v26 }
 0x64c   : > { %6008 = vpush %v5601_v2 }
 0x67d   : > { %s6009_s17 = spop %6008 }
 0x67e   : > { %v5603_v44 = vstv %s6009_s17 }
 0x67f   : > { %5604 = vst [vmem:[%s418_s19] sm:$0xff] %v5603_v44 }
 0x680   : > { %6516 = shalt.err (!%p6513_p10)
}
 0x681   : > { %6028 = dma.vmem_to_hbm [thread:$0]  (%p6707_p3), %s5619_s29, 128, %s5621_s22, %s5606_s23  }
 0x682 PF: > { %s5632_s27 = sand.u32 1, %s6551_s30   ;;  %p11289_p12 = scmp.ge.s32.totalorder %s6563_s12, 2 }
 0x683   : > { %s5633_s24 = scalar_lea.sflag [#allocation4], %s5632_s27 }
 0x684   : > { %p6048_p13 = pnand %p11289_p12, %p6658_p6 }
 0x686   : > { %p6049_p0 = pneg %p6048_p13 }
 0x688   : > { %6546 = dma.done.wait (%p6049_p0), %s5633_s24, 128  }
 0x689   : > { %6548 = vsyncadd (%p6049_p0), %s5633_s24, 4294967168  ;;  %p24_p5 = scmp.ge.s32.totalorder %s6697_s26, 4   ;;  %s11290_s30 = smov %s6555_s10 }
 0x68a   : > { %s11291_s10 = smov %s6559_s11  ;;  %s11292_s11 = smov %s6713_s21 }
 0x68b   : > { %s11293_s12 = smov %s6697_s26  ;;  %26 = sbr.rel (!%p24_p5) target bundleno = 11 (0xb), region = 117 }
 0x690   :  { %5639 = vsyncpa [#allocation3], 1 }
 0x691   :  { %5641 = vsyncpa [#allocation3 + $0x1], 1 }
 0x692   :  { %5642 = vsyncpa [#allocation6], 1 }
 0x693   :  { %5643 = vsyncpa [#allocation9], 1 }
 0x694   :  { %5644 = vsyncpa [#allocation4], 1 }
 0x695   :  { %5646 = vsyncpa [#allocation4 + $0x1], 1 }

</bundles_post_ra>
